<compile_context>
chip_gen: v7x
topology: tpu7x:2x2x1
jax: 0.10.0
libtpu: 0.0.40
codegen_flags: <defaults>
</compile_context>

<pallas_src>
import functools
import math

import numpy as np
import jax
import jax.numpy as jnp
from jax.experimental import pallas as pl
from jax.experimental.pallas import tpu as pltpu

_VMEM = pl.BlockSpec(memory_space=pltpu.MemorySpace.VMEM)


# ------------------------------- fused kernel --------------------------------
def _cd_kernel(x_ref, fcw_ref, fcb_ref, e_ref,
               a1_ref, b1_ref, i1_ref,
               a2_ref, b2_ref, i2_ref,
               a3_ref, b3_ref, f_ref,
               o_ref, *, B):
    f32 = jnp.float32
    bf16 = jnp.bfloat16

    def deconv(x, a_ref, b_ref, *, k, pad, Hin, act):
        """ConvTranspose2d(stride=2, output_padding=1) + bias + activation.

        x: (B*(Hin+2), Win*Cin) f32, rows=(b, ypad), lanes=(x, c), y-pad rows 0.
        a_ref: (k, Win*Cin, 2*Win*Cout) bf16 banded per-ky matrices (kx taps and
               x interleave folded into the columns, x borders folded in too).
        Returns the two output row-parity planes, each (M, 2*Win*Cout) f32.
        """
        Hp = Hin + 2
        M = (B - 1) * Hp + Hin
        acc = [None, None]
        for ky in range(k):
            dy = ky - pad
            ry = dy % 2                 # output row parity fed by this tap row
            ys = 1 - (dy // 2)          # row shift into the y-padded input
            lhs = x[ys:ys + M, :].astype(bf16)
            part = jnp.dot(lhs, a_ref[ky], preferred_element_type=f32)
            acc[ry] = part if acc[ry] is None else acc[ry] + part
        bias = b_ref[...]
        out = []
        for ry in range(2):
            v = acc[ry] + bias
            if act == "relu":
                v = jnp.maximum(v, 0.0)
            else:                       # sigmoid
                v = 1.0 / (1.0 + jnp.exp(-v))
            out.append(v)
        return out

    def interleave(p0, p1, i_ref):
        # Row-parity interleave + batch-boundary / y-pad row insertion via two
        # tiny constant 0/1 matmuls (also drops the garbage cross-batch rows).
        return (jnp.dot(i_ref[0], p0, preferred_element_type=f32)
                + jnp.dot(i_ref[1], p1, preferred_element_type=f32))

    # ---- Linear(input_dim, 2048) + ReLU; columns pre-permuted to (y, x, c).
    h = jnp.dot(x_ref[...].astype(bf16), fcw_ref[...],
                preferred_element_type=f32)
    h = jnp.maximum(h + fcb_ref[...], 0.0)                       # (B, 2048)

    # ---- scatter fc rows into the (b, ypad) x (x, c) layout of dc1's input.
    x1 = None
    for y in range(4):
        hy = h[:, y * 512:(y + 1) * 512]                          # (B, 512)
        t = jnp.dot(e_ref[y], hy, preferred_element_type=f32)     # (B*6, 512)
        x1 = t if x1 is None else x1 + t

    # ---- three fused transposed convolutions, all in VMEM values.
    p0, p1 = deconv(x1, a1_ref, b1_ref, k=3, pad=1, Hin=4, act="relu")
    x2 = interleave(p0, p1, i1_ref)                               # (B*10, 512)
    p0, p1 = deconv(x2, a2_ref, b2_ref, k=5, pad=2, Hin=8, act="relu")
    x3 = interleave(p0, p1, i2_ref)                               # (B*18, 512)
    p0, p1 = deconv(x3, a3_ref, b3_ref, k=5, pad=2, Hin=16, act="sigmoid")
    o_ref[...] = interleave(p0, p1, f_ref).astype(o_ref.dtype)    # (B*32, 128)


# --------------------------------- wrapper ------------------------------------
def cd_forward(prep, x, *, out_ch):
    B = x.shape[0]
    ncol = prep["dc3_A"].shape[2]                 # 32 * padded Cout
    cpad = ncol // 32
    o = pl.pallas_call(
        functools.partial(_cd_kernel, B=B),
        out_shape=jax.ShapeDtypeStruct((B * 32, ncol), jnp.float32),
        in_specs=[_VMEM] * 13,
        out_specs=_VMEM,
    )(x, prep["fc_w"], prep["fc_b"], prep["e"],
      prep["dc1_A"], prep["dc1_b"], prep["i1"],
      prep["dc2_A"], prep["dc2_b"], prep["i2"],
      prep["dc3_A"], prep["dc3_b"], prep["f"])
    # (B*32, 32*Cpad) rows=(b, y), lanes=(x, c) -> NCHW, strip dummy channel.
    y = o.reshape(B, 32, 32, cpad).transpose(0, 3, 1, 2)
    return y[:, :out_ch]


# --------------------------- parameter preparation ---------------------------
def _banded_deconv_weights(w, pad, Win, cpad):
    # w: (Cin, Cout, k, k) PyTorch ConvTranspose2d layout.  Per ky, a dense
    # (Win*Cin, 2*Win*Cpad) matrix mapping an (x, c) input row to the full
    # x-interleaved output row for that ky (x borders handled by omission).
    w = np.asarray(w, np.float32)
    Cin, Cout, k, _ = w.shape
    Wout = 2 * Win
    A = np.zeros((k, Win * Cin, Wout * cpad), np.float32)
    for ky in range(k):
        for kx in range(k):
            for j in range(Win):
                n = 2 * j + kx - pad
                if 0 <= n < Wout:
                    A[ky, j * Cin:(j + 1) * Cin,
                      n * cpad:n * cpad + Cout] = w[:, :, ky, kx]
    return A


def _fc_select(B, H=4):
    # E[y]: (B*(H+2), B) 0/1 matrix scattering h-row y of batch b to row
    # b*(H+2)+1+y of dc1's y-padded input.
    E = np.zeros((H, B * (H + 2), B), np.float32)
    for y in range(H):
        for b in range(B):
            E[y, b * (H + 2) + 1 + y, b] = 1.0
    return E


def _interleave_mat(B, Hin, pad_rows=True):
    # I[r]: rows of the next layer's (y-padded) input <- rows of parity plane r.
    Hp = Hin + 2
    M = (B - 1) * Hp + Hin
    rows_per_b = 2 * Hin + 2 if pad_rows else 2 * Hin
    off = 1 if pad_rows else 0
    I = np.zeros((2, B * rows_per_b, M), np.float32)
    for r in range(2):
        for b in range(B):
            for m in range(Hin):
                I[r, b * rows_per_b + off + 2 * m + r, b * Hp + m] = 1.0
    return I


def init_params(key, input_dim, out_ch):
    # PyTorch-layout parameters (Linear: (out,in); ConvTranspose2d: (Cin,Cout,k,k)).
    def u(k, shape, fan_in):
        s = 1.0 / math.sqrt(fan_in)
        return jax.random.uniform(k, shape, jnp.float32, -s, s)

    ks = jax.random.split(key, 8)
    p = {}
    p["fc_w"] = u(ks[0], (128 * 4 * 4, input_dim), input_dim)
    p["fc_b"] = u(ks[1], (128 * 4 * 4,), input_dim)
    p["dc1_w"] = u(ks[2], (128, 64, 3, 3), 128 * 9)
    p["dc1_b"] = u(ks[3], (64,), 128 * 9)
    p["dc2_w"] = u(ks[4], (64, 32, 5, 5), 64 * 25)
    p["dc2_b"] = u(ks[5], (32,), 64 * 25)
    p["dc3_w"] = u(ks[6], (32, out_ch, 5, 5), 32 * 25)
    p["dc3_b"] = u(ks[7], (out_ch,), 32 * 25)
    return p


def prep_params(p, batch):
    B = batch
    input_dim = p["fc_w"].shape[1]
    # Permute fc columns so the (B, 2048) output is already in (y, x, c) order.
    fc_w = (np.asarray(p["fc_w"], np.float32).reshape(128, 4, 4, input_dim)
            .transpose(1, 2, 0, 3).reshape(2048, input_dim).T)
    fc_b = (np.asarray(p["fc_b"], np.float32).reshape(128, 4, 4)
            .transpose(1, 2, 0).reshape(1, 2048))
    prep = {
        "fc_w": jnp.asarray(fc_w, jnp.bfloat16),
        "fc_b": jnp.asarray(fc_b, jnp.float32),
        "e": jnp.asarray(_fc_select(B), jnp.float32),
        "i1": jnp.asarray(_interleave_mat(B, 4), jnp.float32),
        "i2": jnp.asarray(_interleave_mat(B, 8), jnp.float32),
        "f": jnp.asarray(_interleave_mat(B, 16, pad_rows=False), jnp.float32),
    }
    for name, pad, Win in (("dc1", 1, 4), ("dc2", 2, 8), ("dc3", 2, 16)):
        w = np.asarray(p[name + "_w"], np.float32)
        b = np.asarray(p[name + "_b"], np.float32)
        Cout = w.shape[1]
        # dc3: pad Cout up so the output lane width (2*Win*Cpad) is 128-dense.
        cpad = Cout if name != "dc3" else 4 * ((Cout + 3) // 4)
        bias = np.zeros((cpad,), np.float32)
        bias[:Cout] = b
        prep[name + "_A"] = jnp.asarray(
            _banded_deconv_weights(w, pad, Win, cpad), jnp.bfloat16)
        prep[name + "_b"] = jnp.asarray(
            np.tile(bias, 2 * Win).reshape(1, 2 * Win * cpad), jnp.float32)
    return prep


# ------------------------- pure-JAX reference (check) -------------------------
def _ref_forward(params, x):
    hi = jax.lax.Precision.HIGHEST
    h = jnp.maximum(jnp.dot(x, params["fc_w"].T, precision=hi) + params["fc_b"], 0.0)
    h = h.reshape(x.shape[0], 128, 4, 4)

    def deconv(h, w, b, k, p):
        rhs = jnp.flip(w, (2, 3)).transpose(1, 0, 2, 3)              # OIHW
        y = jax.lax.conv_general_dilated(
            h, rhs, window_strides=(1, 1),
            padding=((k - 1 - p, k - p), (k - 1 - p, k - p)),        # output_padding=1
            lhs_dilation=(2, 2),
            dimension_numbers=("NCHW", "OIHW", "NCHW"), precision=hi)
        return y + b.reshape(1, -1, 1, 1)

    h = jnp.maximum(deconv(h, params["dc1_w"], params["dc1_b"], 3, 1), 0.0)
    h = jnp.maximum(deconv(h, params["dc2_w"], params["dc2_b"], 5, 2), 0.0)
    return jax.nn.sigmoid(deconv(h, params["dc3_w"], params["dc3_b"], 5, 2))


if __name__ == "__main__":
    input_dim, out_ch, batch = 64, 3, 2
    key = jax.random.PRNGKey(0)
    k_x, k_p = jax.random.split(key)
    x = jax.random.normal(k_x, (batch, input_dim), jnp.float32)

    params = init_params(k_p, input_dim, out_ch)
    prep = prep_params(params, batch)

    fwd = jax.jit(functools.partial(cd_forward, out_ch=out_ch))
    y = fwd(prep, x)
    jax.block_until_ready(y)
    assert y.shape == (batch, out_ch, 32, 32)

    # numerical sanity check against a pure-JAX f32 reference of the torch
    # module (bf16 weights/activations in the kernel -> slightly relaxed atol).
    y_ref = _ref_forward(params, x)
    err = float(jnp.max(jnp.abs(y - y_ref)))
    assert err < 1.5e-2, f"max abs err vs reference: {err}"

    print("KERNEL_OK")
</pallas_src>

<mosaic_0001>
module attributes {stable_mosaic.version = 11 : i64} {
  func.func @_cd_kernel(%arg0: memref<2x64xf32, #tpu.memory_space<vmem>>, %arg1: memref<64x2048xbf16, #tpu.memory_space<vmem>>, %arg2: memref<1x2048xf32, #tpu.memory_space<vmem>>, %arg3: memref<4x12x2xf32, #tpu.memory_space<vmem>>, %arg4: memref<3x512x512xbf16, #tpu.memory_space<vmem>>, %arg5: memref<1x512xf32, #tpu.memory_space<vmem>>, %arg6: memref<2x20x10xf32, #tpu.memory_space<vmem>>, %arg7: memref<5x512x512xbf16, #tpu.memory_space<vmem>>, %arg8: memref<1x512xf32, #tpu.memory_space<vmem>>, %arg9: memref<2x36x18xf32, #tpu.memory_space<vmem>>, %arg10: memref<5x512x128xbf16, #tpu.memory_space<vmem>>, %arg11: memref<1x128xf32, #tpu.memory_space<vmem>>, %arg12: memref<2x64x34xf32, #tpu.memory_space<vmem>>, %arg13: memref<64x128xf32, #tpu.memory_space<vmem>>) attributes {dimension_semantics = [], scalar_prefetch = 0 : i64, scratch_operands = 0 : i64, tpu.core_type = #tpu.core_type<tc>} {
    %c0 = arith.constant 0 : index
    %c0_0 = arith.constant 0 : index
    %0 = vector.load %arg0[%c0, %c0_0] : memref<2x64xf32, #tpu.memory_space<vmem>>, vector<2x64xf32>
    %1 = arith.truncf %0 : vector<2x64xf32> to vector<2x64xbf16>
    %c0_1 = arith.constant 0 : index
    %c0_2 = arith.constant 0 : index
    %2 = vector.load %arg1[%c0_1, %c0_2] : memref<64x2048xbf16, #tpu.memory_space<vmem>>, vector<64x2048xbf16>
    %cst = arith.constant dense<0.000000e+00> : vector<2x2048xf32>
    %3 = tpu.matmul %1, %2, %cst {dimension_numbers = #tpu.dot_dimension_numbers<[1], [0], [0], [1], [0, 0, 1, 1], [], []>} : vector<2x64xbf16>, vector<64x2048xbf16>, vector<2x2048xf32> -> vector<2x2048xf32>
    %c0_3 = arith.constant 0 : index
    %c0_4 = arith.constant 0 : index
    %4 = vector.load %arg2[%c0_3, %c0_4] : memref<1x2048xf32, #tpu.memory_space<vmem>>, vector<1x2048xf32>
    %5 = vector.broadcast %4 : vector<1x2048xf32> to vector<2x2048xf32>
    %6 = arith.addf %3, %5 : vector<2x2048xf32>
    %cst_5 = arith.constant 0.000000e+00 : f32
    %7 = vector.broadcast %cst_5 : f32 to vector<2x2048xf32>
    %8 = arith.maximumf %6, %7 : vector<2x2048xf32>
    %9 = vector.extract_strided_slice %8 {offsets = [0, 0], sizes = [2, 512], strides = [1, 1]} : vector<2x2048xf32> to vector<2x512xf32>
    %c0_6 = arith.constant 0 : index
    %c0_7 = arith.constant 0 : index
    %c0_8 = arith.constant 0 : index
    %10 = vector.load %arg3[%c0_6, %c0_7, %c0_8] : memref<4x12x2xf32, #tpu.memory_space<vmem>>, vector<1x12x2xf32>
    %11 = vector.shape_cast %10 : vector<1x12x2xf32> to vector<12x2xf32>
    %cst_9 = arith.constant dense<0.000000e+00> : vector<12x512xf32>
    %12 = tpu.matmul %11, %9, %cst_9 {dimension_numbers = #tpu.dot_dimension_numbers<[1], [0], [0], [1], [0, 0, 1, 1], [], []>} : vector<12x2xf32>, vector<2x512xf32>, vector<12x512xf32> -> vector<12x512xf32>
    %13 = vector.extract_strided_slice %8 {offsets = [0, 512], sizes = [2, 512], strides = [1, 1]} : vector<2x2048xf32> to vector<2x512xf32>
    %c1 = arith.constant 1 : index
    %c0_10 = arith.constant 0 : index
    %c0_11 = arith.constant 0 : index
    %14 = vector.load %arg3[%c1, %c0_10, %c0_11] : memref<4x12x2xf32, #tpu.memory_space<vmem>>, vector<1x12x2xf32>
    %15 = vector.shape_cast %14 : vector<1x12x2xf32> to vector<12x2xf32>
    %cst_12 = arith.constant dense<0.000000e+00> : vector<12x512xf32>
    %16 = tpu.matmul %15, %13, %cst_12 {dimension_numbers = #tpu.dot_dimension_numbers<[1], [0], [0], [1], [0, 0, 1, 1], [], []>} : vector<12x2xf32>, vector<2x512xf32>, vector<12x512xf32> -> vector<12x512xf32>
    %17 = arith.addf %12, %16 : vector<12x512xf32>
    %18 = vector.extract_strided_slice %8 {offsets = [0, 1024], sizes = [2, 512], strides = [1, 1]} : vector<2x2048xf32> to vector<2x512xf32>
    %c2 = arith.constant 2 : index
    %c0_13 = arith.constant 0 : index
    %c0_14 = arith.constant 0 : index
    %19 = vector.load %arg3[%c2, %c0_13, %c0_14] : memref<4x12x2xf32, #tpu.memory_space<vmem>>, vector<1x12x2xf32>
    %20 = vector.shape_cast %19 : vector<1x12x2xf32> to vector<12x2xf32>
    %cst_15 = arith.constant dense<0.000000e+00> : vector<12x512xf32>
    %21 = tpu.matmul %20, %18, %cst_15 {dimension_numbers = #tpu.dot_dimension_numbers<[1], [0], [0], [1], [0, 0, 1, 1], [], []>} : vector<12x2xf32>, vector<2x512xf32>, vector<12x512xf32> -> vector<12x512xf32>
    %22 = arith.addf %17, %21 : vector<12x512xf32>
    %23 = vector.extract_strided_slice %8 {offsets = [0, 1536], sizes = [2, 512], strides = [1, 1]} : vector<2x2048xf32> to vector<2x512xf32>
    %c3 = arith.constant 3 : index
    %c0_16 = arith.constant 0 : index
    %c0_17 = arith.constant 0 : index
    %24 = vector.load %arg3[%c3, %c0_16, %c0_17] : memref<4x12x2xf32, #tpu.memory_space<vmem>>, vector<1x12x2xf32>
    %25 = vector.shape_cast %24 : vector<1x12x2xf32> to vector<12x2xf32>
    %cst_18 = arith.constant dense<0.000000e+00> : vector<12x512xf32>
    %26 = tpu.matmul %25, %23, %cst_18 {dimension_numbers = #tpu.dot_dimension_numbers<[1], [0], [0], [1], [0, 0, 1, 1], [], []>} : vector<12x2xf32>, vector<2x512xf32>, vector<12x512xf32> -> vector<12x512xf32>
    %27 = arith.addf %22, %26 : vector<12x512xf32>
    %28 = vector.extract_strided_slice %27 {offsets = [2, 0], sizes = [10, 512], strides = [1, 1]} : vector<12x512xf32> to vector<10x512xf32>
    %29 = arith.truncf %28 : vector<10x512xf32> to vector<10x512xbf16>
    %c0_19 = arith.constant 0 : index
    %c0_20 = arith.constant 0 : index
    %c0_21 = arith.constant 0 : index
    %30 = vector.load %arg4[%c0_19, %c0_20, %c0_21] : memref<3x512x512xbf16, #tpu.memory_space<vmem>>, vector<1x512x512xbf16>
    %31 = vector.shape_cast %30 : vector<1x512x512xbf16> to vector<512x512xbf16>
    %cst_22 = arith.constant dense<0.000000e+00> : vector<10x512xf32>
    %32 = tpu.matmul %29, %31, %cst_22 {dimension_numbers = #tpu.dot_dimension_numbers<[1], [0], [0], [1], [0, 0, 1, 1], [], []>} : vector<10x512xbf16>, vector<512x512xbf16>, vector<10x512xf32> -> vector<10x512xf32>
    %33 = vector.extract_strided_slice %27 {offsets = [1, 0], sizes = [10, 512], strides = [1, 1]} : vector<12x512xf32> to vector<10x512xf32>
    %34 = arith.truncf %33 : vector<10x512xf32> to vector<10x512xbf16>
    %c1_23 = arith.constant 1 : index
    %c0_24 = arith.constant 0 : index
    %c0_25 = arith.constant 0 : index
    %35 = vector.load %arg4[%c1_23, %c0_24, %c0_25] : memref<3x512x512xbf16, #tpu.memory_space<vmem>>, vector<1x512x512xbf16>
    %36 = vector.shape_cast %35 : vector<1x512x512xbf16> to vector<512x512xbf16>
    %cst_26 = arith.constant dense<0.000000e+00> : vector<10x512xf32>
    %37 = tpu.matmul %34, %36, %cst_26 {dimension_numbers = #tpu.dot_dimension_numbers<[1], [0], [0], [1], [0, 0, 1, 1], [], []>} : vector<10x512xbf16>, vector<512x512xbf16>, vector<10x512xf32> -> vector<10x512xf32>
    %38 = vector.extract_strided_slice %27 {offsets = [1, 0], sizes = [10, 512], strides = [1, 1]} : vector<12x512xf32> to vector<10x512xf32>
    %39 = arith.truncf %38 : vector<10x512xf32> to vector<10x512xbf16>
    %c2_27 = arith.constant 2 : index
    %c0_28 = arith.constant 0 : index
    %c0_29 = arith.constant 0 : index
    %40 = vector.load %arg4[%c2_27, %c0_28, %c0_29] : memref<3x512x512xbf16, #tpu.memory_space<vmem>>, vector<1x512x512xbf16>
    %41 = vector.shape_cast %40 : vector<1x512x512xbf16> to vector<512x512xbf16>
    %cst_30 = arith.constant dense<0.000000e+00> : vector<10x512xf32>
    %42 = tpu.matmul %39, %41, %cst_30 {dimension_numbers = #tpu.dot_dimension_numbers<[1], [0], [0], [1], [0, 0, 1, 1], [], []>} : vector<10x512xbf16>, vector<512x512xbf16>, vector<10x512xf32> -> vector<10x512xf32>
    %43 = arith.addf %32, %42 : vector<10x512xf32>
    %c0_31 = arith.constant 0 : index
    %c0_32 = arith.constant 0 : index
    %44 = vector.load %arg5[%c0_31, %c0_32] : memref<1x512xf32, #tpu.memory_space<vmem>>, vector<1x512xf32>
    %45 = vector.broadcast %44 : vector<1x512xf32> to vector<10x512xf32>
    %46 = arith.addf %37, %45 : vector<10x512xf32>
    %cst_33 = arith.constant 0.000000e+00 : f32
    %47 = vector.broadcast %cst_33 : f32 to vector<10x512xf32>
    %48 = arith.maximumf %46, %47 : vector<10x512xf32>
    %49 = vector.broadcast %44 : vector<1x512xf32> to vector<10x512xf32>
    %50 = arith.addf %43, %49 : vector<10x512xf32>
    %cst_34 = arith.constant 0.000000e+00 : f32
    %51 = vector.broadcast %cst_34 : f32 to vector<10x512xf32>
    %52 = arith.maximumf %50, %51 : vector<10x512xf32>
    %c0_35 = arith.constant 0 : index
    %c0_36 = arith.constant 0 : index
    %c0_37 = arith.constant 0 : index
    %53 = vector.load %arg6[%c0_35, %c0_36, %c0_37] : memref<2x20x10xf32, #tpu.memory_space<vmem>>, vector<1x20x10xf32>
    %54 = vector.shape_cast %53 : vector<1x20x10xf32> to vector<20x10xf32>
    %cst_38 = arith.constant dense<0.000000e+00> : vector<20x512xf32>
    %55 = tpu.matmul %54, %48, %cst_38 {dimension_numbers = #tpu.dot_dimension_numbers<[1], [0], [0], [1], [0, 0, 1, 1], [], []>} : vector<20x10xf32>, vector<10x512xf32>, vector<20x512xf32> -> vector<20x512xf32>
    %c1_39 = arith.constant 1 : index
    %c0_40 = arith.constant 0 : index
    %c0_41 = arith.constant 0 : index
    %56 = vector.load %arg6[%c1_39, %c0_40, %c0_41] : memref<2x20x10xf32, #tpu.memory_space<vmem>>, vector<1x20x10xf32>
    %57 = vector.shape_cast %56 : vector<1x20x10xf32> to vector<20x10xf32>
    %cst_42 = arith.constant dense<0.000000e+00> : vector<20x512xf32>
    %58 = tpu.matmul %57, %52, %cst_42 {dimension_numbers = #tpu.dot_dimension_numbers<[1], [0], [0], [1], [0, 0, 1, 1], [], []>} : vector<20x10xf32>, vector<10x512xf32>, vector<20x512xf32> -> vector<20x512xf32>
    %59 = arith.addf %55, %58 : vector<20x512xf32>
    %60 = vector.extract_strided_slice %59 {offsets = [2, 0], sizes = [18, 512], strides = [1, 1]} : vector<20x512xf32> to vector<18x512xf32>
    %61 = arith.truncf %60 : vector<18x512xf32> to vector<18x512xbf16>
    %c0_43 = arith.constant 0 : index
    %c0_44 = arith.constant 0 : index
    %c0_45 = arith.constant 0 : index
    %62 = vector.load %arg7[%c0_43, %c0_44, %c0_45] : memref<5x512x512xbf16, #tpu.memory_space<vmem>>, vector<1x512x512xbf16>
    %63 = vector.shape_cast %62 : vector<1x512x512xbf16> to vector<512x512xbf16>
    %cst_46 = arith.constant dense<0.000000e+00> : vector<18x512xf32>
    %64 = tpu.matmul %61, %63, %cst_46 {dimension_numbers = #tpu.dot_dimension_numbers<[1], [0], [0], [1], [0, 0, 1, 1], [], []>} : vector<18x512xbf16>, vector<512x512xbf16>, vector<18x512xf32> -> vector<18x512xf32>
    %65 = vector.extract_strided_slice %59 {offsets = [2, 0], sizes = [18, 512], strides = [1, 1]} : vector<20x512xf32> to vector<18x512xf32>
    %66 = arith.truncf %65 : vector<18x512xf32> to vector<18x512xbf16>
    %c1_47 = arith.constant 1 : index
    %c0_48 = arith.constant 0 : index
    %c0_49 = arith.constant 0 : index
    %67 = vector.load %arg7[%c1_47, %c0_48, %c0_49] : memref<5x512x512xbf16, #tpu.memory_space<vmem>>, vector<1x512x512xbf16>
    %68 = vector.shape_cast %67 : vector<1x512x512xbf16> to vector<512x512xbf16>
    %cst_50 = arith.constant dense<0.000000e+00> : vector<18x512xf32>
    %69 = tpu.matmul %66, %68, %cst_50 {dimension_numbers = #tpu.dot_dimension_numbers<[1], [0], [0], [1], [0, 0, 1, 1], [], []>} : vector<18x512xbf16>, vector<512x512xbf16>, vector<18x512xf32> -> vector<18x512xf32>
    %70 = vector.extract_strided_slice %59 {offsets = [1, 0], sizes = [18, 512], strides = [1, 1]} : vector<20x512xf32> to vector<18x512xf32>
    %71 = arith.truncf %70 : vector<18x512xf32> to vector<18x512xbf16>
    %c2_51 = arith.constant 2 : index
    %c0_52 = arith.constant 0 : index
    %c0_53 = arith.constant 0 : index
    %72 = vector.load %arg7[%c2_51, %c0_52, %c0_53] : memref<5x512x512xbf16, #tpu.memory_space<vmem>>, vector<1x512x512xbf16>
    %73 = vector.shape_cast %72 : vector<1x512x512xbf16> to vector<512x512xbf16>
    %cst_54 = arith.constant dense<0.000000e+00> : vector<18x512xf32>
    %74 = tpu.matmul %71, %73, %cst_54 {dimension_numbers = #tpu.dot_dimension_numbers<[1], [0], [0], [1], [0, 0, 1, 1], [], []>} : vector<18x512xbf16>, vector<512x512xbf16>, vector<18x512xf32> -> vector<18x512xf32>
    %75 = arith.addf %64, %74 : vector<18x512xf32>
    %76 = vector.extract_strided_slice %59 {offsets = [1, 0], sizes = [18, 512], strides = [1, 1]} : vector<20x512xf32> to vector<18x512xf32>
    %77 = arith.truncf %76 : vector<18x512xf32> to vector<18x512xbf16>
    %c3_55 = arith.constant 3 : index
    %c0_56 = arith.constant 0 : index
    %c0_57 = arith.constant 0 : index
    %78 = vector.load %arg7[%c3_55, %c0_56, %c0_57] : memref<5x512x512xbf16, #tpu.memory_space<vmem>>, vector<1x512x512xbf16>
    %79 = vector.shape_cast %78 : vector<1x512x512xbf16> to vector<512x512xbf16>
    %cst_58 = arith.constant dense<0.000000e+00> : vector<18x512xf32>
    %80 = tpu.matmul %77, %79, %cst_58 {dimension_numbers = #tpu.dot_dimension_numbers<[1], [0], [0], [1], [0, 0, 1, 1], [], []>} : vector<18x512xbf16>, vector<512x512xbf16>, vector<18x512xf32> -> vector<18x512xf32>
    %81 = arith.addf %69, %80 : vector<18x512xf32>
    %82 = vector.extract_strided_slice %59 {offsets = [0, 0], sizes = [18, 512], strides = [1, 1]} : vector<20x512xf32> to vector<18x512xf32>
    %83 = arith.truncf %82 : vector<18x512xf32> to vector<18x512xbf16>
    %c4 = arith.constant 4 : index
    %c0_59 = arith.constant 0 : index
    %c0_60 = arith.constant 0 : index
    %84 = vector.load %arg7[%c4, %c0_59, %c0_60] : memref<5x512x512xbf16, #tpu.memory_space<vmem>>, vector<1x512x512xbf16>
    %85 = vector.shape_cast %84 : vector<1x512x512xbf16> to vector<512x512xbf16>
    %cst_61 = arith.constant dense<0.000000e+00> : vector<18x512xf32>
    %86 = tpu.matmul %83, %85, %cst_61 {dimension_numbers = #tpu.dot_dimension_numbers<[1], [0], [0], [1], [0, 0, 1, 1], [], []>} : vector<18x512xbf16>, vector<512x512xbf16>, vector<18x512xf32> -> vector<18x512xf32>
    %87 = arith.addf %75, %86 : vector<18x512xf32>
    %c0_62 = arith.constant 0 : index
    %c0_63 = arith.constant 0 : index
    %88 = vector.load %arg8[%c0_62, %c0_63] : memref<1x512xf32, #tpu.memory_space<vmem>>, vector<1x512xf32>
    %89 = vector.broadcast %88 : vector<1x512xf32> to vector<18x512xf32>
    %90 = arith.addf %87, %89 : vector<18x512xf32>
    %cst_64 = arith.constant 0.000000e+00 : f32
    %91 = vector.broadcast %cst_64 : f32 to vector<18x512xf32>
    %92 = arith.maximumf %90, %91 : vector<18x512xf32>
    %93 = vector.broadcast %88 : vector<1x512xf32> to vector<18x512xf32>
    %94 = arith.addf %81, %93 : vector<18x512xf32>
    %cst_65 = arith.constant 0.000000e+00 : f32
    %95 = vector.broadcast %cst_65 : f32 to vector<18x512xf32>
    %96 = arith.maximumf %94, %95 : vector<18x512xf32>
    %c0_66 = arith.constant 0 : index
    %c0_67 = arith.constant 0 : index
    %c0_68 = arith.constant 0 : index
    %97 = vector.load %arg9[%c0_66, %c0_67, %c0_68] : memref<2x36x18xf32, #tpu.memory_space<vmem>>, vector<1x36x18xf32>
    %98 = vector.shape_cast %97 : vector<1x36x18xf32> to vector<36x18xf32>
    %cst_69 = arith.constant dense<0.000000e+00> : vector<36x512xf32>
    %99 = tpu.matmul %98, %92, %cst_69 {dimension_numbers = #tpu.dot_dimension_numbers<[1], [0], [0], [1], [0, 0, 1, 1], [], []>} : vector<36x18xf32>, vector<18x512xf32>, vector<36x512xf32> -> vector<36x512xf32>
    %c1_70 = arith.constant 1 : index
    %c0_71 = arith.constant 0 : index
    %c0_72 = arith.constant 0 : index
    %100 = vector.load %arg9[%c1_70, %c0_71, %c0_72] : memref<2x36x18xf32, #tpu.memory_space<vmem>>, vector<1x36x18xf32>
    %101 = vector.shape_cast %100 : vector<1x36x18xf32> to vector<36x18xf32>
    %cst_73 = arith.constant dense<0.000000e+00> : vector<36x512xf32>
    %102 = tpu.matmul %101, %96, %cst_73 {dimension_numbers = #tpu.dot_dimension_numbers<[1], [0], [0], [1], [0, 0, 1, 1], [], []>} : vector<36x18xf32>, vector<18x512xf32>, vector<36x512xf32> -> vector<36x512xf32>
    %103 = arith.addf %99, %102 : vector<36x512xf32>
    %104 = vector.extract_strided_slice %103 {offsets = [2, 0], sizes = [34, 512], strides = [1, 1]} : vector<36x512xf32> to vector<34x512xf32>
    %105 = arith.truncf %104 : vector<34x512xf32> to vector<34x512xbf16>
    %c0_74 = arith.constant 0 : index
    %c0_75 = arith.constant 0 : index
    %c0_76 = arith.constant 0 : index
    %106 = vector.load %arg10[%c0_74, %c0_75, %c0_76] : memref<5x512x128xbf16, #tpu.memory_space<vmem>>, vector<1x512x128xbf16>
    %107 = vector.shape_cast %106 : vector<1x512x128xbf16> to vector<512x128xbf16>
    %cst_77 = arith.constant dense<0.000000e+00> : vector<34x128xf32>
    %108 = tpu.matmul %105, %107, %cst_77 {dimension_numbers = #tpu.dot_dimension_numbers<[1], [0], [0], [1], [0, 0, 1, 1], [], []>} : vector<34x512xbf16>, vector<512x128xbf16>, vector<34x128xf32> -> vector<34x128xf32>
    %109 = vector.extract_strided_slice %103 {offsets = [2, 0], sizes = [34, 512], strides = [1, 1]} : vector<36x512xf32> to vector<34x512xf32>
    %110 = arith.truncf %109 : vector<34x512xf32> to vector<34x512xbf16>
    %c1_78 = arith.constant 1 : index
    %c0_79 = arith.constant 0 : index
    %c0_80 = arith.constant 0 : index
    %111 = vector.load %arg10[%c1_78, %c0_79, %c0_80] : memref<5x512x128xbf16, #tpu.memory_space<vmem>>, vector<1x512x128xbf16>
    %112 = vector.shape_cast %111 : vector<1x512x128xbf16> to vector<512x128xbf16>
    %cst_81 = arith.constant dense<0.000000e+00> : vector<34x128xf32>
    %113 = tpu.matmul %110, %112, %cst_81 {dimension_numbers = #tpu.dot_dimension_numbers<[1], [0], [0], [1], [0, 0, 1, 1], [], []>} : vector<34x512xbf16>, vector<512x128xbf16>, vector<34x128xf32> -> vector<34x128xf32>
    %114 = vector.extract_strided_slice %103 {offsets = [1, 0], sizes = [34, 512], strides = [1, 1]} : vector<36x512xf32> to vector<34x512xf32>
    %115 = arith.truncf %114 : vector<34x512xf32> to vector<34x512xbf16>
    %c2_82 = arith.constant 2 : index
    %c0_83 = arith.constant 0 : index
    %c0_84 = arith.constant 0 : index
    %116 = vector.load %arg10[%c2_82, %c0_83, %c0_84] : memref<5x512x128xbf16, #tpu.memory_space<vmem>>, vector<1x512x128xbf16>
    %117 = vector.shape_cast %116 : vector<1x512x128xbf16> to vector<512x128xbf16>
    %cst_85 = arith.constant dense<0.000000e+00> : vector<34x128xf32>
    %118 = tpu.matmul %115, %117, %cst_85 {dimension_numbers = #tpu.dot_dimension_numbers<[1], [0], [0], [1], [0, 0, 1, 1], [], []>} : vector<34x512xbf16>, vector<512x128xbf16>, vector<34x128xf32> -> vector<34x128xf32>
    %119 = arith.addf %108, %118 : vector<34x128xf32>
    %120 = vector.extract_strided_slice %103 {offsets = [1, 0], sizes = [34, 512], strides = [1, 1]} : vector<36x512xf32> to vector<34x512xf32>
    %121 = arith.truncf %120 : vector<34x512xf32> to vector<34x512xbf16>
    %c3_86 = arith.constant 3 : index
    %c0_87 = arith.constant 0 : index
    %c0_88 = arith.constant 0 : index
    %122 = vector.load %arg10[%c3_86, %c0_87, %c0_88] : memref<5x512x128xbf16, #tpu.memory_space<vmem>>, vector<1x512x128xbf16>
    %123 = vector.shape_cast %122 : vector<1x512x128xbf16> to vector<512x128xbf16>
    %cst_89 = arith.constant dense<0.000000e+00> : vector<34x128xf32>
    %124 = tpu.matmul %121, %123, %cst_89 {dimension_numbers = #tpu.dot_dimension_numbers<[1], [0], [0], [1], [0, 0, 1, 1], [], []>} : vector<34x512xbf16>, vector<512x128xbf16>, vector<34x128xf32> -> vector<34x128xf32>
    %125 = arith.addf %113, %124 : vector<34x128xf32>
    %126 = vector.extract_strided_slice %103 {offsets = [0, 0], sizes = [34, 512], strides = [1, 1]} : vector<36x512xf32> to vector<34x512xf32>
    %127 = arith.truncf %126 : vector<34x512xf32> to vector<34x512xbf16>
    %c4_90 = arith.constant 4 : index
    %c0_91 = arith.constant 0 : index
    %c0_92 = arith.constant 0 : index
    %128 = vector.load %arg10[%c4_90, %c0_91, %c0_92] : memref<5x512x128xbf16, #tpu.memory_space<vmem>>, vector<1x512x128xbf16>
    %129 = vector.shape_cast %128 : vector<1x512x128xbf16> to vector<512x128xbf16>
    %cst_93 = arith.constant dense<0.000000e+00> : vector<34x128xf32>
    %130 = tpu.matmul %127, %129, %cst_93 {dimension_numbers = #tpu.dot_dimension_numbers<[1], [0], [0], [1], [0, 0, 1, 1], [], []>} : vector<34x512xbf16>, vector<512x128xbf16>, vector<34x128xf32> -> vector<34x128xf32>
    %131 = arith.addf %119, %130 : vector<34x128xf32>
    %c0_94 = arith.constant 0 : index
    %c0_95 = arith.constant 0 : index
    %132 = vector.load %arg11[%c0_94, %c0_95] : memref<1x128xf32, #tpu.memory_space<vmem>>, vector<1x128xf32>
    %133 = vector.broadcast %132 : vector<1x128xf32> to vector<34x128xf32>
    %134 = arith.addf %131, %133 : vector<34x128xf32>
    %cst_96 = arith.constant 0.000000e+00 : f32
    %135 = vector.broadcast %cst_96 : f32 to vector<34x128xf32>
    %136 = arith.subf %135, %134 : vector<34x128xf32>
    %137 = math.exp %136 : vector<34x128xf32>
    %cst_97 = arith.constant 1.000000e+00 : f32
    %138 = vector.broadcast %cst_97 : f32 to vector<34x128xf32>
    %139 = arith.addf %138, %137 : vector<34x128xf32>
    %cst_98 = arith.constant 1.000000e+00 : f32
    %140 = vector.broadcast %cst_98 : f32 to vector<34x128xf32>
    %141 = arith.divf %140, %139 : vector<34x128xf32>
    %142 = vector.broadcast %132 : vector<1x128xf32> to vector<34x128xf32>
    %143 = arith.addf %125, %142 : vector<34x128xf32>
    %cst_99 = arith.constant 0.000000e+00 : f32
    %144 = vector.broadcast %cst_99 : f32 to vector<34x128xf32>
    %145 = arith.subf %144, %143 : vector<34x128xf32>
    %146 = math.exp %145 : vector<34x128xf32>
    %cst_100 = arith.constant 1.000000e+00 : f32
    %147 = vector.broadcast %cst_100 : f32 to vector<34x128xf32>
    %148 = arith.addf %147, %146 : vector<34x128xf32>
    %cst_101 = arith.constant 1.000000e+00 : f32
    %149 = vector.broadcast %cst_101 : f32 to vector<34x128xf32>
    %150 = arith.divf %149, %148 : vector<34x128xf32>
    %c0_102 = arith.constant 0 : index
    %c0_103 = arith.constant 0 : index
    %c0_104 = arith.constant 0 : index
    %151 = vector.load %arg12[%c0_102, %c0_103, %c0_104] : memref<2x64x34xf32, #tpu.memory_space<vmem>>, vector<1x64x34xf32>
    %152 = vector.shape_cast %151 : vector<1x64x34xf32> to vector<64x34xf32>
    %cst_105 = arith.constant dense<0.000000e+00> : vector<64x128xf32>
    %153 = tpu.matmul %152, %141, %cst_105 {dimension_numbers = #tpu.dot_dimension_numbers<[1], [0], [0], [1], [0, 0, 1, 1], [], []>} : vector<64x34xf32>, vector<34x128xf32>, vector<64x128xf32> -> vector<64x128xf32>
    %c1_106 = arith.constant 1 : index
    %c0_107 = arith.constant 0 : index
    %c0_108 = arith.constant 0 : index
    %154 = vector.load %arg12[%c1_106, %c0_107, %c0_108] : memref<2x64x34xf32, #tpu.memory_space<vmem>>, vector<1x64x34xf32>
    %155 = vector.shape_cast %154 : vector<1x64x34xf32> to vector<64x34xf32>
    %cst_109 = arith.constant dense<0.000000e+00> : vector<64x128xf32>
    %156 = tpu.matmul %155, %150, %cst_109 {dimension_numbers = #tpu.dot_dimension_numbers<[1], [0], [0], [1], [0, 0, 1, 1], [], []>} : vector<64x34xf32>, vector<34x128xf32>, vector<64x128xf32> -> vector<64x128xf32>
    %157 = arith.addf %153, %156 : vector<64x128xf32>
    %c0_110 = arith.constant 0 : index
    %c0_111 = arith.constant 0 : index
    %158 = vector.load %arg13[%c0_110, %c0_111] : memref<64x128xf32, #tpu.memory_space<vmem>>, vector<64x128xf32>
    tpu.vector_store %arg13[%c0_110, %c0_111], %157 {strides = array<i32>} : memref<64x128xf32, #tpu.memory_space<vmem>>, vector<64x128xf32>,
    return
  }
}

</mosaic_0001>

<bundles_post_ra>
// kernel: cd_forward.1
= control target key start
LH: loop header
LB: loop body
LE: loop exit
PB: predicated region body
PF: predicated region fallthrough
CT: control target
= control target key end

     0   :  { %18 = vsyncpa [#allocation3], 0  ;;  %s18042_s0 = inlined_call_operand.hbm [shape: f32[2,64], index: 0, kind: input, shape index: {}]   ;;  %s18043_s1 = inlined_call_operand.hbm [shape: bf16[64,2048], index: 1, kind: input, shape index: {}]   ;;  %s18044_s2 = inlined_call_operand.hbm [shape: f32[1,2048], index: 2, kind: input, shape index: {}]   ;;  %s18045_s3 = inlined_call_operand.vmem [shape: f32[4,12,2], index: 3, kind: input, shape index: {}]   ;;  %s18046_s4 = inlined_call_operand.hbm [shape: bf16[3,512,512], index: 4, kind: input, shape index: {}]   ;;  %s18047_s5 = inlined_call_operand.hbm [shape: f32[1,512], index: 5, kind: input, shape index: {}]   ;;  %s18048_s6 = inlined_call_operand.vmem [shape: f32[2,20,10], index: 6, kind: input, shape index: {}]   ;;  %s18049_s7 = inlined_call_operand.hbm [shape: bf16[5,512,512], index: 7, kind: input, shape index: {}]   ;;  %s18050_s8 = inlined_call_operand.hbm [shape: f32[1,512], index: 8, kind: input, shape index: {}]   ;;  %s18051_s9 = inlined_call_operand.vmem [shape: f32[2,36,18], index: 9, kind: input, shape index: {}]   ;;  %s18052_s10 = inlined_call_operand.hbm [shape: bf16[5,512,128], index: 10, kind: input, shape index: {}]   ;;  %s18053_s11 = inlined_call_operand.hbm [shape: f32[1,128], index: 11, kind: input, shape index: {}]   ;;  %s18054_s12 = inlined_call_operand.vmem [shape: f32[2,64,34], index: 12, kind: input, shape index: {}]   ;;  %s18055_s13 = inlined_call_operand.vmem [shape: f32[64,128], index: 13, kind: output, shape index: {}]  }
   0x1   :  { %19 = vsyncpa [#allocation5], 0 }
   0x2   :  { %20 = vsyncpa [#allocation8], 0 }
   0x3   :  { %21 = vsyncpa [#allocation11], 0 }
   0x4   :  { %22 = vsyncpa [#allocation14], 0  ;;  %s16845_s25 = smov [#allocation4]   ;;  %s16637_s29 = scalar_lea.hbm %s18043_s1, 8192 }
   0x5   :  { %s38_s26 = sshll.u32 %s16845_s25, 4  ;;  %p16638_p0 = scmp.ne.s32.totalorder %s18043_s1, %s16637_s29  ;;  %s39_s26 = int_to_ptr.vmem [resolvable:$true] %s38_s26 }
   0x6   :  { %p16641_p1 = scmp.lt.u32.totalorder %s16637_s29, %s18043_s1 }
   0x8   :  { %p16643_p2 = pnand %p16641_p1, %p16638_p0 }
   0xa   :  { %16646 = shalt.err (!%p16643_p2)
}
   0xb   :  { %s16647_s17 = scalar_lea.vmem %s39_s26, 8192  ;;  %p16652_p4 = scmp.lt.s32.totalorder %s39_s26, %s39_s26 }
   0xc   :  { %p16648_p3 = scmp.ne.s32.totalorder %s39_s26, %s16647_s17  ;;  %p16653_p5 = scmp.lt.s32.totalorder %s16647_s17, %s16647_s17 }
   0xe   :  { %p16654_p6 = por %p16653_p5, %p16652_p4 }
  0x10   :  { %p16655_p7 = pnand %p16654_p6, %p16648_p3 }
  0x12   :  { %16658 = shalt.err (!%p16655_p7)
}
  0x13   :  { %s16846_s18 = smov 1024   ;;  %s16847_s19 = smov 64  }
  0x14   :  { %44 = dma.hbm_to_vmem [thread:$0]  %s18043_s1, 8192, %s39_s26, [#allocation5], %s16846_s18, %s16846_s18, %s16847_s19  }
  0x15   :  { %s16848_s22 = smov [#allocation7]   ;;  %s16659_s27 = scalar_lea.hbm %s18046_s4, 49152 }
  0x16   :  { %s62_s23 = sshll.u32 %s16848_s22, 4  ;;  %p16660_p8 = scmp.ne.s32.totalorder %s18046_s4, %s16659_s27  ;;  %s63_s23 = int_to_ptr.vmem [resolvable:$true] %s62_s23 }
  0x17   :  { %p16663_p9 = scmp.lt.u32.totalorder %s16659_s27, %s18046_s4 }
  0x19   :  { %p16665_p10 = pnand %p16663_p9, %p16660_p8 }
  0x1b   :  { %16668 = shalt.err (!%p16665_p10)
}
  0x1c   :  { %s16669_s15 = scalar_lea.vmem %s63_s23, 49152  ;;  %p16674_p12 = scmp.lt.s32.totalorder %s63_s23, %s63_s23 }
  0x1d   :  { %p16670_p11 = scmp.ne.s32.totalorder %s63_s23, %s16669_s15  ;;  %p16675_p13 = scmp.lt.s32.totalorder %s16669_s15, %s16669_s15 }
  0x1f   :  { %p16676_p0 = por %p16675_p13, %p16674_p12 }
  0x21   :  { %p16677_p1 = pnand %p16676_p0, %p16670_p11 }
  0x23   :  { %16680 = shalt.err (!%p16677_p1)
}
  0x24   :  { %s16849_s1 = smov 256   ;;  %s16850_s26 = smov 16  }
  0x25   :  { %68 = dma.hbm_to_vmem [thread:$0]  %s18046_s4, 49152, %s63_s23, [#allocation8], %s16849_s1, %s16849_s1, %s16850_s26  }
  0x26   :  { %s16851_s18 = smov [#allocation10]   ;;  %s16852_s21 = smov [#allocation13]  }
  0x27   :  { %s86_s20 = sshll.u32 %s16851_s18, 4  ;;  %s110_s22 = sshll.u32 %s16852_s21, 4  ;;  %s87_s20 = int_to_ptr.vmem [resolvable:$true] %s86_s20  ;;  %s16957_s22 = int_to_ptr.vmem [resolvable:$true] %s110_s22 }
  0x28   :  { %s16681_s27 = scalar_lea.hbm %s18049_s7, 81920 }
  0x29   :  { %p16682_p2 = scmp.ne.s32.totalorder %s18049_s7, %s16681_s27  ;;  %p16685_p3 = scmp.lt.u32.totalorder %s16681_s27, %s18049_s7 }
  0x2b   :  { %p16687_p4 = pnand %p16685_p3, %p16682_p2 }
  0x2d   :  { %16690 = shalt.err (!%p16687_p4)
}
  0x2e   :  { %s16691_s4 = scalar_lea.vmem %s87_s20, 81920  ;;  %p16696_p6 = scmp.lt.s32.totalorder %s87_s20, %s87_s20 }
  0x2f   :  { %p16692_p5 = scmp.ne.s32.totalorder %s87_s20, %s16691_s4  ;;  %p16697_p7 = scmp.lt.s32.totalorder %s16691_s4, %s16691_s4 }
  0x31   :  { %p16698_p8 = por %p16697_p7, %p16696_p6 }
  0x33   :  { %p16699_p9 = pnand %p16698_p8, %p16692_p5 }
  0x35   :  { %16702 = shalt.err (!%p16699_p9)
}
  0x36   :  { %92 = dma.hbm_to_vmem [thread:$0]  %s18049_s7, 81920, %s87_s20, [#allocation11], %s16849_s1, %s16849_s1, %s16850_s26  }
  0x37   :  { %s16703_s18 = scalar_lea.hbm %s18052_s10, 20480 }
  0x38   :  { %p16704_p10 = scmp.ne.s32.totalorder %s18052_s10, %s16703_s18  ;;  %p16707_p11 = scmp.lt.u32.totalorder %s16703_s18, %s18052_s10 }
  0x3a   :  { %p16709_p12 = pnand %p16707_p11, %p16704_p10 }
  0x3c   :  { %16712 = shalt.err (!%p16709_p12)
}
  0x3d   :  { %s16713_s28 = scalar_lea.vmem %s16957_s22, 20480  ;;  %p16718_p0 = scmp.lt.s32.totalorder %s16957_s22, %s16957_s22 }
  0x3e   :  { %p16714_p13 = scmp.ne.s32.totalorder %s16957_s22, %s16713_s28  ;;  %p16719_p1 = scmp.lt.s32.totalorder %s16713_s28, %s16713_s28 }
  0x40   :  { %p16720_p2 = por %p16719_p1, %p16718_p0 }
  0x42   :  { %p16721_p3 = pnand %p16720_p2, %p16714_p13 }
  0x44   :  { %16724 = shalt.err (!%p16721_p3)
}
  0x45   :  { %s16853_s7 = smov 4   ;;  %s16854_s20 = smov [#allocation2]  }
  0x46   :  { %116 = dma.hbm_to_vmem [thread:$0]  %s18052_s10, 20480, %s16957_s22, [#allocation14], %s16847_s19, %s16847_s19, %s16853_s7  }
  0x47   :  { %s29_s29 = sshll.u32 %s16854_s20, 4  ;;  %s16855_s30 = smov [#allocation6]   ;;  %s30_s29 = int_to_ptr.vmem [resolvable:$true] %s29_s29 }
  0x48   :  { %s51_s14 = sshll.u32 %s16855_s30, 4  ;;  %s16725_s15 = scalar_lea.hbm %s18042_s0, 32  ;;  %s52_s14 = int_to_ptr.vmem [resolvable:$true] %s51_s14 }
  0x49   :  { %p16726_p4 = scmp.ne.s32.totalorder %s18042_s0, %s16725_s15  ;;  %p16729_p5 = scmp.lt.u32.totalorder %s16725_s15, %s18042_s0 }
  0x4b   :  { %p16731_p6 = pnand %p16729_p5, %p16726_p4 }
  0x4d   :  { %16734 = shalt.err (!%p16731_p6)
}
  0x4e   :  { %s16735_s10 = scalar_lea.vmem %s30_s29, 32  ;;  %p16740_p8 = scmp.lt.s32.totalorder %s30_s29, %s30_s29 }
  0x4f   :  { %p16736_p7 = scmp.ne.s32.totalorder %s30_s29, %s16735_s10  ;;  %p16741_p9 = scmp.lt.s32.totalorder %s16735_s10, %s16735_s10 }
  0x51   :  { %p16742_p10 = por %p16741_p9, %p16740_p8 }
  0x53   :  { %p16743_p11 = pnand %p16742_p10, %p16736_p7 }
  0x55   :  { %16746 = shalt.err (!%p16743_p11)
}
  0x56   :  { %32 = dma.hbm_to_vmem [thread:$0]  %s18042_s0, 32, %s30_s29, [#allocation3]  }
  0x57   :  { %s16747_s27 = scalar_lea.hbm %s18044_s2, 256 }
  0x58   :  { %p16748_p12 = scmp.ne.s32.totalorder %s18044_s2, %s16747_s27  ;;  %p16751_p13 = scmp.lt.u32.totalorder %s16747_s27, %s18044_s2 }
  0x5a   :  { %p16753_p0 = pnand %p16751_p13, %p16748_p12 }
  0x5c   :  { %16756 = shalt.err (!%p16753_p0)
}
  0x5d   :  { %s16757_s20 = scalar_lea.vmem %s52_s14, 256  ;;  %p16762_p2 = scmp.lt.s32.totalorder %s52_s14, %s52_s14 }
  0x5e   :  { %p16758_p1 = scmp.ne.s32.totalorder %s52_s14, %s16757_s20  ;;  %p16763_p3 = scmp.lt.s32.totalorder %s16757_s20, %s16757_s20 }
  0x60   :  { %p16764_p4 = por %p16763_p3, %p16762_p2 }
  0x62   :  { %p16765_p5 = pnand %p16764_p4, %p16758_p1 }
  0x64   :  { %16768 = shalt.err (!%p16765_p5)
}
  0x65   :  { %54 = dma.hbm_to_vmem [thread:$0]  %s18044_s2, 256, %s52_s14, [#allocation5]  }
  0x66   :  { %s16856_s30 = smov [#allocation9]   ;;  %s16857_s23 = smov [#allocation12]  }
  0x67   :  { %s75_s4 = sshll.u32 %s16856_s30, 4  ;;  %s99_s15 = sshll.u32 %s16857_s23, 4  ;;  %s76_s4 = int_to_ptr.vmem [resolvable:$true] %s75_s4  ;;  %s100_s15 = int_to_ptr.vmem [resolvable:$true] %s99_s15 }
  0x68   :  { %s16769_s18 = scalar_lea.hbm %s18047_s5, 64 }
  0x69   :  { %p16770_p6 = scmp.ne.s32.totalorder %s18047_s5, %s16769_s18  ;;  %p16773_p7 = scmp.lt.u32.totalorder %s16769_s18, %s18047_s5 }
  0x6b   :  { %p16775_p8 = pnand %p16773_p7, %p16770_p6 }
  0x6d   :  { %16778 = shalt.err (!%p16775_p8)
}
  0x6e   :  { %s16779_s2 = scalar_lea.vmem %s76_s4, 64  ;;  %p16784_p10 = scmp.lt.s32.totalorder %s76_s4, %s76_s4 }
  0x6f   :  { %p16780_p9 = scmp.ne.s32.totalorder %s76_s4, %s16779_s2  ;;  %p16785_p11 = scmp.lt.s32.totalorder %s16779_s2, %s16779_s2 }
  0x71   :  { %p16786_p12 = por %p16785_p11, %p16784_p10 }
  0x73   :  { %p16787_p13 = pnand %p16786_p12, %p16780_p9 }
  0x75   :  { %16790 = shalt.err (!%p16787_p13)
}
  0x76   :  { %78 = dma.hbm_to_vmem [thread:$0]  %s18047_s5, 64, %s76_s4, [#allocation8]  }
  0x77   :  { %s16791_s28 = scalar_lea.hbm %s18050_s8, 64 }
  0x78   :  { %p16792_p0 = scmp.ne.s32.totalorder %s18050_s8, %s16791_s28  ;;  %p16795_p1 = scmp.lt.u32.totalorder %s16791_s28, %s18050_s8 }
  0x7a   :  { %p16797_p2 = pnand %p16795_p1, %p16792_p0 }
  0x7c   :  { %16800 = shalt.err (!%p16797_p2)
}
  0x7d   :  { %s16801_s0 = scalar_lea.vmem %s100_s15, 64  ;;  %p16806_p4 = scmp.lt.s32.totalorder %s100_s15, %s100_s15 }
  0x7e   :  { %p16802_p3 = scmp.ne.s32.totalorder %s100_s15, %s16801_s0  ;;  %p16807_p5 = scmp.lt.s32.totalorder %s16801_s0, %s16801_s0 }
  0x80   :  { %p16808_p6 = por %p16807_p5, %p16806_p4 }
  0x82   :  { %p16809_p7 = pnand %p16808_p6, %p16802_p3 }
  0x84   :  { %16812 = shalt.err (!%p16809_p7)
}
  0x85   :  { %102 = dma.hbm_to_vmem [thread:$0]  %s18050_s8, 64, %s100_s15, [#allocation11]  }
  0x86   :  { %s16858_s30 = smov [#allocation15]   ;;  %s16813_s17 = scalar_lea.hbm %s18053_s11, 16 }
  0x87   :  { %s123_s4 = sshll.u32 %s16858_s30, 4  ;;  %p16814_p8 = scmp.ne.s32.totalorder %s18053_s11, %s16813_s17  ;;  %s124_s4 = int_to_ptr.vmem [resolvable:$true] %s123_s4 }
  0x88   :  { %p16817_p9 = scmp.lt.u32.totalorder %s16813_s17, %s18053_s11 }
  0x8a   :  { %p16819_p10 = pnand %p16817_p9, %p16814_p8 }
  0x8c   :  { %16822 = shalt.err (!%p16819_p10)
}
  0x8d   :  { %s16823_s22 = scalar_lea.vmem %s124_s4, 16  ;;  %s16827_s8 = scalar_lea.vmem %s124_s4, 32 }
  0x8e   :  { %p16824_p11 = scmp.ne.s32.totalorder %s124_s4, %s16823_s22  ;;  %p16828_p12 = scmp.lt.s32.totalorder %s124_s4, %s124_s4 }
  0x8f   :  { %p16829_p13 = scmp.lt.s32.totalorder %s16827_s8, %s16823_s22 }
  0x91   :  { %p16830_p0 = por %p16829_p13, %p16828_p12 }
  0x93   :  { %p16831_p1 = pnand %p16830_p0, %p16824_p11 }
  0x95   :  { %16834 = shalt.err (!%p16831_p1)
}
  0x96   :  { %126 = dma.hbm_to_vmem [thread:$0]  %s18053_s11, 16, %s124_s4, [#allocation14]  }
  0x97   :  { %16835 = dma.done.wait [#allocation3], 32  }
  0x98   :  { %16836 = vsyncadd [#allocation3], 4294967264 }
  0x99   :  { %16837 = dma.done.wait [#allocation5], 8448  }
  0x9a   :  { %16838 = vsyncadd [#allocation5], 4294958848 }
  0x9b   :  { %16839 = dma.done.wait [#allocation8], 49216  }
  0x9c   :  { %16840 = vsyncadd [#allocation8], 4294918080 }
  0x9d   :  { %16841 = dma.done.wait [#allocation11], 81984  }
  0x9e   :  { %16842 = vsyncadd [#allocation11], 4294885312 }
  0x9f   :  { %16843 = dma.done.wait [#allocation14], 20496  }
  0xa0   :  { %16844 = vsyncadd [#allocation14], 4294946800  ;;  %v16859_v0 = vmov 0   ;;  %v161_v1 = vld [vmem:[#allocation4 + $0x10] sm:$0xff]  ;;  %v159_v3 = vld [vmem:[#allocation4] sm:$0xff]  ;;  %vm627_vm0 = vcmask 523264  }
  0xa1   :  { %745 = vmatprep.mubr.bf16.mxu0 %v16859_v0  ;;  %663 = vmatprep.mubr.bf16.mxu1 %v16859_v0  ;;  %v169_v2 = vld [vmem:[#allocation4 + $0x50] sm:$0xff]  ;;  %v167_v5 = vld [vmem:[#allocation4 + $0x40] sm:$0xff]  ;;  %v160_v33 = vld [vmem:[#allocation4 + $0x8] sm:$0xff]  ;;  %vm987_vm1 = vcmask 1041408   ;;  %vm980_vm2 = vcmask 15360   ;;  %vm16861_vm3 = vmmov 1  }
  0xa2   :  { %v12878_v4 = vcombine.high %v161_v1, %v169_v2  ;;  %v12877_v6 = vcombine.low %v161_v1, %v169_v2  ;;  %v177_v7 = vld [vmem:[#allocation4 + $0x90] sm:$0xff]  ;;  %v12874_v9 = vcombine.high %v159_v3, %v167_v5  ;;  %v12873_v10 = vcombine.low %v159_v3, %v167_v5  ;;  %v175_v12 = vld [vmem:[#allocation4 + $0x80] sm:$0xff]  ;;  %v168_v34 = vld [vmem:[#allocation4 + $0x48] sm:$0xff] }
  0xa3   :  { %v185_v8 = vld [vmem:[#allocation4 + $0xd0] sm:$0xff]  ;;  %v183_v13 = vld [vmem:[#allocation4 + $0xc0] sm:$0xff]  ;;  %v157_v36 = vld [vmem:[#allocation2] sm:$0x3]  ;;  %v12876_v39 = vcombine.high %v160_v33, %v168_v34  ;;  %v12875_v46 = vcombine.low %v160_v33, %v168_v34  ;;  %vm4615_vm5 = vcmask 80896   ;;  %vm6305_vm7 = vcmask 1046528  }
  0xa4   :  { %v12894_v11 = vcombine.high %v177_v7, %v185_v8  ;;  %v193_v14 = vld [vmem:[#allocation4 + $0x110] sm:$0xff]  ;;  %713 = vmatprep.subr.bf16.mxu0 %v12878_v4  ;;  %v12890_v15 = vcombine.high %v175_v12, %v183_v13  ;;  %v191_v17 = vld [vmem:[#allocation4 + $0x100] sm:$0xff]  ;;  %631 = vmatprep.subr.bf16.mxu1 %v12874_v9  ;;  %v12893_v19 = vcombine.low %v177_v7, %v185_v8  ;;  %v176_v43 = vld [vmem:[#allocation4 + $0x88] sm:$0xff]  ;;  %vm5384_vm6 = vsmask.f32 7424 }
  0xa5   :  { %v201_v16 = vld [vmem:[#allocation4 + $0x150] sm:$0xff]  ;;  %v199_v18 = vld [vmem:[#allocation4 + $0x140] sm:$0xff]  ;;  %714 = vmatpush1.bf16.msra.mxu0 %v12877_v6  ;;  %632 = vmatpush1.bf16.msra.mxu1 %v12873_v10  ;;  %v12889_v20 = vcombine.low %v175_v12, %v183_v13  ;;  %v17052_v42 = vpack.c.bf16 %v157_v36, %v157_v36  ;;  %v184_v44 = vld [vmem:[#allocation4 + $0xc8] sm:$0xff]  ;;  %vm10053_vm8 = vcmask 146432   ;;  %vm12591_vm9 = vcmask 277504  }
  0xa6   :  { %715 = vmatprep.subr.bf16.mxu0 %v12894_v11  ;;  %v12910_v21 = vcombine.high %v193_v14, %v201_v16  ;;  %633 = vmatprep.subr.bf16.mxu1 %v12890_v15  ;;  %v12906_v22 = vcombine.high %v191_v17, %v199_v18  ;;  %v209_v23 = vld [vmem:[#allocation4 + $0x190] sm:$0xff]  ;;  %v207_v25 = vld [vmem:[#allocation4 + $0x180] sm:$0xff]  ;;  %v12909_v27 = vcombine.low %v193_v14, %v201_v16  ;;  %v192_v51 = vld [vmem:[#allocation4 + $0x108] sm:$0xff] }
  0xa7   :  { %v217_v24 = vld [vmem:[#allocation4 + $0x1d0] sm:$0xff]  ;;  %v215_v26 = vld [vmem:[#allocation4 + $0x1c0] sm:$0xff]  ;;  %v12905_v28 = vcombine.low %v191_v17, %v199_v18  ;;  %v12892_v48 = vcombine.high %v176_v43, %v184_v44  ;;  %v200_v52 = vld [vmem:[#allocation4 + $0x148] sm:$0xff]  ;;  %v12891_v55 = vcombine.low %v176_v43, %v184_v44 }
  0xa8   :  { %v12926_v29 = vcombine.high %v209_v23, %v217_v24  ;;  %v12922_v30 = vcombine.high %v207_v25, %v215_v26  ;;  %v163_v31 = vld [vmem:[#allocation4 + $0x20] sm:$0xff]  ;;  %v12925_v35 = vcombine.low %v209_v23, %v217_v24  ;;  %v12921_v37 = vcombine.low %v207_v25, %v215_v26  ;;  %v208_v58 = vld [vmem:[#allocation4 + $0x188] sm:$0xff]  ;;  %v165_v62 = vld [vmem:[#allocation4 + $0x30] sm:$0xff] }
  0xa9   :  { %716 = vmatpush1.bf16.msra.mxu0 %v12893_v19  ;;  %634 = vmatpush1.bf16.msra.mxu1 %v12889_v20  ;;  %v171_v32 = vld [vmem:[#allocation4 + $0x60] sm:$0xff]  ;;  %v216_v59 = vld [vmem:[#allocation4 + $0x1c8] sm:$0xff]  ;;  %v12908_v60 = vcombine.high %v192_v51, %v200_v52  ;;  %v173_v63 = vld [vmem:[#allocation4 + $0x70] sm:$0xff]  ;;  %v12907_v1 = vcombine.low %v192_v51, %v200_v52 }
  0xaa   :  { %717 = vmatprep.subr.bf16.mxu0 %v12910_v21  ;;  %635 = vmatprep.subr.bf16.mxu1 %v12906_v22  ;;  %v12882_v38 = vcombine.high %v163_v31, %v171_v32  ;;  %v179_v40 = vld [vmem:[#allocation4 + $0xa0] sm:$0xff]  ;;  %v12881_v45 = vcombine.low %v163_v31, %v171_v32  ;;  %v162_v3 = vld [vmem:[#allocation4 + $0x18] sm:$0xff]  ;;  %v12924_v5 = vcombine.high %v208_v58, %v216_v59  ;;  %v181_v7 = vld [vmem:[#allocation4 + $0xb0] sm:$0xff] }
  0xab   :  { %v187_v41 = vld [vmem:[#allocation4 + $0xe0] sm:$0xff]  ;;  %v170_v4 = vld [vmem:[#allocation4 + $0x58] sm:$0xff]  ;;  %v189_v8 = vld [vmem:[#allocation4 + $0xf0] sm:$0xff]  ;;  %v12923_v9 = vcombine.low %v208_v58, %v216_v59  ;;  %v12886_v10 = vcombine.high %v165_v62, %v173_v63  ;;  %v12885_v14 = vcombine.low %v165_v62, %v173_v63 }
  0xac   :  { %v12898_v47 = vcombine.high %v179_v40, %v187_v41  ;;  %v195_v49 = vld [vmem:[#allocation4 + $0x120] sm:$0xff]  ;;  %v12897_v53 = vcombine.low %v179_v40, %v187_v41  ;;  %v178_v11 = vld [vmem:[#allocation4 + $0x98] sm:$0xff]  ;;  %v12880_v13 = vcombine.high %v162_v3, %v170_v4  ;;  %v197_v15 = vld [vmem:[#allocation4 + $0x130] sm:$0xff]  ;;  %v12879_v17 = vcombine.low %v162_v3, %v170_v4 }
  0xad   :  { %718 = vmatpush1.bf16.msra.mxu0 %v12909_v27  ;;  %636 = vmatpush1.bf16.msra.mxu1 %v12905_v28  ;;  %v203_v50 = vld [vmem:[#allocation4 + $0x160] sm:$0xff]  ;;  %v186_v12 = vld [vmem:[#allocation4 + $0xd8] sm:$0xff]  ;;  %v205_v16 = vld [vmem:[#allocation4 + $0x170] sm:$0xff]  ;;  %v12902_v18 = vcombine.high %v181_v7, %v189_v8  ;;  %v12901_v22 = vcombine.low %v181_v7, %v189_v8  ;;  %v227_v7 = vlaneseq }
  0xae   :  { %719 = vmatprep.subr.bf16.mxu0 %v12926_v29  ;;  %637 = vmatprep.subr.bf16.mxu1 %v12922_v30  ;;  %v211_v54 = vld [vmem:[#allocation4 + $0x1a0] sm:$0xff]  ;;  %v12914_v56 = vcombine.high %v195_v49, %v203_v50  ;;  %v12913_v61 = vcombine.low %v195_v49, %v203_v50  ;;  %v194_v19 = vld [vmem:[#allocation4 + $0x118] sm:$0xff]  ;;  %v12896_v21 = vcombine.high %v178_v11, %v186_v12  ;;  %v213_v23 = vld [vmem:[#allocation4 + $0x1b0] sm:$0xff] }
  0xaf   :  { %v219_v57 = vld [vmem:[#allocation4 + $0x1e0] sm:$0xff]  ;;  %v202_v20 = vld [vmem:[#allocation4 + $0x158] sm:$0xff]  ;;  %v221_v24 = vld [vmem:[#allocation4 + $0x1f0] sm:$0xff]  ;;  %v12895_v25 = vcombine.low %v178_v11, %v186_v12  ;;  %v12918_v26 = vcombine.high %v197_v15, %v205_v16  ;;  %v12917_v30 = vcombine.low %v197_v15, %v205_v16 }
  0xb0   :  { %v12930_v2 = vcombine.high %v211_v54, %v219_v57  ;;  %v12929_v6 = vcombine.low %v211_v54, %v219_v57  ;;  %v210_v27 = vld [vmem:[#allocation4 + $0x198] sm:$0xff]  ;;  %v12912_v29 = vcombine.high %v194_v19, %v202_v20  ;;  %v12911_v31 = vcombine.low %v194_v19, %v202_v20  ;;  %v164_v33 = vld [vmem:[#allocation4 + $0x28] sm:$0xff]  ;;  %v17080_v8 = vld [vmem:[#allocation6] sm:$0xff] }
  0xb1   :  { %720 = vmatpush1.bf16.msra.mxu0 %v12925_v35  ;;  %638 = vmatpush1.bf16.msra.mxu1 %v12921_v37  ;;  %v218_v28 = vld [vmem:[#allocation4 + $0x1d8] sm:$0xff]  ;;  %v12934_v32 = vcombine.high %v213_v23, %v221_v24  ;;  %v172_v34 = vld [vmem:[#allocation4 + $0x68] sm:$0xff]  ;;  %v12933_v36 = vcombine.low %v213_v23, %v221_v24  ;;  %vm17309_vm4 = vmpackc.low %vm987_vm1, %vm16861_vm3 }
  0xb2   :  { %795 = vmatprep.subr.bf16.mxu0 %v12882_v38  ;;  %672 = vmatprep.subr.bf16.mxu1 %v12876_v39  ;;  %v12928_v35 = vcombine.high %v210_v27, %v218_v28  ;;  %v12927_v37 = vcombine.low %v210_v27, %v218_v28  ;;  %v180_v38 = vld [vmem:[#allocation4 + $0xa8] sm:$0xff]  ;;  %v12884_v40 = vcombine.high %v164_v33, %v172_v34  ;;  %v166_v51 = vld [vmem:[#allocation4 + $0x38] sm:$0xff] }
  0xb3   :  { %v188_v39 = vld [vmem:[#allocation4 + $0xe8] sm:$0xff]  ;;  %v12883_v41 = vcombine.low %v164_v33, %v172_v34  ;;  %v174_v52 = vld [vmem:[#allocation4 + $0x78] sm:$0xff] }
  0xb4   :  { %12939 = vmatmul.mubr.msk.bf16.vlgmr.msra.gmra.mrb[0].mxu0 %vm627_vm0, %v17052_v42  ;;  %12937 = vmatmul.mubr.msk.bf16.vlgmr.msra.gmra.mrb[0].mxu1 %vm627_vm0, %v17052_v42  ;;  %v196_v43 = vld [vmem:[#allocation4 + $0x128] sm:$0xff]  ;;  %v12888_v57 = vcombine.high %v166_v51, %v174_v52  ;;  %v12887_v58 = vcombine.low %v166_v51, %v174_v52  ;;  %v198_v59 = vld [vmem:[#allocation4 + $0x138] sm:$0xff] }
  0xb5   :  { %796 = vmatpush1.bf16.msra.mxu0 %v12881_v45  ;;  %673 = vmatpush1.bf16.msra.mxu1 %v12875_v46  ;;  %v204_v44 = vld [vmem:[#allocation4 + $0x168] sm:$0xff]  ;;  %v12900_v45 = vcombine.high %v180_v38, %v188_v39  ;;  %v12899_v46 = vcombine.low %v180_v38, %v188_v39  ;;  %v214_v63 = vld [vmem:[#allocation4 + $0x1b8] sm:$0xff] }
  0xb6   :  { %797 = vmatprep.subr.bf16.mxu0 %v12898_v47  ;;  %674 = vmatprep.subr.bf16.mxu1 %v12892_v48  ;;  %v212_v47 = vld [vmem:[#allocation4 + $0x1a8] sm:$0xff]  ;;  %v12916_v49 = vcombine.high %v196_v43, %v204_v44  ;;  %v12915_v50 = vcombine.low %v196_v43, %v204_v44  ;;  %v17110_v33 = vld [vmem:[%s18045_s3 + $0x18] sm:$0xf] }
  0xb7   :  { %827 = vmatprep.mubr.bf16.mxu0 %v16859_v0  ;;  %704 = vmatprep.mubr.bf16.mxu1 %v16859_v0  ;;  %v220_v48 = vld [vmem:[#allocation4 + $0x1e8] sm:$0xff] }
  0xb8   :  { %v12931_v54 = vcombine.low %v212_v47, %v220_v48  ;;  %v17103_v28 = vld [vmem:[%s18045_s3 + $0x10] sm:$0xff]  ;;  %v17134_v38 = vld [vmem:[%s18045_s3 + $0x8] sm:$0xf] }
  0xb9   :  { %798 = vmatpush1.bf16.msra.mxu0 %v12897_v53  ;;  %675 = vmatpush1.bf16.msra.mxu1 %v12891_v55  ;;  %v12932_v53 = vcombine.high %v212_v47, %v220_v48  ;;  %v182_v55 = vld [vmem:[#allocation4 + $0xb8] sm:$0xff]  ;;  %v17114_v34 = vld [vmem:[#allocation6 + $0x8] sm:$0xff] }
  0xba   :  { %799 = vmatprep.subr.bf16.mxu0 %v12914_v56  ;;  %676 = vmatprep.subr.bf16.mxu1 %v12908_v60  ;;  %v190_v56 = vld [vmem:[#allocation4 + $0xf8] sm:$0xff] }
  0xbb   :  { %v206_v60 = vld [vmem:[#allocation4 + $0x178] sm:$0xff]  ;;  %v12903_v62 = vcombine.low %v182_v55, %v190_v56 }
  0xbc   :  { %v12919_v3 = vcombine.low %v198_v59, %v206_v60 }
  0xbd   :  { %800 = vmatpush1.bf16.msra.mxu0 %v12913_v61  ;;  %677 = vmatpush1.bf16.msra.mxu1 %v12907_v1  ;;  %v12904_v61 = vcombine.high %v182_v55, %v190_v56  ;;  %v222_v1 = vld [vmem:[#allocation4 + $0x1f8] sm:$0xff] }
  0xbe   :  { %801 = vmatprep.subr.bf16.mxu0 %v12930_v2  ;;  %678 = vmatprep.subr.bf16.mxu1 %v12924_v5  ;;  %v12920_v2 = vcombine.high %v198_v59, %v206_v60  ;;  %v12936_v4 = vcombine.high %v214_v63, %v222_v1  ;;  %v12935_v5 = vcombine.low %v214_v63, %v222_v1 }
  0xc1   :  { %802 = vmatpush1.bf16.msra.mxu0 %v12929_v6  ;;  %679 = vmatpush1.bf16.msra.mxu1 %v12923_v9  ;;  %v16860_v6 = vmov 0.0  }
  0xc2   :  { %877 = vmatprep.subr.bf16.mxu0 %v12886_v10  ;;  %754 = vmatprep.subr.bf16.mxu1 %v12880_v13 }
  0xc4   :  { %12941 = vmatmul.mubr.msk.bf16.vlgmr.msra.gmra.mrb[4].mxu0 %vm627_vm0, %v17052_v42  ;;  %12938 = vmatmul.mubr.msk.bf16.vlgmr.msra.gmra.mrb[4].mxu1 %vm627_vm0, %v17052_v42 }
  0xc5   :  { %878 = vmatpush1.bf16.msra.mxu0 %v12885_v14  ;;  %755 = vmatpush1.bf16.msra.mxu1 %v12879_v17 }
  0xc6   :  { %879 = vmatprep.subr.bf16.mxu0 %v12902_v18  ;;  %756 = vmatprep.subr.bf16.mxu1 %v12896_v21 }
  0xc7   :  { %909 = vmatprep.mubr.bf16.mxu0 %v16859_v0  ;;  %786 = vmatprep.mubr.bf16.mxu1 %v16859_v0 }
  0xc9   :  { %880 = vmatpush1.bf16.msra.mxu0 %v12901_v22  ;;  %757 = vmatpush1.bf16.msra.mxu1 %v12895_v25 }
  0xca   :  { %881 = vmatprep.subr.bf16.mxu0 %v12918_v26  ;;  %758 = vmatprep.subr.bf16.mxu1 %v12912_v29 }
  0xcd   :  { %882 = vmatpush1.bf16.msra.mxu0 %v12917_v30  ;;  %759 = vmatpush1.bf16.msra.mxu1 %v12911_v31 }
  0xce   :  { %883 = vmatprep.subr.bf16.mxu0 %v12934_v32  ;;  %760 = vmatprep.subr.bf16.mxu1 %v12928_v35  ;;  %v17122_v35 = vld [vmem:[%s18045_s3] sm:$0xff] }
  0xd1   :  { %884 = vmatpush1.bf16.msra.mxu0 %v12933_v36  ;;  %761 = vmatpush1.bf16.msra.mxu1 %v12927_v37 }
  0xd2   :  { %836 = vmatprep.subr.bf16.mxu1 %v12884_v40 }
  0xd4   :  { %12943 = vmatmul.mubr.msk.bf16.vlgmr.msra.gmra.mrb[8].mxu0 %vm627_vm0, %v17052_v42  ;;  %12940 = vmatmul.mubr.msk.bf16.vlgmr.msra.gmra.mrb[8].mxu1 %vm627_vm0, %v17052_v42 }
  0xd5   :  { %837 = vmatpush1.bf16.msra.mxu1 %v12883_v41  ;;  %868 = vmatprep.mubr.bf16.mxu1 %v16859_v0 }
  0xd6   :  { %838 = vmatprep.subr.bf16.mxu1 %v12900_v45  ;;  %1064 = vmatprep.mubr.f32.mxu0 %v16860_v6 }
  0xd9   :  { %839 = vmatpush1.bf16.msra.mxu1 %v12899_v46 }
  0xda   :  { %840 = vmatprep.subr.bf16.mxu1 %v12916_v49  ;;  %v17142_v49 = vld [vmem:[%s18045_s3 + $0x20] sm:$0xff] }
  0xdd   :  { %841 = vmatpush1.bf16.msra.mxu1 %v12915_v50 }
  0xde   :  { %842 = vmatprep.subr.bf16.mxu1 %v12932_v53  ;;  %v17152_v53 = vld [vmem:[%s18045_s3 + $0x28] sm:$0xf] }
  0xe1   :  { %843 = vmatpush1.bf16.msra.mxu1 %v12931_v54 }
  0xe2   :  { %918 = vmatprep.subr.bf16.mxu1 %v12888_v57 }
  0xe4   :  { %12942 = vmatmul.mubr.msk.bf16.vlgmr.msra.gmra.mrb[12].mxu1 %vm627_vm0, %v17052_v42 }
  0xe5   :  { %919 = vmatpush1.bf16.msra.mxu1 %v12887_v58  ;;  %950 = vmatprep.mubr.bf16.mxu1 %v16859_v0  ;;  %v17078_v0 = vshrl.u32 %v227_v7, 7 }
  0xe6   :  { %920 = vmatprep.subr.bf16.mxu1 %v12904_v61 }
  0xe7   :  { %v245_v9 = vsub.s32 4, %v17078_v0  ;;  %v249_v10 = vsub.s32 5, %v17078_v0  ;;  %v17085_v11 = vsub.s32 0, %v17078_v0  ;;  %v17088_v12 = vsub.s32 1, %v17078_v0 }
  0xe8   :  { %v17158_v54 = vsub.s32 3, %v17078_v0  ;;  %v253_v55 = vsub.s32 6, %v17078_v0  ;;  %v17162_v56 = vsub.s32 2, %v17078_v0  ;;  %v257_v57 = vsub.s32 7, %v17078_v0  ;;  %v14951_v0 = vld [vmem:[#allocation7 + $0x904] ss:$16 sps:$4 sm:$0xff]  }
  0xe9   :  { %921 = vmatpush1.bf16.msra.mxu1 %v12903_v62  ;;  %v250_v13 = vrot.slane %v17080_v8, %v249_v10  ;;  %v230_v14 = vrot.slane %v17080_v8, %v17085_v11  ;;  %v234_v15 = vrot.slane %v17080_v8, %v17088_v12  ;;  %v262_v36 = vrot.slane %v17114_v34, %v17085_v11 }
  0xea   :  { %922 = vmatprep.subr.bf16.mxu1 %v12920_v2  ;;  %v266_v37 = vrot.slane %v17114_v34, %v17088_v12  ;;  %v278_v58 = vrot.slane %v17114_v34, %v245_v9  ;;  %v282_v59 = vrot.slane %v17114_v34, %v249_v10  ;;  %v242_v60 = vrot.slane %v17080_v8, %v17158_v54 }
  0xeb   :  { %v254_v61 = vrot.slane %v17080_v8, %v253_v55  ;;  %v238_v62 = vrot.slane %v17080_v8, %v17162_v56  ;;  %v258_v63 = vrot.slane %v17080_v8, %v257_v57 }
  0xed   :  { %923 = vmatpush1.bf16.msra.mxu1 %v12919_v3 }
  0xee   :  { %924 = vmatprep.subr.bf16.mxu1 %v12936_v4 }
  0xf1   :  { %925 = vmatpush1.bf16.msra.mxu1 %v12935_v5 }
  0xf4   :  { %12944 = vmatmul.mubr.msk.bf16.vlgmr.msra.gmra.mrb[16].mxu1 %vm627_vm0, %v17052_v42  ;;  %v246_v42 = vrot.slane %v17080_v8, %v245_v9 }
  0xf5   :  { %1141 = vmatprep.mubr.f32.mxu1 %v16860_v6 }
 0x187   :  { %v747_v16 = vpop.f32.mrb[0].mxu0  ;;  %v665_v19 = vpop.f32.mrb[0].mxu1 }
 0x188   :  { %v748_v17 = vadd.f32 %v747_v16, %v246_v42  ;;  %v749_v18 = vpop.f32.mrb[1].mxu0  ;;  %v666_v22 = vadd.f32 %v665_v19, %v230_v14  ;;  %v667_v23 = vpop.f32.mrb[1].mxu1 }
 0x189   :  { %v750_v20 = vadd.f32 %v749_v18, %v250_v13  ;;  %v751_v21 = vpop.f32.mrb[2].mxu0  ;;  %v668_v26 = vadd.f32 %v667_v23, %v234_v15  ;;  %v669_v27 = vpop.f32.mrb[2].mxu1  ;;  %v17187_v15 = vld [vmem:[%s18045_s3 + $0x30] sm:$0xff] }
 0x18a   :  { %v963_v24 = vmax.f32 %v748_v17, 0.0  ;;  %v752_v25 = vpop.f32.mrb[3].mxu0  ;;  %v670_v30 = vpop.f32.mrb[3].mxu1  ;;  %v959_v31 = vmax.f32 %v666_v22, 0.0  ;;  %v14903_v22 = vld [vmem:[#allocation7 + $0x804] ss:$16 sps:$4 sm:$0xff]  }
 0x18b   :  { %v964_v29 = vmax.f32 %v750_v20, 0.0  ;;  %v960_v32 = vmax.f32 %v668_v26, 0.0  ;;  %v17194_v25 = vld [vmem:[%s18045_s3 + $0x38] sm:$0xf]  ;;  %v14901_v26 = vld [vmem:[#allocation7 + $0x800] ss:$16 sps:$4 sm:$0xff]  }
 0x18c   :  { %v14909_v27 = vld [vmem:[#allocation7 + $0x824] ss:$16 sps:$4 sm:$0xff]  }
 0x18d   :  { %12947 = vmatprep.subr.msk.mxu0 %vm987_vm1, %v964_v29  ;;  %v14907_v29 = vld [vmem:[#allocation7 + $0x820] ss:$16 sps:$4 sm:$0xff]   ;;  %v14915_v30 = vld [vmem:[#allocation7 + $0x844] ss:$16 sps:$4 sm:$0xff]  }
 0x18e   :  { %12948 = vmatpush1.msk.msra.mxu0 %vm987_vm1, %v963_v24 }
 0x18f   :  { %12949 = vmatmul.mubr.msk.f32.vlgmr.msra.gmra.mrb[12].mxu0 %vm980_vm2, %v17103_v28  ;;  %12955 = vmatprep.subr.msk.mxu0 %vm987_vm1, %v960_v32  ;;  %v14913_v32 = vld [vmem:[#allocation7 + $0x840] ss:$16 sps:$4 sm:$0xff]  }
 0x190   :  { %1070 = vmatprep.mubr.f32.mxu0 %v16860_v6  ;;  %12956 = vmatpush1.msk.msra.mxu0 %vm987_vm1, %v959_v31  ;;  %v274_v31 = vrot.slane %v17114_v34, %v17158_v54 }
 0x193   :  { %12950 = vmatmul.mubr.msk.f32.gmra.mrb[14].mxu0 %vm980_vm2, %v17110_v33 }
 0x194   :  { %1236 = vmatprep.mubr.f32.mxu0 %v16860_v6 }
 0x197   :  { %v829_v39 = vpop.f32.mrb[4].mxu0  ;;  %12957 = vmatmul.mubr.msk.f32.vlgmr.msra.gmra.mrb[12].mxu0 %vm980_vm2, %v17122_v35  ;;  %v706_v43 = vpop.f32.mrb[4].mxu1 }
 0x198   :  { %v830_v40 = vadd.f32 %v829_v39, %v262_v36  ;;  %v831_v41 = vpop.f32.mrb[5].mxu0  ;;  %1242 = vmatprep.mubr.f32.mxu0 %v16860_v6  ;;  %v708_v46 = vpop.f32.mrb[5].mxu1  ;;  %v707_v14 = vadd.f32 %v706_v43, %v238_v62  ;;  %v14921_v36 = vld [vmem:[#allocation7 + $0x864] ss:$16 sps:$4 sm:$0xff]   ;;  %v14919_v43 = vld [vmem:[#allocation7 + $0x860] ss:$16 sps:$4 sm:$0xff]  }
 0x199   :  { %v832_v44 = vadd.f32 %v831_v41, %v266_v37  ;;  %v833_v45 = vpop.f32.mrb[6].mxu0  ;;  %v710_v50 = vpop.f32.mrb[6].mxu1  ;;  %v709_v9 = vadd.f32 %v708_v46, %v242_v60  ;;  %v14927_v46 = vld [vmem:[#allocation7 + $0x884] ss:$16 sps:$4 sm:$0xff]  }
 0x19a   :  { %v967_v47 = vmax.f32 %v830_v40, 0.0  ;;  %v834_v48 = vpop.f32.mrb[7].mxu0  ;;  %v711_v52 = vpop.f32.mrb[7].mxu1  ;;  %v961_v24 = vmax.f32 %v707_v14, 0.0  ;;  %v14931_v50 = vld [vmem:[#allocation7 + $0x8a0] ss:$16 sps:$4 sm:$0xff]  }
 0x19b   :  { %v968_v51 = vmax.f32 %v832_v44, 0.0  ;;  %12958 = vmatmul.mubr.msk.f32.gmra.mrb[14].mxu0 %vm980_vm2, %v17134_v38  ;;  %v962_v23 = vmax.f32 %v709_v9, 0.0  ;;  %v14933_v48 = vld [vmem:[#allocation7 + $0x8a4] ss:$16 sps:$4 sm:$0xff]   ;;  %v14937_v52 = vld [vmem:[#allocation7 + $0x8c0] ss:$16 sps:$4 sm:$0xff]  }
 0x19c   :  { %1411 = vmatprep.mubr.f32.mxu0 %v16860_v6  ;;  %v14957_v9 = vld [vmem:[#allocation7 + $0x924] ss:$16 sps:$4 sm:$0xff]  }
 0x19d   :  { %12965 = vmatprep.subr.msk.mxu0 %vm987_vm1, %v968_v51  ;;  %v14939_v51 = vld [vmem:[#allocation7 + $0x8c4] ss:$16 sps:$4 sm:$0xff]  }
 0x19e   :  { %12966 = vmatpush1.msk.msra.mxu0 %vm987_vm1, %v967_v47  ;;  %v14963_v14 = vld [vmem:[#allocation7 + $0x944] ss:$16 sps:$4 sm:$0xff]  }
 0x19f   :  { %12967 = vmatmul.mubr.msk.f32.vlgmr.msra.gmra.mrb[12].mxu0 %vm980_vm2, %v17142_v49 }
 0x1a0   :  { %1417 = vmatprep.mubr.f32.mxu0 %v16860_v6 }
 0x1a3   :  { %12968 = vmatmul.mubr.msk.f32.gmra.mrb[14].mxu0 %vm980_vm2, %v17152_v53 }
 0x1a4   :  { %1594 = vmatprep.mubr.f32.mxu0 %v16860_v6 }
 0x1a7   :  { %v911_v1 = vpop.f32.mrb[8].mxu0  ;;  %v788_v4 = vpop.f32.mrb[8].mxu1 }
 0x1a8   :  { %v912_v2 = vadd.f32 %v911_v1, %v278_v58  ;;  %v913_v3 = vpop.f32.mrb[9].mxu0  ;;  %v789_v10 = vadd.f32 %v788_v4, %v254_v61  ;;  %v790_v42 = vpop.f32.mrb[9].mxu1  ;;  %v14945_v58 = vld [vmem:[#allocation7 + $0x8e4] ss:$16 sps:$4 sm:$0xff]   ;;  %v14912_v4 = vld [vmem:[#allocation7 + $0x82c] ss:$16 sps:$4 sm:$0xff]  }
 0x1a9   :  { %v914_v5 = vadd.f32 %v913_v3, %v282_v59  ;;  %v915_v7 = vpop.f32.mrb[10].mxu0  ;;  %v791_v16 = vadd.f32 %v790_v42, %v258_v63  ;;  %v792_v17 = vpop.f32.mrb[10].mxu1  ;;  %v14906_v63 = vld [vmem:[#allocation7 + $0x80c] ss:$16 sps:$4 sm:$0xff]  }
 0x1aa   :  { %v916_v13 = vpop.f32.mrb[11].mxu0  ;;  %v965_v8 = vmax.f32 %v789_v10, 0.0  ;;  %v793_v19 = vpop.f32.mrb[11].mxu1  ;;  %v971_v20 = vmax.f32 %v912_v2, 0.0  ;;  %v14949_v7 = vld [vmem:[#allocation7 + $0x900] ss:$16 sps:$4 sm:$0xff]  }
 0x1ab   :  { %v972_v18 = vmax.f32 %v914_v5, 0.0  ;;  %v966_v21 = vmax.f32 %v791_v16, 0.0  ;;  %v14943_v5 = vld [vmem:[#allocation7 + $0x8e0] ss:$16 sps:$4 sm:$0xff]   ;;  %v14916_v10 = vld [vmem:[#allocation7 + $0x848] ss:$16 sps:$4 sm:$0xff]  }
 0x1ac   :  { %v14924_v42 = vld [vmem:[#allocation7 + $0x86c] ss:$16 sps:$4 sm:$0xff]   ;;  %v14955_v13 = vld [vmem:[#allocation7 + $0x920] ss:$16 sps:$4 sm:$0xff]  }
 0x1ad   :  { %12975 = vmatprep.subr.msk.mxu0 %vm987_vm1, %v972_v18  ;;  %12951 = vmatprep.subr.msk.mxu1 %vm987_vm1, %v966_v21  ;;  %v14930_v16 = vld [vmem:[#allocation7 + $0x88c] ss:$16 sps:$4 sm:$0xff]   ;;  %v14961_v17 = vld [vmem:[#allocation7 + $0x940] ss:$16 sps:$4 sm:$0xff]   ;;  %v14969_v18 = vld [vmem:[#allocation7 + $0x964] ss:$16 sps:$4 sm:$0xff]  }
 0x1ae   :  { %12976 = vmatpush1.msk.msra.mxu0 %vm987_vm1, %v971_v20  ;;  %12952 = vmatpush1.msk.msra.mxu1 %vm987_vm1, %v965_v8  ;;  %v14928_v8 = vld [vmem:[#allocation7 + $0x888] ss:$16 sps:$4 sm:$0xff]   ;;  %v14936_v19 = vld [vmem:[#allocation7 + $0x8ac] ss:$16 sps:$4 sm:$0xff]   ;;  %v14967_v20 = vld [vmem:[#allocation7 + $0x960] ss:$16 sps:$4 sm:$0xff]  }
 0x1af   :  { %12977 = vmatmul.mubr.msk.f32.vlgmr.msra.gmra.mrb[12].mxu0 %vm980_vm2, %v17187_v15  ;;  %12953 = vmatmul.mubr.msk.f32.vlgmr.msra.gmra.mrb[20].mxu1 %vm980_vm2, %v17103_v28  ;;  %v270_v28 = vrot.slane %v17114_v34, %v17162_v56  ;;  %v14975_v21 = vld [vmem:[#allocation7 + $0x984] ss:$16 sps:$4 sm:$0xff]  }
 0x1b0   :  { %1600 = vmatprep.mubr.f32.mxu0 %v16860_v6  ;;  %1147 = vmatprep.mubr.f32.mxu1 %v16860_v6 }
 0x1b1   :  { %12959 = vmatprep.subr.msk.mxu1 %vm987_vm1, %v962_v23  ;;  %2754 = vmatprep.subr.bf16.mxu0 %v14903_v22  ;;  %v14934_v22 = vld [vmem:[#allocation7 + $0x8a8] ss:$16 sps:$4 sm:$0xff]   ;;  %v14942_v23 = vld [vmem:[#allocation7 + $0x8cc] ss:$16 sps:$4 sm:$0xff]  }
 0x1b2   :  { %12960 = vmatpush1.msk.msra.mxu1 %vm987_vm1, %v961_v24  ;;  %2755 = vmatpush1.bf16.msra.mxu0 %v14901_v26  ;;  %v14973_v24 = vld [vmem:[#allocation7 + $0x980] ss:$16 sps:$4 sm:$0xff]   ;;  %v14948_v26 = vld [vmem:[#allocation7 + $0x8ec] ss:$16 sps:$4 sm:$0xff]  }
 0x1b3   :  { %12978 = vmatmul.mubr.msk.f32.gmra.mrb[14].mxu0 %vm980_vm2, %v17194_v25  ;;  %12954 = vmatmul.mubr.msk.f32.gmra.mrb[22].mxu1 %vm980_vm2, %v17110_v33 }
 0x1b4   :  { %1313 = vmatprep.mubr.f32.mxu1 %v16860_v6  ;;  %2756 = vmatprep.subr.bf16.mxu0 %v14909_v27  ;;  %v14946_v27 = vld [vmem:[#allocation7 + $0x8e8] ss:$16 sps:$4 sm:$0xff]  }
 0x1b6   :  { %2757 = vmatpush1.bf16.msra.mxu0 %v14907_v29  ;;  %v14954_v29 = vld [vmem:[#allocation7 + $0x90c] ss:$16 sps:$4 sm:$0xff]  }
 0x1b7   :  { %v870_v37 = vpop.f32.mrb[12].mxu1  ;;  %12961 = vmatmul.mubr.msk.f32.vlgmr.msra.gmra.mrb[20].mxu1 %vm980_vm2, %v17122_v35  ;;  %2758 = vmatprep.subr.bf16.mxu0 %v14915_v30  ;;  %v14925_v35 = vld [vmem:[#allocation7 + $0x880] ss:$16 sps:$4 sm:$0xff]   ;;  %v14952_v30 = vld [vmem:[#allocation7 + $0x908] ss:$16 sps:$4 sm:$0xff]  }
 0x1b8   :  { %v871_v39 = vadd.f32 %v870_v37, %v270_v28  ;;  %v872_v40 = vpop.f32.mrb[13].mxu1  ;;  %1319 = vmatprep.mubr.f32.mxu1 %v16860_v6  ;;  %v14960_v28 = vld [vmem:[#allocation7 + $0x92c] ss:$16 sps:$4 sm:$0xff]  }
 0x1b9   :  { %v873_v33 = vadd.f32 %v872_v40, %v274_v31  ;;  %v874_v41 = vpop.f32.mrb[14].mxu1  ;;  %v14958_v31 = vld [vmem:[#allocation7 + $0x928] ss:$16 sps:$4 sm:$0xff]   ;;  %v14972_v37 = vld [vmem:[#allocation7 + $0x96c] ss:$16 sps:$4 sm:$0xff]  }
 0x1ba   :  { %v969_v44 = vmax.f32 %v871_v39, 0.0  ;;  %v875_v45 = vpop.f32.mrb[15].mxu1  ;;  %2759 = vmatpush1.bf16.msra.mxu0 %v14913_v32  ;;  %v14966_v32 = vld [vmem:[#allocation7 + $0x94c] ss:$16 sps:$4 sm:$0xff]   ;;  %v14970_v39 = vld [vmem:[#allocation7 + $0x968] ss:$16 sps:$4 sm:$0xff]  }
 0x1bb   :  { %v970_v47 = vmax.f32 %v873_v33, 0.0  ;;  %12962 = vmatmul.mubr.msk.f32.gmra.mrb[22].mxu1 %vm980_vm2, %v17134_v38  ;;  %2760 = vmatprep.subr.bf16.mxu0 %v14921_v36  ;;  %v286_v38 = vrot.slane %v17114_v34, %v253_v55  ;;  %v14904_v55 = vld [vmem:[#allocation7 + $0x808] ss:$16 sps:$4 sm:$0xff]   ;;  %v14978_v40 = vld [vmem:[#allocation7 + $0x98c] ss:$16 sps:$4 sm:$0xff]  }
 0x1bc   :  { %1488 = vmatprep.mubr.f32.mxu1 %v16860_v6  ;;  %v14964_v36 = vld [vmem:[#allocation7 + $0x948] ss:$16 sps:$4 sm:$0xff]   ;;  %v14981_v41 = vld [vmem:[#allocation7 + $0x9a4] ss:$16 sps:$4 sm:$0xff]  }
 0x1bd   :  { %12969 = vmatprep.subr.msk.mxu1 %vm987_vm1, %v970_v47  ;;  %v14976_v33 = vld [vmem:[#allocation7 + $0x988] ss:$16 sps:$4 sm:$0xff]   ;;  %v14990_v47 = vld [vmem:[#allocation7 + $0x9cc] ss:$16 sps:$4 sm:$0xff]  }
 0x1be   :  { %12970 = vmatpush1.msk.msra.mxu1 %vm987_vm1, %v969_v44  ;;  %2761 = vmatpush1.bf16.msra.mxu0 %v14919_v43  ;;  %v14984_v43 = vld [vmem:[#allocation7 + $0x9ac] ss:$16 sps:$4 sm:$0xff]   ;;  %v14979_v44 = vld [vmem:[#allocation7 + $0x9a0] ss:$16 sps:$4 sm:$0xff]   ;;  %v14982_v45 = vld [vmem:[#allocation7 + $0x9a8] ss:$16 sps:$4 sm:$0xff]  }
 0x1bf   :  { %12971 = vmatmul.mubr.msk.f32.vlgmr.msra.gmra.mrb[20].mxu1 %vm980_vm2, %v17142_v49  ;;  %2762 = vmatprep.subr.bf16.mxu0 %v14927_v46  ;;  %v290_v49 = vrot.slane %v17114_v34, %v257_v57  ;;  %v14910_v34 = vld [vmem:[#allocation7 + $0x828] ss:$16 sps:$4 sm:$0xff]   ;;  %v14918_v57 = vld [vmem:[#allocation7 + $0x84c] ss:$16 sps:$4 sm:$0xff]   ;;  %v14987_v46 = vld [vmem:[#allocation7 + $0x9c4] ss:$16 sps:$4 sm:$0xff]  }
 0x1c0   :  { %1494 = vmatprep.mubr.f32.mxu1 %v16860_v6 }
 0x1c2   :  { %2763 = vmatpush1.bf16.msra.mxu0 %v14925_v35  ;;  %v14985_v35 = vld [vmem:[#allocation7 + $0x9c0] ss:$16 sps:$4 sm:$0xff]  }
 0x1c3   :  { %12972 = vmatmul.mubr.msk.f32.gmra.mrb[22].mxu1 %vm980_vm2, %v17152_v53  ;;  %2764 = vmatprep.subr.bf16.mxu0 %v14933_v48  ;;  %v14988_v48 = vld [vmem:[#allocation7 + $0x9c8] ss:$16 sps:$4 sm:$0xff]  }
 0x1c4   :  { %1671 = vmatprep.mubr.f32.mxu1 %v16860_v6 }
 0x1c6   :  { %2765 = vmatpush1.bf16.msra.mxu0 %v14931_v50  ;;  %v14993_v50 = vld [vmem:[#allocation7 + $0x9e4] ss:$16 sps:$4 sm:$0xff]  }
 0x1c7   :  { %v952_v59 = vpop.f32.mrb[16].mxu1  ;;  %2766 = vmatprep.subr.bf16.mxu0 %v14939_v51  ;;  %v14996_v51 = vld [vmem:[#allocation7 + $0x9ec] ss:$16 sps:$4 sm:$0xff]  }
 0x1c8   :  { %v953_v60 = vadd.f32 %v952_v59, %v286_v38  ;;  %v954_v61 = vpop.f32.mrb[17].mxu1  ;;  %v14991_v38 = vld [vmem:[#allocation7 + $0x9e0] ss:$16 sps:$4 sm:$0xff]  }
 0x1c9   :  { %v955_v53 = vadd.f32 %v954_v61, %v290_v49  ;;  %v956_v62 = vpop.f32.mrb[18].mxu1  ;;  %v14994_v49 = vld [vmem:[#allocation7 + $0x9e8] ss:$16 sps:$4 sm:$0xff]  }
 0x1ca   :  { %v973_v1 = vmax.f32 %v953_v60, 0.0  ;;  %v957_v2 = vpop.f32.mrb[19].mxu1  ;;  %2767 = vmatpush1.bf16.msra.mxu0 %v14937_v52  ;;  %v14999_v52 = vld [vmem:[#allocation7 + $0xa04] ss:$16 sps:$4 sm:$0xff]  }
 0x1cb   :  { %v974_v3 = vmax.f32 %v955_v53, 0.0  ;;  %2768 = vmatprep.subr.bf16.mxu0 %v14945_v58  ;;  %v15002_v58 = vld [vmem:[#allocation7 + $0xa0c] ss:$16 sps:$4 sm:$0xff]  }
 0x1cd   :  { %12979 = vmatprep.subr.msk.mxu1 %vm987_vm1, %v974_v3 }
 0x1ce   :  { %12980 = vmatpush1.msk.msra.mxu1 %vm987_vm1, %v973_v1  ;;  %2769 = vmatpush1.bf16.msra.mxu0 %v14943_v5 }
 0x1cf   :  { %12981 = vmatmul.mubr.msk.f32.vlgmr.msra.gmra.mrb[20].mxu1 %vm980_vm2, %v17187_v15  ;;  %2840 = vmatprep.subr.bf16.mxu1 %v14906_v63  ;;  %v14922_v15 = vld [vmem:[#allocation7 + $0x868] ss:$16 sps:$4 sm:$0xff]  }
 0x1d0   :  { %1677 = vmatprep.mubr.f32.mxu1 %v16860_v6  ;;  %2841 = vmatpush1.bf16.msra.mxu1 %v14904_v55 }
 0x1d1   :  { %2842 = vmatprep.subr.bf16.mxu1 %v14912_v4  ;;  %2770 = vmatprep.subr.bf16.mxu0 %v14951_v0  ;;  %v14997_v0 = vld [vmem:[#allocation7 + $0xa00] ss:$16 sps:$4 sm:$0xff]  }
 0x1d2   :  { %2771 = vmatpush1.bf16.msra.mxu0 %v14949_v7  ;;  %v15008_v7 = vld [vmem:[#allocation7 + $0xa2c] ss:$16 sps:$4 sm:$0xff]  }
 0x1d3   :  { %12982 = vmatmul.mubr.msk.f32.gmra.mrb[22].mxu1 %vm980_vm2, %v17194_v25  ;;  %2772 = vmatprep.subr.bf16.mxu0 %v14957_v9  ;;  %v14940_v25 = vld [vmem:[#allocation7 + $0x8c8] ss:$16 sps:$4 sm:$0xff]  }
 0x1d4   :  { %2843 = vmatpush1.bf16.msra.mxu1 %v14910_v34  ;;  %v15000_v34 = vld [vmem:[#allocation7 + $0xa08] ss:$16 sps:$4 sm:$0xff]  }
 0x1d5   :  { %2844 = vmatprep.subr.bf16.mxu1 %v14918_v57  ;;  %v15005_v57 = vld [vmem:[#allocation7 + $0xa24] ss:$16 sps:$4 sm:$0xff]  }
 0x1d6   :  { %2773 = vmatpush1.bf16.msra.mxu0 %v14955_v13  ;;  %v15006_v13 = vld [vmem:[#allocation7 + $0xa28] ss:$16 sps:$4 sm:$0xff]  }
 0x1d7   :  { %2774 = vmatprep.subr.bf16.mxu0 %v14963_v14  ;;  %v15011_v14 = vld [vmem:[#allocation7 + $0xa44] ss:$16 sps:$4 sm:$0xff]  }
 0x1d8   :  { %2845 = vmatpush1.bf16.msra.mxu1 %v14916_v10 }
 0x1d9   :  { %2846 = vmatprep.subr.bf16.mxu1 %v14924_v42  ;;  %v15003_v42 = vld [vmem:[#allocation7 + $0xa20] ss:$16 sps:$4 sm:$0xff]  }
 0x1da   :  { %2775 = vmatpush1.bf16.msra.mxu0 %v14961_v17  ;;  %v15012_v17 = vld [vmem:[#allocation7 + $0xa48] ss:$16 sps:$4 sm:$0xff]  }
 0x1db   :  { %2776 = vmatprep.subr.bf16.mxu0 %v14969_v18  ;;  %v15017_v18 = vld [vmem:[#allocation7 + $0xa64] ss:$16 sps:$4 sm:$0xff]  }
 0x1dc   :  { %2847 = vmatpush1.bf16.msra.mxu1 %v14922_v15  ;;  %v15014_v15 = vld [vmem:[#allocation7 + $0xa4c] ss:$16 sps:$4 sm:$0xff]  }
 0x1dd   :  { %2848 = vmatprep.subr.bf16.mxu1 %v14930_v16  ;;  %v15009_v16 = vld [vmem:[#allocation7 + $0xa40] ss:$16 sps:$4 sm:$0xff]  }
 0x1de   :  { %2777 = vmatpush1.bf16.msra.mxu0 %v14967_v20  ;;  %v15018_v20 = vld [vmem:[#allocation7 + $0xa68] ss:$16 sps:$4 sm:$0xff]  }
 0x1df   :  { %2778 = vmatprep.subr.bf16.mxu0 %v14975_v21  ;;  %v15023_v21 = vld [vmem:[#allocation7 + $0xa84] ss:$16 sps:$4 sm:$0xff]  }
 0x1e0   :  { %2849 = vmatpush1.bf16.msra.mxu1 %v14928_v8  ;;  %v15020_v8 = vld [vmem:[#allocation7 + $0xa6c] ss:$16 sps:$4 sm:$0xff]  }
 0x1e1   :  { %2850 = vmatprep.subr.bf16.mxu1 %v14936_v19  ;;  %v15015_v19 = vld [vmem:[#allocation7 + $0xa60] ss:$16 sps:$4 sm:$0xff]  }
 0x1e2   :  { %2779 = vmatpush1.bf16.msra.mxu0 %v14973_v24  ;;  %v15024_v24 = vld [vmem:[#allocation7 + $0xa88] ss:$16 sps:$4 sm:$0xff]  }
 0x1e3   :  { %2780 = vmatprep.subr.bf16.mxu0 %v14981_v41 }
 0x1e4   :  { %2851 = vmatpush1.bf16.msra.mxu1 %v14934_v22  ;;  %v15026_v22 = vld [vmem:[#allocation7 + $0xa8c] ss:$16 sps:$4 sm:$0xff]  }
 0x1e5   :  { %2852 = vmatprep.subr.bf16.mxu1 %v14942_v23  ;;  %v15021_v23 = vld [vmem:[#allocation7 + $0xa80] ss:$16 sps:$4 sm:$0xff]  }
 0x1e6   :  { %2781 = vmatpush1.bf16.msra.mxu0 %v14979_v44 }
 0x1e7   :  { %2782 = vmatprep.subr.bf16.mxu0 %v14987_v46  ;;  %v15042_v46 = vld [vmem:[#allocation7 + $0xae8] ss:$16 sps:$4 sm:$0xff]  }
 0x1e8   :  { %2853 = vmatpush1.bf16.msra.mxu1 %v14940_v25  ;;  %v15029_v25 = vld [vmem:[#allocation7 + $0xaa4] ss:$16 sps:$4 sm:$0xff]  }
 0x1e9   :  { %2854 = vmatprep.subr.bf16.mxu1 %v14948_v26  ;;  %v15032_v26 = vld [vmem:[#allocation7 + $0xaac] ss:$16 sps:$4 sm:$0xff]  }
 0x1ea   :  { %2783 = vmatpush1.bf16.msra.mxu0 %v14985_v35 }
 0x1eb   :  { %2784 = vmatprep.subr.bf16.mxu0 %v14993_v50  ;;  %v15050_v50 = vld [vmem:[#allocation7 + $0xb0c] ss:$16 sps:$4 sm:$0xff]  }
 0x1ec   :  { %2855 = vmatpush1.bf16.msra.mxu1 %v14946_v27  ;;  %v15027_v27 = vld [vmem:[#allocation7 + $0xaa0] ss:$16 sps:$4 sm:$0xff]  }
 0x1ed   :  { %2856 = vmatprep.subr.bf16.mxu1 %v14954_v29  ;;  %v15030_v29 = vld [vmem:[#allocation7 + $0xaa8] ss:$16 sps:$4 sm:$0xff]  }
 0x1ee   :  { %2785 = vmatpush1.bf16.msra.mxu0 %v14991_v38 }
 0x1ef   :  { %2797 = vmatprep.subr.bf16.mxu0 %v14999_v52 }
 0x1f0   :  { %2857 = vmatpush1.bf16.msra.mxu1 %v14952_v30 }
 0x1f1   :  { %2858 = vmatprep.subr.bf16.mxu1 %v14960_v28  ;;  %v15035_v28 = vld [vmem:[#allocation7 + $0xac4] ss:$16 sps:$4 sm:$0xff]  }
 0x1f4   :  { %2859 = vmatpush1.bf16.msra.mxu1 %v14958_v31  ;;  %v15038_v31 = vld [vmem:[#allocation7 + $0xacc] ss:$16 sps:$4 sm:$0xff]  }
 0x1f5   :  { %2860 = vmatprep.subr.bf16.mxu1 %v14966_v32 }
 0x1f8   :  { %2861 = vmatpush1.bf16.msra.mxu1 %v14964_v36  ;;  %v15033_v36 = vld [vmem:[#allocation7 + $0xac0] ss:$16 sps:$4 sm:$0xff]  }
 0x1f9   :  { %2862 = vmatprep.subr.bf16.mxu1 %v14972_v37  ;;  %v15036_v37 = vld [vmem:[#allocation7 + $0xac8] ss:$16 sps:$4 sm:$0xff]  }
 0x1fc   :  { %2863 = vmatpush1.bf16.msra.mxu1 %v14970_v39 }
 0x1fd   :  { %2864 = vmatprep.subr.bf16.mxu1 %v14978_v40  ;;  %v15041_v40 = vld [vmem:[#allocation7 + $0xae4] ss:$16 sps:$4 sm:$0xff]  }
 0x200   :  { %2865 = vmatpush1.bf16.msra.mxu1 %v14976_v33  ;;  %v15044_v33 = vld [vmem:[#allocation7 + $0xaec] ss:$16 sps:$4 sm:$0xff]  }
 0x201   :  { %2866 = vmatprep.subr.bf16.mxu1 %v14984_v43 }
 0x204   :  { %2867 = vmatpush1.bf16.msra.mxu1 %v14982_v45  ;;  %v15039_v45 = vld [vmem:[#allocation7 + $0xae0] ss:$16 sps:$4 sm:$0xff]  }
 0x205   :  { %2868 = vmatprep.subr.bf16.mxu1 %v14990_v47 }
 0x208   :  { %2869 = vmatpush1.bf16.msra.mxu1 %v14988_v48  ;;  %v15047_v48 = vld [vmem:[#allocation7 + $0xb04] ss:$16 sps:$4 sm:$0xff]  }
 0x209   :  { %2870 = vmatprep.subr.bf16.mxu1 %v14996_v51  ;;  %v15045_v51 = vld [vmem:[#allocation7 + $0xb00] ss:$16 sps:$4 sm:$0xff]  }
 0x20c   :  { %2871 = vmatpush1.bf16.msra.mxu1 %v14994_v49  ;;  %v15048_v49 = vld [vmem:[#allocation7 + $0xb08] ss:$16 sps:$4 sm:$0xff]  }
 0x20d   :  { %2883 = vmatprep.subr.bf16.mxu1 %v15002_v58  ;;  %v15053_v58 = vld [vmem:[#allocation7 + $0xb24] ss:$16 sps:$4 sm:$0xff]  }
 0x282   :  { %v1596_v59 = vpop.f32.mrb[12].mxu0 }
 0x283   :  { %v1598_v60 = vpop.f32.mrb[13].mxu0 }
 0x286   :  { %v1602_v61 = vpop.f32.mrb[14].mxu0 }
 0x287   :  { %v17242_v53 = vpack.c.bf16 %v1602_v61, %v1596_v59  ;;  %v1604_v62 = vpop.f32.mrb[15].mxu0  ;;  %v15056_v59 = vld [vmem:[#allocation7 + $0xb2c] ss:$16 sps:$4 sm:$0xff]   ;;  %v15054_v61 = vld [vmem:[#allocation7 + $0xb28] ss:$16 sps:$4 sm:$0xff]  }
 0x288   :  { %v17244_v63 = vpack.c.bf16 %v1604_v62, %v1598_v60  ;;  %v15051_v60 = vld [vmem:[#allocation7 + $0xb20] ss:$16 sps:$4 sm:$0xff]   ;;  %v15059_v62 = vld [vmem:[#allocation7 + $0xb44] ss:$16 sps:$4 sm:$0xff]  }
 0x289   :  { %v2085_v1 = vshll.u32 %v17242_v53, 16  ;;  %v2083_v3 = vshrl.u32 %v17242_v53, 16 }
 0x28a   :  { %v2092_v2 = vshll.u32 %v17244_v63, 16  ;;  %v2090_v4 = vshrl.u32 %v17244_v63, 16 }
 0x28b   :  { %v2087_v55 = vrot.slane %v2085_v1, 1  ;;  %v15062_v1 = vld [vmem:[#allocation7 + $0xb4c] ss:$16 sps:$4 sm:$0xff]  }
 0x28c   :  { %v2094_v5 = vrot.slane %v2092_v2, 1  ;;  %v15057_v2 = vld [vmem:[#allocation7 + $0xb40] ss:$16 sps:$4 sm:$0xff]  }
 0x28d   :  { %v17252_v10 = vor.u32 %v2087_v55, %v2083_v3  ;;  %v15060_v55 = vld [vmem:[#allocation7 + $0xb48] ss:$16 sps:$4 sm:$0xff]   ;;  %v15065_v3 = vld [vmem:[#allocation7 + $0xb64] ss:$16 sps:$4 sm:$0xff]  }
 0x28e   :  { %v17250_v9 = vor.u32 %v2094_v5, %v2090_v4  ;;  %v15068_v4 = vld [vmem:[#allocation7 + $0xb6c] ss:$16 sps:$4 sm:$0xff]   ;;  %v15063_v5 = vld [vmem:[#allocation7 + $0xb60] ss:$16 sps:$4 sm:$0xff]  }
 0x290   :  { %2786 = vmatprep.mubr.bf16.mxu0 %v17250_v9  ;;  %2872 = vmatprep.mubr.bf16.mxu1 %v17250_v9 }
 0x291   :  { %2787 = vmatmul.mubr.bf16.vlgmr.msra.gmra.mrb[16].mxu0 %v17252_v10  ;;  %2873 = vmatmul.mubr.bf16.vlgmr.msra.gmra.mrb[24].mxu1 %v17252_v10 }
 0x292   :  { %2798 = vmatpush1.bf16.msra.mxu0 %v14997_v0  ;;  %2884 = vmatpush1.bf16.msra.mxu1 %v15000_v34  ;;  %v15066_v0 = vld [vmem:[#allocation7 + $0xb68] ss:$16 sps:$4 sm:$0xff]   ;;  %v15071_v34 = vld [vmem:[#allocation7 + $0xb84] ss:$16 sps:$4 sm:$0xff]  }
 0x293   :  { %2799 = vmatprep.subr.bf16.mxu0 %v15005_v57  ;;  %2885 = vmatprep.subr.bf16.mxu1 %v15008_v7  ;;  %v15074_v57 = vld [vmem:[#allocation7 + $0xb8c] ss:$16 sps:$4 sm:$0xff]   ;;  %v15069_v7 = vld [vmem:[#allocation7 + $0xb80] ss:$16 sps:$4 sm:$0xff]  }
 0x296   :  { %2800 = vmatpush1.bf16.msra.mxu0 %v15003_v42  ;;  %2886 = vmatpush1.bf16.msra.mxu1 %v15006_v13  ;;  %v15072_v42 = vld [vmem:[#allocation7 + $0xb88] ss:$16 sps:$4 sm:$0xff]   ;;  %v15077_v13 = vld [vmem:[#allocation7 + $0xba4] ss:$16 sps:$4 sm:$0xff]  }
 0x297   :  { %2801 = vmatprep.subr.bf16.mxu0 %v15011_v14  ;;  %2887 = vmatprep.subr.bf16.mxu1 %v15014_v15  ;;  %v15080_v14 = vld [vmem:[#allocation7 + $0xbac] ss:$16 sps:$4 sm:$0xff]   ;;  %v15075_v15 = vld [vmem:[#allocation7 + $0xba0] ss:$16 sps:$4 sm:$0xff]  }
 0x29a   :  { %2802 = vmatpush1.bf16.msra.mxu0 %v15009_v16  ;;  %2888 = vmatpush1.bf16.msra.mxu1 %v15012_v17  ;;  %v15078_v16 = vld [vmem:[#allocation7 + $0xba8] ss:$16 sps:$4 sm:$0xff]   ;;  %v15083_v17 = vld [vmem:[#allocation7 + $0xbc4] ss:$16 sps:$4 sm:$0xff]  }
 0x29b   :  { %2803 = vmatprep.subr.bf16.mxu0 %v15017_v18  ;;  %2889 = vmatprep.subr.bf16.mxu1 %v15020_v8  ;;  %v15086_v18 = vld [vmem:[#allocation7 + $0xbcc] ss:$16 sps:$4 sm:$0xff]   ;;  %v15081_v8 = vld [vmem:[#allocation7 + $0xbc0] ss:$16 sps:$4 sm:$0xff]  }
 0x29e   :  { %2804 = vmatpush1.bf16.msra.mxu0 %v15015_v19  ;;  %2890 = vmatpush1.bf16.msra.mxu1 %v15018_v20  ;;  %v15084_v19 = vld [vmem:[#allocation7 + $0xbc8] ss:$16 sps:$4 sm:$0xff]  }
 0x29f   :  { %2805 = vmatprep.subr.bf16.mxu0 %v15023_v21  ;;  %2891 = vmatprep.subr.bf16.mxu1 %v15026_v22  ;;  %v15089_v21 = vld [vmem:[#allocation7 + $0xbe4] ss:$16 sps:$4 sm:$0xff]   ;;  %v15092_v22 = vld [vmem:[#allocation7 + $0xbec] ss:$16 sps:$4 sm:$0xff]  }
 0x2a2   :  { %2806 = vmatpush1.bf16.msra.mxu0 %v15021_v23  ;;  %2892 = vmatpush1.bf16.msra.mxu1 %v15024_v24  ;;  %v1673_v30 = vpop.f32.mrb[20].mxu1  ;;  %v15087_v23 = vld [vmem:[#allocation7 + $0xbe0] ss:$16 sps:$4 sm:$0xff]   ;;  %v15090_v24 = vld [vmem:[#allocation7 + $0xbe8] ss:$16 sps:$4 sm:$0xff]  }
 0x2a3   :  { %2807 = vmatprep.subr.bf16.mxu0 %v15029_v25  ;;  %2893 = vmatprep.subr.bf16.mxu1 %v15032_v26  ;;  %v1675_v32 = vpop.f32.mrb[21].mxu1 }
 0x2a6   :  { %2808 = vmatpush1.bf16.msra.mxu0 %v15027_v27  ;;  %2894 = vmatpush1.bf16.msra.mxu1 %v15030_v29  ;;  %v1679_v39 = vpop.f32.mrb[22].mxu1  ;;  %v15095_v27 = vld [vmem:[#allocation7 + $0x4] ss:$16 sps:$4 sm:$0xff]   ;;  %v15098_v29 = vld [vmem:[#allocation7 + $0xc] ss:$16 sps:$4 sm:$0xff]  }
 0x2a7   :  { %2809 = vmatprep.subr.bf16.mxu0 %v15035_v28  ;;  %2895 = vmatprep.subr.bf16.mxu1 %v15038_v31  ;;  %v17258_v41 = vpack.c.bf16 %v1679_v39, %v1673_v30  ;;  %v1681_v43 = vpop.f32.mrb[23].mxu1  ;;  %v15093_v30 = vld [vmem:[#allocation7] ss:$16 sps:$4 sm:$0xff]   ;;  %v2931_v28 = vrot.slane %v17244_v63, 1  ;;  %v15096_v31 = vld [vmem:[#allocation7 + $0x8] ss:$16 sps:$4 sm:$0xff]  }
 0x2a8   :  { %v17260_v44 = vpack.c.bf16 %v1681_v43, %v1675_v32  ;;  %v15101_v32 = vld [vmem:[#allocation7 + $0x24] ss:$16 sps:$4 sm:$0xff]   ;;  %v15099_v39 = vld [vmem:[#allocation7 + $0x20] ss:$16 sps:$4 sm:$0xff]   ;;  %v15110_v63 = vld [vmem:[#allocation7 + $0x4c] ss:$16 sps:$4 sm:$0xff]  }
 0x2a9   :  { %v2099_v20 = vshll.u32 %v17258_v41, 16  ;;  %v2097_v25 = vshrl.u32 %v17258_v41, 16  ;;  %v15105_v43 = vld [vmem:[#allocation7 + $0x40] ss:$16 sps:$4 sm:$0xff]  }
 0x2aa   :  { %2810 = vmatpush1.bf16.msra.mxu0 %v15033_v36  ;;  %2896 = vmatpush1.bf16.msra.mxu1 %v15036_v37  ;;  %v2104_v47 = vshrl.u32 %v17260_v44, 16  ;;  %v2106_v35 = vshll.u32 %v17260_v44, 16  ;;  %v15104_v36 = vld [vmem:[#allocation7 + $0x2c] ss:$16 sps:$4 sm:$0xff]  }
 0x2ab   :  { %2811 = vmatprep.subr.bf16.mxu0 %v15041_v40  ;;  %2897 = vmatprep.subr.bf16.mxu1 %v15044_v33  ;;  %v2101_v26 = vrot.slane %v2099_v20, 1  ;;  %v15102_v40 = vld [vmem:[#allocation7 + $0x28] ss:$16 sps:$4 sm:$0xff]   ;;  %v15107_v33 = vld [vmem:[#allocation7 + $0x44] ss:$16 sps:$4 sm:$0xff]  }
 0x2ac   :  { %v2108_v38 = vrot.slane %v2106_v35, 1  ;;  %v15111_v35 = vld [vmem:[#allocation7 + $0x60] ss:$16 sps:$4 sm:$0xff]   ;;  %v15161_v20 = vld [vmem:[#allocation7 + $0x164] ss:$16 sps:$4 sm:$0xff]  }
 0x2ad   :  { %v17271_v37 = vor.u32 %v2101_v26, %v2097_v25  ;;  %v15170_v25 = vld [vmem:[#allocation7 + $0x18c] ss:$16 sps:$4 sm:$0xff]   ;;  %v15165_v26 = vld [vmem:[#allocation7 + $0x180] ss:$16 sps:$4 sm:$0xff]  }
 0x2ae   :  { %2812 = vmatpush1.bf16.msra.mxu0 %v15039_v45  ;;  %2898 = vmatpush1.bf16.msra.mxu1 %v15042_v46  ;;  %v17264_v52 = vor.u32 %v2108_v38, %v2104_v47  ;;  %v15108_v45 = vld [vmem:[#allocation7 + $0x48] ss:$16 sps:$4 sm:$0xff]   ;;  %v15113_v46 = vld [vmem:[#allocation7 + $0x64] ss:$16 sps:$4 sm:$0xff]   ;;  %v15116_v47 = vld [vmem:[#allocation7 + $0x6c] ss:$16 sps:$4 sm:$0xff]  }
 0x2af   :  { %2813 = vmatprep.subr.bf16.mxu0 %v15047_v48  ;;  %2899 = vmatprep.subr.bf16.mxu1 %v15050_v50  ;;  %v15114_v48 = vld [vmem:[#allocation7 + $0x68] ss:$16 sps:$4 sm:$0xff]   ;;  %v15119_v50 = vld [vmem:[#allocation7 + $0x84] ss:$16 sps:$4 sm:$0xff]   ;;  %v15117_v38 = vld [vmem:[#allocation7 + $0x80] ss:$16 sps:$4 sm:$0xff]  }
 0x2b0   :  { %2829 = vmatprep.mubr.bf16.mxu0 %v17264_v52  ;;  %2915 = vmatprep.mubr.bf16.mxu1 %v17264_v52 }
 0x2b2   :  { %2814 = vmatpush1.bf16.msra.mxu0 %v15045_v51  ;;  %2900 = vmatpush1.bf16.msra.mxu1 %v15048_v49  ;;  %v15122_v51 = vld [vmem:[#allocation7 + $0x8c] ss:$16 sps:$4 sm:$0xff]   ;;  %v15120_v49 = vld [vmem:[#allocation7 + $0x88] ss:$16 sps:$4 sm:$0xff]  }
 0x2b3   :  { %2815 = vmatprep.subr.bf16.mxu0 %v15053_v58  ;;  %2901 = vmatprep.subr.bf16.mxu1 %v15056_v59  ;;  %v15125_v58 = vld [vmem:[#allocation7 + $0xa4] ss:$16 sps:$4 sm:$0xff]   ;;  %v15128_v59 = vld [vmem:[#allocation7 + $0xac] ss:$16 sps:$4 sm:$0xff]  }
 0x2b6   :  { %2816 = vmatpush1.bf16.msra.mxu0 %v15051_v60  ;;  %2902 = vmatpush1.bf16.msra.mxu1 %v15054_v61  ;;  %v15123_v60 = vld [vmem:[#allocation7 + $0xa0] ss:$16 sps:$4 sm:$0xff]   ;;  %v15126_v61 = vld [vmem:[#allocation7 + $0xa8] ss:$16 sps:$4 sm:$0xff]  }
 0x2b7   :  { %2817 = vmatprep.subr.bf16.mxu0 %v15059_v62  ;;  %2903 = vmatprep.subr.bf16.mxu1 %v15062_v1  ;;  %v15131_v62 = vld [vmem:[#allocation7 + $0xc4] ss:$16 sps:$4 sm:$0xff]   ;;  %v15134_v1 = vld [vmem:[#allocation7 + $0xcc] ss:$16 sps:$4 sm:$0xff]  }
 0x2ba   :  { %2818 = vmatpush1.bf16.msra.mxu0 %v15057_v2  ;;  %2904 = vmatpush1.bf16.msra.mxu1 %v15060_v55  ;;  %v15129_v2 = vld [vmem:[#allocation7 + $0xc0] ss:$16 sps:$4 sm:$0xff]   ;;  %v15132_v55 = vld [vmem:[#allocation7 + $0xc8] ss:$16 sps:$4 sm:$0xff]  }
 0x2bb   :  { %2819 = vmatprep.subr.bf16.mxu0 %v15065_v3  ;;  %2905 = vmatprep.subr.bf16.mxu1 %v15068_v4  ;;  %v15137_v3 = vld [vmem:[#allocation7 + $0xe4] ss:$16 sps:$4 sm:$0xff]   ;;  %v15140_v4 = vld [vmem:[#allocation7 + $0xec] ss:$16 sps:$4 sm:$0xff]  }
 0x2be   :  { %2820 = vmatpush1.bf16.msra.mxu0 %v15063_v5  ;;  %2906 = vmatpush1.bf16.msra.mxu1 %v15066_v0  ;;  %v15135_v5 = vld [vmem:[#allocation7 + $0xe0] ss:$16 sps:$4 sm:$0xff]   ;;  %v15138_v0 = vld [vmem:[#allocation7 + $0xe8] ss:$16 sps:$4 sm:$0xff]  }
 0x2bf   :  { %2821 = vmatprep.subr.bf16.mxu0 %v15071_v34  ;;  %2907 = vmatprep.subr.bf16.mxu1 %v15074_v57  ;;  %v15143_v34 = vld [vmem:[#allocation7 + $0x104] ss:$16 sps:$4 sm:$0xff]   ;;  %v15146_v57 = vld [vmem:[#allocation7 + $0x10c] ss:$16 sps:$4 sm:$0xff]  }
 0x2c2   :  { %2822 = vmatpush1.bf16.msra.mxu0 %v15069_v7  ;;  %2908 = vmatpush1.bf16.msra.mxu1 %v15072_v42  ;;  %v15141_v7 = vld [vmem:[#allocation7 + $0x100] ss:$16 sps:$4 sm:$0xff]   ;;  %v15144_v42 = vld [vmem:[#allocation7 + $0x108] ss:$16 sps:$4 sm:$0xff]  }
 0x2c3   :  { %2823 = vmatprep.subr.bf16.mxu0 %v15077_v13  ;;  %2909 = vmatprep.subr.bf16.mxu1 %v15080_v14  ;;  %v15149_v13 = vld [vmem:[#allocation7 + $0x124] ss:$16 sps:$4 sm:$0xff]   ;;  %v15152_v14 = vld [vmem:[#allocation7 + $0x12c] ss:$16 sps:$4 sm:$0xff]  }
 0x2c6   :  { %2824 = vmatpush1.bf16.msra.mxu0 %v15075_v15  ;;  %2910 = vmatpush1.bf16.msra.mxu1 %v15078_v16  ;;  %v15147_v15 = vld [vmem:[#allocation7 + $0x120] ss:$16 sps:$4 sm:$0xff]   ;;  %v15150_v16 = vld [vmem:[#allocation7 + $0x128] ss:$16 sps:$4 sm:$0xff]  }
 0x2c7   :  { %2825 = vmatprep.subr.bf16.mxu0 %v15083_v17  ;;  %2911 = vmatprep.subr.bf16.mxu1 %v15086_v18  ;;  %v15155_v17 = vld [vmem:[#allocation7 + $0x144] ss:$16 sps:$4 sm:$0xff]   ;;  %v15158_v18 = vld [vmem:[#allocation7 + $0x14c] ss:$16 sps:$4 sm:$0xff]  }
 0x2ca   :  { %2826 = vmatpush1.bf16.msra.mxu0 %v15081_v8  ;;  %2912 = vmatpush1.bf16.msra.mxu1 %v15084_v19  ;;  %v15153_v8 = vld [vmem:[#allocation7 + $0x140] ss:$16 sps:$4 sm:$0xff]   ;;  %v15156_v19 = vld [vmem:[#allocation7 + $0x148] ss:$16 sps:$4 sm:$0xff]  }
 0x2cb   :  { %2827 = vmatprep.subr.bf16.mxu0 %v15089_v21  ;;  %2913 = vmatprep.subr.bf16.mxu1 %v15092_v22  ;;  %v15164_v21 = vld [vmem:[#allocation7 + $0x16c] ss:$16 sps:$4 sm:$0xff]   ;;  %v15159_v22 = vld [vmem:[#allocation7 + $0x160] ss:$16 sps:$4 sm:$0xff]  }
 0x2ce   :  { %2828 = vmatpush1.bf16.msra.mxu0 %v15087_v23  ;;  %2914 = vmatpush1.bf16.msra.mxu1 %v15090_v24  ;;  %v15162_v23 = vld [vmem:[#allocation7 + $0x168] ss:$16 sps:$4 sm:$0xff]   ;;  %v15167_v24 = vld [vmem:[#allocation7 + $0x184] ss:$16 sps:$4 sm:$0xff]  }
 0x2cf   :  { %3578 = vmatprep.subr.bf16.mxu0 %v15095_v27  ;;  %3664 = vmatprep.subr.bf16.mxu1 %v15098_v29  ;;  %v15168_v27 = vld [vmem:[#allocation7 + $0x188] ss:$16 sps:$4 sm:$0xff]   ;;  %v15173_v29 = vld [vmem:[#allocation7 + $0x1a4] ss:$16 sps:$4 sm:$0xff]  }
 0x2d1   :  { %2830 = vmatmul.mubr.bf16.vlgmr.msra.gmra.mrb[16].mxu0 %v17271_v37  ;;  %2916 = vmatmul.mubr.bf16.vlgmr.msra.gmra.mrb[24].mxu1 %v17271_v37 }
 0x2d2   :  { %3579 = vmatpush1.bf16.msra.mxu0 %v15093_v30  ;;  %3610 = vmatprep.mubr.bf16.mxu0 %v2931_v28  ;;  %v15176_v30 = vld [vmem:[#allocation7 + $0x1ac] ss:$16 sps:$4 sm:$0xff]  }
 0x2d3   :  { %3665 = vmatpush1.bf16.msra.mxu1 %v15096_v31  ;;  %3696 = vmatprep.mubr.bf16.mxu1 %v2931_v28  ;;  %v15171_v28 = vld [vmem:[#allocation7 + $0x1a0] ss:$16 sps:$4 sm:$0xff]   ;;  %v15174_v31 = vld [vmem:[#allocation7 + $0x1a8] ss:$16 sps:$4 sm:$0xff]  }
 0x2d4   :  { %3580 = vmatprep.subr.bf16.mxu0 %v15101_v32  ;;  %3666 = vmatprep.subr.bf16.mxu1 %v15104_v36  ;;  %v15179_v32 = vld [vmem:[#allocation7 + $0x1c4] ss:$16 sps:$4 sm:$0xff]   ;;  %v15182_v36 = vld [vmem:[#allocation7 + $0x1cc] ss:$16 sps:$4 sm:$0xff]  }
 0x2d6   :  { %3581 = vmatpush1.bf16.msra.mxu0 %v15099_v39  ;;  %v15177_v39 = vld [vmem:[#allocation7 + $0x1c0] ss:$16 sps:$4 sm:$0xff]  }
 0x2d7   :  { %3667 = vmatpush1.bf16.msra.mxu1 %v15102_v40  ;;  %3582 = vmatprep.subr.bf16.mxu0 %v15107_v33  ;;  %v15180_v40 = vld [vmem:[#allocation7 + $0x1c8] ss:$16 sps:$4 sm:$0xff]   ;;  %v15185_v33 = vld [vmem:[#allocation7 + $0x1e4] ss:$16 sps:$4 sm:$0xff]  }
 0x2d8   :  { %3668 = vmatprep.subr.bf16.mxu1 %v15110_v63  ;;  %v15188_v63 = vld [vmem:[#allocation7 + $0x1ec] ss:$16 sps:$4 sm:$0xff]  }
 0x2da   :  { %3583 = vmatpush1.bf16.msra.mxu0 %v15105_v43  ;;  %v15183_v43 = vld [vmem:[#allocation7 + $0x1e0] ss:$16 sps:$4 sm:$0xff]  }
 0x2db   :  { %3669 = vmatpush1.bf16.msra.mxu1 %v15108_v45  ;;  %3584 = vmatprep.subr.bf16.mxu0 %v15113_v46  ;;  %v15186_v45 = vld [vmem:[#allocation7 + $0x1e8] ss:$16 sps:$4 sm:$0xff]   ;;  %v15191_v46 = vld [vmem:[#allocation7 + $0x204] ss:$16 sps:$4 sm:$0xff]  }
 0x2dc   :  { %3670 = vmatprep.subr.bf16.mxu1 %v15116_v47  ;;  %v15194_v47 = vld [vmem:[#allocation7 + $0x20c] ss:$16 sps:$4 sm:$0xff]  }
 0x2de   :  { %3585 = vmatpush1.bf16.msra.mxu0 %v15111_v35  ;;  %v15189_v35 = vld [vmem:[#allocation7 + $0x200] ss:$16 sps:$4 sm:$0xff]  }
 0x2df   :  { %3671 = vmatpush1.bf16.msra.mxu1 %v15114_v48  ;;  %3586 = vmatprep.subr.bf16.mxu0 %v15119_v50  ;;  %v2930_v48 = vrot.slane %v17242_v53, 1  ;;  %v15192_v50 = vld [vmem:[#allocation7 + $0x208] ss:$16 sps:$4 sm:$0xff]   ;;  %v15201_v53 = vld [vmem:[#allocation7 + $0x240] ss:$16 sps:$4 sm:$0xff]  }
 0x2e0   :  { %3672 = vmatprep.subr.bf16.mxu1 %v15122_v51  ;;  %v15197_v51 = vld [vmem:[#allocation7 + $0x224] ss:$16 sps:$4 sm:$0xff]  }
 0x2e2   :  { %3587 = vmatpush1.bf16.msra.mxu0 %v15117_v38  ;;  %v2933_v38 = vrot.slane %v17260_v44, 1  ;;  %v15212_v44 = vld [vmem:[#allocation7 + $0x26c] ss:$16 sps:$4 sm:$0xff]  }
 0x2e3   :  { %3673 = vmatpush1.bf16.msra.mxu1 %v15120_v49  ;;  %3588 = vmatprep.subr.bf16.mxu0 %v15125_v58  ;;  %v15200_v49 = vld [vmem:[#allocation7 + $0x22c] ss:$16 sps:$4 sm:$0xff]   ;;  %v15195_v58 = vld [vmem:[#allocation7 + $0x220] ss:$16 sps:$4 sm:$0xff]  }
 0x2e4   :  { %3674 = vmatprep.subr.bf16.mxu1 %v15128_v59  ;;  %v15198_v59 = vld [vmem:[#allocation7 + $0x228] ss:$16 sps:$4 sm:$0xff]  }
 0x2e6   :  { %3589 = vmatpush1.bf16.msra.mxu0 %v15123_v60  ;;  %v15203_v60 = vld [vmem:[#allocation7 + $0x244] ss:$16 sps:$4 sm:$0xff]  }
 0x2e7   :  { %3675 = vmatpush1.bf16.msra.mxu1 %v15126_v61  ;;  %3590 = vmatprep.subr.bf16.mxu0 %v15131_v62  ;;  %v15206_v61 = vld [vmem:[#allocation7 + $0x24c] ss:$16 sps:$4 sm:$0xff]   ;;  %v15204_v62 = vld [vmem:[#allocation7 + $0x248] ss:$16 sps:$4 sm:$0xff]  }
 0x2e8   :  { %3676 = vmatprep.subr.bf16.mxu1 %v15134_v1  ;;  %v15209_v1 = vld [vmem:[#allocation7 + $0x264] ss:$16 sps:$4 sm:$0xff]  }
 0x2ea   :  { %3591 = vmatpush1.bf16.msra.mxu0 %v15129_v2  ;;  %v15207_v2 = vld [vmem:[#allocation7 + $0x260] ss:$16 sps:$4 sm:$0xff]  }
 0x2eb   :  { %3677 = vmatpush1.bf16.msra.mxu1 %v15132_v55  ;;  %3592 = vmatprep.subr.bf16.mxu0 %v15137_v3  ;;  %v15210_v55 = vld [vmem:[#allocation7 + $0x268] ss:$16 sps:$4 sm:$0xff]   ;;  %v15215_v3 = vld [vmem:[#allocation7 + $0x284] ss:$16 sps:$4 sm:$0xff]  }
 0x2ec   :  { %3678 = vmatprep.subr.bf16.mxu1 %v15140_v4  ;;  %v15218_v4 = vld [vmem:[#allocation7 + $0x28c] ss:$16 sps:$4 sm:$0xff]  }
 0x2ee   :  { %3593 = vmatpush1.bf16.msra.mxu0 %v15135_v5  ;;  %v15213_v5 = vld [vmem:[#allocation7 + $0x280] ss:$16 sps:$4 sm:$0xff]  }
 0x2ef   :  { %3679 = vmatpush1.bf16.msra.mxu1 %v15138_v0  ;;  %3594 = vmatprep.subr.bf16.mxu0 %v15143_v34  ;;  %v15216_v0 = vld [vmem:[#allocation7 + $0x288] ss:$16 sps:$4 sm:$0xff]   ;;  %v15221_v34 = vld [vmem:[#allocation7 + $0x2a4] ss:$16 sps:$4 sm:$0xff]  }
 0x2f0   :  { %3680 = vmatprep.subr.bf16.mxu1 %v15146_v57  ;;  %v15224_v57 = vld [vmem:[#allocation7 + $0x2ac] ss:$16 sps:$4 sm:$0xff]  }
 0x2f2   :  { %3595 = vmatpush1.bf16.msra.mxu0 %v15141_v7  ;;  %v15219_v7 = vld [vmem:[#allocation7 + $0x2a0] ss:$16 sps:$4 sm:$0xff]  }
 0x2f3   :  { %3681 = vmatpush1.bf16.msra.mxu1 %v15144_v42  ;;  %3596 = vmatprep.subr.bf16.mxu0 %v15149_v13  ;;  %v15222_v42 = vld [vmem:[#allocation7 + $0x2a8] ss:$16 sps:$4 sm:$0xff]   ;;  %v15227_v13 = vld [vmem:[#allocation7 + $0x2c4] ss:$16 sps:$4 sm:$0xff]  }
 0x2f4   :  { %3682 = vmatprep.subr.bf16.mxu1 %v15152_v14  ;;  %v15230_v14 = vld [vmem:[#allocation7 + $0x2cc] ss:$16 sps:$4 sm:$0xff]  }
 0x2f6   :  { %3597 = vmatpush1.bf16.msra.mxu0 %v15147_v15  ;;  %v15225_v15 = vld [vmem:[#allocation7 + $0x2c0] ss:$16 sps:$4 sm:$0xff]  }
 0x2f7   :  { %3683 = vmatpush1.bf16.msra.mxu1 %v15150_v16  ;;  %3598 = vmatprep.subr.bf16.mxu0 %v15155_v17  ;;  %v15228_v16 = vld [vmem:[#allocation7 + $0x2c8] ss:$16 sps:$4 sm:$0xff]   ;;  %v15233_v17 = vld [vmem:[#allocation7 + $0x2e4] ss:$16 sps:$4 sm:$0xff]  }
 0x2f8   :  { %3684 = vmatprep.subr.bf16.mxu1 %v15158_v18  ;;  %v15236_v18 = vld [vmem:[#allocation7 + $0x2ec] ss:$16 sps:$4 sm:$0xff]  }
 0x2fa   :  { %3599 = vmatpush1.bf16.msra.mxu0 %v15153_v8  ;;  %v15231_v8 = vld [vmem:[#allocation7 + $0x2e0] ss:$16 sps:$4 sm:$0xff]  }
 0x2fb   :  { %3685 = vmatpush1.bf16.msra.mxu1 %v15156_v19  ;;  %3600 = vmatprep.subr.bf16.mxu0 %v15161_v20  ;;  %v15234_v19 = vld [vmem:[#allocation7 + $0x2e8] ss:$16 sps:$4 sm:$0xff]   ;;  %v15239_v20 = vld [vmem:[#allocation7 + $0x304] ss:$16 sps:$4 sm:$0xff]  }
 0x2fc   :  { %3686 = vmatprep.subr.bf16.mxu1 %v15164_v21  ;;  %v15242_v21 = vld [vmem:[#allocation7 + $0x30c] ss:$16 sps:$4 sm:$0xff]  }
 0x2fe   :  { %3601 = vmatpush1.bf16.msra.mxu0 %v15159_v22  ;;  %v15237_v22 = vld [vmem:[#allocation7 + $0x300] ss:$16 sps:$4 sm:$0xff]  }
 0x2ff   :  { %3687 = vmatpush1.bf16.msra.mxu1 %v15162_v23  ;;  %3602 = vmatprep.subr.bf16.mxu0 %v15167_v24  ;;  %v15240_v23 = vld [vmem:[#allocation7 + $0x308] ss:$16 sps:$4 sm:$0xff]   ;;  %v15245_v24 = vld [vmem:[#allocation7 + $0x324] ss:$16 sps:$4 sm:$0xff]  }
 0x300   :  { %3688 = vmatprep.subr.bf16.mxu1 %v15170_v25  ;;  %v15248_v25 = vld [vmem:[#allocation7 + $0x32c] ss:$16 sps:$4 sm:$0xff]  }
 0x302   :  { %3603 = vmatpush1.bf16.msra.mxu0 %v15165_v26  ;;  %v15243_v26 = vld [vmem:[#allocation7 + $0x320] ss:$16 sps:$4 sm:$0xff]  }
 0x303   :  { %3689 = vmatpush1.bf16.msra.mxu1 %v15168_v27  ;;  %3604 = vmatprep.subr.bf16.mxu0 %v15173_v29  ;;  %v15246_v27 = vld [vmem:[#allocation7 + $0x328] ss:$16 sps:$4 sm:$0xff]   ;;  %v15251_v29 = vld [vmem:[#allocation7 + $0x344] ss:$16 sps:$4 sm:$0xff]  }
 0x304   :  { %3690 = vmatprep.subr.bf16.mxu1 %v15176_v30  ;;  %v15254_v30 = vld [vmem:[#allocation7 + $0x34c] ss:$16 sps:$4 sm:$0xff]  }
 0x306   :  { %3605 = vmatpush1.bf16.msra.mxu0 %v15171_v28  ;;  %v15249_v28 = vld [vmem:[#allocation7 + $0x340] ss:$16 sps:$4 sm:$0xff]  }
 0x307   :  { %3691 = vmatpush1.bf16.msra.mxu1 %v15174_v31  ;;  %3606 = vmatprep.subr.bf16.mxu0 %v15179_v32  ;;  %v15252_v31 = vld [vmem:[#allocation7 + $0x348] ss:$16 sps:$4 sm:$0xff]   ;;  %v15257_v32 = vld [vmem:[#allocation7 + $0x364] ss:$16 sps:$4 sm:$0xff]  }
 0x308   :  { %3692 = vmatprep.subr.bf16.mxu1 %v15182_v36  ;;  %v15260_v36 = vld [vmem:[#allocation7 + $0x36c] ss:$16 sps:$4 sm:$0xff]  }
 0x30a   :  { %3607 = vmatpush1.bf16.msra.mxu0 %v15177_v39  ;;  %v15255_v39 = vld [vmem:[#allocation7 + $0x360] ss:$16 sps:$4 sm:$0xff]  }
 0x30b   :  { %3693 = vmatpush1.bf16.msra.mxu1 %v15180_v40  ;;  %3608 = vmatprep.subr.bf16.mxu0 %v15185_v33  ;;  %v15258_v40 = vld [vmem:[#allocation7 + $0x368] ss:$16 sps:$4 sm:$0xff]   ;;  %v15263_v33 = vld [vmem:[#allocation7 + $0x384] ss:$16 sps:$4 sm:$0xff]  }
 0x30c   :  { %3694 = vmatprep.subr.bf16.mxu1 %v15188_v63  ;;  %v15266_v63 = vld [vmem:[#allocation7 + $0x38c] ss:$16 sps:$4 sm:$0xff]  }
 0x30e   :  { %3609 = vmatpush1.bf16.msra.mxu0 %v15183_v43  ;;  %v15261_v43 = vld [vmem:[#allocation7 + $0x380] ss:$16 sps:$4 sm:$0xff]  }
 0x30f   :  { %3695 = vmatpush1.bf16.msra.mxu1 %v15186_v45  ;;  %3621 = vmatprep.subr.bf16.mxu0 %v15191_v46  ;;  %v15264_v45 = vld [vmem:[#allocation7 + $0x388] ss:$16 sps:$4 sm:$0xff]   ;;  %v15269_v46 = vld [vmem:[#allocation7 + $0x3a4] ss:$16 sps:$4 sm:$0xff]  }
 0x310   :  { %3707 = vmatprep.subr.bf16.mxu1 %v15194_v47  ;;  %v15272_v47 = vld [vmem:[#allocation7 + $0x3ac] ss:$16 sps:$4 sm:$0xff]  }
 0x311   :  { %3611 = vmatmul.mubr.bf16.vlgmr.msra.gmra.mrb[16].mxu0 %v2930_v48 }
 0x312   :  { %3697 = vmatmul.mubr.bf16.vlgmr.msra.gmra.mrb[24].mxu1 %v2930_v48  ;;  %3622 = vmatpush1.bf16.msra.mxu0 %v15189_v35  ;;  %v15267_v35 = vld [vmem:[#allocation7 + $0x3a0] ss:$16 sps:$4 sm:$0xff]   ;;  %v15270_v48 = vld [vmem:[#allocation7 + $0x3a8] ss:$16 sps:$4 sm:$0xff]  }
 0x313   :  { %3653 = vmatprep.mubr.bf16.mxu0 %v2933_v38  ;;  %3708 = vmatpush1.bf16.msra.mxu1 %v15192_v50  ;;  %v15275_v50 = vld [vmem:[#allocation7 + $0x3c4] ss:$16 sps:$4 sm:$0xff]  }
 0x314   :  { %3739 = vmatprep.mubr.bf16.mxu1 %v2933_v38  ;;  %3623 = vmatprep.subr.bf16.mxu0 %v15197_v51  ;;  %v15278_v51 = vld [vmem:[#allocation7 + $0x3cc] ss:$16 sps:$4 sm:$0xff]   ;;  %v15273_v38 = vld [vmem:[#allocation7 + $0x3c0] ss:$16 sps:$4 sm:$0xff]  }
 0x315   :  { %3709 = vmatprep.subr.bf16.mxu1 %v15200_v49  ;;  %v15276_v49 = vld [vmem:[#allocation7 + $0x3c8] ss:$16 sps:$4 sm:$0xff]  }
 0x316   :  { %3624 = vmatpush1.bf16.msra.mxu0 %v15195_v58  ;;  %v15281_v58 = vld [vmem:[#allocation7 + $0x3e4] ss:$16 sps:$4 sm:$0xff]  }
 0x317   :  { %3710 = vmatpush1.bf16.msra.mxu1 %v15198_v59  ;;  %3625 = vmatprep.subr.bf16.mxu0 %v15203_v60  ;;  %v15284_v59 = vld [vmem:[#allocation7 + $0x3ec] ss:$16 sps:$4 sm:$0xff]   ;;  %v15279_v60 = vld [vmem:[#allocation7 + $0x3e0] ss:$16 sps:$4 sm:$0xff]  }
 0x318   :  { %3711 = vmatprep.subr.bf16.mxu1 %v15206_v61  ;;  %v15282_v61 = vld [vmem:[#allocation7 + $0x3e8] ss:$16 sps:$4 sm:$0xff]  }
 0x31a   :  { %3626 = vmatpush1.bf16.msra.mxu0 %v15201_v53  ;;  %v15287_v53 = vld [vmem:[#allocation7 + $0x404] ss:$16 sps:$4 sm:$0xff]  }
 0x31b   :  { %3712 = vmatpush1.bf16.msra.mxu1 %v15204_v62  ;;  %3627 = vmatprep.subr.bf16.mxu0 %v15209_v1  ;;  %v15290_v62 = vld [vmem:[#allocation7 + $0x40c] ss:$16 sps:$4 sm:$0xff]   ;;  %v15285_v1 = vld [vmem:[#allocation7 + $0x400] ss:$16 sps:$4 sm:$0xff]  }
 0x31c   :  { %3713 = vmatprep.subr.bf16.mxu1 %v15212_v44  ;;  %v2932_v44 = vrot.slane %v17258_v41, 1  ;;  %v15297_v41 = vld [vmem:[#allocation7 + $0x440] ss:$16 sps:$4 sm:$0xff]  }
 0x31e   :  { %3628 = vmatpush1.bf16.msra.mxu0 %v15207_v2  ;;  %v15288_v2 = vld [vmem:[#allocation7 + $0x408] ss:$16 sps:$4 sm:$0xff]  }
 0x31f   :  { %3714 = vmatpush1.bf16.msra.mxu1 %v15210_v55  ;;  %3629 = vmatprep.subr.bf16.mxu0 %v15215_v3  ;;  %v15293_v55 = vld [vmem:[#allocation7 + $0x424] ss:$16 sps:$4 sm:$0xff]   ;;  %v15296_v3 = vld [vmem:[#allocation7 + $0x42c] ss:$16 sps:$4 sm:$0xff]  }
 0x320   :  { %3715 = vmatprep.subr.bf16.mxu1 %v15218_v4  ;;  %v15291_v4 = vld [vmem:[#allocation7 + $0x420] ss:$16 sps:$4 sm:$0xff]  }
 0x322   :  { %3630 = vmatpush1.bf16.msra.mxu0 %v15213_v5  ;;  %v15294_v5 = vld [vmem:[#allocation7 + $0x428] ss:$16 sps:$4 sm:$0xff]  }
 0x323   :  { %3716 = vmatpush1.bf16.msra.mxu1 %v15216_v0  ;;  %3631 = vmatprep.subr.bf16.mxu0 %v15221_v34  ;;  %v15299_v0 = vld [vmem:[#allocation7 + $0x444] ss:$16 sps:$4 sm:$0xff]   ;;  %v15302_v34 = vld [vmem:[#allocation7 + $0x44c] ss:$16 sps:$4 sm:$0xff]  }
 0x324   :  { %3717 = vmatprep.subr.bf16.mxu1 %v15224_v57  ;;  %v15300_v57 = vld [vmem:[#allocation7 + $0x448] ss:$16 sps:$4 sm:$0xff]  }
 0x326   :  { %3632 = vmatpush1.bf16.msra.mxu0 %v15219_v7  ;;  %v15305_v7 = vld [vmem:[#allocation7 + $0x464] ss:$16 sps:$4 sm:$0xff]  }
 0x327   :  { %3718 = vmatpush1.bf16.msra.mxu1 %v15222_v42  ;;  %3633 = vmatprep.subr.bf16.mxu0 %v15227_v13  ;;  %v15308_v42 = vld [vmem:[#allocation7 + $0x46c] ss:$16 sps:$4 sm:$0xff]   ;;  %v15303_v13 = vld [vmem:[#allocation7 + $0x460] ss:$16 sps:$4 sm:$0xff]  }
 0x328   :  { %3719 = vmatprep.subr.bf16.mxu1 %v15230_v14  ;;  %v15306_v14 = vld [vmem:[#allocation7 + $0x468] ss:$16 sps:$4 sm:$0xff]  }
 0x32a   :  { %3634 = vmatpush1.bf16.msra.mxu0 %v15225_v15  ;;  %v15311_v15 = vld [vmem:[#allocation7 + $0x484] ss:$16 sps:$4 sm:$0xff]  }
 0x32b   :  { %3720 = vmatpush1.bf16.msra.mxu1 %v15228_v16  ;;  %3635 = vmatprep.subr.bf16.mxu0 %v15233_v17  ;;  %v15314_v16 = vld [vmem:[#allocation7 + $0x48c] ss:$16 sps:$4 sm:$0xff]   ;;  %v15312_v17 = vld [vmem:[#allocation7 + $0x488] ss:$16 sps:$4 sm:$0xff]  }
 0x32c   :  { %3721 = vmatprep.subr.bf16.mxu1 %v15236_v18  ;;  %v15317_v18 = vld [vmem:[#allocation7 + $0x4a4] ss:$16 sps:$4 sm:$0xff]  }
 0x32e   :  { %3636 = vmatpush1.bf16.msra.mxu0 %v15231_v8  ;;  %v15320_v8 = vld [vmem:[#allocation7 + $0x4ac] ss:$16 sps:$4 sm:$0xff]  }
 0x32f   :  { %3722 = vmatpush1.bf16.msra.mxu1 %v15234_v19  ;;  %3637 = vmatprep.subr.bf16.mxu0 %v15239_v20  ;;  %v15315_v19 = vld [vmem:[#allocation7 + $0x4a0] ss:$16 sps:$4 sm:$0xff]   ;;  %v15318_v20 = vld [vmem:[#allocation7 + $0x4a8] ss:$16 sps:$4 sm:$0xff]  }
 0x330   :  { %3723 = vmatprep.subr.bf16.mxu1 %v15242_v21  ;;  %v15323_v21 = vld [vmem:[#allocation7 + $0x4c4] ss:$16 sps:$4 sm:$0xff]  }
 0x332   :  { %3638 = vmatpush1.bf16.msra.mxu0 %v15237_v22  ;;  %v15326_v22 = vld [vmem:[#allocation7 + $0x4cc] ss:$16 sps:$4 sm:$0xff]  }
 0x333   :  { %3724 = vmatpush1.bf16.msra.mxu1 %v15240_v23  ;;  %3639 = vmatprep.subr.bf16.mxu0 %v15245_v24  ;;  %v15321_v23 = vld [vmem:[#allocation7 + $0x4c0] ss:$16 sps:$4 sm:$0xff]   ;;  %v15324_v24 = vld [vmem:[#allocation7 + $0x4c8] ss:$16 sps:$4 sm:$0xff]  }
 0x334   :  { %3725 = vmatprep.subr.bf16.mxu1 %v15248_v25  ;;  %v15329_v25 = vld [vmem:[#allocation7 + $0x4e4] ss:$16 sps:$4 sm:$0xff]  }
 0x336   :  { %3640 = vmatpush1.bf16.msra.mxu0 %v15243_v26  ;;  %v15332_v26 = vld [vmem:[#allocation7 + $0x4ec] ss:$16 sps:$4 sm:$0xff]  }
 0x337   :  { %3726 = vmatpush1.bf16.msra.mxu1 %v15246_v27  ;;  %3641 = vmatprep.subr.bf16.mxu0 %v15251_v29  ;;  %v15327_v27 = vld [vmem:[#allocation7 + $0x4e0] ss:$16 sps:$4 sm:$0xff]   ;;  %v15330_v29 = vld [vmem:[#allocation7 + $0x4e8] ss:$16 sps:$4 sm:$0xff]  }
 0x338   :  { %3727 = vmatprep.subr.bf16.mxu1 %v15254_v30  ;;  %v15335_v30 = vld [vmem:[#allocation7 + $0x504] ss:$16 sps:$4 sm:$0xff]  }
 0x33a   :  { %3642 = vmatpush1.bf16.msra.mxu0 %v15249_v28  ;;  %v15338_v28 = vld [vmem:[#allocation7 + $0x50c] ss:$16 sps:$4 sm:$0xff]  }
 0x33b   :  { %3728 = vmatpush1.bf16.msra.mxu1 %v15252_v31  ;;  %3643 = vmatprep.subr.bf16.mxu0 %v15257_v32  ;;  %v15333_v31 = vld [vmem:[#allocation7 + $0x500] ss:$16 sps:$4 sm:$0xff]   ;;  %v15336_v32 = vld [vmem:[#allocation7 + $0x508] ss:$16 sps:$4 sm:$0xff]  }
 0x33c   :  { %3729 = vmatprep.subr.bf16.mxu1 %v15260_v36  ;;  %v15341_v36 = vld [vmem:[#allocation7 + $0x524] ss:$16 sps:$4 sm:$0xff]  }
 0x33e   :  { %3644 = vmatpush1.bf16.msra.mxu0 %v15255_v39  ;;  %v15344_v39 = vld [vmem:[#allocation7 + $0x52c] ss:$16 sps:$4 sm:$0xff]  }
 0x33f   :  { %3730 = vmatpush1.bf16.msra.mxu1 %v15258_v40  ;;  %3645 = vmatprep.subr.bf16.mxu0 %v15263_v33  ;;  %v15339_v40 = vld [vmem:[#allocation7 + $0x520] ss:$16 sps:$4 sm:$0xff]   ;;  %v15342_v33 = vld [vmem:[#allocation7 + $0x528] ss:$16 sps:$4 sm:$0xff]  }
 0x340   :  { %3731 = vmatprep.subr.bf16.mxu1 %v15266_v63  ;;  %v15347_v63 = vld [vmem:[#allocation7 + $0x544] ss:$16 sps:$4 sm:$0xff]  }
 0x342   :  { %3646 = vmatpush1.bf16.msra.mxu0 %v15261_v43  ;;  %v15350_v43 = vld [vmem:[#allocation7 + $0x54c] ss:$16 sps:$4 sm:$0xff]  }
 0x343   :  { %3732 = vmatpush1.bf16.msra.mxu1 %v15264_v45  ;;  %3647 = vmatprep.subr.bf16.mxu0 %v15269_v46  ;;  %v15345_v45 = vld [vmem:[#allocation7 + $0x540] ss:$16 sps:$4 sm:$0xff]   ;;  %v15348_v46 = vld [vmem:[#allocation7 + $0x548] ss:$16 sps:$4 sm:$0xff]  }
 0x344   :  { %3733 = vmatprep.subr.bf16.mxu1 %v15272_v47  ;;  %v15353_v47 = vld [vmem:[#allocation7 + $0x564] ss:$16 sps:$4 sm:$0xff]  }
 0x346   :  { %3648 = vmatpush1.bf16.msra.mxu0 %v15267_v35  ;;  %v15356_v35 = vld [vmem:[#allocation7 + $0x56c] ss:$16 sps:$4 sm:$0xff]  }
 0x347   :  { %3734 = vmatpush1.bf16.msra.mxu1 %v15270_v48  ;;  %3649 = vmatprep.subr.bf16.mxu0 %v15275_v50  ;;  %v15351_v48 = vld [vmem:[#allocation7 + $0x560] ss:$16 sps:$4 sm:$0xff]   ;;  %v15354_v50 = vld [vmem:[#allocation7 + $0x568] ss:$16 sps:$4 sm:$0xff]  }
 0x348   :  { %3735 = vmatprep.subr.bf16.mxu1 %v15278_v51  ;;  %v15359_v51 = vld [vmem:[#allocation7 + $0x584] ss:$16 sps:$4 sm:$0xff]  }
 0x34a   :  { %3650 = vmatpush1.bf16.msra.mxu0 %v15273_v38  ;;  %v15362_v38 = vld [vmem:[#allocation7 + $0x58c] ss:$16 sps:$4 sm:$0xff]  }
 0x34b   :  { %3736 = vmatpush1.bf16.msra.mxu1 %v15276_v49  ;;  %3651 = vmatprep.subr.bf16.mxu0 %v15281_v58  ;;  %v15357_v49 = vld [vmem:[#allocation7 + $0x580] ss:$16 sps:$4 sm:$0xff]   ;;  %v15360_v58 = vld [vmem:[#allocation7 + $0x588] ss:$16 sps:$4 sm:$0xff]  }
 0x34c   :  { %3737 = vmatprep.subr.bf16.mxu1 %v15284_v59  ;;  %v15365_v59 = vld [vmem:[#allocation7 + $0x5a4] ss:$16 sps:$4 sm:$0xff]  }
 0x34e   :  { %3652 = vmatpush1.bf16.msra.mxu0 %v15279_v60  ;;  %v15368_v60 = vld [vmem:[#allocation7 + $0x5ac] ss:$16 sps:$4 sm:$0xff]  }
 0x34f   :  { %3738 = vmatpush1.bf16.msra.mxu1 %v15282_v61  ;;  %4412 = vmatprep.subr.bf16.mxu0 %v15287_v53  ;;  %v15363_v61 = vld [vmem:[#allocation7 + $0x5a0] ss:$16 sps:$4 sm:$0xff]   ;;  %v15366_v53 = vld [vmem:[#allocation7 + $0x5a8] ss:$16 sps:$4 sm:$0xff]  }
 0x350   :  { %4498 = vmatprep.subr.bf16.mxu1 %v15290_v62  ;;  %v15371_v62 = vld [vmem:[#allocation7 + $0x5c4] ss:$16 sps:$4 sm:$0xff]  }
 0x351   :  { %3654 = vmatmul.mubr.bf16.vlgmr.msra.gmra.mrb[16].mxu0 %v2932_v44 }
 0x352   :  { %3740 = vmatmul.mubr.bf16.vlgmr.msra.gmra.mrb[24].mxu1 %v2932_v44  ;;  %4413 = vmatpush1.bf16.msra.mxu0 %v15285_v1  ;;  %v15374_v1 = vld [vmem:[#allocation7 + $0x5cc] ss:$16 sps:$4 sm:$0xff]   ;;  %v15369_v44 = vld [vmem:[#allocation7 + $0x5c0] ss:$16 sps:$4 sm:$0xff]  }
 0x353   :  { %4444 = vmatprep.mubr.bf16.mxu0 %v17250_v9  ;;  %4499 = vmatpush1.bf16.msra.mxu1 %v15288_v2  ;;  %v15372_v2 = vld [vmem:[#allocation7 + $0x5c8] ss:$16 sps:$4 sm:$0xff]  }
 0x354   :  { %4530 = vmatprep.mubr.bf16.mxu1 %v17250_v9  ;;  %4414 = vmatprep.subr.bf16.mxu0 %v15293_v55  ;;  %v15309_v9 = vld [vmem:[#allocation7 + $0x480] ss:$16 sps:$4 sm:$0xff]   ;;  %v15377_v55 = vld [vmem:[#allocation7 + $0x5e4] ss:$16 sps:$4 sm:$0xff]  }
 0x355   :  { %4500 = vmatprep.subr.bf16.mxu1 %v15296_v3  ;;  %v15380_v3 = vld [vmem:[#allocation7 + $0x5ec] ss:$16 sps:$4 sm:$0xff]  }
 0x356   :  { %4415 = vmatpush1.bf16.msra.mxu0 %v15291_v4  ;;  %v15375_v4 = vld [vmem:[#allocation7 + $0x5e0] ss:$16 sps:$4 sm:$0xff]  }
 0x357   :  { %4501 = vmatpush1.bf16.msra.mxu1 %v15294_v5  ;;  %4416 = vmatprep.subr.bf16.mxu0 %v15299_v0  ;;  %v15378_v5 = vld [vmem:[#allocation7 + $0x5e8] ss:$16 sps:$4 sm:$0xff]   ;;  %v15383_v0 = vld [vmem:[#allocation7 + $0x604] ss:$16 sps:$4 sm:$0xff]  }
 0x358   :  { %4502 = vmatprep.subr.bf16.mxu1 %v15302_v34  ;;  %v15386_v34 = vld [vmem:[#allocation7 + $0x60c] ss:$16 sps:$4 sm:$0xff]  }
 0x35a   :  { %4417 = vmatpush1.bf16.msra.mxu0 %v15297_v41  ;;  %v15381_v41 = vld [vmem:[#allocation7 + $0x600] ss:$16 sps:$4 sm:$0xff]  }
 0x35b   :  { %4503 = vmatpush1.bf16.msra.mxu1 %v15300_v57  ;;  %4418 = vmatprep.subr.bf16.mxu0 %v15305_v7  ;;  %v15384_v57 = vld [vmem:[#allocation7 + $0x608] ss:$16 sps:$4 sm:$0xff]   ;;  %v15389_v7 = vld [vmem:[#allocation7 + $0x624] ss:$16 sps:$4 sm:$0xff]  }
 0x35c   :  { %4504 = vmatprep.subr.bf16.mxu1 %v15308_v42  ;;  %v15392_v42 = vld [vmem:[#allocation7 + $0x62c] ss:$16 sps:$4 sm:$0xff]  }
 0x35e   :  { %4419 = vmatpush1.bf16.msra.mxu0 %v15303_v13  ;;  %v15387_v13 = vld [vmem:[#allocation7 + $0x620] ss:$16 sps:$4 sm:$0xff]  }
 0x35f   :  { %4505 = vmatpush1.bf16.msra.mxu1 %v15306_v14  ;;  %4420 = vmatprep.subr.bf16.mxu0 %v15311_v15  ;;  %v15390_v14 = vld [vmem:[#allocation7 + $0x628] ss:$16 sps:$4 sm:$0xff]   ;;  %v15395_v15 = vld [vmem:[#allocation7 + $0x644] ss:$16 sps:$4 sm:$0xff]  }
 0x360   :  { %4506 = vmatprep.subr.bf16.mxu1 %v15314_v16  ;;  %v15398_v16 = vld [vmem:[#allocation7 + $0x64c] ss:$16 sps:$4 sm:$0xff]  }
 0x362   :  { %4421 = vmatpush1.bf16.msra.mxu0 %v15309_v9  ;;  %v15393_v9 = vld [vmem:[#allocation7 + $0x640] ss:$16 sps:$4 sm:$0xff]  }
 0x363   :  { %4507 = vmatpush1.bf16.msra.mxu1 %v15312_v17  ;;  %4422 = vmatprep.subr.bf16.mxu0 %v15317_v18  ;;  %v15396_v17 = vld [vmem:[#allocation7 + $0x648] ss:$16 sps:$4 sm:$0xff]   ;;  %v15401_v18 = vld [vmem:[#allocation7 + $0x664] ss:$16 sps:$4 sm:$0xff]  }
 0x364   :  { %4508 = vmatprep.subr.bf16.mxu1 %v15320_v8  ;;  %v15399_v8 = vld [vmem:[#allocation7 + $0x660] ss:$16 sps:$4 sm:$0xff]  }
 0x366   :  { %4423 = vmatpush1.bf16.msra.mxu0 %v15315_v19  ;;  %v15402_v19 = vld [vmem:[#allocation7 + $0x668] ss:$16 sps:$4 sm:$0xff]  }
 0x367   :  { %4509 = vmatpush1.bf16.msra.mxu1 %v15318_v20  ;;  %4424 = vmatprep.subr.bf16.mxu0 %v15323_v21  ;;  %v15407_v20 = vld [vmem:[#allocation7 + $0x684] ss:$16 sps:$4 sm:$0xff]   ;;  %v15410_v21 = vld [vmem:[#allocation7 + $0x68c] ss:$16 sps:$4 sm:$0xff]  }
 0x368   :  { %4510 = vmatprep.subr.bf16.mxu1 %v15326_v22  ;;  %v15408_v22 = vld [vmem:[#allocation7 + $0x688] ss:$16 sps:$4 sm:$0xff]  }
 0x36a   :  { %4425 = vmatpush1.bf16.msra.mxu0 %v15321_v23  ;;  %v15413_v23 = vld [vmem:[#allocation7 + $0x6a4] ss:$16 sps:$4 sm:$0xff]  }
 0x36b   :  { %4511 = vmatpush1.bf16.msra.mxu1 %v15324_v24  ;;  %4426 = vmatprep.subr.bf16.mxu0 %v15329_v25  ;;  %v15416_v24 = vld [vmem:[#allocation7 + $0x6ac] ss:$16 sps:$4 sm:$0xff]   ;;  %v15411_v25 = vld [vmem:[#allocation7 + $0x6a0] ss:$16 sps:$4 sm:$0xff]  }
 0x36c   :  { %4512 = vmatprep.subr.bf16.mxu1 %v15332_v26  ;;  %v15414_v26 = vld [vmem:[#allocation7 + $0x6a8] ss:$16 sps:$4 sm:$0xff]  }
 0x36e   :  { %4427 = vmatpush1.bf16.msra.mxu0 %v15327_v27  ;;  %v15419_v27 = vld [vmem:[#allocation7 + $0x6c4] ss:$16 sps:$4 sm:$0xff]  }
 0x36f   :  { %4513 = vmatpush1.bf16.msra.mxu1 %v15330_v29  ;;  %4428 = vmatprep.subr.bf16.mxu0 %v15335_v30  ;;  %v15422_v29 = vld [vmem:[#allocation7 + $0x6cc] ss:$16 sps:$4 sm:$0xff]   ;;  %v15417_v30 = vld [vmem:[#allocation7 + $0x6c0] ss:$16 sps:$4 sm:$0xff]  }
 0x370   :  { %4514 = vmatprep.subr.bf16.mxu1 %v15338_v28  ;;  %v15420_v28 = vld [vmem:[#allocation7 + $0x6c8] ss:$16 sps:$4 sm:$0xff]  }
 0x372   :  { %4429 = vmatpush1.bf16.msra.mxu0 %v15333_v31  ;;  %v15425_v31 = vld [vmem:[#allocation7 + $0x6e4] ss:$16 sps:$4 sm:$0xff]  }
 0x373   :  { %4515 = vmatpush1.bf16.msra.mxu1 %v15336_v32  ;;  %4430 = vmatprep.subr.bf16.mxu0 %v15341_v36  ;;  %v15428_v32 = vld [vmem:[#allocation7 + $0x6ec] ss:$16 sps:$4 sm:$0xff]   ;;  %v15423_v36 = vld [vmem:[#allocation7 + $0x6e0] ss:$16 sps:$4 sm:$0xff]  }
 0x374   :  { %4516 = vmatprep.subr.bf16.mxu1 %v15344_v39  ;;  %v15426_v39 = vld [vmem:[#allocation7 + $0x6e8] ss:$16 sps:$4 sm:$0xff]  }
 0x376   :  { %4431 = vmatpush1.bf16.msra.mxu0 %v15339_v40  ;;  %v15431_v40 = vld [vmem:[#allocation7 + $0x704] ss:$16 sps:$4 sm:$0xff]  }
 0x377   :  { %4517 = vmatpush1.bf16.msra.mxu1 %v15342_v33  ;;  %4432 = vmatprep.subr.bf16.mxu0 %v15347_v63  ;;  %v15434_v33 = vld [vmem:[#allocation7 + $0x70c] ss:$16 sps:$4 sm:$0xff]   ;;  %v15429_v63 = vld [vmem:[#allocation7 + $0x700] ss:$16 sps:$4 sm:$0xff]  }
 0x378   :  { %4518 = vmatprep.subr.bf16.mxu1 %v15350_v43  ;;  %v15432_v43 = vld [vmem:[#allocation7 + $0x708] ss:$16 sps:$4 sm:$0xff]  }
 0x37a   :  { %4433 = vmatpush1.bf16.msra.mxu0 %v15345_v45  ;;  %v15437_v45 = vld [vmem:[#allocation7 + $0x724] ss:$16 sps:$4 sm:$0xff]  }
 0x37b   :  { %4519 = vmatpush1.bf16.msra.mxu1 %v15348_v46  ;;  %4434 = vmatprep.subr.bf16.mxu0 %v15353_v47  ;;  %v15440_v46 = vld [vmem:[#allocation7 + $0x72c] ss:$16 sps:$4 sm:$0xff]   ;;  %v15435_v47 = vld [vmem:[#allocation7 + $0x720] ss:$16 sps:$4 sm:$0xff]  }
 0x37c   :  { %4520 = vmatprep.subr.bf16.mxu1 %v15356_v35  ;;  %v15438_v35 = vld [vmem:[#allocation7 + $0x728] ss:$16 sps:$4 sm:$0xff]  }
 0x37e   :  { %4435 = vmatpush1.bf16.msra.mxu0 %v15351_v48  ;;  %v15443_v48 = vld [vmem:[#allocation7 + $0x744] ss:$16 sps:$4 sm:$0xff]  }
 0x37f   :  { %4521 = vmatpush1.bf16.msra.mxu1 %v15354_v50  ;;  %4436 = vmatprep.subr.bf16.mxu0 %v15359_v51  ;;  %v15446_v50 = vld [vmem:[#allocation7 + $0x74c] ss:$16 sps:$4 sm:$0xff]   ;;  %v15441_v51 = vld [vmem:[#allocation7 + $0x740] ss:$16 sps:$4 sm:$0xff]  }
 0x380   :  { %4522 = vmatprep.subr.bf16.mxu1 %v15362_v38  ;;  %v15444_v38 = vld [vmem:[#allocation7 + $0x748] ss:$16 sps:$4 sm:$0xff]  }
 0x382   :  { %4437 = vmatpush1.bf16.msra.mxu0 %v15357_v49  ;;  %v15449_v49 = vld [vmem:[#allocation7 + $0x764] ss:$16 sps:$4 sm:$0xff]  }
 0x383   :  { %4523 = vmatpush1.bf16.msra.mxu1 %v15360_v58  ;;  %4438 = vmatprep.subr.bf16.mxu0 %v15365_v59  ;;  %v15452_v58 = vld [vmem:[#allocation7 + $0x76c] ss:$16 sps:$4 sm:$0xff]   ;;  %v15447_v59 = vld [vmem:[#allocation7 + $0x760] ss:$16 sps:$4 sm:$0xff]  }
 0x384   :  { %4524 = vmatprep.subr.bf16.mxu1 %v15368_v60  ;;  %v15450_v60 = vld [vmem:[#allocation7 + $0x768] ss:$16 sps:$4 sm:$0xff]  }
 0x386   :  { %4439 = vmatpush1.bf16.msra.mxu0 %v15363_v61  ;;  %v15455_v61 = vld [vmem:[#allocation7 + $0x784] ss:$16 sps:$4 sm:$0xff]  }
 0x387   :  { %4525 = vmatpush1.bf16.msra.mxu1 %v15366_v53  ;;  %4440 = vmatprep.subr.bf16.mxu0 %v15371_v62  ;;  %v15458_v53 = vld [vmem:[#allocation7 + $0x78c] ss:$16 sps:$4 sm:$0xff]   ;;  %v15453_v62 = vld [vmem:[#allocation7 + $0x780] ss:$16 sps:$4 sm:$0xff]  }
 0x388   :  { %4526 = vmatprep.subr.bf16.mxu1 %v15374_v1  ;;  %v15456_v1 = vld [vmem:[#allocation7 + $0x788] ss:$16 sps:$4 sm:$0xff]  }
 0x38a   :  { %4441 = vmatpush1.bf16.msra.mxu0 %v15369_v44  ;;  %v15461_v44 = vld [vmem:[#allocation7 + $0x7a4] ss:$16 sps:$4 sm:$0xff]  }
 0x38b   :  { %4527 = vmatpush1.bf16.msra.mxu1 %v15372_v2  ;;  %4442 = vmatprep.subr.bf16.mxu0 %v15377_v55  ;;  %v15464_v2 = vld [vmem:[#allocation7 + $0x7ac] ss:$16 sps:$4 sm:$0xff]   ;;  %v15459_v55 = vld [vmem:[#allocation7 + $0x7a0] ss:$16 sps:$4 sm:$0xff]  }
 0x38c   :  { %4528 = vmatprep.subr.bf16.mxu1 %v15380_v3  ;;  %v15462_v3 = vld [vmem:[#allocation7 + $0x7a8] ss:$16 sps:$4 sm:$0xff]  }
 0x38e   :  { %4443 = vmatpush1.bf16.msra.mxu0 %v15375_v4  ;;  %v15467_v4 = vld [vmem:[#allocation7 + $0x7c4] ss:$16 sps:$4 sm:$0xff]  }
 0x38f   :  { %4529 = vmatpush1.bf16.msra.mxu1 %v15378_v5  ;;  %4455 = vmatprep.subr.bf16.mxu0 %v15383_v0  ;;  %v15470_v5 = vld [vmem:[#allocation7 + $0x7cc] ss:$16 sps:$4 sm:$0xff]   ;;  %v15465_v0 = vld [vmem:[#allocation7 + $0x7c0] ss:$16 sps:$4 sm:$0xff]  }
 0x390   :  { %4541 = vmatprep.subr.bf16.mxu1 %v15386_v34  ;;  %v15468_v34 = vld [vmem:[#allocation7 + $0x7c8] ss:$16 sps:$4 sm:$0xff]  }
 0x391   :  { %4445 = vmatmul.mubr.bf16.vlgmr.msra.gmra.mrb[20].mxu0 %v17252_v10 }
 0x392   :  { %4531 = vmatmul.mubr.bf16.vlgmr.msra.gmra.mrb[28].mxu1 %v17252_v10  ;;  %4456 = vmatpush1.bf16.msra.mxu0 %v15381_v41  ;;  %v15404_v10 = vld [vmem:[#allocation7 + $0x66c] ss:$16 sps:$4 sm:$0xff]   ;;  %v15473_v41 = vld [vmem:[#allocation7 + $0x7e4] ss:$16 sps:$4 sm:$0xff]  }
 0x393   :  { %4487 = vmatprep.mubr.bf16.mxu0 %v17264_v52  ;;  %4542 = vmatpush1.bf16.msra.mxu1 %v15384_v57  ;;  %v15476_v57 = vld [vmem:[#allocation7 + $0x7ec] ss:$16 sps:$4 sm:$0xff]  }
 0x394   :  { %4573 = vmatprep.mubr.bf16.mxu1 %v17264_v52  ;;  %4457 = vmatprep.subr.bf16.mxu0 %v15389_v7  ;;  %v15405_v52 = vld [vmem:[#allocation7 + $0x680] ss:$16 sps:$4 sm:$0xff]  }
 0x395   :  { %4543 = vmatprep.subr.bf16.mxu1 %v15392_v42  ;;  %v15471_v7 = vld [vmem:[#allocation7 + $0x7e0] ss:$16 sps:$4 sm:$0xff]   ;;  %v15474_v42 = vld [vmem:[#allocation7 + $0x7e8] ss:$16 sps:$4 sm:$0xff]  }
 0x396   :  { %4458 = vmatpush1.bf16.msra.mxu0 %v15387_v13  ;;  %v3750_v13 = vld [vmem:[#allocation9] sm:$0xf] }
 0x397   :  { %4544 = vmatpush1.bf16.msra.mxu1 %v15390_v14  ;;  %4459 = vmatprep.subr.bf16.mxu0 %v15395_v15  ;;  %v17289_v14 = vrot.slane %v3750_v13, %v17085_v11  ;;  %v17292_v15 = vrot.slane %v3750_v13, %v17162_v56 }
 0x398   :  { %4545 = vmatprep.subr.bf16.mxu1 %v15398_v16  ;;  %v17295_v16 = vrot.slane %v3750_v13, %v17088_v12 }
 0x39a   :  { %4460 = vmatpush1.bf16.msra.mxu0 %v15393_v9  ;;  %v17298_v9 = vrot.slane %v3750_v13, %v17158_v54 }
 0x39b   :  { %4546 = vmatpush1.bf16.msra.mxu1 %v15396_v17  ;;  %4461 = vmatprep.subr.bf16.mxu0 %v15401_v18 }
 0x39c   :  { %4547 = vmatprep.subr.bf16.mxu1 %v15404_v10 }
 0x39e   :  { %4462 = vmatpush1.bf16.msra.mxu0 %v15399_v8 }
 0x39f   :  { %4548 = vmatpush1.bf16.msra.mxu1 %v15402_v19  ;;  %4463 = vmatprep.subr.bf16.mxu0 %v15407_v20 }
 0x3a0   :  { %4549 = vmatprep.subr.bf16.mxu1 %v15410_v21 }
 0x3a2   :  { %4464 = vmatpush1.bf16.msra.mxu0 %v15405_v52 }
 0x3a3   :  { %4550 = vmatpush1.bf16.msra.mxu1 %v15408_v22  ;;  %4465 = vmatprep.subr.bf16.mxu0 %v15413_v23 }
 0x3a4   :  { %4551 = vmatprep.subr.bf16.mxu1 %v15416_v24 }
 0x3a6   :  { %4466 = vmatpush1.bf16.msra.mxu0 %v15411_v25 }
 0x3a7   :  { %4552 = vmatpush1.bf16.msra.mxu1 %v15414_v26  ;;  %4467 = vmatprep.subr.bf16.mxu0 %v15419_v27 }
 0x3a8   :  { %4553 = vmatprep.subr.bf16.mxu1 %v15422_v29 }
 0x3aa   :  { %4468 = vmatpush1.bf16.msra.mxu0 %v15417_v30 }
 0x3ab   :  { %4554 = vmatpush1.bf16.msra.mxu1 %v15420_v28  ;;  %4469 = vmatprep.subr.bf16.mxu0 %v15425_v31 }
 0x3ac   :  { %4555 = vmatprep.subr.bf16.mxu1 %v15428_v32 }
 0x3ae   :  { %4470 = vmatpush1.bf16.msra.mxu0 %v15423_v36 }
 0x3af   :  { %4556 = vmatpush1.bf16.msra.mxu1 %v15426_v39  ;;  %4471 = vmatprep.subr.bf16.mxu0 %v15431_v40 }
 0x3b0   :  { %4557 = vmatprep.subr.bf16.mxu1 %v15434_v33 }
 0x3b2   :  { %4472 = vmatpush1.bf16.msra.mxu0 %v15429_v63 }
 0x3b3   :  { %4558 = vmatpush1.bf16.msra.mxu1 %v15432_v43  ;;  %4473 = vmatprep.subr.bf16.mxu0 %v15437_v45  ;;  %v15512_v43 = vld [vmem:[#allocation10 + $0x8ac] ss:$16 sps:$4 sm:$0xff]  }
 0x3b4   :  { %4559 = vmatprep.subr.bf16.mxu1 %v15440_v46 }
 0x3b6   :  { %4474 = vmatpush1.bf16.msra.mxu0 %v15435_v47 }
 0x3b7   :  { %4560 = vmatpush1.bf16.msra.mxu1 %v15438_v35  ;;  %4475 = vmatprep.subr.bf16.mxu0 %v15443_v48  ;;  %v13367_v35 = vld [vmem:[%s18048_s6 + $0x18] sm:$0xff]  ;;  %v13368_v48 = vld [vmem:[%s18048_s6 + $0x20] sm:$0xff] }
 0x3b8   :  { %4561 = vmatprep.subr.bf16.mxu1 %v15446_v50  ;;  %v13369_v50 = vld [vmem:[%s18048_s6 + $0x28] sm:$0xf] }
 0x3ba   :  { %4476 = vmatpush1.bf16.msra.mxu0 %v15441_v51 }
 0x3bb   :  { %4562 = vmatpush1.bf16.msra.mxu1 %v15444_v38  ;;  %4477 = vmatprep.subr.bf16.mxu0 %v15449_v49 }
 0x3bc   :  { %4563 = vmatprep.subr.bf16.mxu1 %v15452_v58 }
 0x3be   :  { %4478 = vmatpush1.bf16.msra.mxu0 %v15447_v59 }
 0x3bf   :  { %4564 = vmatpush1.bf16.msra.mxu1 %v15450_v60  ;;  %4479 = vmatprep.subr.bf16.mxu0 %v15455_v61 }
 0x3c0   :  { %4565 = vmatprep.subr.bf16.mxu1 %v15458_v53 }
 0x3c2   :  { %4480 = vmatpush1.bf16.msra.mxu0 %v15453_v62 }
 0x3c3   :  { %4566 = vmatpush1.bf16.msra.mxu1 %v15456_v1  ;;  %4481 = vmatprep.subr.bf16.mxu0 %v15461_v44 }
 0x3c4   :  { %4567 = vmatprep.subr.bf16.mxu1 %v15464_v2 }
 0x3c6   :  { %4482 = vmatpush1.bf16.msra.mxu0 %v15459_v55 }
 0x3c7   :  { %4568 = vmatpush1.bf16.msra.mxu1 %v15462_v3  ;;  %4483 = vmatprep.subr.bf16.mxu0 %v15467_v4 }
 0x3c8   :  { %4569 = vmatprep.subr.bf16.mxu1 %v15470_v5 }
 0x3ca   :  { %4484 = vmatpush1.bf16.msra.mxu0 %v15465_v0 }
 0x3cb   :  { %4570 = vmatpush1.bf16.msra.mxu1 %v15468_v34  ;;  %4485 = vmatprep.subr.bf16.mxu0 %v15473_v41 }
 0x3cc   :  { %4571 = vmatprep.subr.bf16.mxu1 %v15476_v57 }
 0x3ce   :  { %4486 = vmatpush1.bf16.msra.mxu0 %v15471_v7 }
 0x3cf   :  { %4572 = vmatpush1.bf16.msra.mxu1 %v15474_v42 }
 0x3d1   :  { %4488 = vmatmul.mubr.bf16.vlgmr.msra.gmra.mrb[20].mxu0 %v17271_v37 }
 0x3d2   :  { %4574 = vmatmul.mubr.bf16.vlgmr.msra.gmra.mrb[28].mxu1 %v17271_v37  ;;  %4701 = vmatprep.mubr.f32.mxu0 %v16860_v6 }
 0x3d3   :  { %4784 = vmatprep.mubr.f32.mxu1 %v16860_v6 }
 0x424   :  { %v3655_v17 = vpop.f32.mrb[16].mxu0 }
 0x425   :  { %v4592_v37 = vadd.f32 %v17289_v14, %v3655_v17  ;;  %v3741_v18 = vpop.f32.mrb[24].mxu1  ;;  %v3657_v10 = vpop.f32.mrb[17].mxu0 }
 0x426   :  { %v4594_v8 = vadd.f32 %v17292_v15, %v3741_v18  ;;  %v4593_v19 = vadd.f32 %v17295_v16, %v3657_v10  ;;  %v3743_v20 = vpop.f32.mrb[25].mxu1  ;;  %v3659_v21 = vpop.f32.mrb[18].mxu0  ;;  %v15479_v10 = vld [vmem:[#allocation10 + $0x804] ss:$16 sps:$4 sm:$0xff]  }
 0x427   :  { %v4595_v52 = vadd.f32 %v17298_v9, %v3743_v20  ;;  %v4596_v22 = vadd.f32 %v17289_v14, %v3659_v21  ;;  %v3745_v23 = vpop.f32.mrb[26].mxu1  ;;  %v3661_v24 = vpop.f32.mrb[19].mxu0  ;;  %v4600_v29 = vmax.f32 %v4592_v37, 0.0  ;;  %v15485_v20 = vld [vmem:[#allocation10 + $0x824] ss:$16 sps:$4 sm:$0xff]  }
 0x428   :  { %v4598_v25 = vadd.f32 %v17292_v15, %v3745_v23  ;;  %v4597_v26 = vadd.f32 %v17295_v16, %v3661_v24  ;;  %v3747_v27 = vpop.f32.mrb[27].mxu1  ;;  %v4602_v31 = vmax.f32 %v4594_v8, 0.0  ;;  %v4601_v32 = vmax.f32 %v4593_v19, 0.0  ;;  %v15482_v19 = vld [vmem:[#allocation10 + $0x80c] ss:$16 sps:$4 sm:$0xff]  }
 0x429   :  { %v4604_v30 = vmax.f32 %v4596_v22, 0.0  ;;  %v4599_v28 = vadd.f32 %v17298_v9, %v3747_v27  ;;  %v4603_v40 = vmax.f32 %v4595_v52, 0.0  ;;  %v15488_v21 = vld [vmem:[#allocation10 + $0x82c] ss:$16 sps:$4 sm:$0xff]   ;;  %v4609_v52 = vld [vmem:[%s18048_s6 + $0x8] sm:$0xff] }
 0x42a   :  { %v4606_v36 = vmax.f32 %v4598_v25, 0.0  ;;  %v4605_v39 = vmax.f32 %v4597_v26, 0.0  ;;  %v15483_v22 = vld [vmem:[#allocation10 + $0x820] ss:$16 sps:$4 sm:$0xff]   ;;  %v15486_v23 = vld [vmem:[#allocation10 + $0x828] ss:$16 sps:$4 sm:$0xff]  }
 0x42b   :  { %v14663_v33 = vpack.c.bf16 %v4604_v30, %v4600_v29  ;;  %v4607_v63 = vmax.f32 %v4599_v28, 0.0  ;;  %v15491_v24 = vld [vmem:[#allocation10 + $0x844] ss:$16 sps:$4 sm:$0xff]   ;;  %v15494_v25 = vld [vmem:[#allocation10 + $0x84c] ss:$16 sps:$4 sm:$0xff]  }
 0x42c   :  { %v14669_v45 = vpack.c.bf16 %v4606_v36, %v4602_v31  ;;  %v14660_v46 = vpack.c.bf16 %v4605_v39, %v4601_v32  ;;  %v4610_v26 = vld [vmem:[%s18048_s6 + $0x10] sm:$0xf]  ;;  %v15489_v27 = vld [vmem:[#allocation10 + $0x840] ss:$16 sps:$4 sm:$0xff]   ;;  %v15497_v30 = vld [vmem:[#allocation10 + $0x864] ss:$16 sps:$4 sm:$0xff]  }
 0x42d   :  { %v14666_v47 = vpack.c.bf16 %v4607_v63, %v4603_v40  ;;  %v15492_v29 = vld [vmem:[#allocation10 + $0x848] ss:$16 sps:$4 sm:$0xff]   ;;  %v15500_v28 = vld [vmem:[#allocation10 + $0x86c] ss:$16 sps:$4 sm:$0xff]   ;;  %v15495_v31 = vld [vmem:[#allocation10 + $0x860] ss:$16 sps:$4 sm:$0xff]  }
 0x42e   :  { %14662 = vmatprep.subr.msk.bf16.mxu0 %vm17309_vm4, %v14660_v46  ;;  %v15498_v32 = vld [vmem:[#allocation10 + $0x868] ss:$16 sps:$4 sm:$0xff]   ;;  %v15503_v36 = vld [vmem:[#allocation10 + $0x884] ss:$16 sps:$4 sm:$0xff]   ;;  %v15506_v39 = vld [vmem:[#allocation10 + $0x88c] ss:$16 sps:$4 sm:$0xff]  }
 0x42f   :  { %14668 = vmatprep.subr.msk.bf16.mxu1 %vm17309_vm4, %v14666_v47  ;;  %14665 = vmatpush1.bf16.msk.msra.mxu0 %vm17309_vm4, %v14663_v33  ;;  %v15501_v40 = vld [vmem:[#allocation10 + $0x880] ss:$16 sps:$4 sm:$0xff]   ;;  %v15504_v33 = vld [vmem:[#allocation10 + $0x888] ss:$16 sps:$4 sm:$0xff]   ;;  %v15509_v63 = vld [vmem:[#allocation10 + $0x8a4] ss:$16 sps:$4 sm:$0xff]  }
 0x430   :  { %14671 = vmatpush1.bf16.msk.msra.mxu1 %vm17309_vm4, %v14669_v45  ;;  %v15507_v45 = vld [vmem:[#allocation10 + $0x8a0] ss:$16 sps:$4 sm:$0xff]   ;;  %v15510_v46 = vld [vmem:[#allocation10 + $0x8a8] ss:$16 sps:$4 sm:$0xff]   ;;  %v15515_v47 = vld [vmem:[#allocation10 + $0x8c4] ss:$16 sps:$4 sm:$0xff]  }
 0x432   :  { %13372 = vmatmul.mubr.msk.f32.vlgmr.msra.gmra.mrb[24].mxu0 %vm4615_vm5, %v13367_v35 }
 0x433   :  { %4707 = vmatprep.mubr.f32.mxu0 %v16860_v6  ;;  %13377 = vmatmul.mubr.msk.f32.vlgmr.msra.gmra.mrb[32].mxu1 %vm4615_vm5, %v13367_v35  ;;  %v15518_v35 = vld [vmem:[#allocation10 + $0x8cc] ss:$16 sps:$4 sm:$0xff]  }
 0x434   :  { %4790 = vmatprep.mubr.f32.mxu1 %v16860_v6 }
 0x436   :  { %13373 = vmatmul.mubr.msk.f32.gmra.mrb[26].mxu0 %vm4615_vm5, %v13368_v48 }
 0x437   :  { %4713 = vmatprep.mubr.f32.mxu0 %v16860_v6  ;;  %13378 = vmatmul.mubr.msk.f32.gmra.mrb[34].mxu1 %vm4615_vm5, %v13368_v48  ;;  %v15513_v48 = vld [vmem:[#allocation10 + $0x8c0] ss:$16 sps:$4 sm:$0xff]  }
 0x438   :  { %4796 = vmatprep.mubr.f32.mxu1 %v16860_v6 }
 0x43a   :  { %13374 = vmatmul.mubr.msk.f32.gmra.mrb[28].mxu0 %vm4615_vm5, %v13369_v50 }
 0x43b   :  { %4888 = vmatprep.mubr.f32.mxu0 %v16860_v6  ;;  %13379 = vmatmul.mubr.msk.f32.gmra.mrb[36].mxu1 %vm4615_vm5, %v13369_v50  ;;  %v15516_v50 = vld [vmem:[#allocation10 + $0x8c8] ss:$16 sps:$4 sm:$0xff]  }
 0x43c   :  { %4971 = vmatprep.mubr.f32.mxu1 %v16860_v6 }
 0x4a4   :  { %v4489_v51 = vpop.f32.mrb[20].mxu0 }
 0x4a5   :  { %v14716_v38 = vadd.f32 %v4489_v51, %v17289_v14  ;;  %v4575_v49 = vpop.f32.mrb[28].mxu1  ;;  %v4491_v58 = vpop.f32.mrb[21].mxu0  ;;  %v15521_v51 = vld [vmem:[#allocation10 + $0x8e4] ss:$16 sps:$4 sm:$0xff]  }
 0x4a6   :  { %v14720_v59 = vadd.f32 %v4575_v49, %v17292_v15  ;;  %v14717_v60 = vadd.f32 %v4491_v58, %v17295_v16  ;;  %v4577_v61 = vpop.f32.mrb[29].mxu1  ;;  %v4493_v53 = vpop.f32.mrb[22].mxu0  ;;  %v15519_v49 = vld [vmem:[#allocation10 + $0x8e0] ss:$16 sps:$4 sm:$0xff]   ;;  %v15522_v58 = vld [vmem:[#allocation10 + $0x8e8] ss:$16 sps:$4 sm:$0xff]  }
 0x4a7   :  { %v14721_v62 = vadd.f32 %v4577_v61, %v17298_v9  ;;  %v14718_v1 = vadd.f32 %v4493_v53, %v17289_v14  ;;  %v4579_v44 = vpop.f32.mrb[30].mxu1  ;;  %v4495_v2 = vpop.f32.mrb[23].mxu0  ;;  %v4584_v5 = vmax.f32 %v14716_v38, 0.0  ;;  %v15524_v38 = vld [vmem:[#allocation10 + $0x8ec] ss:$16 sps:$4 sm:$0xff]  }
 0x4a8   :  { %v14722_v55 = vadd.f32 %v4579_v44, %v17292_v15  ;;  %v14719_v3 = vadd.f32 %v4495_v2, %v17295_v16  ;;  %v4581_v4 = vpop.f32.mrb[31].mxu1  ;;  %v4586_v41 = vmax.f32 %v14720_v59, 0.0  ;;  %v4585_v57 = vmax.f32 %v14717_v60, 0.0  ;;  %v4608_v15 = vld [vmem:[%s18048_s6] sm:$0xff]  ;;  %v15527_v59 = vld [vmem:[#allocation10 + $0x904] ss:$16 sps:$4 sm:$0xff]  }
 0x4a9   :  { %v4588_v0 = vmax.f32 %v14718_v1, 0.0  ;;  %v14723_v34 = vadd.f32 %v4581_v4, %v17298_v9  ;;  %v4587_v13 = vmax.f32 %v14721_v62, 0.0  ;;  %v15477_v16 = vld [vmem:[#allocation10 + $0x800] ss:$16 sps:$4 sm:$0xff]   ;;  %v15480_v9 = vld [vmem:[#allocation10 + $0x808] ss:$16 sps:$4 sm:$0xff]  }
 0x4aa   :  { %v4590_v7 = vmax.f32 %v14722_v55, 0.0  ;;  %v4589_v42 = vmax.f32 %v14719_v3, 0.0  ;;  %v15530_v60 = vld [vmem:[#allocation10 + $0x90c] ss:$16 sps:$4 sm:$0xff]   ;;  %v15525_v61 = vld [vmem:[#allocation10 + $0x900] ss:$16 sps:$4 sm:$0xff]  }
 0x4ab   :  { %v14675_v17 = vpack.c.bf16 %v4588_v0, %v4584_v5  ;;  %v4591_v37 = vmax.f32 %v14723_v34, 0.0  ;;  %v15528_v53 = vld [vmem:[#allocation10 + $0x908] ss:$16 sps:$4 sm:$0xff]   ;;  %v15533_v62 = vld [vmem:[#allocation10 + $0x924] ss:$16 sps:$4 sm:$0xff]  }
 0x4ac   :  { %v14681_v18 = vpack.c.bf16 %v4590_v7, %v4586_v41  ;;  %v14672_v14 = vpack.c.bf16 %v4589_v42, %v4585_v57  ;;  %v15536_v1 = vld [vmem:[#allocation10 + $0x92c] ss:$16 sps:$4 sm:$0xff]   ;;  %v15531_v44 = vld [vmem:[#allocation10 + $0x920] ss:$16 sps:$4 sm:$0xff]   ;;  %v15534_v2 = vld [vmem:[#allocation10 + $0x928] ss:$16 sps:$4 sm:$0xff]  }
 0x4ad   :  { %v14678_v8 = vpack.c.bf16 %v4591_v37, %v4587_v13  ;;  %v15539_v55 = vld [vmem:[#allocation10 + $0x944] ss:$16 sps:$4 sm:$0xff]   ;;  %v15542_v3 = vld [vmem:[#allocation10 + $0x94c] ss:$16 sps:$4 sm:$0xff]   ;;  %v15537_v4 = vld [vmem:[#allocation10 + $0x940] ss:$16 sps:$4 sm:$0xff]  }
 0x4ae   :  { %14674 = vmatprep.subr.msk.bf16.mxu0 %vm17309_vm4, %v14672_v14  ;;  %v15540_v5 = vld [vmem:[#allocation10 + $0x948] ss:$16 sps:$4 sm:$0xff]   ;;  %v15545_v0 = vld [vmem:[#allocation10 + $0x964] ss:$16 sps:$4 sm:$0xff]   ;;  %v15548_v34 = vld [vmem:[#allocation10 + $0x96c] ss:$16 sps:$4 sm:$0xff]  }
 0x4af   :  { %14680 = vmatprep.subr.msk.bf16.mxu1 %vm17309_vm4, %v14678_v8  ;;  %14677 = vmatpush1.bf16.msk.msra.mxu0 %vm17309_vm4, %v14675_v17  ;;  %v15543_v41 = vld [vmem:[#allocation10 + $0x960] ss:$16 sps:$4 sm:$0xff]   ;;  %v15546_v57 = vld [vmem:[#allocation10 + $0x968] ss:$16 sps:$4 sm:$0xff]   ;;  %v15551_v42 = vld [vmem:[#allocation10 + $0x984] ss:$16 sps:$4 sm:$0xff]  }
 0x4b0   :  { %14683 = vmatpush1.bf16.msk.msra.mxu1 %vm17309_vm4, %v14681_v18  ;;  %6093 = vmatprep.subr.bf16.mxu0 %v15479_v10  ;;  %v15549_v7 = vld [vmem:[#allocation10 + $0x980] ss:$16 sps:$4 sm:$0xff]   ;;  %v15552_v13 = vld [vmem:[#allocation10 + $0x988] ss:$16 sps:$4 sm:$0xff]   ;;  %v15554_v17 = vld [vmem:[#allocation10 + $0x98c] ss:$16 sps:$4 sm:$0xff]  }
 0x4b1   :  { %6195 = vmatprep.subr.bf16.mxu1 %v15482_v19  ;;  %v15557_v37 = vld [vmem:[#allocation10 + $0x9a4] ss:$16 sps:$4 sm:$0xff]   ;;  %v15560_v18 = vld [vmem:[#allocation10 + $0x9ac] ss:$16 sps:$4 sm:$0xff]   ;;  %v15555_v14 = vld [vmem:[#allocation10 + $0x9a0] ss:$16 sps:$4 sm:$0xff]  }
 0x4b2   :  { %13382 = vmatmul.mubr.msk.f32.vlgmr.msra.gmra.mrb[24].mxu0 %vm4615_vm5, %v4608_v15  ;;  %v15558_v10 = vld [vmem:[#allocation10 + $0x9a8] ss:$16 sps:$4 sm:$0xff]   ;;  %v15563_v8 = vld [vmem:[#allocation10 + $0x9c4] ss:$16 sps:$4 sm:$0xff]   ;;  %v15566_v19 = vld [vmem:[#allocation10 + $0x9cc] ss:$16 sps:$4 sm:$0xff]  }
 0x4b3   :  { %4894 = vmatprep.mubr.f32.mxu0 %v16860_v6  ;;  %13387 = vmatmul.mubr.msk.f32.vlgmr.msra.gmra.mrb[32].mxu1 %vm4615_vm5, %v4608_v15  ;;  %v15561_v15 = vld [vmem:[#allocation10 + $0x9c0] ss:$16 sps:$4 sm:$0xff]  }
 0x4b4   :  { %4977 = vmatprep.mubr.f32.mxu1 %v16860_v6  ;;  %6094 = vmatpush1.bf16.msra.mxu0 %v15477_v16  ;;  %v15564_v16 = vld [vmem:[#allocation10 + $0x9c8] ss:$16 sps:$4 sm:$0xff]  }
 0x4b5   :  { %6196 = vmatpush1.bf16.msra.mxu1 %v15480_v9  ;;  %6095 = vmatprep.subr.bf16.mxu0 %v15485_v20  ;;  %v15567_v9 = vld [vmem:[#allocation10 + $0x9e0] ss:$16 sps:$4 sm:$0xff]   ;;  %v15569_v20 = vld [vmem:[#allocation10 + $0x9e4] ss:$16 sps:$4 sm:$0xff]  }
 0x4b6   :  { %13383 = vmatmul.mubr.msk.f32.gmra.mrb[26].mxu0 %vm4615_vm5, %v4609_v52  ;;  %6197 = vmatprep.subr.bf16.mxu1 %v15488_v21  ;;  %v15570_v21 = vld [vmem:[#allocation10 + $0x9e8] ss:$16 sps:$4 sm:$0xff]  }
 0x4b7   :  { %4900 = vmatprep.mubr.f32.mxu0 %v16860_v6  ;;  %13388 = vmatmul.mubr.msk.f32.gmra.mrb[34].mxu1 %vm4615_vm5, %v4609_v52  ;;  %v15572_v52 = vld [vmem:[#allocation10 + $0x9ec] ss:$16 sps:$4 sm:$0xff]  }
 0x4b8   :  { %4983 = vmatprep.mubr.f32.mxu1 %v16860_v6  ;;  %6096 = vmatpush1.bf16.msra.mxu0 %v15483_v22  ;;  %v15575_v22 = vld [vmem:[#allocation10 + $0xa04] ss:$16 sps:$4 sm:$0xff]  }
 0x4b9   :  { %6198 = vmatpush1.bf16.msra.mxu1 %v15486_v23  ;;  %6097 = vmatprep.subr.bf16.mxu0 %v15491_v24  ;;  %v15578_v23 = vld [vmem:[#allocation10 + $0xa0c] ss:$16 sps:$4 sm:$0xff]  }
 0x4ba   :  { %13384 = vmatmul.mubr.msk.f32.gmra.mrb[28].mxu0 %vm4615_vm5, %v4610_v26  ;;  %6199 = vmatprep.subr.bf16.mxu1 %v15494_v25 }
 0x4bb   :  { %13389 = vmatmul.mubr.msk.f32.gmra.mrb[36].mxu1 %vm4615_vm5, %v4610_v26 }
 0x4bc   :  { %6098 = vmatpush1.bf16.msra.mxu0 %v15489_v27 }
 0x4bd   :  { %6200 = vmatpush1.bf16.msra.mxu1 %v15492_v29  ;;  %6099 = vmatprep.subr.bf16.mxu0 %v15497_v30 }
 0x4be   :  { %6201 = vmatprep.subr.bf16.mxu1 %v15500_v28 }
 0x4c0   :  { %6100 = vmatpush1.bf16.msra.mxu0 %v15495_v31 }
 0x4c1   :  { %6202 = vmatpush1.bf16.msra.mxu1 %v15498_v32  ;;  %6101 = vmatprep.subr.bf16.mxu0 %v15503_v36 }
 0x4c2   :  { %6203 = vmatprep.subr.bf16.mxu1 %v15506_v39 }
 0x4c4   :  { %6102 = vmatpush1.bf16.msra.mxu0 %v15501_v40 }
 0x4c5   :  { %6204 = vmatpush1.bf16.msra.mxu1 %v15504_v33  ;;  %6103 = vmatprep.subr.bf16.mxu0 %v15509_v63 }
 0x4c6   :  { %6205 = vmatprep.subr.bf16.mxu1 %v15512_v43 }
 0x4c8   :  { %6104 = vmatpush1.bf16.msra.mxu0 %v15507_v45 }
 0x4c9   :  { %6206 = vmatpush1.bf16.msra.mxu1 %v15510_v46  ;;  %6105 = vmatprep.subr.bf16.mxu0 %v15515_v47 }
 0x4ca   :  { %6207 = vmatprep.subr.bf16.mxu1 %v15518_v35 }
 0x4cc   :  { %6106 = vmatpush1.bf16.msra.mxu0 %v15513_v48 }
 0x4cd   :  { %6208 = vmatpush1.bf16.msra.mxu1 %v15516_v50  ;;  %6107 = vmatprep.subr.bf16.mxu0 %v15521_v51 }
 0x4ce   :  { %6209 = vmatprep.subr.bf16.mxu1 %v15524_v38 }
 0x4d0   :  { %6108 = vmatpush1.bf16.msra.mxu0 %v15519_v49 }
 0x4d1   :  { %6210 = vmatpush1.bf16.msra.mxu1 %v15522_v58  ;;  %6109 = vmatprep.subr.bf16.mxu0 %v15527_v59 }
 0x4d2   :  { %6211 = vmatprep.subr.bf16.mxu1 %v15530_v60 }
 0x4d4   :  { %6110 = vmatpush1.bf16.msra.mxu0 %v15525_v61 }
 0x4d5   :  { %6212 = vmatpush1.bf16.msra.mxu1 %v15528_v53  ;;  %6111 = vmatprep.subr.bf16.mxu0 %v15533_v62 }
 0x4d6   :  { %6213 = vmatprep.subr.bf16.mxu1 %v15536_v1 }
 0x4d8   :  { %6112 = vmatpush1.bf16.msra.mxu0 %v15531_v44 }
 0x4d9   :  { %6214 = vmatpush1.bf16.msra.mxu1 %v15534_v2  ;;  %6113 = vmatprep.subr.bf16.mxu0 %v15539_v55  ;;  %v15573_v2 = vld [vmem:[#allocation10 + $0xa00] ss:$16 sps:$4 sm:$0xff]   ;;  %v15576_v55 = vld [vmem:[#allocation10 + $0xa08] ss:$16 sps:$4 sm:$0xff]  }
 0x4da   :  { %6215 = vmatprep.subr.bf16.mxu1 %v15542_v3 }
 0x4dc   :  { %6114 = vmatpush1.bf16.msra.mxu0 %v15537_v4 }
 0x4dd   :  { %6216 = vmatpush1.bf16.msra.mxu1 %v15540_v5  ;;  %6115 = vmatprep.subr.bf16.mxu0 %v15545_v0 }
 0x4de   :  { %6217 = vmatprep.subr.bf16.mxu1 %v15548_v34  ;;  %v15581_v34 = vld [vmem:[#allocation10 + $0xa24] ss:$16 sps:$4 sm:$0xff]  }
 0x4e0   :  { %6116 = vmatpush1.bf16.msra.mxu0 %v15543_v41  ;;  %v15584_v41 = vld [vmem:[#allocation10 + $0xa2c] ss:$16 sps:$4 sm:$0xff]  }
 0x4e1   :  { %6218 = vmatpush1.bf16.msra.mxu1 %v15546_v57  ;;  %6117 = vmatprep.subr.bf16.mxu0 %v15551_v42 }
 0x4e2   :  { %6219 = vmatprep.subr.bf16.mxu1 %v15554_v17  ;;  %v15582_v17 = vld [vmem:[#allocation10 + $0xa28] ss:$16 sps:$4 sm:$0xff]  }
 0x4e4   :  { %6118 = vmatpush1.bf16.msra.mxu0 %v15549_v7 }
 0x4e5   :  { %6220 = vmatpush1.bf16.msra.mxu1 %v15552_v13  ;;  %6119 = vmatprep.subr.bf16.mxu0 %v15557_v37  ;;  %v15579_v13 = vld [vmem:[#allocation10 + $0xa20] ss:$16 sps:$4 sm:$0xff]   ;;  %v15587_v37 = vld [vmem:[#allocation10 + $0xa44] ss:$16 sps:$4 sm:$0xff]  }
 0x4e6   :  { %6221 = vmatprep.subr.bf16.mxu1 %v15560_v18  ;;  %v15590_v18 = vld [vmem:[#allocation10 + $0xa4c] ss:$16 sps:$4 sm:$0xff]  }
 0x4e8   :  { %6120 = vmatpush1.bf16.msra.mxu0 %v15555_v14 }
 0x4e9   :  { %6222 = vmatpush1.bf16.msra.mxu1 %v15558_v10  ;;  %6121 = vmatprep.subr.bf16.mxu0 %v15563_v8 }
 0x4ea   :  { %6223 = vmatprep.subr.bf16.mxu1 %v15566_v19  ;;  %v15585_v19 = vld [vmem:[#allocation10 + $0xa40] ss:$16 sps:$4 sm:$0xff]  }
 0x4ec   :  { %6122 = vmatpush1.bf16.msra.mxu0 %v15561_v15  ;;  %v15588_v15 = vld [vmem:[#allocation10 + $0xa48] ss:$16 sps:$4 sm:$0xff]  }
 0x4ed   :  { %6224 = vmatpush1.bf16.msra.mxu1 %v15564_v16  ;;  %6123 = vmatprep.subr.bf16.mxu0 %v15569_v20  ;;  %v15596_v20 = vld [vmem:[#allocation10 + $0xa6c] ss:$16 sps:$4 sm:$0xff]  }
 0x4ee   :  { %6225 = vmatprep.subr.bf16.mxu1 %v15572_v52  ;;  %v15591_v52 = vld [vmem:[#allocation10 + $0xa60] ss:$16 sps:$4 sm:$0xff]  }
 0x4f0   :  { %6124 = vmatpush1.bf16.msra.mxu0 %v15567_v9  ;;  %v15593_v9 = vld [vmem:[#allocation10 + $0xa64] ss:$16 sps:$4 sm:$0xff]  }
 0x4f1   :  { %6226 = vmatpush1.bf16.msra.mxu1 %v15570_v21  ;;  %6144 = vmatprep.subr.bf16.mxu0 %v15575_v22  ;;  %v15594_v22 = vld [vmem:[#allocation10 + $0xa68] ss:$16 sps:$4 sm:$0xff]  }
 0x4f2   :  { %6246 = vmatprep.subr.bf16.mxu1 %v15578_v23  ;;  %v15599_v23 = vld [vmem:[#allocation10 + $0xa84] ss:$16 sps:$4 sm:$0xff]  }
 0x585   :  { %v4890_v24 = vpop.f32.mrb[24].mxu0 }
 0x586   :  { %v4892_v25 = vpop.f32.mrb[25].mxu0  ;;  %v4973_v26 = vpop.f32.mrb[32].mxu1 }
 0x587   :  { %v4975_v27 = vpop.f32.mrb[33].mxu1 }
 0x589   :  { %v4896_v29 = vpop.f32.mrb[26].mxu0 }
 0x58a   :  { %v17377_v30 = vpack.c.bf16 %v4896_v29, %v4890_v24  ;;  %v4898_v28 = vpop.f32.mrb[27].mxu0  ;;  %v4979_v31 = vpop.f32.mrb[34].mxu1  ;;  %v15602_v24 = vld [vmem:[#allocation10 + $0xa8c] ss:$16 sps:$4 sm:$0xff]  }
 0x58b   :  { %v17379_v32 = vpack.c.bf16 %v4898_v28, %v4892_v25  ;;  %v17381_v36 = vpack.c.bf16 %v4979_v31, %v4973_v26  ;;  %v4981_v39 = vpop.f32.mrb[35].mxu1  ;;  %v15597_v25 = vld [vmem:[#allocation10 + $0xa80] ss:$16 sps:$4 sm:$0xff]   ;;  %v15600_v26 = vld [vmem:[#allocation10 + $0xa88] ss:$16 sps:$4 sm:$0xff]  }
 0x58c   :  { %v5388_v40 = vshll.u32 %v17377_v30, 16  ;;  %v17384_v33 = vpack.c.bf16 %v4981_v39, %v4975_v27  ;;  %v5386_v59 = vshrl.u32 %v17377_v30, 16  ;;  %v15605_v27 = vld [vmem:[#allocation10 + $0xaa4] ss:$16 sps:$4 sm:$0xff]   ;;  %v15608_v29 = vld [vmem:[#allocation10 + $0xaac] ss:$16 sps:$4 sm:$0xff]  }
 0x58d   :  { %v4902_v63 = vpop.f32.mrb[28].mxu0  ;;  %v5400_v43 = vshll.u32 %v17379_v32, 16  ;;  %v5398_v49 = vshrl.u32 %v17379_v32, 16  ;;  %v15603_v28 = vld [vmem:[#allocation10 + $0xaa0] ss:$16 sps:$4 sm:$0xff]  }
 0x58e   :  { %v17387_v45 = vpack.c.bf16 %v4902_v63, %v4902_v63  ;;  %v4904_v46 = vpop.f32.mrb[29].mxu0  ;;  %v17389_v47 = vpop.f32.mrb[36].mxu1  ;;  %v5390_v51 = vrot.slane %v5388_v40, 1  ;;  %v5424_v61 = vshll.u32 %v17384_v33, 16  ;;  %v5422_v57 = vshrl.u32 %v17384_v33, 16 }
 0x58f   :  { %v17391_v35 = vpack.c.bf16 %v4904_v46, %v4904_v46  ;;  %v5402_v48 = vrot.slane %v5400_v43, 1  ;;  %v4987_v50 = vpop.f32.mrb[37].mxu1  ;;  %v15606_v31 = vld [vmem:[#allocation10 + $0xaa8] ss:$16 sps:$4 sm:$0xff]   ;;  %v15611_v39 = vld [vmem:[#allocation10 + $0xac4] ss:$16 sps:$4 sm:$0xff]  }
 0x590   :  { %v5393_v38 = vshll.u32 %v17387_v45, 16  ;;  %v17399_v44 = vpack.c.bf16 %v4987_v50, %v4987_v50  ;;  %v5391_v3 = vor.u32 %v5390_v51, %v5386_v59  ;;  %v5426_v7 = vrot.slane %v5424_v61, 1  ;;  %v15614_v40 = vld [vmem:[#allocation10 + $0xacc] ss:$16 sps:$4 sm:$0xff]   ;;  %v15609_v63 = vld [vmem:[#allocation10 + $0xac0] ss:$16 sps:$4 sm:$0xff]  }
 0x591   :  { %v5405_v58 = vshll.u32 %v17391_v35, 16  ;;  %v5403_v53 = vor.u32 %v5402_v48, %v5398_v49  ;;  %v5436_v1 = vshrl.u32 %v17391_v35, 16  ;;  %v5433_v14 = vshrl.u32 %v17387_v45, 16  ;;  %v15612_v43 = vld [vmem:[#allocation10 + $0xac8] ss:$16 sps:$4 sm:$0xff]  }
 0x592   :  { %v5395_v60 = vrot.slane %v5393_v38, 1  ;;  %v5429_v42 = vshll.u32 %v17399_v44, 16  ;;  %v5427_v10 = vor.u32 %v5426_v7, %v5422_v57  ;;  %v15617_v46 = vld [vmem:[#allocation10 + $0xae4] ss:$16 sps:$4 sm:$0xff]   ;;  %v15620_v48 = vld [vmem:[#allocation10 + $0xaec] ss:$16 sps:$4 sm:$0xff]  }
 0x593   :  { %v5407_v62 = vrot.slane %v5405_v58, 1  ;;  %v15615_v50 = vld [vmem:[#allocation10 + $0xae0] ss:$16 sps:$4 sm:$0xff]   ;;  %v15618_v51 = vld [vmem:[#allocation10 + $0xae8] ss:$16 sps:$4 sm:$0xff]  }
 0x594   :  { %v17409_v0 = vsel %vm5384_vm6, %v5391_v3, %v5395_v60  ;;  %v17418_v8 = vrot.slane %v5429_v42, 1  ;;  %v17420_v16 = vor.u32 %v5433_v14, %v5395_v60  ;;  %v15623_v38 = vld [vmem:[#allocation10 + $0xb04] ss:$16 sps:$4 sm:$0xff]   ;;  %v15626_v49 = vld [vmem:[#allocation10 + $0xb0c] ss:$16 sps:$4 sm:$0xff]  }
 0x595   :  { %v17402_v4 = vsel %vm5384_vm6, %v5403_v53, %v5407_v62  ;;  %v17404_v5 = vor.u32 %v5436_v1, %v5407_v62  ;;  %v15621_v58 = vld [vmem:[#allocation10 + $0xb00] ss:$16 sps:$4 sm:$0xff]   ;;  %v15624_v59 = vld [vmem:[#allocation10 + $0xb08] ss:$16 sps:$4 sm:$0xff]   ;;  %v15629_v60 = vld [vmem:[#allocation10 + $0xb24] ss:$16 sps:$4 sm:$0xff]  }
 0x596   :  { %6125 = vmatprep.mubr.bf16.mxu0 %v17402_v4  ;;  %6227 = vmatprep.mubr.bf16.mxu1 %v17402_v4  ;;  %v17426_v21 = vsel %vm5384_vm6, %v5427_v10, %v17418_v8  ;;  %v15632_v61 = vld [vmem:[#allocation10 + $0xb2c] ss:$16 sps:$4 sm:$0xff]   ;;  %v15627_v53 = vld [vmem:[#allocation10 + $0xb20] ss:$16 sps:$4 sm:$0xff]   ;;  %v15630_v62 = vld [vmem:[#allocation10 + $0xb28] ss:$16 sps:$4 sm:$0xff]  }
 0x597   :  { %6126 = vmatmul.mubr.bf16.vlgmr.msra.gmra.mrb[32].mxu0 %v17409_v0  ;;  %6228 = vmatmul.mubr.bf16.vlgmr.msra.gmra.mrb[40].mxu1 %v17409_v0  ;;  %v15635_v1 = vld [vmem:[#allocation10 + $0xb44] ss:$16 sps:$4 sm:$0xff]   ;;  %v15636_v3 = vld [vmem:[#allocation10 + $0xb48] ss:$16 sps:$4 sm:$0xff]   ;;  %v15639_v57 = vld [vmem:[#allocation10 + $0xb60] ss:$16 sps:$4 sm:$0xff]  }
 0x598   :  { %6145 = vmatpush1.bf16.msra.mxu0 %v15573_v2  ;;  %6247 = vmatpush1.bf16.msra.mxu1 %v15576_v55  ;;  %v15638_v2 = vld [vmem:[#allocation10 + $0xb4c] ss:$16 sps:$4 sm:$0xff]   ;;  %v15633_v55 = vld [vmem:[#allocation10 + $0xb40] ss:$16 sps:$4 sm:$0xff]   ;;  %v15642_v7 = vld [vmem:[#allocation10 + $0xb68] ss:$16 sps:$4 sm:$0xff]  }
 0x599   :  { %6135 = vmatprep.mubr.bf16.mxu0 %v17404_v5  ;;  %6237 = vmatprep.mubr.bf16.mxu1 %v17404_v5  ;;  %v15647_v42 = vld [vmem:[#allocation10 + $0xb84] ss:$16 sps:$4 sm:$0xff]   ;;  %v15656_v14 = vld [vmem:[#allocation10 + $0xbac] ss:$16 sps:$4 sm:$0xff]   ;;  %v15651_v10 = vld [vmem:[#allocation10 + $0xba0] ss:$16 sps:$4 sm:$0xff]  }
 0x59a   :  { %6146 = vmatprep.subr.bf16.mxu0 %v15581_v34  ;;  %6248 = vmatprep.subr.bf16.mxu1 %v15584_v41  ;;  %v15641_v34 = vld [vmem:[#allocation10 + $0xb64] ss:$16 sps:$4 sm:$0xff]   ;;  %v15644_v41 = vld [vmem:[#allocation10 + $0xb6c] ss:$16 sps:$4 sm:$0xff]  }
 0x59c   :  { %6147 = vmatpush1.bf16.msra.mxu0 %v15579_v13  ;;  %6249 = vmatpush1.bf16.msra.mxu1 %v15582_v17  ;;  %v15650_v13 = vld [vmem:[#allocation10 + $0xb8c] ss:$16 sps:$4 sm:$0xff]   ;;  %v15645_v17 = vld [vmem:[#allocation10 + $0xb80] ss:$16 sps:$4 sm:$0xff]  }
 0x59d   :  { %6148 = vmatprep.subr.bf16.mxu0 %v15587_v37  ;;  %6250 = vmatprep.subr.bf16.mxu1 %v15590_v18  ;;  %v15648_v37 = vld [vmem:[#allocation10 + $0xb88] ss:$16 sps:$4 sm:$0xff]   ;;  %v15653_v18 = vld [vmem:[#allocation10 + $0xba4] ss:$16 sps:$4 sm:$0xff]  }
 0x59f   :  { %6136 = vmatmul.mubr.bf16.gmra.mrb[36].mxu0 %v17420_v16  ;;  %6238 = vmatmul.mubr.bf16.gmra.mrb[44].mxu1 %v17420_v16 }
 0x5a0   :  { %6149 = vmatpush1.bf16.msra.mxu0 %v15585_v19  ;;  %6251 = vmatpush1.bf16.msra.mxu1 %v15588_v15  ;;  %v15654_v19 = vld [vmem:[#allocation10 + $0xba8] ss:$16 sps:$4 sm:$0xff]   ;;  %v15659_v15 = vld [vmem:[#allocation10 + $0xbc4] ss:$16 sps:$4 sm:$0xff]  }
 0x5a1   :  { %6150 = vmatprep.subr.bf16.mxu0 %v15593_v9  ;;  %6252 = vmatprep.subr.bf16.mxu1 %v15596_v20  ;;  %v15662_v9 = vld [vmem:[#allocation10 + $0xbcc] ss:$16 sps:$4 sm:$0xff]   ;;  %v17432_v20 = vpack.c.bf16 %v17389_v47, %v17389_v47  ;;  %v15666_v47 = vld [vmem:[#allocation10 + $0xbe8] ss:$16 sps:$4 sm:$0xff]  }
 0x5a2   :  { %6176 = vmatprep.mubr.bf16.mxu0 %v17426_v21  ;;  %6278 = vmatprep.mubr.bf16.mxu1 %v17426_v21 }
 0x5a4   :  { %6151 = vmatpush1.bf16.msra.mxu0 %v15591_v52  ;;  %6253 = vmatpush1.bf16.msra.mxu1 %v15594_v22  ;;  %v5412_v52 = vshll.u32 %v17381_v36, 16  ;;  %v15657_v22 = vld [vmem:[#allocation10 + $0xbc0] ss:$16 sps:$4 sm:$0xff]  }
 0x5a5   :  { %6152 = vmatprep.subr.bf16.mxu0 %v15599_v23  ;;  %6254 = vmatprep.subr.bf16.mxu1 %v15602_v24  ;;  %v15660_v23 = vld [vmem:[#allocation10 + $0xbc8] ss:$16 sps:$4 sm:$0xff]   ;;  %v15665_v24 = vld [vmem:[#allocation10 + $0xbe4] ss:$16 sps:$4 sm:$0xff]  }
 0x5a8   :  { %6153 = vmatpush1.bf16.msra.mxu0 %v15597_v25  ;;  %6255 = vmatpush1.bf16.msra.mxu1 %v15600_v26  ;;  %v15668_v25 = vld [vmem:[#allocation10 + $0xbec] ss:$16 sps:$4 sm:$0xff]   ;;  %v5410_v26 = vshrl.u32 %v17381_v36, 16 }
 0x5a9   :  { %6154 = vmatprep.subr.bf16.mxu0 %v15605_v27  ;;  %6256 = vmatprep.subr.bf16.mxu1 %v15608_v29  ;;  %v5414_v27 = vrot.slane %v5412_v52, 1  ;;  %v5417_v29 = vshll.u32 %v17432_v20, 16  ;;  %v15705_v52 = vld [vmem:[#allocation10 + $0xc0] ss:$16 sps:$4 sm:$0xff]  }
 0x5ac   :  { %6155 = vmatpush1.bf16.msra.mxu0 %v15603_v28  ;;  %6257 = vmatpush1.bf16.msra.mxu1 %v15606_v31  ;;  %v15663_v28 = vld [vmem:[#allocation10 + $0xbe0] ss:$16 sps:$4 sm:$0xff]   ;;  %v15671_v31 = vld [vmem:[#allocation10 + $0x4] ss:$16 sps:$4 sm:$0xff]  }
 0x5ad   :  { %6156 = vmatprep.subr.bf16.mxu0 %v15611_v39  ;;  %6258 = vmatprep.subr.bf16.mxu1 %v15614_v40  ;;  %v15674_v39 = vld [vmem:[#allocation10 + $0xc] ss:$16 sps:$4 sm:$0xff]   ;;  %v5415_v40 = vor.u32 %v5414_v27, %v5410_v26  ;;  %v15714_v26 = vld [vmem:[#allocation10 + $0xe8] ss:$16 sps:$4 sm:$0xff]   ;;  %v15719_v27 = vld [vmem:[#allocation10 + $0x104] ss:$16 sps:$4 sm:$0xff]  }
 0x5b0   :  { %6157 = vmatpush1.bf16.msra.mxu0 %v15609_v63  ;;  %6259 = vmatpush1.bf16.msra.mxu1 %v15612_v43  ;;  %v5419_v63 = vrot.slane %v5417_v29, 1  ;;  %v5442_v43 = vshrl.u32 %v17399_v44, 16  ;;  %v15722_v29 = vld [vmem:[#allocation10 + $0x10c] ss:$16 sps:$4 sm:$0xff]  }
 0x5b1   :  { %6158 = vmatprep.subr.bf16.mxu0 %v15617_v46  ;;  %6260 = vmatprep.subr.bf16.mxu1 %v15620_v48  ;;  %v15669_v46 = vld [vmem:[#allocation10] ss:$16 sps:$4 sm:$0xff]   ;;  %v15672_v48 = vld [vmem:[#allocation10 + $0x8] ss:$16 sps:$4 sm:$0xff]  }
 0x5b4   :  { %6159 = vmatpush1.bf16.msra.mxu0 %v15615_v50  ;;  %6261 = vmatpush1.bf16.msra.mxu1 %v15618_v51  ;;  %v17439_v50 = vsel %vm5384_vm6, %v5415_v40, %v5419_v63  ;;  %v17442_v51 = vor.u32 %v5442_v43, %v17418_v8  ;;  %v15683_v8 = vld [vmem:[#allocation10 + $0x44] ss:$16 sps:$4 sm:$0xff]   ;;  %v15723_v40 = vld [vmem:[#allocation10 + $0x120] ss:$16 sps:$4 sm:$0xff]  }
 0x5b5   :  { %6160 = vmatprep.subr.bf16.mxu0 %v15623_v38  ;;  %6262 = vmatprep.subr.bf16.mxu1 %v15626_v49  ;;  %v15677_v38 = vld [vmem:[#allocation10 + $0x24] ss:$16 sps:$4 sm:$0xff]   ;;  %v15680_v49 = vld [vmem:[#allocation10 + $0x2c] ss:$16 sps:$4 sm:$0xff]  }
 0x5b6   :  { %v15731_v43 = vld [vmem:[#allocation10 + $0x144] ss:$16 sps:$4 sm:$0xff]  }
 0x5b8   :  { %6161 = vmatpush1.bf16.msra.mxu0 %v15621_v58  ;;  %6263 = vmatpush1.bf16.msra.mxu1 %v15624_v59  ;;  %v15675_v58 = vld [vmem:[#allocation10 + $0x20] ss:$16 sps:$4 sm:$0xff]   ;;  %v15678_v59 = vld [vmem:[#allocation10 + $0x28] ss:$16 sps:$4 sm:$0xff]  }
 0x5b9   :  { %6162 = vmatprep.subr.bf16.mxu0 %v15629_v60  ;;  %6264 = vmatprep.subr.bf16.mxu1 %v15632_v61  ;;  %v5439_v60 = vshrl.u32 %v17432_v20, 16  ;;  %v15686_v61 = vld [vmem:[#allocation10 + $0x4c] ss:$16 sps:$4 sm:$0xff]  }
 0x5bc   :  { %6163 = vmatpush1.bf16.msra.mxu0 %v15627_v53  ;;  %6265 = vmatpush1.bf16.msra.mxu1 %v15630_v62  ;;  %v17450_v53 = vrot.slane %v17391_v35, 1  ;;  %v17452_v62 = vor.u32 %v5439_v60, %v5419_v63  ;;  %v15726_v63 = vld [vmem:[#allocation10 + $0x128] ss:$16 sps:$4 sm:$0xff]  }
 0x5bd   :  { %6164 = vmatprep.subr.bf16.mxu0 %v15635_v1  ;;  %6266 = vmatprep.subr.bf16.mxu1 %v15638_v2  ;;  %v15681_v1 = vld [vmem:[#allocation10 + $0x40] ss:$16 sps:$4 sm:$0xff]   ;;  %v15684_v2 = vld [vmem:[#allocation10 + $0x48] ss:$16 sps:$4 sm:$0xff]  }
 0x5be   :  { %v15738_v60 = vld [vmem:[#allocation10 + $0x168] ss:$16 sps:$4 sm:$0xff]  }
 0x5c0   :  { %6165 = vmatpush1.bf16.msra.mxu0 %v15633_v55  ;;  %6267 = vmatpush1.bf16.msra.mxu1 %v15636_v3  ;;  %v6309_v55 = vrot.slane %v17379_v32, 1  ;;  %v15689_v3 = vld [vmem:[#allocation10 + $0x64] ss:$16 sps:$4 sm:$0xff]  }
 0x5c1   :  { %6166 = vmatprep.subr.bf16.mxu0 %v15641_v34  ;;  %6268 = vmatprep.subr.bf16.mxu1 %v15644_v41  ;;  %v15692_v34 = vld [vmem:[#allocation10 + $0x6c] ss:$16 sps:$4 sm:$0xff]  }
 0x5c2   :  { %v17459_v41 = vsel %vm6305_vm7, %v6309_v55, %v17450_v53  ;;  %v15749_v55 = vld [vmem:[#allocation10 + $0x1a4] ss:$16 sps:$4 sm:$0xff]  }
 0x5c4   :  { %6167 = vmatpush1.bf16.msra.mxu0 %v15639_v57  ;;  %6269 = vmatpush1.bf16.msra.mxu1 %v15642_v7  ;;  %v15687_v57 = vld [vmem:[#allocation10 + $0x60] ss:$16 sps:$4 sm:$0xff]   ;;  %v15690_v7 = vld [vmem:[#allocation10 + $0x68] ss:$16 sps:$4 sm:$0xff]  }
 0x5c5   :  { %6168 = vmatprep.subr.bf16.mxu0 %v15647_v42  ;;  %6270 = vmatprep.subr.bf16.mxu1 %v15650_v13  ;;  %v15695_v42 = vld [vmem:[#allocation10 + $0x84] ss:$16 sps:$4 sm:$0xff]   ;;  %v15698_v13 = vld [vmem:[#allocation10 + $0x8c] ss:$16 sps:$4 sm:$0xff]  }
 0x5c8   :  { %6169 = vmatpush1.bf16.msra.mxu0 %v15645_v17  ;;  %6271 = vmatpush1.bf16.msra.mxu1 %v15648_v37  ;;  %v15693_v17 = vld [vmem:[#allocation10 + $0x80] ss:$16 sps:$4 sm:$0xff]   ;;  %v15696_v37 = vld [vmem:[#allocation10 + $0x88] ss:$16 sps:$4 sm:$0xff]  }
 0x5c9   :  { %6170 = vmatprep.subr.bf16.mxu0 %v15653_v18  ;;  %6272 = vmatprep.subr.bf16.mxu1 %v15656_v14  ;;  %v15701_v18 = vld [vmem:[#allocation10 + $0xa4] ss:$16 sps:$4 sm:$0xff]   ;;  %v15704_v14 = vld [vmem:[#allocation10 + $0xac] ss:$16 sps:$4 sm:$0xff]  }
 0x5cc   :  { %6171 = vmatpush1.bf16.msra.mxu0 %v15651_v10  ;;  %6273 = vmatpush1.bf16.msra.mxu1 %v15654_v19  ;;  %v15699_v10 = vld [vmem:[#allocation10 + $0xa0] ss:$16 sps:$4 sm:$0xff]   ;;  %v15702_v19 = vld [vmem:[#allocation10 + $0xa8] ss:$16 sps:$4 sm:$0xff]  }
 0x5cd   :  { %6172 = vmatprep.subr.bf16.mxu0 %v15659_v15  ;;  %6274 = vmatprep.subr.bf16.mxu1 %v15662_v9  ;;  %v15707_v15 = vld [vmem:[#allocation10 + $0xc4] ss:$16 sps:$4 sm:$0xff]   ;;  %v15710_v9 = vld [vmem:[#allocation10 + $0xcc] ss:$16 sps:$4 sm:$0xff]  }
 0x5d0   :  { %6173 = vmatpush1.bf16.msra.mxu0 %v15657_v22  ;;  %6275 = vmatpush1.bf16.msra.mxu1 %v15660_v23  ;;  %v15708_v22 = vld [vmem:[#allocation10 + $0xc8] ss:$16 sps:$4 sm:$0xff]   ;;  %v15713_v23 = vld [vmem:[#allocation10 + $0xe4] ss:$16 sps:$4 sm:$0xff]  }
 0x5d1   :  { %6174 = vmatprep.subr.bf16.mxu0 %v15665_v24  ;;  %6276 = vmatprep.subr.bf16.mxu1 %v15668_v25  ;;  %v15716_v24 = vld [vmem:[#allocation10 + $0xec] ss:$16 sps:$4 sm:$0xff]   ;;  %v15711_v25 = vld [vmem:[#allocation10 + $0xe0] ss:$16 sps:$4 sm:$0xff]  }
 0x5d4   :  { %6175 = vmatpush1.bf16.msra.mxu0 %v15663_v28  ;;  %6277 = vmatpush1.bf16.msra.mxu1 %v15666_v47  ;;  %v15717_v28 = vld [vmem:[#allocation10 + $0x100] ss:$16 sps:$4 sm:$0xff]   ;;  %v15720_v47 = vld [vmem:[#allocation10 + $0x108] ss:$16 sps:$4 sm:$0xff]  }
 0x5d5   :  { %6966 = vmatprep.subr.bf16.mxu0 %v15671_v31  ;;  %7068 = vmatprep.subr.bf16.mxu1 %v15674_v39  ;;  %v15725_v31 = vld [vmem:[#allocation10 + $0x124] ss:$16 sps:$4 sm:$0xff]   ;;  %v15728_v39 = vld [vmem:[#allocation10 + $0x12c] ss:$16 sps:$4 sm:$0xff]  }
 0x5d7   :  { %6177 = vmatmul.mubr.bf16.vlgmr.msra.gmra.mrb[32].mxu0 %v17439_v50  ;;  %6279 = vmatmul.mubr.bf16.vlgmr.msra.gmra.mrb[40].mxu1 %v17439_v50 }
 0x5d8   :  { %6186 = vmatprep.mubr.bf16.mxu0 %v17442_v51  ;;  %6288 = vmatprep.mubr.bf16.mxu1 %v17442_v51 }
 0x5d9   :  { %6967 = vmatpush1.bf16.msra.mxu0 %v15669_v46  ;;  %7069 = vmatpush1.bf16.msra.mxu1 %v15672_v48  ;;  %v15734_v46 = vld [vmem:[#allocation10 + $0x14c] ss:$16 sps:$4 sm:$0xff]   ;;  %v15729_v48 = vld [vmem:[#allocation10 + $0x140] ss:$16 sps:$4 sm:$0xff]  }
 0x5da   :  { %6968 = vmatprep.subr.bf16.mxu0 %v15677_v38  ;;  %7070 = vmatprep.subr.bf16.mxu1 %v15680_v49  ;;  %v15732_v38 = vld [vmem:[#allocation10 + $0x148] ss:$16 sps:$4 sm:$0xff]   ;;  %v15737_v49 = vld [vmem:[#allocation10 + $0x164] ss:$16 sps:$4 sm:$0xff]  }
 0x5dd   :  { %6969 = vmatpush1.bf16.msra.mxu0 %v15675_v58  ;;  %7071 = vmatpush1.bf16.msra.mxu1 %v15678_v59  ;;  %v15740_v58 = vld [vmem:[#allocation10 + $0x16c] ss:$16 sps:$4 sm:$0xff]   ;;  %v15735_v59 = vld [vmem:[#allocation10 + $0x160] ss:$16 sps:$4 sm:$0xff]  }
 0x5de   :  { %6970 = vmatprep.subr.bf16.mxu0 %v15683_v8  ;;  %7072 = vmatprep.subr.bf16.mxu1 %v15686_v61  ;;  %v15743_v8 = vld [vmem:[#allocation10 + $0x184] ss:$16 sps:$4 sm:$0xff]   ;;  %v15746_v61 = vld [vmem:[#allocation10 + $0x18c] ss:$16 sps:$4 sm:$0xff]  }
 0x5df   :  { %6187 = vmatmul.mubr.bf16.gmra.mrb[40].mxu0 %v17452_v62  ;;  %6289 = vmatmul.mubr.bf16.gmra.mrb[48].mxu1 %v17452_v62 }
 0x5e0   :  { %6998 = vmatprep.mubr.bf16.mxu0 %v17459_v41  ;;  %7100 = vmatprep.mubr.bf16.mxu1 %v17459_v41 }
 0x5e1   :  { %6971 = vmatpush1.bf16.msra.mxu0 %v15681_v1  ;;  %7073 = vmatpush1.bf16.msra.mxu1 %v15684_v2  ;;  %v15741_v1 = vld [vmem:[#allocation10 + $0x180] ss:$16 sps:$4 sm:$0xff]   ;;  %v15744_v2 = vld [vmem:[#allocation10 + $0x188] ss:$16 sps:$4 sm:$0xff]  }
 0x5e2   :  { %6972 = vmatprep.subr.bf16.mxu0 %v15689_v3  ;;  %7074 = vmatprep.subr.bf16.mxu1 %v15692_v34  ;;  %v15752_v3 = vld [vmem:[#allocation10 + $0x1ac] ss:$16 sps:$4 sm:$0xff]   ;;  %v15747_v34 = vld [vmem:[#allocation10 + $0x1a0] ss:$16 sps:$4 sm:$0xff]  }
 0x5e5   :  { %6973 = vmatpush1.bf16.msra.mxu0 %v15687_v57  ;;  %7075 = vmatpush1.bf16.msra.mxu1 %v15690_v7  ;;  %v15750_v57 = vld [vmem:[#allocation10 + $0x1a8] ss:$16 sps:$4 sm:$0xff]   ;;  %v15755_v7 = vld [vmem:[#allocation10 + $0x1c4] ss:$16 sps:$4 sm:$0xff]  }
 0x5e6   :  { %6974 = vmatprep.subr.bf16.mxu0 %v15695_v42  ;;  %7076 = vmatprep.subr.bf16.mxu1 %v15698_v13  ;;  %v15758_v42 = vld [vmem:[#allocation10 + $0x1cc] ss:$16 sps:$4 sm:$0xff]   ;;  %v15753_v13 = vld [vmem:[#allocation10 + $0x1c0] ss:$16 sps:$4 sm:$0xff]  }
 0x5e9   :  { %6975 = vmatpush1.bf16.msra.mxu0 %v15693_v17  ;;  %7077 = vmatpush1.bf16.msra.mxu1 %v15696_v37  ;;  %v15756_v17 = vld [vmem:[#allocation10 + $0x1c8] ss:$16 sps:$4 sm:$0xff]   ;;  %v15761_v37 = vld [vmem:[#allocation10 + $0x1e4] ss:$16 sps:$4 sm:$0xff]  }
 0x5ea   :  { %6976 = vmatprep.subr.bf16.mxu0 %v15701_v18  ;;  %7078 = vmatprep.subr.bf16.mxu1 %v15704_v14  ;;  %v15764_v18 = vld [vmem:[#allocation10 + $0x1ec] ss:$16 sps:$4 sm:$0xff]   ;;  %v15759_v14 = vld [vmem:[#allocation10 + $0x1e0] ss:$16 sps:$4 sm:$0xff]  }
 0x5ed   :  { %6977 = vmatpush1.bf16.msra.mxu0 %v15699_v10  ;;  %7079 = vmatpush1.bf16.msra.mxu1 %v15702_v19  ;;  %v15762_v10 = vld [vmem:[#allocation10 + $0x1e8] ss:$16 sps:$4 sm:$0xff]   ;;  %v15767_v19 = vld [vmem:[#allocation10 + $0x204] ss:$16 sps:$4 sm:$0xff]  }
 0x5ee   :  { %6978 = vmatprep.subr.bf16.mxu0 %v15707_v15  ;;  %7080 = vmatprep.subr.bf16.mxu1 %v15710_v9  ;;  %v15770_v15 = vld [vmem:[#allocation10 + $0x20c] ss:$16 sps:$4 sm:$0xff]   ;;  %v17464_v9 = vrot.slane %v17387_v45, 1 }
 0x5f1   :  { %6979 = vmatpush1.bf16.msra.mxu0 %v15705_v52  ;;  %7081 = vmatpush1.bf16.msra.mxu1 %v15708_v22  ;;  %v6306_v52 = vrot.slane %v17377_v30, 1  ;;  %v15765_v22 = vld [vmem:[#allocation10 + $0x200] ss:$16 sps:$4 sm:$0xff]  }
 0x5f2   :  { %6980 = vmatprep.subr.bf16.mxu0 %v15713_v23  ;;  %7082 = vmatprep.subr.bf16.mxu1 %v15716_v24  ;;  %v15768_v23 = vld [vmem:[#allocation10 + $0x208] ss:$16 sps:$4 sm:$0xff]  }
 0x5f3   :  { %v17469_v24 = vsel %vm6305_vm7, %v6306_v52, %v17464_v9  ;;  %v15824_v52 = vld [vmem:[#allocation10 + $0x32c] ss:$16 sps:$4 sm:$0xff]  }
 0x5f5   :  { %6981 = vmatpush1.bf16.msra.mxu0 %v15711_v25  ;;  %7083 = vmatpush1.bf16.msra.mxu1 %v15714_v26  ;;  %v15773_v25 = vld [vmem:[#allocation10 + $0x224] ss:$16 sps:$4 sm:$0xff]   ;;  %v15776_v26 = vld [vmem:[#allocation10 + $0x22c] ss:$16 sps:$4 sm:$0xff]  }
 0x5f6   :  { %6982 = vmatprep.subr.bf16.mxu0 %v15719_v27  ;;  %7084 = vmatprep.subr.bf16.mxu1 %v15722_v29  ;;  %v15771_v27 = vld [vmem:[#allocation10 + $0x220] ss:$16 sps:$4 sm:$0xff]   ;;  %v15774_v29 = vld [vmem:[#allocation10 + $0x228] ss:$16 sps:$4 sm:$0xff]  }
 0x5f9   :  { %6983 = vmatpush1.bf16.msra.mxu0 %v15717_v28  ;;  %7085 = vmatpush1.bf16.msra.mxu1 %v15720_v47  ;;  %v15779_v28 = vld [vmem:[#allocation10 + $0x244] ss:$16 sps:$4 sm:$0xff]   ;;  %v15782_v47 = vld [vmem:[#allocation10 + $0x24c] ss:$16 sps:$4 sm:$0xff]  }
 0x5fa   :  { %6984 = vmatprep.subr.bf16.mxu0 %v15725_v31  ;;  %7086 = vmatprep.subr.bf16.mxu1 %v15728_v39  ;;  %v17476_v31 = vrot.slane %v17399_v44, 1  ;;  %v6315_v39 = vrot.slane %v17384_v33, 1 }
 0x5fd   :  { %6985 = vmatpush1.bf16.msra.mxu0 %v15723_v40  ;;  %7087 = vmatpush1.bf16.msra.mxu1 %v15726_v63  ;;  %v15777_v40 = vld [vmem:[#allocation10 + $0x240] ss:$16 sps:$4 sm:$0xff]   ;;  %v15780_v63 = vld [vmem:[#allocation10 + $0x248] ss:$16 sps:$4 sm:$0xff]  }
 0x5fe   :  { %6986 = vmatprep.subr.bf16.mxu0 %v15731_v43  ;;  %7088 = vmatprep.subr.bf16.mxu1 %v15734_v46  ;;  %v15785_v43 = vld [vmem:[#allocation10 + $0x264] ss:$16 sps:$4 sm:$0xff]   ;;  %v15788_v46 = vld [vmem:[#allocation10 + $0x26c] ss:$16 sps:$4 sm:$0xff]  }
 0x601   :  { %6987 = vmatpush1.bf16.msra.mxu0 %v15729_v48  ;;  %7089 = vmatpush1.bf16.msra.mxu1 %v15732_v38  ;;  %v17483_v48 = vsel %vm6305_vm7, %v6315_v39, %v17476_v31  ;;  %v15783_v38 = vld [vmem:[#allocation10 + $0x260] ss:$16 sps:$4 sm:$0xff]  }
 0x602   :  { %6988 = vmatprep.subr.bf16.mxu0 %v15737_v49  ;;  %7090 = vmatprep.subr.bf16.mxu1 %v15740_v58  ;;  %v15786_v49 = vld [vmem:[#allocation10 + $0x268] ss:$16 sps:$4 sm:$0xff]   ;;  %v15791_v58 = vld [vmem:[#allocation10 + $0x284] ss:$16 sps:$4 sm:$0xff]   ;;  %v15831_v39 = vld [vmem:[#allocation10 + $0x360] ss:$16 sps:$4 sm:$0xff]  }
 0x605   :  { %6989 = vmatpush1.bf16.msra.mxu0 %v15735_v59  ;;  %7091 = vmatpush1.bf16.msra.mxu1 %v15738_v60  ;;  %v15794_v59 = vld [vmem:[#allocation10 + $0x28c] ss:$16 sps:$4 sm:$0xff]   ;;  %v15789_v60 = vld [vmem:[#allocation10 + $0x280] ss:$16 sps:$4 sm:$0xff]  }
 0x606   :  { %6990 = vmatprep.subr.bf16.mxu0 %v15743_v8  ;;  %7092 = vmatprep.subr.bf16.mxu1 %v15746_v61  ;;  %v15792_v8 = vld [vmem:[#allocation10 + $0x288] ss:$16 sps:$4 sm:$0xff]   ;;  %v15797_v61 = vld [vmem:[#allocation10 + $0x2a4] ss:$16 sps:$4 sm:$0xff]  }
 0x609   :  { %6991 = vmatpush1.bf16.msra.mxu0 %v15741_v1  ;;  %7093 = vmatpush1.bf16.msra.mxu1 %v15744_v2  ;;  %v15800_v1 = vld [vmem:[#allocation10 + $0x2ac] ss:$16 sps:$4 sm:$0xff]   ;;  %v15795_v2 = vld [vmem:[#allocation10 + $0x2a0] ss:$16 sps:$4 sm:$0xff]  }
 0x60a   :  { %6992 = vmatprep.subr.bf16.mxu0 %v15749_v55  ;;  %7094 = vmatprep.subr.bf16.mxu1 %v15752_v3  ;;  %v15798_v55 = vld [vmem:[#allocation10 + $0x2a8] ss:$16 sps:$4 sm:$0xff]   ;;  %v15803_v3 = vld [vmem:[#allocation10 + $0x2c4] ss:$16 sps:$4 sm:$0xff]  }
 0x60d   :  { %6993 = vmatpush1.bf16.msra.mxu0 %v15747_v34  ;;  %7095 = vmatpush1.bf16.msra.mxu1 %v15750_v57  ;;  %v15806_v34 = vld [vmem:[#allocation10 + $0x2cc] ss:$16 sps:$4 sm:$0xff]   ;;  %v15801_v57 = vld [vmem:[#allocation10 + $0x2c0] ss:$16 sps:$4 sm:$0xff]  }
 0x60e   :  { %6994 = vmatprep.subr.bf16.mxu0 %v15755_v7  ;;  %7096 = vmatprep.subr.bf16.mxu1 %v15758_v42  ;;  %v15804_v7 = vld [vmem:[#allocation10 + $0x2c8] ss:$16 sps:$4 sm:$0xff]   ;;  %v15809_v42 = vld [vmem:[#allocation10 + $0x2e4] ss:$16 sps:$4 sm:$0xff]  }
 0x611   :  { %6995 = vmatpush1.bf16.msra.mxu0 %v15753_v13  ;;  %7097 = vmatpush1.bf16.msra.mxu1 %v15756_v17  ;;  %v15812_v13 = vld [vmem:[#allocation10 + $0x2ec] ss:$16 sps:$4 sm:$0xff]   ;;  %v15807_v17 = vld [vmem:[#allocation10 + $0x2e0] ss:$16 sps:$4 sm:$0xff]  }
 0x612   :  { %6996 = vmatprep.subr.bf16.mxu0 %v15761_v37  ;;  %7098 = vmatprep.subr.bf16.mxu1 %v15764_v18  ;;  %v15810_v37 = vld [vmem:[#allocation10 + $0x2e8] ss:$16 sps:$4 sm:$0xff]   ;;  %v15815_v18 = vld [vmem:[#allocation10 + $0x304] ss:$16 sps:$4 sm:$0xff]  }
 0x615   :  { %6997 = vmatpush1.bf16.msra.mxu0 %v15759_v14  ;;  %7099 = vmatpush1.bf16.msra.mxu1 %v15762_v10  ;;  %v15818_v14 = vld [vmem:[#allocation10 + $0x30c] ss:$16 sps:$4 sm:$0xff]   ;;  %v15813_v10 = vld [vmem:[#allocation10 + $0x300] ss:$16 sps:$4 sm:$0xff]  }
 0x616   :  { %7017 = vmatprep.subr.bf16.mxu0 %v15767_v19  ;;  %7119 = vmatprep.subr.bf16.mxu1 %v15770_v15  ;;  %v15816_v19 = vld [vmem:[#allocation10 + $0x308] ss:$16 sps:$4 sm:$0xff]   ;;  %v15821_v15 = vld [vmem:[#allocation10 + $0x324] ss:$16 sps:$4 sm:$0xff]  }
 0x618   :  { %6999 = vmatmul.mubr.bf16.vlgmr.msra.gmra.mrb[32].mxu0 %v17469_v24  ;;  %7101 = vmatmul.mubr.bf16.vlgmr.msra.gmra.mrb[40].mxu1 %v17469_v24 }
 0x619   :  { %7008 = vmatprep.mubr.bf16.mxu0 %v17450_v53  ;;  %7018 = vmatpush1.bf16.msra.mxu0 %v15765_v22  ;;  %v15819_v22 = vld [vmem:[#allocation10 + $0x320] ss:$16 sps:$4 sm:$0xff]  }
 0x61a   :  { %7110 = vmatprep.mubr.bf16.mxu1 %v17450_v53  ;;  %7120 = vmatpush1.bf16.msra.mxu1 %v15768_v23  ;;  %v15822_v23 = vld [vmem:[#allocation10 + $0x328] ss:$16 sps:$4 sm:$0xff]  }
 0x61b   :  { %7019 = vmatprep.subr.bf16.mxu0 %v15773_v25  ;;  %7121 = vmatprep.subr.bf16.mxu1 %v15776_v26  ;;  %v15827_v25 = vld [vmem:[#allocation10 + $0x344] ss:$16 sps:$4 sm:$0xff]   ;;  %v15830_v26 = vld [vmem:[#allocation10 + $0x34c] ss:$16 sps:$4 sm:$0xff]  }
 0x61d   :  { %7020 = vmatpush1.bf16.msra.mxu0 %v15771_v27  ;;  %v15825_v27 = vld [vmem:[#allocation10 + $0x340] ss:$16 sps:$4 sm:$0xff]  }
 0x61e   :  { %7122 = vmatpush1.bf16.msra.mxu1 %v15774_v29  ;;  %7021 = vmatprep.subr.bf16.mxu0 %v15779_v28  ;;  %v15828_v29 = vld [vmem:[#allocation10 + $0x348] ss:$16 sps:$4 sm:$0xff]   ;;  %v15833_v28 = vld [vmem:[#allocation10 + $0x364] ss:$16 sps:$4 sm:$0xff]  }
 0x61f   :  { %7123 = vmatprep.subr.bf16.mxu1 %v15782_v47  ;;  %v15836_v47 = vld [vmem:[#allocation10 + $0x36c] ss:$16 sps:$4 sm:$0xff]  }
 0x620   :  { %7009 = vmatmul.mubr.bf16.gmra.mrb[44].mxu0 %v17464_v9  ;;  %7111 = vmatmul.mubr.bf16.gmra.mrb[52].mxu1 %v17464_v9 }
 0x621   :  { %7022 = vmatpush1.bf16.msra.mxu0 %v15777_v40  ;;  %7049 = vmatprep.mubr.bf16.mxu0 %v17483_v48  ;;  %v15834_v40 = vld [vmem:[#allocation10 + $0x368] ss:$16 sps:$4 sm:$0xff]  }
 0x622   :  { %7124 = vmatpush1.bf16.msra.mxu1 %v15780_v63  ;;  %7151 = vmatprep.mubr.bf16.mxu1 %v17483_v48  ;;  %v15839_v63 = vld [vmem:[#allocation10 + $0x384] ss:$16 sps:$4 sm:$0xff]  }
 0x623   :  { %7023 = vmatprep.subr.bf16.mxu0 %v15785_v43  ;;  %7125 = vmatprep.subr.bf16.mxu1 %v15788_v46  ;;  %v15842_v43 = vld [vmem:[#allocation10 + $0x38c] ss:$16 sps:$4 sm:$0xff]   ;;  %v15837_v46 = vld [vmem:[#allocation10 + $0x380] ss:$16 sps:$4 sm:$0xff]  }
 0x625   :  { %7024 = vmatpush1.bf16.msra.mxu0 %v15783_v38  ;;  %v15840_v38 = vld [vmem:[#allocation10 + $0x388] ss:$16 sps:$4 sm:$0xff]  }
 0x626   :  { %7126 = vmatpush1.bf16.msra.mxu1 %v15786_v49  ;;  %7025 = vmatprep.subr.bf16.mxu0 %v15791_v58  ;;  %v15845_v49 = vld [vmem:[#allocation10 + $0x3a4] ss:$16 sps:$4 sm:$0xff]   ;;  %v15848_v58 = vld [vmem:[#allocation10 + $0x3ac] ss:$16 sps:$4 sm:$0xff]  }
 0x627   :  { %7127 = vmatprep.subr.bf16.mxu1 %v15794_v59  ;;  %v15843_v59 = vld [vmem:[#allocation10 + $0x3a0] ss:$16 sps:$4 sm:$0xff]  }
 0x629   :  { %7026 = vmatpush1.bf16.msra.mxu0 %v15789_v60  ;;  %v15846_v60 = vld [vmem:[#allocation10 + $0x3a8] ss:$16 sps:$4 sm:$0xff]  }
 0x62a   :  { %7128 = vmatpush1.bf16.msra.mxu1 %v15792_v8  ;;  %7027 = vmatprep.subr.bf16.mxu0 %v15797_v61  ;;  %v15851_v8 = vld [vmem:[#allocation10 + $0x3c4] ss:$16 sps:$4 sm:$0xff]   ;;  %v15854_v61 = vld [vmem:[#allocation10 + $0x3cc] ss:$16 sps:$4 sm:$0xff]  }
 0x62b   :  { %7129 = vmatprep.subr.bf16.mxu1 %v15800_v1  ;;  %v15849_v1 = vld [vmem:[#allocation10 + $0x3c0] ss:$16 sps:$4 sm:$0xff]  }
 0x62d   :  { %7028 = vmatpush1.bf16.msra.mxu0 %v15795_v2  ;;  %v15852_v2 = vld [vmem:[#allocation10 + $0x3c8] ss:$16 sps:$4 sm:$0xff]  }
 0x62e   :  { %7130 = vmatpush1.bf16.msra.mxu1 %v15798_v55  ;;  %7029 = vmatprep.subr.bf16.mxu0 %v15803_v3  ;;  %v15857_v55 = vld [vmem:[#allocation10 + $0x3e4] ss:$16 sps:$4 sm:$0xff]   ;;  %v15860_v3 = vld [vmem:[#allocation10 + $0x3ec] ss:$16 sps:$4 sm:$0xff]  }
 0x62f   :  { %7131 = vmatprep.subr.bf16.mxu1 %v15806_v34  ;;  %v15855_v34 = vld [vmem:[#allocation10 + $0x3e0] ss:$16 sps:$4 sm:$0xff]  }
 0x631   :  { %7030 = vmatpush1.bf16.msra.mxu0 %v15801_v57  ;;  %v15858_v57 = vld [vmem:[#allocation10 + $0x3e8] ss:$16 sps:$4 sm:$0xff]  }
 0x632   :  { %7132 = vmatpush1.bf16.msra.mxu1 %v15804_v7  ;;  %7031 = vmatprep.subr.bf16.mxu0 %v15809_v42  ;;  %v15863_v7 = vld [vmem:[#allocation10 + $0xc04] ss:$16 sps:$4 sm:$0xff]   ;;  %v17488_v42 = vrot.slane %v17432_v20, 1 }
 0x633   :  { %7133 = vmatprep.subr.bf16.mxu1 %v15812_v13  ;;  %v6312_v13 = vrot.slane %v17381_v36, 1 }
 0x635   :  { %7032 = vmatpush1.bf16.msra.mxu0 %v15807_v17  ;;  %v15866_v17 = vld [vmem:[#allocation10 + $0xc0c] ss:$16 sps:$4 sm:$0xff]  }
 0x636   :  { %7134 = vmatpush1.bf16.msra.mxu1 %v15810_v37  ;;  %7033 = vmatprep.subr.bf16.mxu0 %v15815_v18  ;;  %v15861_v37 = vld [vmem:[#allocation10 + $0xc00] ss:$16 sps:$4 sm:$0xff]   ;;  %v17493_v18 = vsel %vm6305_vm7, %v6312_v13, %v17488_v42  ;;  %v15911_v13 = vld [vmem:[#allocation10 + $0xd04] ss:$16 sps:$4 sm:$0xff]  }
 0x637   :  { %7135 = vmatprep.subr.bf16.mxu1 %v15818_v14  ;;  %v15864_v14 = vld [vmem:[#allocation10 + $0xc08] ss:$16 sps:$4 sm:$0xff]  }
 0x639   :  { %7034 = vmatpush1.bf16.msra.mxu0 %v15813_v10  ;;  %v15869_v10 = vld [vmem:[#allocation10 + $0xc24] ss:$16 sps:$4 sm:$0xff]  }
 0x63a   :  { %7136 = vmatpush1.bf16.msra.mxu1 %v15816_v19  ;;  %7035 = vmatprep.subr.bf16.mxu0 %v15821_v15  ;;  %v15872_v19 = vld [vmem:[#allocation10 + $0xc2c] ss:$16 sps:$4 sm:$0xff]   ;;  %v15867_v15 = vld [vmem:[#allocation10 + $0xc20] ss:$16 sps:$4 sm:$0xff]  }
 0x63b   :  { %7137 = vmatprep.subr.bf16.mxu1 %v15824_v52  ;;  %v15870_v52 = vld [vmem:[#allocation10 + $0xc28] ss:$16 sps:$4 sm:$0xff]  }
 0x63d   :  { %7036 = vmatpush1.bf16.msra.mxu0 %v15819_v22  ;;  %v15875_v22 = vld [vmem:[#allocation10 + $0xc44] ss:$16 sps:$4 sm:$0xff]  }
 0x63e   :  { %7138 = vmatpush1.bf16.msra.mxu1 %v15822_v23  ;;  %7037 = vmatprep.subr.bf16.mxu0 %v15827_v25  ;;  %v15878_v23 = vld [vmem:[#allocation10 + $0xc4c] ss:$16 sps:$4 sm:$0xff]   ;;  %v15873_v25 = vld [vmem:[#allocation10 + $0xc40] ss:$16 sps:$4 sm:$0xff]  }
 0x63f   :  { %7139 = vmatprep.subr.bf16.mxu1 %v15830_v26  ;;  %v15876_v26 = vld [vmem:[#allocation10 + $0xc48] ss:$16 sps:$4 sm:$0xff]  }
 0x641   :  { %7038 = vmatpush1.bf16.msra.mxu0 %v15825_v27  ;;  %v15881_v27 = vld [vmem:[#allocation10 + $0xc64] ss:$16 sps:$4 sm:$0xff]  }
 0x642   :  { %7140 = vmatpush1.bf16.msra.mxu1 %v15828_v29  ;;  %7039 = vmatprep.subr.bf16.mxu0 %v15833_v28  ;;  %v15884_v29 = vld [vmem:[#allocation10 + $0xc6c] ss:$16 sps:$4 sm:$0xff]   ;;  %v15879_v28 = vld [vmem:[#allocation10 + $0xc60] ss:$16 sps:$4 sm:$0xff]  }
 0x643   :  { %7141 = vmatprep.subr.bf16.mxu1 %v15836_v47  ;;  %v15882_v47 = vld [vmem:[#allocation10 + $0xc68] ss:$16 sps:$4 sm:$0xff]  }
 0x645   :  { %7040 = vmatpush1.bf16.msra.mxu0 %v15831_v39  ;;  %v15887_v39 = vld [vmem:[#allocation10 + $0xc84] ss:$16 sps:$4 sm:$0xff]  }
 0x646   :  { %7142 = vmatpush1.bf16.msra.mxu1 %v15834_v40  ;;  %7041 = vmatprep.subr.bf16.mxu0 %v15839_v63  ;;  %v15890_v40 = vld [vmem:[#allocation10 + $0xc8c] ss:$16 sps:$4 sm:$0xff]   ;;  %v15885_v63 = vld [vmem:[#allocation10 + $0xc80] ss:$16 sps:$4 sm:$0xff]  }
 0x647   :  { %7143 = vmatprep.subr.bf16.mxu1 %v15842_v43  ;;  %v15888_v43 = vld [vmem:[#allocation10 + $0xc88] ss:$16 sps:$4 sm:$0xff]  }
 0x649   :  { %7042 = vmatpush1.bf16.msra.mxu0 %v15837_v46  ;;  %v15893_v46 = vld [vmem:[#allocation10 + $0xca4] ss:$16 sps:$4 sm:$0xff]  }
 0x64a   :  { %7144 = vmatpush1.bf16.msra.mxu1 %v15840_v38  ;;  %7043 = vmatprep.subr.bf16.mxu0 %v15845_v49  ;;  %v15896_v38 = vld [vmem:[#allocation10 + $0xcac] ss:$16 sps:$4 sm:$0xff]   ;;  %v15891_v49 = vld [vmem:[#allocation10 + $0xca0] ss:$16 sps:$4 sm:$0xff]  }
 0x64b   :  { %7145 = vmatprep.subr.bf16.mxu1 %v15848_v58  ;;  %v15899_v58 = vld [vmem:[#allocation10 + $0xcc4] ss:$16 sps:$4 sm:$0xff]  }
 0x64d   :  { %7044 = vmatpush1.bf16.msra.mxu0 %v15843_v59  ;;  %v15902_v59 = vld [vmem:[#allocation10 + $0xccc] ss:$16 sps:$4 sm:$0xff]  }
 0x64e   :  { %7146 = vmatpush1.bf16.msra.mxu1 %v15846_v60  ;;  %7045 = vmatprep.subr.bf16.mxu0 %v15851_v8  ;;  %v15897_v60 = vld [vmem:[#allocation10 + $0xcc0] ss:$16 sps:$4 sm:$0xff]   ;;  %v15900_v8 = vld [vmem:[#allocation10 + $0xcc8] ss:$16 sps:$4 sm:$0xff]  }
 0x64f   :  { %7147 = vmatprep.subr.bf16.mxu1 %v15854_v61  ;;  %v15905_v61 = vld [vmem:[#allocation10 + $0xce4] ss:$16 sps:$4 sm:$0xff]  }
 0x651   :  { %7046 = vmatpush1.bf16.msra.mxu0 %v15849_v1  ;;  %v15908_v1 = vld [vmem:[#allocation10 + $0xcec] ss:$16 sps:$4 sm:$0xff]  }
 0x652   :  { %7148 = vmatpush1.bf16.msra.mxu1 %v15852_v2  ;;  %7047 = vmatprep.subr.bf16.mxu0 %v15857_v55 }
 0x653   :  { %7149 = vmatprep.subr.bf16.mxu1 %v15860_v3  ;;  %v15903_v3 = vld [vmem:[#allocation10 + $0xce0] ss:$16 sps:$4 sm:$0xff]  }
 0x655   :  { %7048 = vmatpush1.bf16.msra.mxu0 %v15855_v34  ;;  %v15906_v34 = vld [vmem:[#allocation10 + $0xce8] ss:$16 sps:$4 sm:$0xff]  }
 0x656   :  { %7150 = vmatpush1.bf16.msra.mxu1 %v15858_v57  ;;  %7939 = vmatprep.subr.bf16.mxu0 %v15863_v7 }
 0x657   :  { %8041 = vmatprep.subr.bf16.mxu1 %v15866_v17 }
 0x658   :  { %7050 = vmatmul.mubr.bf16.vlgmr.msra.gmra.mrb[32].mxu0 %v17493_v18 }
 0x659   :  { %7152 = vmatmul.mubr.bf16.vlgmr.msra.gmra.mrb[40].mxu1 %v17493_v18  ;;  %7059 = vmatprep.mubr.bf16.mxu0 %v17476_v31 }
 0x65a   :  { %7161 = vmatprep.mubr.bf16.mxu1 %v17476_v31  ;;  %7940 = vmatpush1.bf16.msra.mxu0 %v15861_v37 }
 0x65b   :  { %8042 = vmatpush1.bf16.msra.mxu1 %v15864_v14  ;;  %7941 = vmatprep.subr.bf16.mxu0 %v15869_v10  ;;  %v15914_v14 = vld [vmem:[#allocation10 + $0xd0c] ss:$16 sps:$4 sm:$0xff]  }
 0x65c   :  { %8043 = vmatprep.subr.bf16.mxu1 %v15872_v19 }
 0x65e   :  { %7942 = vmatpush1.bf16.msra.mxu0 %v15867_v15  ;;  %v15909_v15 = vld [vmem:[#allocation10 + $0xd00] ss:$16 sps:$4 sm:$0xff]  }
 0x65f   :  { %8044 = vmatpush1.bf16.msra.mxu1 %v15870_v52  ;;  %7943 = vmatprep.subr.bf16.mxu0 %v15875_v22  ;;  %v15912_v52 = vld [vmem:[#allocation10 + $0xd08] ss:$16 sps:$4 sm:$0xff]   ;;  %v15917_v22 = vld [vmem:[#allocation10 + $0xd24] ss:$16 sps:$4 sm:$0xff]  }
 0x660   :  { %7060 = vmatmul.mubr.bf16.gmra.mrb[48].mxu0 %v17488_v42  ;;  %8045 = vmatprep.subr.bf16.mxu1 %v15878_v23  ;;  %v15920_v23 = vld [vmem:[#allocation10 + $0xd2c] ss:$16 sps:$4 sm:$0xff]  }
 0x661   :  { %7162 = vmatmul.mubr.bf16.gmra.mrb[56].mxu1 %v17488_v42  ;;  %7971 = vmatprep.mubr.bf16.mxu0 %v17402_v4 }
 0x662   :  { %7944 = vmatpush1.bf16.msra.mxu0 %v15873_v25  ;;  %8073 = vmatprep.mubr.bf16.mxu1 %v17402_v4  ;;  %v15894_v4 = vld [vmem:[#allocation10 + $0xca8] ss:$16 sps:$4 sm:$0xff]   ;;  %v15915_v25 = vld [vmem:[#allocation10 + $0xd20] ss:$16 sps:$4 sm:$0xff]  }
 0x663   :  { %8046 = vmatpush1.bf16.msra.mxu1 %v15876_v26  ;;  %7945 = vmatprep.subr.bf16.mxu0 %v15881_v27  ;;  %v15918_v26 = vld [vmem:[#allocation10 + $0xd28] ss:$16 sps:$4 sm:$0xff]   ;;  %v15923_v27 = vld [vmem:[#allocation10 + $0xd44] ss:$16 sps:$4 sm:$0xff]  }
 0x664   :  { %8047 = vmatprep.subr.bf16.mxu1 %v15884_v29  ;;  %v15926_v29 = vld [vmem:[#allocation10 + $0xd4c] ss:$16 sps:$4 sm:$0xff]  }
 0x666   :  { %7946 = vmatpush1.bf16.msra.mxu0 %v15879_v28  ;;  %v15921_v28 = vld [vmem:[#allocation10 + $0xd40] ss:$16 sps:$4 sm:$0xff]  }
 0x667   :  { %8048 = vmatpush1.bf16.msra.mxu1 %v15882_v47  ;;  %7947 = vmatprep.subr.bf16.mxu0 %v15887_v39  ;;  %v15924_v47 = vld [vmem:[#allocation10 + $0xd48] ss:$16 sps:$4 sm:$0xff]   ;;  %v15929_v39 = vld [vmem:[#allocation10 + $0xd64] ss:$16 sps:$4 sm:$0xff]  }
 0x668   :  { %8049 = vmatprep.subr.bf16.mxu1 %v15890_v40  ;;  %v15932_v40 = vld [vmem:[#allocation10 + $0xd6c] ss:$16 sps:$4 sm:$0xff]  }
 0x66a   :  { %7948 = vmatpush1.bf16.msra.mxu0 %v15885_v63  ;;  %v15927_v63 = vld [vmem:[#allocation10 + $0xd60] ss:$16 sps:$4 sm:$0xff]  }
 0x66b   :  { %8050 = vmatpush1.bf16.msra.mxu1 %v15888_v43  ;;  %7949 = vmatprep.subr.bf16.mxu0 %v15893_v46  ;;  %v15930_v43 = vld [vmem:[#allocation10 + $0xd68] ss:$16 sps:$4 sm:$0xff]   ;;  %v15935_v46 = vld [vmem:[#allocation10 + $0xd84] ss:$16 sps:$4 sm:$0xff]  }
 0x66c   :  { %8051 = vmatprep.subr.bf16.mxu1 %v15896_v38  ;;  %v15938_v38 = vld [vmem:[#allocation10 + $0xd8c] ss:$16 sps:$4 sm:$0xff]  }
 0x66e   :  { %7950 = vmatpush1.bf16.msra.mxu0 %v15891_v49  ;;  %v15933_v49 = vld [vmem:[#allocation10 + $0xd80] ss:$16 sps:$4 sm:$0xff]  }
 0x66f   :  { %8052 = vmatpush1.bf16.msra.mxu1 %v15894_v4  ;;  %7951 = vmatprep.subr.bf16.mxu0 %v15899_v58  ;;  %v15936_v4 = vld [vmem:[#allocation10 + $0xd88] ss:$16 sps:$4 sm:$0xff]   ;;  %v15941_v58 = vld [vmem:[#allocation10 + $0xda4] ss:$16 sps:$4 sm:$0xff]  }
 0x670   :  { %8053 = vmatprep.subr.bf16.mxu1 %v15902_v59  ;;  %v15944_v59 = vld [vmem:[#allocation10 + $0xdac] ss:$16 sps:$4 sm:$0xff]  }
 0x672   :  { %7952 = vmatpush1.bf16.msra.mxu0 %v15897_v60  ;;  %v17503_v2 = vpop.f32.mrb[36].mxu0  ;;  %v17505_v55 = vpop.f32.mrb[44].mxu1  ;;  %v15939_v60 = vld [vmem:[#allocation10 + $0xda0] ss:$16 sps:$4 sm:$0xff]  }
 0x673   :  { %8054 = vmatpush1.bf16.msra.mxu1 %v15900_v8  ;;  %7953 = vmatprep.subr.bf16.mxu0 %v15905_v61  ;;  %v17507_v57 = vpop.f32.mrb[37].mxu0  ;;  %v17509_v7 = vpop.f32.mrb[45].mxu1  ;;  %v15942_v8 = vld [vmem:[#allocation10 + $0xda8] ss:$16 sps:$4 sm:$0xff]   ;;  %v15947_v61 = vld [vmem:[#allocation10 + $0xdc4] ss:$16 sps:$4 sm:$0xff]  }
 0x674   :  { %8055 = vmatprep.subr.bf16.mxu1 %v15908_v1  ;;  %v6141_v17 = vpop.f32.mrb[38].mxu0  ;;  %v6243_v37 = vpop.f32.mrb[46].mxu1  ;;  %v15950_v1 = vld [vmem:[#allocation10 + $0xdcc] ss:$16 sps:$4 sm:$0xff]  }
 0x675   :  { %v6142_v10 = vpop.f32.mrb[39].mxu0  ;;  %v6244_v19 = vpop.f32.mrb[47].mxu1  ;;  %v15956_v17 = vld [vmem:[#allocation10 + $0xdec] ss:$16 sps:$4 sm:$0xff]   ;;  %v15951_v37 = vld [vmem:[#allocation10 + $0xde0] ss:$16 sps:$4 sm:$0xff]  }
 0x676   :  { %7954 = vmatpush1.bf16.msra.mxu0 %v15903_v3  ;;  %v15945_v3 = vld [vmem:[#allocation10 + $0xdc0] ss:$16 sps:$4 sm:$0xff]   ;;  %v15959_v10 = vld [vmem:[#allocation10 + $0xe04] ss:$16 sps:$4 sm:$0xff]   ;;  %v15962_v19 = vld [vmem:[#allocation10 + $0xe0c] ss:$16 sps:$4 sm:$0xff]  }
 0x677   :  { %8056 = vmatpush1.bf16.msra.mxu1 %v15906_v34  ;;  %7955 = vmatprep.subr.bf16.mxu0 %v15911_v13  ;;  %v15948_v34 = vld [vmem:[#allocation10 + $0xdc8] ss:$16 sps:$4 sm:$0xff]   ;;  %v15953_v13 = vld [vmem:[#allocation10 + $0xde4] ss:$16 sps:$4 sm:$0xff]  }
 0x678   :  { %8057 = vmatprep.subr.bf16.mxu1 %v15914_v14  ;;  %v15954_v14 = vld [vmem:[#allocation10 + $0xde8] ss:$16 sps:$4 sm:$0xff]  }
 0x67a   :  { %7956 = vmatpush1.bf16.msra.mxu0 %v15909_v15  ;;  %v15957_v15 = vld [vmem:[#allocation10 + $0xe00] ss:$16 sps:$4 sm:$0xff]  }
 0x67b   :  { %8058 = vmatpush1.bf16.msra.mxu1 %v15912_v52  ;;  %7957 = vmatprep.subr.bf16.mxu0 %v15917_v22  ;;  %v15960_v52 = vld [vmem:[#allocation10 + $0xe08] ss:$16 sps:$4 sm:$0xff]   ;;  %v15965_v22 = vld [vmem:[#allocation10 + $0xe24] ss:$16 sps:$4 sm:$0xff]  }
 0x67c   :  { %8059 = vmatprep.subr.bf16.mxu1 %v15920_v23  ;;  %v15968_v23 = vld [vmem:[#allocation10 + $0xe2c] ss:$16 sps:$4 sm:$0xff]  }
 0x67e   :  { %7958 = vmatpush1.bf16.msra.mxu0 %v15915_v25  ;;  %v15963_v25 = vld [vmem:[#allocation10 + $0xe20] ss:$16 sps:$4 sm:$0xff]  }
 0x67f   :  { %8060 = vmatpush1.bf16.msra.mxu1 %v15918_v26  ;;  %7959 = vmatprep.subr.bf16.mxu0 %v15923_v27  ;;  %v15966_v26 = vld [vmem:[#allocation10 + $0xe28] ss:$16 sps:$4 sm:$0xff]   ;;  %v15971_v27 = vld [vmem:[#allocation10 + $0xe44] ss:$16 sps:$4 sm:$0xff]  }
 0x680   :  { %8061 = vmatprep.subr.bf16.mxu1 %v15926_v29  ;;  %v15974_v29 = vld [vmem:[#allocation10 + $0xe4c] ss:$16 sps:$4 sm:$0xff]  }
 0x682   :  { %7960 = vmatpush1.bf16.msra.mxu0 %v15921_v28  ;;  %v15969_v28 = vld [vmem:[#allocation10 + $0xe40] ss:$16 sps:$4 sm:$0xff]  }
 0x683   :  { %8062 = vmatpush1.bf16.msra.mxu1 %v15924_v47  ;;  %7961 = vmatprep.subr.bf16.mxu0 %v15929_v39  ;;  %v15972_v47 = vld [vmem:[#allocation10 + $0xe48] ss:$16 sps:$4 sm:$0xff]   ;;  %v15977_v39 = vld [vmem:[#allocation10 + $0xe64] ss:$16 sps:$4 sm:$0xff]  }
 0x684   :  { %8063 = vmatprep.subr.bf16.mxu1 %v15932_v40  ;;  %v15978_v40 = vld [vmem:[#allocation10 + $0xe68] ss:$16 sps:$4 sm:$0xff]  }
 0x686   :  { %7962 = vmatpush1.bf16.msra.mxu0 %v15927_v63  ;;  %v15983_v63 = vld [vmem:[#allocation10 + $0xe84] ss:$16 sps:$4 sm:$0xff]  }
 0x687   :  { %8064 = vmatpush1.bf16.msra.mxu1 %v15930_v43  ;;  %7963 = vmatprep.subr.bf16.mxu0 %v15935_v46  ;;  %v15986_v43 = vld [vmem:[#allocation10 + $0xe8c] ss:$16 sps:$4 sm:$0xff]   ;;  %v15981_v46 = vld [vmem:[#allocation10 + $0xe80] ss:$16 sps:$4 sm:$0xff]  }
 0x688   :  { %8065 = vmatprep.subr.bf16.mxu1 %v15938_v38  ;;  %v15984_v38 = vld [vmem:[#allocation10 + $0xe88] ss:$16 sps:$4 sm:$0xff]  }
 0x68a   :  { %7964 = vmatpush1.bf16.msra.mxu0 %v15933_v49  ;;  %v15989_v49 = vld [vmem:[#allocation10 + $0xea4] ss:$16 sps:$4 sm:$0xff]  }
 0x68b   :  { %8066 = vmatpush1.bf16.msra.mxu1 %v15936_v4  ;;  %7965 = vmatprep.subr.bf16.mxu0 %v15941_v58  ;;  %v15987_v4 = vld [vmem:[#allocation10 + $0xea0] ss:$16 sps:$4 sm:$0xff]   ;;  %v15995_v58 = vld [vmem:[#allocation10 + $0xec4] ss:$16 sps:$4 sm:$0xff]  }
 0x68c   :  { %8067 = vmatprep.subr.bf16.mxu1 %v15944_v59  ;;  %v15998_v59 = vld [vmem:[#allocation10 + $0xecc] ss:$16 sps:$4 sm:$0xff]  }
 0x68e   :  { %7966 = vmatpush1.bf16.msra.mxu0 %v15939_v60  ;;  %v15993_v60 = vld [vmem:[#allocation10 + $0xec0] ss:$16 sps:$4 sm:$0xff]  }
 0x68f   :  { %8068 = vmatpush1.bf16.msra.mxu1 %v15942_v8  ;;  %7967 = vmatprep.subr.bf16.mxu0 %v15947_v61  ;;  %v15996_v8 = vld [vmem:[#allocation10 + $0xec8] ss:$16 sps:$4 sm:$0xff]   ;;  %v16001_v61 = vld [vmem:[#allocation10 + $0xee4] ss:$16 sps:$4 sm:$0xff]  }
 0x690   :  { %8069 = vmatprep.subr.bf16.mxu1 %v15950_v1  ;;  %v16004_v1 = vld [vmem:[#allocation10 + $0xeec] ss:$16 sps:$4 sm:$0xff]  }
 0x692   :  { %7968 = vmatpush1.bf16.msra.mxu0 %v15945_v3 }
 0x693   :  { %8070 = vmatpush1.bf16.msra.mxu1 %v15948_v34  ;;  %7969 = vmatprep.subr.bf16.mxu0 %v15953_v13 }
 0x694   :  { %8071 = vmatprep.subr.bf16.mxu1 %v15956_v17 }
 0x696   :  { %7970 = vmatpush1.bf16.msra.mxu0 %v15951_v37 }
 0x697   :  { %8072 = vmatpush1.bf16.msra.mxu1 %v15954_v14  ;;  %7990 = vmatprep.subr.bf16.mxu0 %v15959_v10  ;;  %v15999_v10 = vld [vmem:[#allocation10 + $0xee0] ss:$16 sps:$4 sm:$0xff]  }
 0x698   :  { %8092 = vmatprep.subr.bf16.mxu1 %v15962_v19 }
 0x699   :  { %7972 = vmatmul.mubr.bf16.vlgmr.msra.gmra.mrb[52].mxu0 %v17409_v0 }
 0x69a   :  { %8074 = vmatmul.mubr.bf16.vlgmr.msra.gmra.mrb[60].mxu1 %v17409_v0  ;;  %7981 = vmatprep.mubr.bf16.mxu0 %v17404_v5  ;;  %v15980_v0 = vld [vmem:[#allocation10 + $0xe6c] ss:$16 sps:$4 sm:$0xff]  }
 0x69b   :  { %7991 = vmatpush1.bf16.msra.mxu0 %v15957_v15  ;;  %8083 = vmatprep.mubr.bf16.mxu1 %v17404_v5  ;;  %v15975_v5 = vld [vmem:[#allocation10 + $0xe60] ss:$16 sps:$4 sm:$0xff]  }
 0x69c   :  { %8093 = vmatpush1.bf16.msra.mxu1 %v15960_v52  ;;  %7992 = vmatprep.subr.bf16.mxu0 %v15965_v22  ;;  %v16002_v52 = vld [vmem:[#allocation10 + $0xee8] ss:$16 sps:$4 sm:$0xff]  }
 0x69d   :  { %8094 = vmatprep.subr.bf16.mxu1 %v15968_v23 }
 0x69f   :  { %7993 = vmatpush1.bf16.msra.mxu0 %v15963_v25  ;;  %v16007_v25 = vld [vmem:[#allocation10 + $0xf04] ss:$16 sps:$4 sm:$0xff]  }
 0x6a0   :  { %8095 = vmatpush1.bf16.msra.mxu1 %v15966_v26  ;;  %7994 = vmatprep.subr.bf16.mxu0 %v15971_v27  ;;  %v16005_v27 = vld [vmem:[#allocation10 + $0xf00] ss:$16 sps:$4 sm:$0xff]  }
 0x6a1   :  { %7982 = vmatmul.mubr.bf16.gmra.mrb[56].mxu0 %v17420_v16  ;;  %8096 = vmatprep.subr.bf16.mxu1 %v15974_v29  ;;  %v16008_v29 = vld [vmem:[#allocation10 + $0xf08] ss:$16 sps:$4 sm:$0xff]  }
 0x6a2   :  { %8084 = vmatmul.mubr.bf16.gmra.mrb[64].mxu1 %v17420_v16  ;;  %8022 = vmatprep.mubr.bf16.mxu0 %v17426_v21  ;;  %v15992_v16 = vld [vmem:[#allocation10 + $0xeac] ss:$16 sps:$4 sm:$0xff]  }
 0x6a3   :  { %7995 = vmatpush1.bf16.msra.mxu0 %v15969_v28  ;;  %8124 = vmatprep.mubr.bf16.mxu1 %v17426_v21  ;;  %v15990_v21 = vld [vmem:[#allocation10 + $0xea8] ss:$16 sps:$4 sm:$0xff]   ;;  %v16013_v28 = vld [vmem:[#allocation10 + $0xf24] ss:$16 sps:$4 sm:$0xff]  }
 0x6a4   :  { %8097 = vmatpush1.bf16.msra.mxu1 %v15972_v47  ;;  %7996 = vmatprep.subr.bf16.mxu0 %v15977_v39  ;;  %v16014_v47 = vld [vmem:[#allocation10 + $0xf28] ss:$16 sps:$4 sm:$0xff]   ;;  %v16019_v39 = vld [vmem:[#allocation10 + $0xf44] ss:$16 sps:$4 sm:$0xff]  }
 0x6a5   :  { %8098 = vmatprep.subr.bf16.mxu1 %v15980_v0  ;;  %v16022_v0 = vld [vmem:[#allocation10 + $0xf4c] ss:$16 sps:$4 sm:$0xff]  }
 0x6a7   :  { %7997 = vmatpush1.bf16.msra.mxu0 %v15975_v5  ;;  %v16017_v5 = vld [vmem:[#allocation10 + $0xf40] ss:$16 sps:$4 sm:$0xff]  }
 0x6a8   :  { %8099 = vmatpush1.bf16.msra.mxu1 %v15978_v40  ;;  %7998 = vmatprep.subr.bf16.mxu0 %v15983_v63  ;;  %v16020_v40 = vld [vmem:[#allocation10 + $0xf48] ss:$16 sps:$4 sm:$0xff]   ;;  %v16025_v63 = vld [vmem:[#allocation10 + $0xf64] ss:$16 sps:$4 sm:$0xff]  }
 0x6a9   :  { %8100 = vmatprep.subr.bf16.mxu1 %v15986_v43  ;;  %v16028_v43 = vld [vmem:[#allocation10 + $0xf6c] ss:$16 sps:$4 sm:$0xff]  }
 0x6ab   :  { %7999 = vmatpush1.bf16.msra.mxu0 %v15981_v46  ;;  %v16023_v46 = vld [vmem:[#allocation10 + $0xf60] ss:$16 sps:$4 sm:$0xff]  }
 0x6ac   :  { %8101 = vmatpush1.bf16.msra.mxu1 %v15984_v38  ;;  %8000 = vmatprep.subr.bf16.mxu0 %v15989_v49  ;;  %v16026_v38 = vld [vmem:[#allocation10 + $0xf68] ss:$16 sps:$4 sm:$0xff]   ;;  %v16031_v49 = vld [vmem:[#allocation10 + $0xf84] ss:$16 sps:$4 sm:$0xff]  }
 0x6ad   :  { %8102 = vmatprep.subr.bf16.mxu1 %v15992_v16  ;;  %v16034_v16 = vld [vmem:[#allocation10 + $0xf8c] ss:$16 sps:$4 sm:$0xff]  }
 0x6af   :  { %8001 = vmatpush1.bf16.msra.mxu0 %v15987_v4  ;;  %v16029_v4 = vld [vmem:[#allocation10 + $0xf80] ss:$16 sps:$4 sm:$0xff]  }
 0x6b0   :  { %8103 = vmatpush1.bf16.msra.mxu1 %v15990_v21  ;;  %8002 = vmatprep.subr.bf16.mxu0 %v15995_v58  ;;  %v16032_v21 = vld [vmem:[#allocation10 + $0xf88] ss:$16 sps:$4 sm:$0xff]   ;;  %v16037_v58 = vld [vmem:[#allocation10 + $0xfa4] ss:$16 sps:$4 sm:$0xff]  }
 0x6b1   :  { %8104 = vmatprep.subr.bf16.mxu1 %v15998_v59  ;;  %v16040_v59 = vld [vmem:[#allocation10 + $0xfac] ss:$16 sps:$4 sm:$0xff]  }
 0x6b2   :  { %v6188_v3 = vpop.f32.mrb[40].mxu0  ;;  %v6290_v34 = vpop.f32.mrb[48].mxu1 }
 0x6b3   :  { %8003 = vmatpush1.bf16.msra.mxu0 %v15993_v60  ;;  %v17520_v13 = vadd.f32 %v6188_v3, %v17503_v2  ;;  %v17523_v17 = vadd.f32 %v6290_v34, %v17505_v55  ;;  %v6190_v37 = vpop.f32.mrb[41].mxu0  ;;  %v6292_v14 = vpop.f32.mrb[49].mxu1  ;;  %v16010_v55 = vld [vmem:[#allocation10 + $0xf0c] ss:$16 sps:$4 sm:$0xff]   ;;  %v16035_v60 = vld [vmem:[#allocation10 + $0xfa0] ss:$16 sps:$4 sm:$0xff]  }
 0x6b4   :  { %8105 = vmatpush1.bf16.msra.mxu1 %v15996_v8  ;;  %v17526_v19 = vadd.f32 %v6190_v37, %v17507_v57  ;;  %v17529_v15 = vadd.f32 %v6292_v14, %v17509_v7  ;;  %8004 = vmatprep.subr.bf16.mxu0 %v16001_v61  ;;  %v6192_v22 = vpop.f32.mrb[42].mxu0  ;;  %v6294_v23 = vpop.f32.mrb[50].mxu1  ;;  %v16016_v57 = vld [vmem:[#allocation10 + $0xf2c] ss:$16 sps:$4 sm:$0xff]   ;;  %v16011_v7 = vld [vmem:[#allocation10 + $0xf20] ss:$16 sps:$4 sm:$0xff]  }
 0x6b5   :  { %8106 = vmatprep.subr.bf16.mxu1 %v16004_v1  ;;  %v6193_v2 = vpop.f32.mrb[43].mxu0  ;;  %v6295_v26 = vpop.f32.mrb[51].mxu1  ;;  %v16038_v8 = vld [vmem:[#allocation10 + $0xfa8] ss:$16 sps:$4 sm:$0xff]   ;;  %v16043_v61 = vld [vmem:[#allocation10 + $0xfc4] ss:$16 sps:$4 sm:$0xff]  }
 0x6b6   :  { %v16046_v1 = vld [vmem:[#allocation10 + $0xfcc] ss:$16 sps:$4 sm:$0xff]   ;;  %v16041_v3 = vld [vmem:[#allocation10 + $0xfc0] ss:$16 sps:$4 sm:$0xff]   ;;  %v16044_v34 = vld [vmem:[#allocation10 + $0xfc8] ss:$16 sps:$4 sm:$0xff]  }
 0x6b7   :  { %8005 = vmatpush1.bf16.msra.mxu0 %v15999_v10  ;;  %v16049_v37 = vld [vmem:[#allocation10 + $0xfe4] ss:$16 sps:$4 sm:$0xff]   ;;  %v16052_v14 = vld [vmem:[#allocation10 + $0xfec] ss:$16 sps:$4 sm:$0xff]   ;;  %v16047_v10 = vld [vmem:[#allocation10 + $0xfe0] ss:$16 sps:$4 sm:$0xff]  }
 0x6b8   :  { %8107 = vmatpush1.bf16.msra.mxu1 %v16002_v52  ;;  %8006 = vmatprep.subr.bf16.mxu0 %v16007_v25  ;;  %v16050_v52 = vld [vmem:[#allocation10 + $0xfe8] ss:$16 sps:$4 sm:$0xff]   ;;  %v16055_v22 = vld [vmem:[#allocation10 + $0x404] ss:$16 sps:$4 sm:$0xff]   ;;  %v16058_v23 = vld [vmem:[#allocation10 + $0x40c] ss:$16 sps:$4 sm:$0xff]  }
 0x6b9   :  { %8108 = vmatprep.subr.bf16.mxu1 %v16010_v55  ;;  %v16053_v25 = vld [vmem:[#allocation10 + $0x400] ss:$16 sps:$4 sm:$0xff]   ;;  %v16056_v2 = vld [vmem:[#allocation10 + $0x408] ss:$16 sps:$4 sm:$0xff]   ;;  %v16061_v26 = vld [vmem:[#allocation10 + $0x424] ss:$16 sps:$4 sm:$0xff]  }
 0x6ba   :  { %v16064_v55 = vld [vmem:[#allocation10 + $0x42c] ss:$16 sps:$4 sm:$0xff]  }
 0x6bb   :  { %8007 = vmatpush1.bf16.msra.mxu0 %v16005_v27  ;;  %v16059_v27 = vld [vmem:[#allocation10 + $0x420] ss:$16 sps:$4 sm:$0xff]  }
 0x6bc   :  { %8109 = vmatpush1.bf16.msra.mxu1 %v16008_v29  ;;  %8008 = vmatprep.subr.bf16.mxu0 %v16013_v28  ;;  %v16062_v29 = vld [vmem:[#allocation10 + $0x428] ss:$16 sps:$4 sm:$0xff]   ;;  %v16067_v28 = vld [vmem:[#allocation10 + $0x444] ss:$16 sps:$4 sm:$0xff]  }
 0x6bd   :  { %8110 = vmatprep.subr.bf16.mxu1 %v16016_v57  ;;  %v16070_v57 = vld [vmem:[#allocation10 + $0x44c] ss:$16 sps:$4 sm:$0xff]  }
 0x6bf   :  { %8009 = vmatpush1.bf16.msra.mxu0 %v16011_v7  ;;  %v16065_v7 = vld [vmem:[#allocation10 + $0x440] ss:$16 sps:$4 sm:$0xff]  }
 0x6c0   :  { %8111 = vmatpush1.bf16.msra.mxu1 %v16014_v47  ;;  %8010 = vmatprep.subr.bf16.mxu0 %v16019_v39  ;;  %v16068_v47 = vld [vmem:[#allocation10 + $0x448] ss:$16 sps:$4 sm:$0xff]   ;;  %v16073_v39 = vld [vmem:[#allocation10 + $0x464] ss:$16 sps:$4 sm:$0xff]  }
 0x6c1   :  { %8112 = vmatprep.subr.bf16.mxu1 %v16022_v0  ;;  %v16074_v0 = vld [vmem:[#allocation10 + $0x468] ss:$16 sps:$4 sm:$0xff]  }
 0x6c3   :  { %8011 = vmatpush1.bf16.msra.mxu0 %v16017_v5  ;;  %v16079_v5 = vld [vmem:[#allocation10 + $0x484] ss:$16 sps:$4 sm:$0xff]  }
 0x6c4   :  { %8113 = vmatpush1.bf16.msra.mxu1 %v16020_v40  ;;  %8012 = vmatprep.subr.bf16.mxu0 %v16025_v63  ;;  %v16082_v40 = vld [vmem:[#allocation10 + $0x48c] ss:$16 sps:$4 sm:$0xff]   ;;  %v16077_v63 = vld [vmem:[#allocation10 + $0x480] ss:$16 sps:$4 sm:$0xff]  }
 0x6c5   :  { %8114 = vmatprep.subr.bf16.mxu1 %v16028_v43  ;;  %v16080_v43 = vld [vmem:[#allocation10 + $0x488] ss:$16 sps:$4 sm:$0xff]  }
 0x6c7   :  { %8013 = vmatpush1.bf16.msra.mxu0 %v16023_v46  ;;  %v16085_v46 = vld [vmem:[#allocation10 + $0x4a4] ss:$16 sps:$4 sm:$0xff]  }
 0x6c8   :  { %8115 = vmatpush1.bf16.msra.mxu1 %v16026_v38  ;;  %8014 = vmatprep.subr.bf16.mxu0 %v16031_v49  ;;  %v16083_v38 = vld [vmem:[#allocation10 + $0x4a0] ss:$16 sps:$4 sm:$0xff]   ;;  %v16091_v49 = vld [vmem:[#allocation10 + $0x4c4] ss:$16 sps:$4 sm:$0xff]  }
 0x6c9   :  { %8116 = vmatprep.subr.bf16.mxu1 %v16034_v16  ;;  %v16094_v16 = vld [vmem:[#allocation10 + $0x4cc] ss:$16 sps:$4 sm:$0xff]  }
 0x6cb   :  { %8015 = vmatpush1.bf16.msra.mxu0 %v16029_v4  ;;  %v16089_v4 = vld [vmem:[#allocation10 + $0x4c0] ss:$16 sps:$4 sm:$0xff]  }
 0x6cc   :  { %8117 = vmatpush1.bf16.msra.mxu1 %v16032_v21  ;;  %8016 = vmatprep.subr.bf16.mxu0 %v16037_v58  ;;  %v16092_v21 = vld [vmem:[#allocation10 + $0x4c8] ss:$16 sps:$4 sm:$0xff]   ;;  %v16097_v58 = vld [vmem:[#allocation10 + $0x4e4] ss:$16 sps:$4 sm:$0xff]  }
 0x6cd   :  { %8118 = vmatprep.subr.bf16.mxu1 %v16040_v59  ;;  %v16100_v59 = vld [vmem:[#allocation10 + $0x4ec] ss:$16 sps:$4 sm:$0xff]  }
 0x6cf   :  { %8017 = vmatpush1.bf16.msra.mxu0 %v16035_v60 }
 0x6d0   :  { %8119 = vmatpush1.bf16.msra.mxu1 %v16038_v8  ;;  %8018 = vmatprep.subr.bf16.mxu0 %v16043_v61 }
 0x6d1   :  { %8120 = vmatprep.subr.bf16.mxu1 %v16046_v1 }
 0x6d3   :  { %8019 = vmatpush1.bf16.msra.mxu0 %v16041_v3 }
 0x6d4   :  { %8121 = vmatpush1.bf16.msra.mxu1 %v16044_v34  ;;  %8020 = vmatprep.subr.bf16.mxu0 %v16049_v37  ;;  %v16095_v37 = vld [vmem:[#allocation10 + $0x4e0] ss:$16 sps:$4 sm:$0xff]  }
 0x6d5   :  { %8122 = vmatprep.subr.bf16.mxu1 %v16052_v14 }
 0x6d7   :  { %8021 = vmatpush1.bf16.msra.mxu0 %v16047_v10 }
 0x6d8   :  { %8123 = vmatpush1.bf16.msra.mxu1 %v16050_v52  ;;  %8783 = vmatprep.subr.bf16.mxu0 %v16055_v22  ;;  %v16098_v52 = vld [vmem:[#allocation10 + $0x4e8] ss:$16 sps:$4 sm:$0xff]  }
 0x6d9   :  { %8885 = vmatprep.subr.bf16.mxu1 %v16058_v23 }
 0x6da   :  { %8023 = vmatmul.mubr.bf16.vlgmr.msra.gmra.mrb[52].mxu0 %v17439_v50 }
 0x6db   :  { %8125 = vmatmul.mubr.bf16.vlgmr.msra.gmra.mrb[60].mxu1 %v17439_v50  ;;  %8032 = vmatprep.mubr.bf16.mxu0 %v17442_v51  ;;  %v16076_v50 = vld [vmem:[#allocation10 + $0x46c] ss:$16 sps:$4 sm:$0xff]  }
 0x6dc   :  { %8134 = vmatprep.mubr.bf16.mxu1 %v17442_v51  ;;  %8784 = vmatpush1.bf16.msra.mxu0 %v16053_v25  ;;  %v16071_v51 = vld [vmem:[#allocation10 + $0x460] ss:$16 sps:$4 sm:$0xff]   ;;  %v16103_v25 = vld [vmem:[#allocation10 + $0x504] ss:$16 sps:$4 sm:$0xff]  }
 0x6dd   :  { %8886 = vmatpush1.bf16.msra.mxu1 %v16056_v2  ;;  %8785 = vmatprep.subr.bf16.mxu0 %v16061_v26  ;;  %v16101_v26 = vld [vmem:[#allocation10 + $0x500] ss:$16 sps:$4 sm:$0xff]  }
 0x6de   :  { %8887 = vmatprep.subr.bf16.mxu1 %v16064_v55  ;;  %v16104_v55 = vld [vmem:[#allocation10 + $0x508] ss:$16 sps:$4 sm:$0xff]  }
 0x6e0   :  { %8786 = vmatpush1.bf16.msra.mxu0 %v16059_v27  ;;  %v16109_v27 = vld [vmem:[#allocation10 + $0x524] ss:$16 sps:$4 sm:$0xff]  }
 0x6e1   :  { %8888 = vmatpush1.bf16.msra.mxu1 %v16062_v29  ;;  %8787 = vmatprep.subr.bf16.mxu0 %v16067_v28  ;;  %v16110_v29 = vld [vmem:[#allocation10 + $0x528] ss:$16 sps:$4 sm:$0xff]   ;;  %v16115_v28 = vld [vmem:[#allocation10 + $0x544] ss:$16 sps:$4 sm:$0xff]  }
 0x6e2   :  { %8033 = vmatmul.mubr.bf16.gmra.mrb[60].mxu0 %v17452_v62  ;;  %8889 = vmatprep.subr.bf16.mxu1 %v16070_v57  ;;  %v16118_v57 = vld [vmem:[#allocation10 + $0x54c] ss:$16 sps:$4 sm:$0xff]  }
 0x6e3   :  { %8135 = vmatmul.mubr.bf16.gmra.mrb[68].mxu1 %v17452_v62  ;;  %8815 = vmatprep.mubr.bf16.mxu0 %v17459_v41  ;;  %v16088_v62 = vld [vmem:[#allocation10 + $0x4ac] ss:$16 sps:$4 sm:$0xff]  }
 0x6e4   :  { %8788 = vmatpush1.bf16.msra.mxu0 %v16065_v7  ;;  %8917 = vmatprep.mubr.bf16.mxu1 %v17459_v41  ;;  %v16086_v41 = vld [vmem:[#allocation10 + $0x4a8] ss:$16 sps:$4 sm:$0xff]   ;;  %v16113_v7 = vld [vmem:[#allocation10 + $0x540] ss:$16 sps:$4 sm:$0xff]  }
 0x6e5   :  { %8890 = vmatpush1.bf16.msra.mxu1 %v16068_v47  ;;  %8789 = vmatprep.subr.bf16.mxu0 %v16073_v39  ;;  %v16116_v47 = vld [vmem:[#allocation10 + $0x548] ss:$16 sps:$4 sm:$0xff]   ;;  %v16121_v39 = vld [vmem:[#allocation10 + $0x564] ss:$16 sps:$4 sm:$0xff]  }
 0x6e6   :  { %8891 = vmatprep.subr.bf16.mxu1 %v16076_v50  ;;  %v16124_v50 = vld [vmem:[#allocation10 + $0x56c] ss:$16 sps:$4 sm:$0xff]  }
 0x6e8   :  { %8790 = vmatpush1.bf16.msra.mxu0 %v16071_v51  ;;  %v16119_v51 = vld [vmem:[#allocation10 + $0x560] ss:$16 sps:$4 sm:$0xff]  }
 0x6e9   :  { %8892 = vmatpush1.bf16.msra.mxu1 %v16074_v0  ;;  %8791 = vmatprep.subr.bf16.mxu0 %v16079_v5  ;;  %v16122_v0 = vld [vmem:[#allocation10 + $0x568] ss:$16 sps:$4 sm:$0xff]   ;;  %v16127_v5 = vld [vmem:[#allocation10 + $0x584] ss:$16 sps:$4 sm:$0xff]  }
 0x6ea   :  { %8893 = vmatprep.subr.bf16.mxu1 %v16082_v40  ;;  %v16130_v40 = vld [vmem:[#allocation10 + $0x58c] ss:$16 sps:$4 sm:$0xff]  }
 0x6ec   :  { %8792 = vmatpush1.bf16.msra.mxu0 %v16077_v63  ;;  %v16125_v63 = vld [vmem:[#allocation10 + $0x580] ss:$16 sps:$4 sm:$0xff]  }
 0x6ed   :  { %8894 = vmatpush1.bf16.msra.mxu1 %v16080_v43  ;;  %8793 = vmatprep.subr.bf16.mxu0 %v16085_v46  ;;  %v16128_v43 = vld [vmem:[#allocation10 + $0x588] ss:$16 sps:$4 sm:$0xff]   ;;  %v16133_v46 = vld [vmem:[#allocation10 + $0x5a4] ss:$16 sps:$4 sm:$0xff]  }
 0x6ee   :  { %8895 = vmatprep.subr.bf16.mxu1 %v16088_v62  ;;  %v16136_v62 = vld [vmem:[#allocation10 + $0x5ac] ss:$16 sps:$4 sm:$0xff]  }
 0x6f0   :  { %8794 = vmatpush1.bf16.msra.mxu0 %v16083_v38  ;;  %v16131_v38 = vld [vmem:[#allocation10 + $0x5a0] ss:$16 sps:$4 sm:$0xff]  }
 0x6f1   :  { %8896 = vmatpush1.bf16.msra.mxu1 %v16086_v41  ;;  %8795 = vmatprep.subr.bf16.mxu0 %v16091_v49  ;;  %v16134_v41 = vld [vmem:[#allocation10 + $0x5a8] ss:$16 sps:$4 sm:$0xff]   ;;  %v16139_v49 = vld [vmem:[#allocation10 + $0x5c4] ss:$16 sps:$4 sm:$0xff]  }
 0x6f2   :  { %8897 = vmatprep.subr.bf16.mxu1 %v16094_v16  ;;  %v16142_v16 = vld [vmem:[#allocation10 + $0x5cc] ss:$16 sps:$4 sm:$0xff]  }
 0x6f3   :  { %v7010_v60 = vpop.f32.mrb[44].mxu0  ;;  %v7112_v8 = vpop.f32.mrb[52].mxu1 }
 0x6f4   :  { %8796 = vmatpush1.bf16.msra.mxu0 %v16089_v4  ;;  %v17540_v61 = vadd.f32 %v7010_v60, %v17520_v13  ;;  %v17543_v1 = vadd.f32 %v7112_v8, %v17523_v17  ;;  %v7012_v3 = vpop.f32.mrb[45].mxu0  ;;  %v7114_v34 = vpop.f32.mrb[53].mxu1  ;;  %v16106_v17 = vld [vmem:[#allocation10 + $0x50c] ss:$16 sps:$4 sm:$0xff]   ;;  %v16137_v4 = vld [vmem:[#allocation10 + $0x5c0] ss:$16 sps:$4 sm:$0xff]  }
 0x6f5   :  { %8898 = vmatpush1.bf16.msra.mxu1 %v16092_v21  ;;  %v17546_v14 = vadd.f32 %v7012_v3, %v17526_v19  ;;  %v17549_v10 = vadd.f32 %v7114_v34, %v17529_v15  ;;  %8797 = vmatprep.subr.bf16.mxu0 %v16097_v58  ;;  %v7014_v22 = vpop.f32.mrb[46].mxu0  ;;  %v7116_v23 = vpop.f32.mrb[54].mxu1  ;;  %v16112_v19 = vld [vmem:[#allocation10 + $0x52c] ss:$16 sps:$4 sm:$0xff]   ;;  %v16107_v15 = vld [vmem:[#allocation10 + $0x520] ss:$16 sps:$4 sm:$0xff]  }
 0x6f6   :  { %8899 = vmatprep.subr.bf16.mxu1 %v16100_v59  ;;  %v7015_v13 = vpop.f32.mrb[47].mxu0  ;;  %v7117_v2 = vpop.f32.mrb[55].mxu1  ;;  %v16140_v21 = vld [vmem:[#allocation10 + $0x5c8] ss:$16 sps:$4 sm:$0xff]   ;;  %v16145_v58 = vld [vmem:[#allocation10 + $0x5e4] ss:$16 sps:$4 sm:$0xff]  }
 0x6f7   :  { %v16148_v59 = vld [vmem:[#allocation10 + $0x5ec] ss:$16 sps:$4 sm:$0xff]   ;;  %v16143_v60 = vld [vmem:[#allocation10 + $0x5e0] ss:$16 sps:$4 sm:$0xff]   ;;  %v16146_v8 = vld [vmem:[#allocation10 + $0x5e8] ss:$16 sps:$4 sm:$0xff]  }
 0x6f8   :  { %8798 = vmatpush1.bf16.msra.mxu0 %v16095_v37  ;;  %v16151_v3 = vld [vmem:[#allocation10 + $0x604] ss:$16 sps:$4 sm:$0xff]   ;;  %v16154_v34 = vld [vmem:[#allocation10 + $0x60c] ss:$16 sps:$4 sm:$0xff]   ;;  %v16149_v37 = vld [vmem:[#allocation10 + $0x600] ss:$16 sps:$4 sm:$0xff]  }
 0x6f9   :  { %8900 = vmatpush1.bf16.msra.mxu1 %v16098_v52  ;;  %8799 = vmatprep.subr.bf16.mxu0 %v16103_v25  ;;  %v16152_v52 = vld [vmem:[#allocation10 + $0x608] ss:$16 sps:$4 sm:$0xff]   ;;  %v16157_v22 = vld [vmem:[#allocation10 + $0x624] ss:$16 sps:$4 sm:$0xff]   ;;  %v16160_v23 = vld [vmem:[#allocation10 + $0x62c] ss:$16 sps:$4 sm:$0xff]  }
 0x6fa   :  { %8901 = vmatprep.subr.bf16.mxu1 %v16106_v17  ;;  %v16155_v25 = vld [vmem:[#allocation10 + $0x620] ss:$16 sps:$4 sm:$0xff]   ;;  %v16158_v13 = vld [vmem:[#allocation10 + $0x628] ss:$16 sps:$4 sm:$0xff]   ;;  %v16163_v2 = vld [vmem:[#allocation10 + $0x644] ss:$16 sps:$4 sm:$0xff]  }
 0x6fb   :  { %v16166_v17 = vld [vmem:[#allocation10 + $0x64c] ss:$16 sps:$4 sm:$0xff]  }
 0x6fc   :  { %8800 = vmatpush1.bf16.msra.mxu0 %v16101_v26  ;;  %v16161_v26 = vld [vmem:[#allocation10 + $0x640] ss:$16 sps:$4 sm:$0xff]  }
 0x6fd   :  { %8902 = vmatpush1.bf16.msra.mxu1 %v16104_v55  ;;  %8801 = vmatprep.subr.bf16.mxu0 %v16109_v27  ;;  %v16164_v55 = vld [vmem:[#allocation10 + $0x648] ss:$16 sps:$4 sm:$0xff]   ;;  %v16169_v27 = vld [vmem:[#allocation10 + $0x664] ss:$16 sps:$4 sm:$0xff]  }
 0x6fe   :  { %8903 = vmatprep.subr.bf16.mxu1 %v16112_v19  ;;  %v16170_v19 = vld [vmem:[#allocation10 + $0x668] ss:$16 sps:$4 sm:$0xff]  }
 0x700   :  { %8802 = vmatpush1.bf16.msra.mxu0 %v16107_v15  ;;  %v16175_v15 = vld [vmem:[#allocation10 + $0x684] ss:$16 sps:$4 sm:$0xff]  }
 0x701   :  { %8904 = vmatpush1.bf16.msra.mxu1 %v16110_v29  ;;  %8803 = vmatprep.subr.bf16.mxu0 %v16115_v28  ;;  %v16178_v29 = vld [vmem:[#allocation10 + $0x68c] ss:$16 sps:$4 sm:$0xff]   ;;  %v16173_v28 = vld [vmem:[#allocation10 + $0x680] ss:$16 sps:$4 sm:$0xff]  }
 0x702   :  { %8905 = vmatprep.subr.bf16.mxu1 %v16118_v57  ;;  %v16176_v57 = vld [vmem:[#allocation10 + $0x688] ss:$16 sps:$4 sm:$0xff]  }
 0x704   :  { %8804 = vmatpush1.bf16.msra.mxu0 %v16113_v7  ;;  %v16181_v7 = vld [vmem:[#allocation10 + $0x6a4] ss:$16 sps:$4 sm:$0xff]  }
 0x705   :  { %8906 = vmatpush1.bf16.msra.mxu1 %v16116_v47  ;;  %8805 = vmatprep.subr.bf16.mxu0 %v16121_v39  ;;  %v16179_v47 = vld [vmem:[#allocation10 + $0x6a0] ss:$16 sps:$4 sm:$0xff]   ;;  %v16187_v39 = vld [vmem:[#allocation10 + $0x6c4] ss:$16 sps:$4 sm:$0xff]  }
 0x706   :  { %8907 = vmatprep.subr.bf16.mxu1 %v16124_v50  ;;  %v16190_v50 = vld [vmem:[#allocation10 + $0x6cc] ss:$16 sps:$4 sm:$0xff]  }
 0x708   :  { %8806 = vmatpush1.bf16.msra.mxu0 %v16119_v51  ;;  %v16185_v51 = vld [vmem:[#allocation10 + $0x6c0] ss:$16 sps:$4 sm:$0xff]  }
 0x709   :  { %8908 = vmatpush1.bf16.msra.mxu1 %v16122_v0  ;;  %8807 = vmatprep.subr.bf16.mxu0 %v16127_v5  ;;  %v16188_v0 = vld [vmem:[#allocation10 + $0x6c8] ss:$16 sps:$4 sm:$0xff]   ;;  %v16193_v5 = vld [vmem:[#allocation10 + $0x6e4] ss:$16 sps:$4 sm:$0xff]  }
 0x70a   :  { %8909 = vmatprep.subr.bf16.mxu1 %v16130_v40 }
 0x70c   :  { %8808 = vmatpush1.bf16.msra.mxu0 %v16125_v63  ;;  %v16196_v63 = vld [vmem:[#allocation10 + $0x6ec] ss:$16 sps:$4 sm:$0xff]  }
 0x70d   :  { %8910 = vmatpush1.bf16.msra.mxu1 %v16128_v43  ;;  %8809 = vmatprep.subr.bf16.mxu0 %v16133_v46 }
 0x70e   :  { %8911 = vmatprep.subr.bf16.mxu1 %v16136_v62 }
 0x710   :  { %8810 = vmatpush1.bf16.msra.mxu0 %v16131_v38 }
 0x711   :  { %8912 = vmatpush1.bf16.msra.mxu1 %v16134_v41  ;;  %8811 = vmatprep.subr.bf16.mxu0 %v16139_v49 }
 0x712   :  { %8913 = vmatprep.subr.bf16.mxu1 %v16142_v16  ;;  %v16191_v16 = vld [vmem:[#allocation10 + $0x6e0] ss:$16 sps:$4 sm:$0xff]  }
 0x714   :  { %8812 = vmatpush1.bf16.msra.mxu0 %v16137_v4 }
 0x715   :  { %8914 = vmatpush1.bf16.msra.mxu1 %v16140_v21  ;;  %8813 = vmatprep.subr.bf16.mxu0 %v16145_v58  ;;  %v16194_v58 = vld [vmem:[#allocation10 + $0x6e8] ss:$16 sps:$4 sm:$0xff]  }
 0x716   :  { %8915 = vmatprep.subr.bf16.mxu1 %v16148_v59 }
 0x718   :  { %8814 = vmatpush1.bf16.msra.mxu0 %v16143_v60  ;;  %v16199_v60 = vld [vmem:[#allocation10 + $0x704] ss:$16 sps:$4 sm:$0xff]  }
 0x719   :  { %8916 = vmatpush1.bf16.msra.mxu1 %v16146_v8  ;;  %8834 = vmatprep.subr.bf16.mxu0 %v16151_v3  ;;  %v16202_v3 = vld [vmem:[#allocation10 + $0x70c] ss:$16 sps:$4 sm:$0xff]  }
 0x71a   :  { %8936 = vmatprep.subr.bf16.mxu1 %v16154_v34  ;;  %v16205_v34 = vld [vmem:[#allocation10 + $0x724] ss:$16 sps:$4 sm:$0xff]  }
 0x71b   :  { %8816 = vmatmul.mubr.bf16.vlgmr.msra.gmra.mrb[52].mxu0 %v17469_v24 }
 0x71c   :  { %8918 = vmatmul.mubr.bf16.vlgmr.msra.gmra.mrb[60].mxu1 %v17469_v24  ;;  %8825 = vmatprep.mubr.bf16.mxu0 %v17450_v53  ;;  %v16172_v24 = vld [vmem:[#allocation10 + $0x66c] ss:$16 sps:$4 sm:$0xff]  }
 0x71d   :  { %8835 = vmatpush1.bf16.msra.mxu0 %v16149_v37  ;;  %8927 = vmatprep.mubr.bf16.mxu1 %v17450_v53  ;;  %v16167_v53 = vld [vmem:[#allocation10 + $0x660] ss:$16 sps:$4 sm:$0xff]   ;;  %v16208_v37 = vld [vmem:[#allocation10 + $0x72c] ss:$16 sps:$4 sm:$0xff]  }
 0x71e   :  { %8937 = vmatpush1.bf16.msra.mxu1 %v16152_v52  ;;  %8836 = vmatprep.subr.bf16.mxu0 %v16157_v22  ;;  %v16203_v52 = vld [vmem:[#allocation10 + $0x720] ss:$16 sps:$4 sm:$0xff]   ;;  %v16211_v22 = vld [vmem:[#allocation10 + $0x744] ss:$16 sps:$4 sm:$0xff]  }
 0x71f   :  { %8938 = vmatprep.subr.bf16.mxu1 %v16160_v23  ;;  %v16214_v23 = vld [vmem:[#allocation10 + $0x74c] ss:$16 sps:$4 sm:$0xff]  }
 0x721   :  { %8837 = vmatpush1.bf16.msra.mxu0 %v16155_v25  ;;  %v16209_v25 = vld [vmem:[#allocation10 + $0x740] ss:$16 sps:$4 sm:$0xff]  }
 0x722   :  { %8939 = vmatpush1.bf16.msra.mxu1 %v16158_v13  ;;  %8838 = vmatprep.subr.bf16.mxu0 %v16163_v2  ;;  %v16212_v13 = vld [vmem:[#allocation10 + $0x748] ss:$16 sps:$4 sm:$0xff]   ;;  %v16217_v2 = vld [vmem:[#allocation10 + $0x764] ss:$16 sps:$4 sm:$0xff]  }
 0x723   :  { %8826 = vmatmul.mubr.bf16.gmra.mrb[64].mxu0 %v17464_v9  ;;  %8940 = vmatprep.subr.bf16.mxu1 %v16166_v17  ;;  %v16220_v17 = vld [vmem:[#allocation10 + $0x76c] ss:$16 sps:$4 sm:$0xff]  }
 0x724   :  { %8928 = vmatmul.mubr.bf16.gmra.mrb[72].mxu1 %v17464_v9  ;;  %8866 = vmatprep.mubr.bf16.mxu0 %v17483_v48  ;;  %v16184_v9 = vld [vmem:[#allocation10 + $0x6ac] ss:$16 sps:$4 sm:$0xff]  }
 0x725   :  { %8839 = vmatpush1.bf16.msra.mxu0 %v16161_v26  ;;  %8968 = vmatprep.mubr.bf16.mxu1 %v17483_v48  ;;  %v16182_v48 = vld [vmem:[#allocation10 + $0x6a8] ss:$16 sps:$4 sm:$0xff]   ;;  %v16215_v26 = vld [vmem:[#allocation10 + $0x760] ss:$16 sps:$4 sm:$0xff]  }
 0x726   :  { %8941 = vmatpush1.bf16.msra.mxu1 %v16164_v55  ;;  %8840 = vmatprep.subr.bf16.mxu0 %v16169_v27  ;;  %v16218_v55 = vld [vmem:[#allocation10 + $0x768] ss:$16 sps:$4 sm:$0xff]   ;;  %v16223_v27 = vld [vmem:[#allocation10 + $0x784] ss:$16 sps:$4 sm:$0xff]  }
 0x727   :  { %8942 = vmatprep.subr.bf16.mxu1 %v16172_v24  ;;  %v16226_v24 = vld [vmem:[#allocation10 + $0x78c] ss:$16 sps:$4 sm:$0xff]  }
 0x729   :  { %8841 = vmatpush1.bf16.msra.mxu0 %v16167_v53  ;;  %v16221_v53 = vld [vmem:[#allocation10 + $0x780] ss:$16 sps:$4 sm:$0xff]  }
 0x72a   :  { %8943 = vmatpush1.bf16.msra.mxu1 %v16170_v19  ;;  %8842 = vmatprep.subr.bf16.mxu0 %v16175_v15  ;;  %v16224_v19 = vld [vmem:[#allocation10 + $0x788] ss:$16 sps:$4 sm:$0xff]   ;;  %v16229_v15 = vld [vmem:[#allocation10 + $0x7a4] ss:$16 sps:$4 sm:$0xff]  }
 0x72b   :  { %8944 = vmatprep.subr.bf16.mxu1 %v16178_v29  ;;  %v16232_v29 = vld [vmem:[#allocation10 + $0x7ac] ss:$16 sps:$4 sm:$0xff]  }
 0x72d   :  { %8843 = vmatpush1.bf16.msra.mxu0 %v16173_v28  ;;  %v16227_v28 = vld [vmem:[#allocation10 + $0x7a0] ss:$16 sps:$4 sm:$0xff]  }
 0x72e   :  { %8945 = vmatpush1.bf16.msra.mxu1 %v16176_v57  ;;  %8844 = vmatprep.subr.bf16.mxu0 %v16181_v7  ;;  %v16230_v57 = vld [vmem:[#allocation10 + $0x7a8] ss:$16 sps:$4 sm:$0xff]   ;;  %v16235_v7 = vld [vmem:[#allocation10 + $0x7c4] ss:$16 sps:$4 sm:$0xff]  }
 0x72f   :  { %8946 = vmatprep.subr.bf16.mxu1 %v16184_v9  ;;  %v16238_v9 = vld [vmem:[#allocation10 + $0x7cc] ss:$16 sps:$4 sm:$0xff]  }
 0x731   :  { %8845 = vmatpush1.bf16.msra.mxu0 %v16179_v47  ;;  %v16233_v47 = vld [vmem:[#allocation10 + $0x7c0] ss:$16 sps:$4 sm:$0xff]  }
 0x732   :  { %8947 = vmatpush1.bf16.msra.mxu1 %v16182_v48  ;;  %8846 = vmatprep.subr.bf16.mxu0 %v16187_v39  ;;  %v16236_v48 = vld [vmem:[#allocation10 + $0x7c8] ss:$16 sps:$4 sm:$0xff]   ;;  %v16241_v39 = vld [vmem:[#allocation10 + $0x7e4] ss:$16 sps:$4 sm:$0xff]  }
 0x733   :  { %8948 = vmatprep.subr.bf16.mxu1 %v16190_v50  ;;  %v7061_v40 = vpop.f32.mrb[48].mxu0  ;;  %v16244_v50 = vld [vmem:[#allocation10 + $0x7ec] ss:$16 sps:$4 sm:$0xff]  }
 0x734   :  { %v17560_v43 = vadd.f32 %v7061_v40, %v17540_v61  ;;  %v7163_v46 = vpop.f32.mrb[56].mxu1  ;;  %v7063_v62 = vpop.f32.mrb[49].mxu0  ;;  %v16250_v40 = vld [vmem:[#allocation10 + $0x100c] ss:$16 sps:$4 sm:$0xff]  }
 0x735   :  { %8847 = vmatpush1.bf16.msra.mxu0 %v16185_v51  ;;  %v17563_v38 = vadd.f32 %v7163_v46, %v17543_v1  ;;  %v17566_v41 = vadd.f32 %v7063_v62, %v17546_v14  ;;  %v7165_v49 = vpop.f32.mrb[57].mxu1  ;;  %v7065_v4 = vpop.f32.mrb[50].mxu0  ;;  %v16197_v1 = vld [vmem:[#allocation10 + $0x700] ss:$16 sps:$4 sm:$0xff]   ;;  %v16200_v14 = vld [vmem:[#allocation10 + $0x708] ss:$16 sps:$4 sm:$0xff]  }
 0x736   :  { %8949 = vmatpush1.bf16.msra.mxu1 %v16188_v0  ;;  %v17569_v21 = vadd.f32 %v7165_v49, %v17549_v10  ;;  %8848 = vmatprep.subr.bf16.mxu0 %v16193_v5  ;;  %v7167_v61 = vpop.f32.mrb[58].mxu1  ;;  %v7066_v59 = vpop.f32.mrb[51].mxu0  ;;  %v16206_v10 = vld [vmem:[#allocation10 + $0x728] ss:$16 sps:$4 sm:$0xff]   ;;  %v16239_v51 = vld [vmem:[#allocation10 + $0x7e0] ss:$16 sps:$4 sm:$0xff]  }
 0x737   :  { %8950 = vmatprep.subr.bf16.mxu1 %v16196_v63  ;;  %v7168_v8 = vpop.f32.mrb[59].mxu1  ;;  %v16242_v0 = vld [vmem:[#allocation10 + $0x7e8] ss:$16 sps:$4 sm:$0xff]   ;;  %v16247_v5 = vld [vmem:[#allocation10 + $0x1004] ss:$16 sps:$4 sm:$0xff]  }
 0x738   :  { %v16245_v63 = vld [vmem:[#allocation10 + $0x1000] ss:$16 sps:$4 sm:$0xff]   ;;  %v16248_v46 = vld [vmem:[#allocation10 + $0x1008] ss:$16 sps:$4 sm:$0xff]   ;;  %v16253_v62 = vld [vmem:[#allocation10 + $0x1024] ss:$16 sps:$4 sm:$0xff]  }
 0x739   :  { %8849 = vmatpush1.bf16.msra.mxu0 %v16191_v16  ;;  %v16256_v49 = vld [vmem:[#allocation10 + $0x102c] ss:$16 sps:$4 sm:$0xff]   ;;  %v16251_v16 = vld [vmem:[#allocation10 + $0x1020] ss:$16 sps:$4 sm:$0xff]   ;;  %v16254_v4 = vld [vmem:[#allocation10 + $0x1028] ss:$16 sps:$4 sm:$0xff]  }
 0x73a   :  { %8951 = vmatpush1.bf16.msra.mxu1 %v16194_v58  ;;  %8850 = vmatprep.subr.bf16.mxu0 %v16199_v60  ;;  %v16259_v58 = vld [vmem:[#allocation10 + $0x1044] ss:$16 sps:$4 sm:$0xff]   ;;  %v16262_v61 = vld [vmem:[#allocation10 + $0x104c] ss:$16 sps:$4 sm:$0xff]   ;;  %v16257_v59 = vld [vmem:[#allocation10 + $0x1040] ss:$16 sps:$4 sm:$0xff]  }
 0x73b   :  { %8952 = vmatprep.subr.bf16.mxu1 %v16202_v3  ;;  %v16260_v60 = vld [vmem:[#allocation10 + $0x1048] ss:$16 sps:$4 sm:$0xff]   ;;  %v16265_v8 = vld [vmem:[#allocation10 + $0x1064] ss:$16 sps:$4 sm:$0xff]  }
 0x73c   :  { %v16266_v3 = vld [vmem:[#allocation10 + $0x1068] ss:$16 sps:$4 sm:$0xff]  }
 0x73d   :  { %8851 = vmatpush1.bf16.msra.mxu0 %v16197_v1  ;;  %v16271_v1 = vld [vmem:[#allocation10 + $0x1084] ss:$16 sps:$4 sm:$0xff]  }
 0x73e   :  { %8953 = vmatpush1.bf16.msra.mxu1 %v16200_v14  ;;  %8852 = vmatprep.subr.bf16.mxu0 %v16205_v34  ;;  %v16274_v14 = vld [vmem:[#allocation10 + $0x108c] ss:$16 sps:$4 sm:$0xff]   ;;  %v16269_v34 = vld [vmem:[#allocation10 + $0x1080] ss:$16 sps:$4 sm:$0xff]  }
 0x73f   :  { %8954 = vmatprep.subr.bf16.mxu1 %v16208_v37  ;;  %v16272_v37 = vld [vmem:[#allocation10 + $0x1088] ss:$16 sps:$4 sm:$0xff]  }
 0x741   :  { %8853 = vmatpush1.bf16.msra.mxu0 %v16203_v52  ;;  %v16277_v52 = vld [vmem:[#allocation10 + $0x10a4] ss:$16 sps:$4 sm:$0xff]  }
 0x742   :  { %8955 = vmatpush1.bf16.msra.mxu1 %v16206_v10  ;;  %8854 = vmatprep.subr.bf16.mxu0 %v16211_v22  ;;  %v16275_v10 = vld [vmem:[#allocation10 + $0x10a0] ss:$16 sps:$4 sm:$0xff]   ;;  %v16283_v22 = vld [vmem:[#allocation10 + $0x10c4] ss:$16 sps:$4 sm:$0xff]  }
 0x743   :  { %8956 = vmatprep.subr.bf16.mxu1 %v16214_v23  ;;  %v16286_v23 = vld [vmem:[#allocation10 + $0x10cc] ss:$16 sps:$4 sm:$0xff]  }
 0x745   :  { %8855 = vmatpush1.bf16.msra.mxu0 %v16209_v25  ;;  %v16281_v25 = vld [vmem:[#allocation10 + $0x10c0] ss:$16 sps:$4 sm:$0xff]  }
 0x746   :  { %8957 = vmatpush1.bf16.msra.mxu1 %v16212_v13  ;;  %8856 = vmatprep.subr.bf16.mxu0 %v16217_v2  ;;  %v16284_v13 = vld [vmem:[#allocation10 + $0x10c8] ss:$16 sps:$4 sm:$0xff]   ;;  %v16289_v2 = vld [vmem:[#allocation10 + $0x10e4] ss:$16 sps:$4 sm:$0xff]  }
 0x747   :  { %8958 = vmatprep.subr.bf16.mxu1 %v16220_v17 }
 0x749   :  { %8857 = vmatpush1.bf16.msra.mxu0 %v16215_v26  ;;  %v16292_v26 = vld [vmem:[#allocation10 + $0x10ec] ss:$16 sps:$4 sm:$0xff]  }
 0x74a   :  { %8959 = vmatpush1.bf16.msra.mxu1 %v16218_v55  ;;  %8858 = vmatprep.subr.bf16.mxu0 %v16223_v27 }
 0x74b   :  { %8960 = vmatprep.subr.bf16.mxu1 %v16226_v24 }
 0x74d   :  { %8859 = vmatpush1.bf16.msra.mxu0 %v16221_v53  ;;  %v16287_v53 = vld [vmem:[#allocation10 + $0x10e0] ss:$16 sps:$4 sm:$0xff]  }
 0x74e   :  { %8961 = vmatpush1.bf16.msra.mxu1 %v16224_v19  ;;  %8860 = vmatprep.subr.bf16.mxu0 %v16229_v15  ;;  %v16290_v15 = vld [vmem:[#allocation10 + $0x10e8] ss:$16 sps:$4 sm:$0xff]  }
 0x74f   :  { %8962 = vmatprep.subr.bf16.mxu1 %v16232_v29 }
 0x751   :  { %8861 = vmatpush1.bf16.msra.mxu0 %v16227_v28 }
 0x752   :  { %8963 = vmatpush1.bf16.msra.mxu1 %v16230_v57  ;;  %8862 = vmatprep.subr.bf16.mxu0 %v16235_v7  ;;  %v16295_v57 = vld [vmem:[#allocation10 + $0x1104] ss:$16 sps:$4 sm:$0xff]  }
 0x753   :  { %8964 = vmatprep.subr.bf16.mxu1 %v16238_v9  ;;  %v16298_v9 = vld [vmem:[#allocation10 + $0x110c] ss:$16 sps:$4 sm:$0xff]  }
 0x755   :  { %8863 = vmatpush1.bf16.msra.mxu0 %v16233_v47  ;;  %v16293_v47 = vld [vmem:[#allocation10 + $0x1100] ss:$16 sps:$4 sm:$0xff]  }
 0x756   :  { %8965 = vmatpush1.bf16.msra.mxu1 %v16236_v48  ;;  %8864 = vmatprep.subr.bf16.mxu0 %v16241_v39  ;;  %v16296_v48 = vld [vmem:[#allocation10 + $0x1108] ss:$16 sps:$4 sm:$0xff]   ;;  %v16301_v39 = vld [vmem:[#allocation10 + $0x1124] ss:$16 sps:$4 sm:$0xff]  }
 0x757   :  { %8966 = vmatprep.subr.bf16.mxu1 %v16244_v50  ;;  %v16304_v50 = vld [vmem:[#allocation10 + $0x112c] ss:$16 sps:$4 sm:$0xff]  }
 0x759   :  { %8865 = vmatpush1.bf16.msra.mxu0 %v16239_v51  ;;  %v16299_v51 = vld [vmem:[#allocation10 + $0x1120] ss:$16 sps:$4 sm:$0xff]  }
 0x75a   :  { %8967 = vmatpush1.bf16.msra.mxu1 %v16242_v0  ;;  %9756 = vmatprep.subr.bf16.mxu0 %v16247_v5  ;;  %v16302_v0 = vld [vmem:[#allocation10 + $0x1128] ss:$16 sps:$4 sm:$0xff]   ;;  %v16307_v5 = vld [vmem:[#allocation10 + $0x1144] ss:$16 sps:$4 sm:$0xff]  }
 0x75b   :  { %9858 = vmatprep.subr.bf16.mxu1 %v16250_v40  ;;  %v16310_v40 = vld [vmem:[#allocation10 + $0x114c] ss:$16 sps:$4 sm:$0xff]  }
 0x75c   :  { %8867 = vmatmul.mubr.bf16.vlgmr.msra.gmra.mrb[52].mxu0 %v17493_v18 }
 0x75d   :  { %8969 = vmatmul.mubr.bf16.vlgmr.msra.gmra.mrb[60].mxu1 %v17493_v18  ;;  %8876 = vmatprep.mubr.bf16.mxu0 %v17476_v31  ;;  %v16268_v18 = vld [vmem:[#allocation10 + $0x106c] ss:$16 sps:$4 sm:$0xff]  }
 0x75e   :  { %8978 = vmatprep.mubr.bf16.mxu1 %v17476_v31  ;;  %9757 = vmatpush1.bf16.msra.mxu0 %v16245_v63  ;;  %v16263_v31 = vld [vmem:[#allocation10 + $0x1060] ss:$16 sps:$4 sm:$0xff]  }
 0x75f   :  { %9859 = vmatpush1.bf16.msra.mxu1 %v16248_v46  ;;  %9758 = vmatprep.subr.bf16.mxu0 %v16253_v62  ;;  %v16305_v63 = vld [vmem:[#allocation10 + $0x1140] ss:$16 sps:$4 sm:$0xff]   ;;  %v16308_v46 = vld [vmem:[#allocation10 + $0x1148] ss:$16 sps:$4 sm:$0xff]   ;;  %v16313_v62 = vld [vmem:[#allocation10 + $0x1164] ss:$16 sps:$4 sm:$0xff]  }
 0x760   :  { %9860 = vmatprep.subr.bf16.mxu1 %v16256_v49  ;;  %v16316_v49 = vld [vmem:[#allocation10 + $0x116c] ss:$16 sps:$4 sm:$0xff]  }
 0x762   :  { %9759 = vmatpush1.bf16.msra.mxu0 %v16251_v16  ;;  %v16311_v16 = vld [vmem:[#allocation10 + $0x1160] ss:$16 sps:$4 sm:$0xff]  }
 0x763   :  { %9861 = vmatpush1.bf16.msra.mxu1 %v16254_v4  ;;  %9760 = vmatprep.subr.bf16.mxu0 %v16259_v58  ;;  %v16314_v4 = vld [vmem:[#allocation10 + $0x1168] ss:$16 sps:$4 sm:$0xff]   ;;  %v16319_v58 = vld [vmem:[#allocation10 + $0x1184] ss:$16 sps:$4 sm:$0xff]  }
 0x764   :  { %8877 = vmatmul.mubr.bf16.gmra.mrb[68].mxu0 %v17488_v42  ;;  %9862 = vmatprep.subr.bf16.mxu1 %v16262_v61  ;;  %v16322_v61 = vld [vmem:[#allocation10 + $0x118c] ss:$16 sps:$4 sm:$0xff]  }
 0x765   :  { %8979 = vmatmul.mubr.bf16.gmra.mrb[76].mxu1 %v17488_v42  ;;  %9788 = vmatprep.mubr.bf16.mxu0 %v17379_v32  ;;  %v16280_v42 = vld [vmem:[#allocation10 + $0x10ac] ss:$16 sps:$4 sm:$0xff]  }
 0x766   :  { %9761 = vmatpush1.bf16.msra.mxu0 %v16257_v59  ;;  %9890 = vmatprep.mubr.bf16.mxu1 %v17379_v32  ;;  %v16278_v32 = vld [vmem:[#allocation10 + $0x10a8] ss:$16 sps:$4 sm:$0xff]   ;;  %v16317_v59 = vld [vmem:[#allocation10 + $0x1180] ss:$16 sps:$4 sm:$0xff]  }
 0x767   :  { %9863 = vmatpush1.bf16.msra.mxu1 %v16260_v60  ;;  %9762 = vmatprep.subr.bf16.mxu0 %v16265_v8  ;;  %v16320_v60 = vld [vmem:[#allocation10 + $0x1188] ss:$16 sps:$4 sm:$0xff]   ;;  %v16325_v8 = vld [vmem:[#allocation10 + $0x11a4] ss:$16 sps:$4 sm:$0xff]  }
 0x768   :  { %9864 = vmatprep.subr.bf16.mxu1 %v16268_v18  ;;  %v16328_v18 = vld [vmem:[#allocation10 + $0x11ac] ss:$16 sps:$4 sm:$0xff]  }
 0x76a   :  { %9763 = vmatpush1.bf16.msra.mxu0 %v16263_v31  ;;  %v16323_v31 = vld [vmem:[#allocation10 + $0x11a0] ss:$16 sps:$4 sm:$0xff]  }
 0x76b   :  { %9865 = vmatpush1.bf16.msra.mxu1 %v16266_v3  ;;  %9764 = vmatprep.subr.bf16.mxu0 %v16271_v1  ;;  %v16326_v3 = vld [vmem:[#allocation10 + $0x11a8] ss:$16 sps:$4 sm:$0xff]   ;;  %v16331_v1 = vld [vmem:[#allocation10 + $0x11c4] ss:$16 sps:$4 sm:$0xff]  }
 0x76c   :  { %9866 = vmatprep.subr.bf16.mxu1 %v16274_v14  ;;  %v16334_v14 = vld [vmem:[#allocation10 + $0x11cc] ss:$16 sps:$4 sm:$0xff]  }
 0x76e   :  { %9765 = vmatpush1.bf16.msra.mxu0 %v16269_v34  ;;  %v16329_v34 = vld [vmem:[#allocation10 + $0x11c0] ss:$16 sps:$4 sm:$0xff]  }
 0x76f   :  { %9867 = vmatpush1.bf16.msra.mxu1 %v16272_v37  ;;  %9766 = vmatprep.subr.bf16.mxu0 %v16277_v52  ;;  %v16332_v37 = vld [vmem:[#allocation10 + $0x11c8] ss:$16 sps:$4 sm:$0xff]   ;;  %v16337_v52 = vld [vmem:[#allocation10 + $0x11e4] ss:$16 sps:$4 sm:$0xff]  }
 0x770   :  { %9868 = vmatprep.subr.bf16.mxu1 %v16280_v42  ;;  %v16340_v42 = vld [vmem:[#allocation10 + $0x11ec] ss:$16 sps:$4 sm:$0xff]  }
 0x772   :  { %9767 = vmatpush1.bf16.msra.mxu0 %v16275_v10  ;;  %v16335_v10 = vld [vmem:[#allocation10 + $0x11e0] ss:$16 sps:$4 sm:$0xff]  }
 0x773   :  { %9869 = vmatpush1.bf16.msra.mxu1 %v16278_v32  ;;  %9768 = vmatprep.subr.bf16.mxu0 %v16283_v22  ;;  %v16338_v32 = vld [vmem:[#allocation10 + $0x11e8] ss:$16 sps:$4 sm:$0xff]   ;;  %v16343_v22 = vld [vmem:[#allocation10 + $0x1204] ss:$16 sps:$4 sm:$0xff]  }
 0x774   :  { %9870 = vmatprep.subr.bf16.mxu1 %v16286_v23  ;;  %v17579_v17 = vpop.f32.mrb[56].mxu0  ;;  %v16346_v23 = vld [vmem:[#allocation10 + $0x120c] ss:$16 sps:$4 sm:$0xff]  }
 0x775   :  { %v17581_v55 = vpop.f32.mrb[64].mxu1  ;;  %v17583_v27 = vpop.f32.mrb[57].mxu0 }
 0x776   :  { %9769 = vmatpush1.bf16.msra.mxu0 %v16281_v25  ;;  %v17585_v24 = vpop.f32.mrb[65].mxu1  ;;  %v7987_v19 = vpop.f32.mrb[58].mxu0  ;;  %v16341_v25 = vld [vmem:[#allocation10 + $0x1200] ss:$16 sps:$4 sm:$0xff]  }
 0x777   :  { %9871 = vmatpush1.bf16.msra.mxu1 %v16284_v13  ;;  %9770 = vmatprep.subr.bf16.mxu0 %v16289_v2  ;;  %v8089_v29 = vpop.f32.mrb[66].mxu1  ;;  %v7988_v28 = vpop.f32.mrb[59].mxu0  ;;  %v16344_v13 = vld [vmem:[#allocation10 + $0x1208] ss:$16 sps:$4 sm:$0xff]   ;;  %v16349_v2 = vld [vmem:[#allocation10 + $0x1224] ss:$16 sps:$4 sm:$0xff]  }
 0x778   :  { %9872 = vmatprep.subr.bf16.mxu1 %v16292_v26  ;;  %v8090_v7 = vpop.f32.mrb[67].mxu1  ;;  %v16352_v26 = vld [vmem:[#allocation10 + $0x122c] ss:$16 sps:$4 sm:$0xff]   ;;  %v16350_v19 = vld [vmem:[#allocation10 + $0x1228] ss:$16 sps:$4 sm:$0xff]  }
 0x779   :  { %v16358_v29 = vld [vmem:[#allocation10 + $0x124c] ss:$16 sps:$4 sm:$0xff]   ;;  %v16353_v28 = vld [vmem:[#allocation10 + $0x1240] ss:$16 sps:$4 sm:$0xff]   ;;  %v16361_v7 = vld [vmem:[#allocation10 + $0x1264] ss:$16 sps:$4 sm:$0xff]  }
 0x77a   :  { %9771 = vmatpush1.bf16.msra.mxu0 %v16287_v53  ;;  %v16347_v53 = vld [vmem:[#allocation10 + $0x1220] ss:$16 sps:$4 sm:$0xff]  }
 0x77b   :  { %9873 = vmatpush1.bf16.msra.mxu1 %v16290_v15  ;;  %9772 = vmatprep.subr.bf16.mxu0 %v16295_v57  ;;  %v16355_v15 = vld [vmem:[#allocation10 + $0x1244] ss:$16 sps:$4 sm:$0xff]   ;;  %v16356_v57 = vld [vmem:[#allocation10 + $0x1248] ss:$16 sps:$4 sm:$0xff]  }
 0x77c   :  { %9874 = vmatprep.subr.bf16.mxu1 %v16298_v9  ;;  %v16362_v9 = vld [vmem:[#allocation10 + $0x1268] ss:$16 sps:$4 sm:$0xff]  }
 0x77e   :  { %9773 = vmatpush1.bf16.msra.mxu0 %v16293_v47  ;;  %v16367_v47 = vld [vmem:[#allocation10 + $0x1284] ss:$16 sps:$4 sm:$0xff]  }
 0x77f   :  { %9875 = vmatpush1.bf16.msra.mxu1 %v16296_v48  ;;  %9774 = vmatprep.subr.bf16.mxu0 %v16301_v39  ;;  %v16370_v48 = vld [vmem:[#allocation10 + $0x128c] ss:$16 sps:$4 sm:$0xff]   ;;  %v16365_v39 = vld [vmem:[#allocation10 + $0x1280] ss:$16 sps:$4 sm:$0xff]  }
 0x780   :  { %9876 = vmatprep.subr.bf16.mxu1 %v16304_v50  ;;  %v16368_v50 = vld [vmem:[#allocation10 + $0x1288] ss:$16 sps:$4 sm:$0xff]  }
 0x782   :  { %9775 = vmatpush1.bf16.msra.mxu0 %v16299_v51  ;;  %v16373_v51 = vld [vmem:[#allocation10 + $0x12a4] ss:$16 sps:$4 sm:$0xff]  }
 0x783   :  { %9877 = vmatpush1.bf16.msra.mxu1 %v16302_v0  ;;  %9776 = vmatprep.subr.bf16.mxu0 %v16307_v5  ;;  %v16371_v0 = vld [vmem:[#allocation10 + $0x12a0] ss:$16 sps:$4 sm:$0xff]   ;;  %v16379_v5 = vld [vmem:[#allocation10 + $0x12c4] ss:$16 sps:$4 sm:$0xff]  }
 0x784   :  { %9878 = vmatprep.subr.bf16.mxu1 %v16310_v40  ;;  %v16382_v40 = vld [vmem:[#allocation10 + $0x12cc] ss:$16 sps:$4 sm:$0xff]  }
 0x786   :  { %9777 = vmatpush1.bf16.msra.mxu0 %v16305_v63  ;;  %v16377_v63 = vld [vmem:[#allocation10 + $0x12c0] ss:$16 sps:$4 sm:$0xff]  }
 0x787   :  { %9879 = vmatpush1.bf16.msra.mxu1 %v16308_v46  ;;  %9778 = vmatprep.subr.bf16.mxu0 %v16313_v62  ;;  %v16380_v46 = vld [vmem:[#allocation10 + $0x12c8] ss:$16 sps:$4 sm:$0xff]   ;;  %v16385_v62 = vld [vmem:[#allocation10 + $0x12e4] ss:$16 sps:$4 sm:$0xff]  }
 0x788   :  { %9880 = vmatprep.subr.bf16.mxu1 %v16316_v49 }
 0x78a   :  { %9779 = vmatpush1.bf16.msra.mxu0 %v16311_v16  ;;  %v16388_v16 = vld [vmem:[#allocation10 + $0x12ec] ss:$16 sps:$4 sm:$0xff]  }
 0x78b   :  { %9881 = vmatpush1.bf16.msra.mxu1 %v16314_v4  ;;  %9780 = vmatprep.subr.bf16.mxu0 %v16319_v58 }
 0x78c   :  { %9882 = vmatprep.subr.bf16.mxu1 %v16322_v61 }
 0x78e   :  { %9781 = vmatpush1.bf16.msra.mxu0 %v16317_v59 }
 0x78f   :  { %9883 = vmatpush1.bf16.msra.mxu1 %v16320_v60  ;;  %9782 = vmatprep.subr.bf16.mxu0 %v16325_v8 }
 0x790   :  { %9884 = vmatprep.subr.bf16.mxu1 %v16328_v18  ;;  %v16383_v18 = vld [vmem:[#allocation10 + $0x12e0] ss:$16 sps:$4 sm:$0xff]  }
 0x792   :  { %9783 = vmatpush1.bf16.msra.mxu0 %v16323_v31 }
 0x793   :  { %9885 = vmatpush1.bf16.msra.mxu1 %v16326_v3  ;;  %9784 = vmatprep.subr.bf16.mxu0 %v16331_v1  ;;  %v16386_v1 = vld [vmem:[#allocation10 + $0x12e8] ss:$16 sps:$4 sm:$0xff]  }
 0x794   :  { %9886 = vmatprep.subr.bf16.mxu1 %v16334_v14 }
 0x796   :  { %9785 = vmatpush1.bf16.msra.mxu0 %v16329_v34  ;;  %v16391_v34 = vld [vmem:[#allocation10 + $0x1304] ss:$16 sps:$4 sm:$0xff]  }
 0x797   :  { %9887 = vmatpush1.bf16.msra.mxu1 %v16332_v37  ;;  %9786 = vmatprep.subr.bf16.mxu0 %v16337_v52  ;;  %v16394_v52 = vld [vmem:[#allocation10 + $0x130c] ss:$16 sps:$4 sm:$0xff]  }
 0x798   :  { %9888 = vmatprep.subr.bf16.mxu1 %v16340_v42  ;;  %v16397_v42 = vld [vmem:[#allocation10 + $0x1324] ss:$16 sps:$4 sm:$0xff]  }
 0x79a   :  { %9787 = vmatpush1.bf16.msra.mxu0 %v16335_v10  ;;  %v16400_v10 = vld [vmem:[#allocation10 + $0x132c] ss:$16 sps:$4 sm:$0xff]  }
 0x79b   :  { %9889 = vmatpush1.bf16.msra.mxu1 %v16338_v32  ;;  %9807 = vmatprep.subr.bf16.mxu0 %v16343_v22  ;;  %v16395_v32 = vld [vmem:[#allocation10 + $0x1320] ss:$16 sps:$4 sm:$0xff]   ;;  %v16403_v22 = vld [vmem:[#allocation10 + $0x1344] ss:$16 sps:$4 sm:$0xff]  }
 0x79c   :  { %9909 = vmatprep.subr.bf16.mxu1 %v16346_v23  ;;  %v16406_v23 = vld [vmem:[#allocation10 + $0x134c] ss:$16 sps:$4 sm:$0xff]  }
 0x79d   :  { %9789 = vmatmul.mubr.bf16.vlgmr.msra.gmra.mrb[32].mxu0 %v17377_v30 }
 0x79e   :  { %9891 = vmatmul.mubr.bf16.vlgmr.msra.gmra.mrb[40].mxu1 %v17377_v30  ;;  %9798 = vmatprep.mubr.bf16.mxu0 %v17391_v35  ;;  %v16364_v30 = vld [vmem:[#allocation10 + $0x126c] ss:$16 sps:$4 sm:$0xff]  }
 0x79f   :  { %9808 = vmatpush1.bf16.msra.mxu0 %v16341_v25  ;;  %9900 = vmatprep.mubr.bf16.mxu1 %v17391_v35  ;;  %v16359_v35 = vld [vmem:[#allocation10 + $0x1260] ss:$16 sps:$4 sm:$0xff]  }
 0x7a0   :  { %9910 = vmatpush1.bf16.msra.mxu1 %v16344_v13  ;;  %9809 = vmatprep.subr.bf16.mxu0 %v16349_v2  ;;  %v16401_v25 = vld [vmem:[#allocation10 + $0x1340] ss:$16 sps:$4 sm:$0xff]   ;;  %v16404_v13 = vld [vmem:[#allocation10 + $0x1348] ss:$16 sps:$4 sm:$0xff]   ;;  %v16409_v2 = vld [vmem:[#allocation10 + $0x1364] ss:$16 sps:$4 sm:$0xff]  }
 0x7a1   :  { %9911 = vmatprep.subr.bf16.mxu1 %v16352_v26  ;;  %v16412_v26 = vld [vmem:[#allocation10 + $0x136c] ss:$16 sps:$4 sm:$0xff]  }
 0x7a3   :  { %9810 = vmatpush1.bf16.msra.mxu0 %v16347_v53  ;;  %v16407_v53 = vld [vmem:[#allocation10 + $0x1360] ss:$16 sps:$4 sm:$0xff]  }
 0x7a4   :  { %9912 = vmatpush1.bf16.msra.mxu1 %v16350_v19  ;;  %9811 = vmatprep.subr.bf16.mxu0 %v16355_v15  ;;  %v16410_v19 = vld [vmem:[#allocation10 + $0x1368] ss:$16 sps:$4 sm:$0xff]   ;;  %v16415_v15 = vld [vmem:[#allocation10 + $0x1384] ss:$16 sps:$4 sm:$0xff]  }
 0x7a5   :  { %9799 = vmatmul.mubr.bf16.gmra.mrb[72].mxu0 %v17387_v45  ;;  %9913 = vmatprep.subr.bf16.mxu1 %v16358_v29  ;;  %v16418_v29 = vld [vmem:[#allocation10 + $0x138c] ss:$16 sps:$4 sm:$0xff]  }
 0x7a6   :  { %9901 = vmatmul.mubr.bf16.gmra.mrb[80].mxu1 %v17387_v45  ;;  %9839 = vmatprep.mubr.bf16.mxu0 %v17384_v33  ;;  %v16376_v45 = vld [vmem:[#allocation10 + $0x12ac] ss:$16 sps:$4 sm:$0xff]  }
 0x7a7   :  { %9812 = vmatpush1.bf16.msra.mxu0 %v16353_v28  ;;  %9941 = vmatprep.mubr.bf16.mxu1 %v17384_v33  ;;  %v16374_v33 = vld [vmem:[#allocation10 + $0x12a8] ss:$16 sps:$4 sm:$0xff]   ;;  %v16413_v28 = vld [vmem:[#allocation10 + $0x1380] ss:$16 sps:$4 sm:$0xff]  }
 0x7a8   :  { %9914 = vmatpush1.bf16.msra.mxu1 %v16356_v57  ;;  %9813 = vmatprep.subr.bf16.mxu0 %v16361_v7  ;;  %v16416_v57 = vld [vmem:[#allocation10 + $0x1388] ss:$16 sps:$4 sm:$0xff]   ;;  %v16421_v7 = vld [vmem:[#allocation10 + $0x13a4] ss:$16 sps:$4 sm:$0xff]  }
 0x7a9   :  { %9915 = vmatprep.subr.bf16.mxu1 %v16364_v30  ;;  %v16424_v30 = vld [vmem:[#allocation10 + $0x13ac] ss:$16 sps:$4 sm:$0xff]  }
 0x7ab   :  { %9814 = vmatpush1.bf16.msra.mxu0 %v16359_v35  ;;  %v16419_v35 = vld [vmem:[#allocation10 + $0x13a0] ss:$16 sps:$4 sm:$0xff]  }
 0x7ac   :  { %9916 = vmatpush1.bf16.msra.mxu1 %v16362_v9  ;;  %9815 = vmatprep.subr.bf16.mxu0 %v16367_v47  ;;  %v16422_v9 = vld [vmem:[#allocation10 + $0x13a8] ss:$16 sps:$4 sm:$0xff]   ;;  %v16427_v47 = vld [vmem:[#allocation10 + $0x13c4] ss:$16 sps:$4 sm:$0xff]  }
 0x7ad   :  { %9917 = vmatprep.subr.bf16.mxu1 %v16370_v48  ;;  %v16430_v48 = vld [vmem:[#allocation10 + $0x13cc] ss:$16 sps:$4 sm:$0xff]  }
 0x7af   :  { %9816 = vmatpush1.bf16.msra.mxu0 %v16365_v39  ;;  %v16425_v39 = vld [vmem:[#allocation10 + $0x13c0] ss:$16 sps:$4 sm:$0xff]  }
 0x7b0   :  { %9918 = vmatpush1.bf16.msra.mxu1 %v16368_v50  ;;  %9817 = vmatprep.subr.bf16.mxu0 %v16373_v51  ;;  %v16428_v50 = vld [vmem:[#allocation10 + $0x13c8] ss:$16 sps:$4 sm:$0xff]   ;;  %v16433_v51 = vld [vmem:[#allocation10 + $0x13e4] ss:$16 sps:$4 sm:$0xff]  }
 0x7b1   :  { %9919 = vmatprep.subr.bf16.mxu1 %v16376_v45  ;;  %v16436_v45 = vld [vmem:[#allocation10 + $0x13ec] ss:$16 sps:$4 sm:$0xff]  }
 0x7b3   :  { %9818 = vmatpush1.bf16.msra.mxu0 %v16371_v0  ;;  %v16431_v0 = vld [vmem:[#allocation10 + $0x13e0] ss:$16 sps:$4 sm:$0xff]  }
 0x7b4   :  { %9920 = vmatpush1.bf16.msra.mxu1 %v16374_v33  ;;  %9819 = vmatprep.subr.bf16.mxu0 %v16379_v5  ;;  %v16434_v33 = vld [vmem:[#allocation10 + $0x13e8] ss:$16 sps:$4 sm:$0xff]  }
 0x7b5   :  { %9921 = vmatprep.subr.bf16.mxu1 %v16382_v40  ;;  %v8034_v49 = vpop.f32.mrb[60].mxu0 }
 0x7b6   :  { %v17596_v4 = vadd.f32 %v8034_v49, %v17579_v17  ;;  %v8136_v58 = vpop.f32.mrb[68].mxu1  ;;  %v8036_v61 = vpop.f32.mrb[61].mxu0 }
 0x7b7   :  { %9820 = vmatpush1.bf16.msra.mxu0 %v16377_v63  ;;  %v17599_v59 = vadd.f32 %v8136_v58, %v17581_v55  ;;  %v17602_v60 = vadd.f32 %v8036_v61, %v17583_v27  ;;  %v8138_v8 = vpop.f32.mrb[69].mxu1  ;;  %v8038_v31 = vpop.f32.mrb[62].mxu0  ;;  %v16389_v55 = vld [vmem:[#allocation10 + $0x1300] ss:$16 sps:$4 sm:$0xff]   ;;  %v16392_v27 = vld [vmem:[#allocation10 + $0x1308] ss:$16 sps:$4 sm:$0xff]  }
 0x7b8   :  { %9922 = vmatpush1.bf16.msra.mxu1 %v16380_v46  ;;  %v17605_v3 = vadd.f32 %v8138_v8, %v17585_v24  ;;  %9821 = vmatprep.subr.bf16.mxu0 %v16385_v62  ;;  %v8140_v17 = vpop.f32.mrb[70].mxu1  ;;  %v8039_v14 = vpop.f32.mrb[63].mxu0  ;;  %v16398_v24 = vld [vmem:[#allocation10 + $0x1328] ss:$16 sps:$4 sm:$0xff]   ;;  %v9972_v8 = vld [vmem:[#allocation12] sm:$0xf] }
 0x7b9   :  { %9923 = vmatprep.subr.bf16.mxu1 %v16388_v16  ;;  %v8141_v37 = vpop.f32.mrb[71].mxu1  ;;  %v17623_v31 = vrot.slane %v9972_v8, %v17162_v56 }
 0x7bb   :  { %9822 = vmatpush1.bf16.msra.mxu0 %v16383_v18  ;;  %v17620_v18 = vrot.slane %v9972_v8, %v17085_v11 }
 0x7bc   :  { %9924 = vmatpush1.bf16.msra.mxu1 %v16386_v1  ;;  %9823 = vmatprep.subr.bf16.mxu0 %v16391_v34 }
 0x7bd   :  { %9925 = vmatprep.subr.bf16.mxu1 %v16394_v52 }
 0x7bf   :  { %9824 = vmatpush1.bf16.msra.mxu0 %v16389_v55 }
 0x7c0   :  { %9926 = vmatpush1.bf16.msra.mxu1 %v16392_v27  ;;  %9825 = vmatprep.subr.bf16.mxu0 %v16397_v42 }
 0x7c1   :  { %9927 = vmatprep.subr.bf16.mxu1 %v16400_v10 }
 0x7c3   :  { %9826 = vmatpush1.bf16.msra.mxu0 %v16395_v32 }
 0x7c4   :  { %9928 = vmatpush1.bf16.msra.mxu1 %v16398_v24  ;;  %9827 = vmatprep.subr.bf16.mxu0 %v16403_v22 }
 0x7c5   :  { %9929 = vmatprep.subr.bf16.mxu1 %v16406_v23 }
 0x7c7   :  { %9828 = vmatpush1.bf16.msra.mxu0 %v16401_v25 }
 0x7c8   :  { %9930 = vmatpush1.bf16.msra.mxu1 %v16404_v13  ;;  %9829 = vmatprep.subr.bf16.mxu0 %v16409_v2 }
 0x7c9   :  { %9931 = vmatprep.subr.bf16.mxu1 %v16412_v26 }
 0x7cb   :  { %9830 = vmatpush1.bf16.msra.mxu0 %v16407_v53 }
 0x7cc   :  { %9932 = vmatpush1.bf16.msra.mxu1 %v16410_v19  ;;  %9831 = vmatprep.subr.bf16.mxu0 %v16415_v15 }
 0x7cd   :  { %9933 = vmatprep.subr.bf16.mxu1 %v16418_v29 }
 0x7cf   :  { %9832 = vmatpush1.bf16.msra.mxu0 %v16413_v28 }
 0x7d0   :  { %9934 = vmatpush1.bf16.msra.mxu1 %v16416_v57  ;;  %9833 = vmatprep.subr.bf16.mxu0 %v16421_v7 }
 0x7d1   :  { %9935 = vmatprep.subr.bf16.mxu1 %v16424_v30 }
 0x7d3   :  { %9834 = vmatpush1.bf16.msra.mxu0 %v16419_v35 }
 0x7d4   :  { %9936 = vmatpush1.bf16.msra.mxu1 %v16422_v9  ;;  %9835 = vmatprep.subr.bf16.mxu0 %v16427_v47 }
 0x7d5   :  { %9937 = vmatprep.subr.bf16.mxu1 %v16430_v48 }
 0x7d7   :  { %9836 = vmatpush1.bf16.msra.mxu0 %v16425_v39 }
 0x7d8   :  { %9938 = vmatpush1.bf16.msra.mxu1 %v16428_v50  ;;  %9837 = vmatprep.subr.bf16.mxu0 %v16433_v51 }
 0x7d9   :  { %9939 = vmatprep.subr.bf16.mxu1 %v16436_v45 }
 0x7db   :  { %9838 = vmatpush1.bf16.msra.mxu0 %v16431_v0 }
 0x7dc   :  { %9940 = vmatpush1.bf16.msra.mxu1 %v16434_v33 }
 0x7de   :  { %9840 = vmatmul.mubr.bf16.vlgmr.msra.gmra.mrb[32].mxu0 %v17381_v36 }
 0x7df   :  { %9942 = vmatmul.mubr.bf16.vlgmr.msra.gmra.mrb[40].mxu1 %v17381_v36  ;;  %9849 = vmatprep.mubr.bf16.mxu0 %v17399_v44 }
 0x7e0   :  { %9951 = vmatprep.mubr.bf16.mxu1 %v17399_v44 }
 0x7e6   :  { %9850 = vmatmul.mubr.bf16.gmra.mrb[76].mxu0 %v17432_v20 }
 0x7e7   :  { %9952 = vmatmul.mubr.bf16.gmra.mrb[84].mxu1 %v17432_v20  ;;  %10145 = vmatprep.mubr.f32.mxu0 %v16860_v6 }
 0x7e8   :  { %10240 = vmatprep.mubr.f32.mxu1 %v16860_v6 }
 0x7f6   :  { %v8827_v5 = vpop.f32.mrb[64].mxu0 }
 0x7f7   :  { %v8828_v40 = vadd.f32 %v8827_v5, %v17596_v4  ;;  %v8929_v63 = vpop.f32.mrb[72].mxu1  ;;  %v8829_v46 = vpop.f32.mrb[65].mxu0  ;;  %v17626_v4 = vrot.slane %v9972_v8, %v17088_v12 }
 0x7f8   :  { %v8930_v62 = vadd.f32 %v8929_v63, %v17599_v59  ;;  %v8830_v36 = vadd.f32 %v8829_v46, %v17602_v60  ;;  %v8931_v49 = vpop.f32.mrb[73].mxu1  ;;  %v8831_v16 = vpop.f32.mrb[66].mxu0  ;;  %v17629_v59 = vrot.slane %v9972_v8, %v17158_v54 }
 0x7f9   :  { %v8932_v44 = vadd.f32 %v8931_v49, %v17605_v3  ;;  %v8933_v58 = vpop.f32.mrb[74].mxu1  ;;  %v8832_v61 = vpop.f32.mrb[67].mxu0  ;;  %v14031_v16 = vld [vmem:[%s18051_s9 + $0x30] sm:$0xff] }
 0x7fa   :  { %v8934_v20 = vpop.f32.mrb[75].mxu1  ;;  %v14033_v58 = vld [vmem:[%s18051_s9 + $0x40] sm:$0xff]  ;;  %v14034_v61 = vld [vmem:[%s18051_s9 + $0x48] sm:$0xf] }
 0x82f   :  { %v8868_v60 = vpop.f32.mrb[52].mxu0 }
 0x830   :  { %v10018_v1 = vadd.f32 %v17620_v18, %v8868_v60  ;;  %v8970_v3 = vpop.f32.mrb[60].mxu1  ;;  %v8870_v17 = vpop.f32.mrb[53].mxu0 }
 0x831   :  { %v10020_v14 = vadd.f32 %v17623_v31, %v8970_v3  ;;  %v10019_v34 = vadd.f32 %v17626_v4, %v8870_v17  ;;  %v8972_v11 = vpop.f32.mrb[61].mxu1  ;;  %v8872_v37 = vpop.f32.mrb[54].mxu0 }
 0x832   :  { %v10021_v56 = vadd.f32 %v17629_v59, %v8972_v11  ;;  %v10022_v52 = vadd.f32 %v17620_v18, %v8872_v37  ;;  %v8974_v12 = vpop.f32.mrb[62].mxu1  ;;  %v8874_v55 = vpop.f32.mrb[55].mxu0  ;;  %v10030_v10 = vmax.f32 %v10018_v1, 0.0 }
 0x833   :  { %v10024_v54 = vadd.f32 %v17623_v31, %v8974_v12  ;;  %v10023_v27 = vadd.f32 %v17626_v4, %v8874_v55  ;;  %v8976_v42 = vpop.f32.mrb[63].mxu1  ;;  %v10032_v22 = vmax.f32 %v10020_v14, 0.0  ;;  %v10031_v23 = vmax.f32 %v10019_v34, 0.0 }
 0x834   :  { %v10034_v32 = vmax.f32 %v10022_v52, 0.0  ;;  %v10025_v24 = vadd.f32 %v17629_v59, %v8976_v42  ;;  %v10033_v2 = vmax.f32 %v10021_v56, 0.0 }
 0x835   :  { %v10036_v25 = vmax.f32 %v10024_v54, 0.0  ;;  %v10035_v13 = vmax.f32 %v10023_v27, 0.0 }
 0x836   :  { %v14686_v26 = vpack.c.bf16 %v10034_v32, %v10030_v10  ;;  %v10037_v53 = vmax.f32 %v10025_v24, 0.0 }
 0x837   :  { %v14690_v19 = vpack.c.bf16 %v10036_v25, %v10032_v22  ;;  %v14684_v15 = vpack.c.bf16 %v10035_v13, %v10031_v23  ;;  %v8878_v29 = vpop.f32.mrb[68].mxu0 }
 0x838   :  { %v14688_v28 = vpack.c.bf16 %v10037_v53, %v10033_v2  ;;  %v8879_v57 = vadd.f32 %v8878_v29, %v8828_v40  ;;  %v8980_v7 = vpop.f32.mrb[76].mxu1  ;;  %v8880_v30 = vpop.f32.mrb[69].mxu0 }
 0x839   :  { %v8981_v35 = vadd.f32 %v8980_v7, %v8930_v62  ;;  %v8881_v9 = vadd.f32 %v8880_v30, %v8830_v36  ;;  %v8982_v47 = vpop.f32.mrb[77].mxu1  ;;  %v8882_v48 = vpop.f32.mrb[70].mxu0  ;;  %14685 = vmatprep.subr.bf16.mxu0 %v14684_v15  ;;  %v14030_v36 = vld [vmem:[%s18051_s9 + $0x28] sm:$0xff] }
 0x83a   :  { %v10026_v39 = vadd.f32 %v17620_v18, %v8879_v57  ;;  %v8983_v50 = vadd.f32 %v8982_v47, %v8932_v44  ;;  %v8984_v51 = vpop.f32.mrb[78].mxu1  ;;  %14689 = vmatprep.subr.bf16.mxu1 %v14688_v28  ;;  %v8883_v45 = vpop.f32.mrb[71].mxu0  ;;  %14687 = vmatpush1.bf16.msra.mxu0 %v14686_v26  ;;  %v14032_v44 = vld [vmem:[%s18051_s9 + $0x38] sm:$0xff] }
 0x83b   :  { %v10028_v0 = vadd.f32 %v17623_v31, %v8981_v35  ;;  %v10027_v33 = vadd.f32 %v17626_v4, %v8881_v9  ;;  %v8985_v5 = vpop.f32.mrb[79].mxu1  ;;  %14691 = vmatpush1.bf16.msra.mxu1 %v14690_v19 }
 0x83c   :  { %v10029_v40 = vadd.f32 %v17629_v59, %v8983_v50  ;;  %v10038_v46 = vmax.f32 %v10026_v39, 0.0 }
 0x83d   :  { %v10039_v63 = vmax.f32 %v10027_v33, 0.0  ;;  %v10040_v49 = vmax.f32 %v10028_v0, 0.0 }
 0x83e   :  { %v10041_v62 = vmax.f32 %v10029_v40, 0.0 }
 0x83f   :  { %14035 = vmatprep.subr.msk.mxu0 %vm987_vm1, %v10039_v63 }
 0x840   :  { %14042 = vmatprep.subr.msk.mxu1 %vm987_vm1, %v10041_v62  ;;  %14036 = vmatpush1.msk.msra.mxu0 %vm987_vm1, %v10038_v46 }
 0x841   :  { %14043 = vmatpush1.msk.msra.mxu1 %vm987_vm1, %v10040_v49  ;;  %14037 = vmatmul.mubr.msk.f32.vlgmr.msra.gmra.mrb[30].mxu0 %vm10053_vm8, %v14030_v36 }
 0x842   :  { %14044 = vmatmul.mubr.msk.f32.vlgmr.msra.gmra.mrb[38].mxu1 %vm10053_vm8, %v14030_v36  ;;  %10151 = vmatprep.mubr.f32.mxu0 %v16860_v6 }
 0x843   :  { %10246 = vmatprep.mubr.f32.mxu1 %v16860_v6 }
 0x845   :  { %14038 = vmatmul.mubr.msk.f32.gmra.mrb[80].mxu0 %vm10053_vm8, %v14031_v16 }
 0x846   :  { %14045 = vmatmul.mubr.msk.f32.gmra.mrb[88].mxu1 %vm10053_vm8, %v14031_v16  ;;  %10157 = vmatprep.mubr.f32.mxu0 %v16860_v6 }
 0x847   :  { %10252 = vmatprep.mubr.f32.mxu1 %v16860_v6 }
 0x849   :  { %14039 = vmatmul.mubr.msk.f32.gmra.mrb[82].mxu0 %vm10053_vm8, %v14032_v44 }
 0x84a   :  { %14046 = vmatmul.mubr.msk.f32.gmra.mrb[90].mxu1 %vm10053_vm8, %v14032_v44  ;;  %10163 = vmatprep.mubr.f32.mxu0 %v16860_v6 }
 0x84b   :  { %10258 = vmatprep.mubr.f32.mxu1 %v16860_v6 }
 0x84d   :  { %14040 = vmatmul.mubr.msk.f32.gmra.mrb[84].mxu0 %vm10053_vm8, %v14033_v58 }
 0x84e   :  { %14047 = vmatmul.mubr.msk.f32.gmra.mrb[92].mxu1 %vm10053_vm8, %v14033_v58  ;;  %10169 = vmatprep.mubr.f32.mxu0 %v16860_v6 }
 0x84f   :  { %10264 = vmatprep.mubr.f32.mxu1 %v16860_v6 }
 0x851   :  { %14041 = vmatmul.mubr.msk.f32.gmra.mrb[86].mxu0 %vm10053_vm8, %v14034_v61 }
 0x852   :  { %14048 = vmatmul.mubr.msk.f32.gmra.mrb[94].mxu1 %vm10053_vm8, %v14034_v61  ;;  %10362 = vmatprep.mubr.f32.mxu0 %v16860_v6 }
 0x853   :  { %10457 = vmatprep.mubr.f32.mxu1 %v16860_v6 }
 0x878   :  { %v9800_v20 = vpop.f32.mrb[72].mxu0 }
 0x879   :  { %v9902_v8 = vpop.f32.mrb[80].mxu1  ;;  %v9802_v60 = vpop.f32.mrb[73].mxu0 }
 0x87a   :  { %v9904_v1 = vpop.f32.mrb[81].mxu1  ;;  %v9804_v3 = vpop.f32.mrb[74].mxu0 }
 0x87b   :  { %v9906_v17 = vpop.f32.mrb[82].mxu1  ;;  %v9805_v14 = vpop.f32.mrb[75].mxu0  ;;  %v16442_v3 = vld [vmem:[#allocation13 + $0x2c8] sm:$0xff]  }
 0x87c   :  { %v9907_v34 = vpop.f32.mrb[83].mxu1  ;;  %v16443_v17 = vld [vmem:[#allocation13 + $0x208] sm:$0xff]  }
 0x87d   :  { %v16444_v14 = vld [vmem:[#allocation13 + $0x288] sm:$0xff]   ;;  %v10044_v34 = vld [vmem:[%s18051_s9 + $0x10] sm:$0xff] }
 0x8b1   :  { %v9841_v11 = vpop.f32.mrb[32].mxu0 }
 0x8b2   :  { %v9994_v37 = vadd.f32 %v17620_v18, %v9841_v11  ;;  %v9943_v56 = vpop.f32.mrb[40].mxu1  ;;  %v9843_v52 = vpop.f32.mrb[33].mxu0  ;;  %v16445_v11 = vld [vmem:[#allocation13 + $0x250] sm:$0xff]  }
 0x8b3   :  { %v9996_v12 = vadd.f32 %v17623_v31, %v9943_v56  ;;  %v9995_v55 = vadd.f32 %v17626_v4, %v9843_v52  ;;  %v9945_v54 = vpop.f32.mrb[41].mxu1  ;;  %v9845_v27 = vpop.f32.mrb[34].mxu0  ;;  %v16447_v56 = vld [vmem:[#allocation13 + $0x210] sm:$0xff]  }
 0x8b4   :  { %v9997_v42 = vadd.f32 %v17629_v59, %v9945_v54  ;;  %v9998_v10 = vadd.f32 %v17620_v18, %v9845_v27  ;;  %v9947_v32 = vpop.f32.mrb[42].mxu1  ;;  %v9847_v24 = vpop.f32.mrb[35].mxu0  ;;  %v10006_v13 = vmax.f32 %v9994_v37, 0.0  ;;  %v16446_v37 = vld [vmem:[#allocation13 + $0x2d0] sm:$0xff]   ;;  %v16449_v54 = vld [vmem:[#allocation13 + $0x258] sm:$0xff]  }
 0x8b5   :  { %v10000_v22 = vadd.f32 %v17623_v31, %v9947_v32  ;;  %v9999_v23 = vadd.f32 %v17626_v4, %v9847_v24  ;;  %v9949_v25 = vpop.f32.mrb[43].mxu1  ;;  %v10008_v53 = vmax.f32 %v9996_v12, 0.0  ;;  %v10007_v19 = vmax.f32 %v9995_v55, 0.0  ;;  %v16448_v52 = vld [vmem:[#allocation13 + $0x290] sm:$0xff]   ;;  %v10045_v12 = vld [vmem:[%s18051_s9 + $0x18] sm:$0xff] }
 0x8b6   :  { %v10010_v2 = vmax.f32 %v9998_v10, 0.0  ;;  %v10001_v26 = vadd.f32 %v17629_v59, %v9949_v25  ;;  %v10009_v28 = vmax.f32 %v9997_v42, 0.0  ;;  %v10046_v55 = vld [vmem:[%s18051_s9 + $0x20] sm:$0xf]  ;;  %v16450_v27 = vld [vmem:[#allocation13 + $0x2d8] sm:$0xff]  }
 0x8b7   :  { %v10012_v15 = vmax.f32 %v10000_v22, 0.0  ;;  %v10011_v29 = vmax.f32 %v9999_v23, 0.0  ;;  %v16451_v42 = vld [vmem:[#allocation13 + $0x218] sm:$0xff]   ;;  %v16453_v32 = vld [vmem:[#allocation13 + $0x260] sm:$0xff]   ;;  %v16458_v25 = vld [vmem:[#allocation13 + $0x2e8] sm:$0xff]  }
 0x8b8   :  { %v14694_v57 = vpack.c.bf16 %v10010_v2, %v10006_v13  ;;  %v10013_v7 = vmax.f32 %v10001_v26, 0.0  ;;  %v16452_v10 = vld [vmem:[#allocation13 + $0x298] sm:$0xff]   ;;  %v16454_v24 = vld [vmem:[#allocation13 + $0x2e0] sm:$0xff]   ;;  %v16459_v13 = vld [vmem:[#allocation13 + $0x228] sm:$0xff]  }
 0x8b9   :  { %v14698_v30 = vpack.c.bf16 %v10012_v15, %v10008_v53  ;;  %v14692_v35 = vpack.c.bf16 %v10011_v29, %v10007_v19  ;;  %v9851_v9 = vpop.f32.mrb[76].mxu0  ;;  %v16455_v22 = vld [vmem:[#allocation13 + $0x220] sm:$0xff]   ;;  %v16460_v2 = vld [vmem:[#allocation13 + $0x2a8] sm:$0xff]   ;;  %v16461_v26 = vld [vmem:[#allocation13 + $0x270] sm:$0xff]  }
 0x8ba   :  { %v14696_v47 = vpack.c.bf16 %v10013_v7, %v10009_v28  ;;  %v9852_v48 = vadd.f32 %v9851_v9, %v9800_v20  ;;  %v9953_v39 = vpop.f32.mrb[84].mxu1  ;;  %v9853_v50 = vpop.f32.mrb[77].mxu0  ;;  %v16456_v23 = vld [vmem:[#allocation13 + $0x2a0] sm:$0xff]   ;;  %v16462_v53 = vld [vmem:[#allocation13 + $0x2f0] sm:$0xff]   ;;  %v16465_v29 = vld [vmem:[#allocation13 + $0x278] sm:$0xff]  }
 0x8bb   :  { %v9954_v51 = vadd.f32 %v9953_v39, %v9902_v8  ;;  %v9854_v45 = vadd.f32 %v9853_v50, %v9802_v60  ;;  %v9955_v0 = vpop.f32.mrb[85].mxu1  ;;  %v9855_v33 = vpop.f32.mrb[78].mxu0  ;;  %14693 = vmatprep.subr.bf16.mxu0 %v14692_v35  ;;  %v16463_v19 = vld [vmem:[#allocation13 + $0x230] sm:$0xff]   ;;  %v16466_v28 = vld [vmem:[#allocation13 + $0x2f8] sm:$0xff]   ;;  %v16470_v35 = vld [vmem:[#allocation13 + $0xc0] sm:$0xff]  }
 0x8bc   :  { %v9968_v5 = vadd.f32 %v9852_v48, %v17560_v43  ;;  %v9956_v40 = vadd.f32 %v9955_v0, %v9904_v1  ;;  %v9957_v63 = vpop.f32.mrb[86].mxu1  ;;  %14697 = vmatprep.subr.bf16.mxu1 %v14696_v47  ;;  %v9856_v46 = vpop.f32.mrb[79].mxu0  ;;  %14695 = vmatpush1.bf16.msra.mxu0 %v14694_v57  ;;  %v16437_v1 = vld [vmem:[#allocation13 + $0x240] sm:$0xff]   ;;  %v16464_v15 = vld [vmem:[#allocation13 + $0x2b0] sm:$0xff]   ;;  %v16467_v57 = vld [vmem:[#allocation13 + $0x238] sm:$0xff]  }
 0x8bd   :  { %v9970_v62 = vadd.f32 %v9954_v51, %v17563_v38  ;;  %v9969_v36 = vadd.f32 %v9854_v45, %v17566_v41  ;;  %v9958_v49 = vpop.f32.mrb[87].mxu1  ;;  %14699 = vmatpush1.bf16.msra.mxu1 %v14698_v30  ;;  %v10042_v38 = vld [vmem:[%s18051_s9] sm:$0xff]  ;;  %v16468_v7 = vld [vmem:[#allocation13 + $0x2b8] sm:$0xff]  }
 0x8be   :  { %v10002_v16 = vadd.f32 %v17620_v18, %v9968_v5  ;;  %v9971_v44 = vadd.f32 %v9956_v40, %v17569_v21  ;;  %v16438_v21 = vld [vmem:[#allocation13 + $0x2c0] sm:$0xff]  }
 0x8bf   :  { %v10004_v58 = vadd.f32 %v17623_v31, %v9970_v62  ;;  %v10003_v61 = vadd.f32 %v17626_v4, %v9969_v36  ;;  %v16439_v18 = vld [vmem:[#allocation13 + $0x200] sm:$0xff]   ;;  %v10043_v4 = vld [vmem:[%s18051_s9 + $0x8] sm:$0xff] }
 0x8c0   :  { %v10005_v43 = vadd.f32 %v17629_v59, %v9971_v44  ;;  %v10014_v8 = vmax.f32 %v10002_v16, 0.0  ;;  %v16440_v31 = vld [vmem:[#allocation13 + $0x280] sm:$0xff]   ;;  %v16441_v59 = vld [vmem:[#allocation13 + $0x248] sm:$0xff]  }
 0x8c1   :  { %v10015_v20 = vmax.f32 %v10003_v61, 0.0  ;;  %v10016_v41 = vmax.f32 %v10004_v58, 0.0  ;;  %v16469_v30 = vld [vmem:[#allocation13 + $0x40] sm:$0xff]  }
 0x8c2   :  { %v10017_v60 = vmax.f32 %v10005_v43, 0.0 }
 0x8c3   :  { %14049 = vmatprep.subr.msk.mxu0 %vm987_vm1, %v10015_v20 }
 0x8c4   :  { %14056 = vmatprep.subr.msk.mxu1 %vm987_vm1, %v10017_v60  ;;  %14050 = vmatpush1.msk.msra.mxu0 %vm987_vm1, %v10014_v8 }
 0x8c5   :  { %14057 = vmatpush1.msk.msra.mxu1 %vm987_vm1, %v10016_v41  ;;  %14051 = vmatmul.mubr.msk.f32.vlgmr.msra.gmra.mrb[30].mxu0 %vm10053_vm8, %v10042_v38 }
 0x8c6   :  { %14058 = vmatmul.mubr.msk.f32.vlgmr.msra.gmra.mrb[38].mxu1 %vm10053_vm8, %v10042_v38  ;;  %10368 = vmatprep.mubr.f32.mxu0 %v16860_v6 }
 0x8c7   :  { %10463 = vmatprep.mubr.f32.mxu1 %v16860_v6  ;;  %14250 = vmatprep.subr.bf16.mxu0 %v16437_v1 }
 0x8c8   :  { %14284 = vmatprep.subr.bf16.mxu1 %v16438_v21  ;;  %14251 = vmatpush3.bf16.msra.mxu0 %v16439_v18 }
 0x8c9   :  { %14052 = vmatmul.mubr.msk.f32.gmra.mrb[80].mxu0 %vm10053_vm8, %v10043_v4  ;;  %14285 = vmatpush3.bf16.msra.mxu1 %v16440_v31 }
 0x8ca   :  { %14059 = vmatmul.mubr.msk.f32.gmra.mrb[88].mxu1 %vm10053_vm8, %v10043_v4  ;;  %10374 = vmatprep.mubr.f32.mxu0 %v16860_v6 }
 0x8cb   :  { %10469 = vmatprep.mubr.f32.mxu1 %v16860_v6  ;;  %14252 = vmatprep.subr.bf16.mxu0 %v16441_v59 }
 0x8cc   :  { %14286 = vmatprep.subr.bf16.mxu1 %v16442_v3  ;;  %14253 = vmatpush3.bf16.msra.mxu0 %v16443_v17 }
 0x8cd   :  { %14053 = vmatmul.mubr.msk.f32.gmra.mrb[82].mxu0 %vm10053_vm8, %v10044_v34  ;;  %14287 = vmatpush3.bf16.msra.mxu1 %v16444_v14 }
 0x8ce   :  { %14060 = vmatmul.mubr.msk.f32.gmra.mrb[90].mxu1 %vm10053_vm8, %v10044_v34  ;;  %10380 = vmatprep.mubr.f32.mxu0 %v16860_v6 }
 0x8cf   :  { %10475 = vmatprep.mubr.f32.mxu1 %v16860_v6  ;;  %14254 = vmatprep.subr.bf16.mxu0 %v16445_v11 }
 0x8d0   :  { %14288 = vmatprep.subr.bf16.mxu1 %v16446_v37  ;;  %14255 = vmatpush3.bf16.msra.mxu0 %v16447_v56 }
 0x8d1   :  { %14054 = vmatmul.mubr.msk.f32.gmra.mrb[84].mxu0 %vm10053_vm8, %v10045_v12  ;;  %14289 = vmatpush3.bf16.msra.mxu1 %v16448_v52 }
 0x8d2   :  { %14061 = vmatmul.mubr.msk.f32.gmra.mrb[92].mxu1 %vm10053_vm8, %v10045_v12  ;;  %10386 = vmatprep.mubr.f32.mxu0 %v16860_v6 }
 0x8d3   :  { %10481 = vmatprep.mubr.f32.mxu1 %v16860_v6  ;;  %14256 = vmatprep.subr.bf16.mxu0 %v16449_v54  ;;  %v16457_v6 = vld [vmem:[#allocation13 + $0x268] sm:$0xff]  }
 0x8d4   :  { %14290 = vmatprep.subr.bf16.mxu1 %v16450_v27  ;;  %14257 = vmatpush3.bf16.msra.mxu0 %v16451_v42 }
 0x8d5   :  { %14055 = vmatmul.mubr.msk.f32.gmra.mrb[86].mxu0 %vm10053_vm8, %v10046_v55  ;;  %14291 = vmatpush3.bf16.msra.mxu1 %v16452_v10 }
 0x8d6   :  { %14062 = vmatmul.mubr.msk.f32.gmra.mrb[94].mxu1 %vm10053_vm8, %v10046_v55  ;;  %14258 = vmatprep.subr.bf16.mxu0 %v16453_v32 }
 0x8d7   :  { %14292 = vmatprep.subr.bf16.mxu1 %v16454_v24 }
 0x8d8   :  { %14259 = vmatpush3.bf16.msra.mxu0 %v16455_v22 }
 0x8d9   :  { %14293 = vmatpush3.bf16.msra.mxu1 %v16456_v23  ;;  %14260 = vmatprep.subr.bf16.mxu0 %v16457_v6 }
 0x8da   :  { %14294 = vmatprep.subr.bf16.mxu1 %v16458_v25 }
 0x8dc   :  { %14261 = vmatpush3.bf16.msra.mxu0 %v16459_v13 }
 0x8dd   :  { %14295 = vmatpush3.bf16.msra.mxu1 %v16460_v2  ;;  %14262 = vmatprep.subr.bf16.mxu0 %v16461_v26 }
 0x8de   :  { %14296 = vmatprep.subr.bf16.mxu1 %v16462_v53 }
 0x8e0   :  { %14263 = vmatpush3.bf16.msra.mxu0 %v16463_v19  ;;  %v16471_v19 = vld [vmem:[#allocation13] sm:$0xff]  }
 0x8e1   :  { %14297 = vmatpush3.bf16.msra.mxu1 %v16464_v15  ;;  %14264 = vmatprep.subr.bf16.mxu0 %v16465_v29  ;;  %v16472_v29 = vld [vmem:[#allocation13 + $0x80] sm:$0xff]  }
 0x8e2   :  { %14298 = vmatprep.subr.bf16.mxu1 %v16466_v28 }
 0x8e4   :  { %14265 = vmatpush3.bf16.msra.mxu0 %v16467_v57 }
 0x8e5   :  { %14299 = vmatpush3.bf16.msra.mxu1 %v16468_v7  ;;  %14318 = vmatprep.subr.bf16.mxu0 %v16469_v30  ;;  %v16473_v30 = vld [vmem:[#allocation13 + $0x48] sm:$0xff]  }
 0x8e6   :  { %14352 = vmatprep.subr.bf16.mxu1 %v16470_v35 }
 0x998   :  { %v10364_v9 = vpop.f32.mrb[30].mxu0 }
 0x999   :  { %v10459_v47 = vpop.f32.mrb[38].mxu1  ;;  %v10366_v48 = vpop.f32.mrb[31].mxu0 }
 0x99a   :  { %v10461_v39 = vpop.f32.mrb[39].mxu1 }
 0x99c   :  { %v10370_v50 = vpop.f32.mrb[80].mxu0 }
 0x99d   :  { %v17735_v51 = vpack.c.bf16 %v10370_v50, %v10364_v9  ;;  %v10465_v45 = vpop.f32.mrb[88].mxu1  ;;  %v10372_v0 = vpop.f32.mrb[81].mxu0 }
 0x99e   :  { %v17737_v33 = vpack.c.bf16 %v10465_v45, %v10459_v47  ;;  %v17739_v5 = vpack.c.bf16 %v10372_v0, %v10366_v48  ;;  %v10467_v40 = vpop.f32.mrb[89].mxu1  ;;  %v16474_v48 = vld [vmem:[#allocation13 + $0xc8] sm:$0xff]  }
 0x99f   :  { %v17741_v63 = vpack.c.bf16 %v10467_v40, %v10461_v39  ;;  %v10697_v46 = vshll.u32 %v17735_v51, 16  ;;  %v10695_v8 = vshrl.u32 %v17735_v51, 16 }
 0x9a0   :  { %v10376_v62 = vpop.f32.mrb[82].mxu0  ;;  %v10709_v36 = vshll.u32 %v17739_v5, 16  ;;  %v10721_v58 = vshll.u32 %v17737_v33, 16  ;;  %v10719_v21 = vshrl.u32 %v17737_v33, 16  ;;  %v10707_v59 = vshrl.u32 %v17739_v5, 16 }
 0x9a1   :  { %v10471_v49 = vpop.f32.mrb[90].mxu1  ;;  %v10378_v16 = vpop.f32.mrb[83].mxu0  ;;  %v10733_v61 = vshll.u32 %v17741_v63, 16  ;;  %v10699_v43 = vrot.slane %v10697_v46, 1  ;;  %v10731_v52 = vshrl.u32 %v17741_v63, 16 }
 0x9a2   :  { %v10473_v44 = vpop.f32.mrb[91].mxu1  ;;  %v10711_v1 = vrot.slane %v10709_v36, 1  ;;  %v10723_v3 = vrot.slane %v10721_v58, 1  ;;  %v16475_v36 = vld [vmem:[#allocation13 + $0x8] sm:$0xff]  }
 0x9a3   :  { %v10735_v34 = vrot.slane %v10733_v61, 1  ;;  %v10700_v12 = vor.u32 %v10699_v43, %v10695_v8  ;;  %v16478_v61 = vld [vmem:[#allocation13 + $0xd0] sm:$0xff]  }
 0x9a4   :  { %v10382_v20 = vpop.f32.mrb[84].mxu0  ;;  %v10712_v10 = vor.u32 %v10711_v1, %v10707_v59  ;;  %v10724_v53 = vor.u32 %v10723_v3, %v10719_v21  ;;  %v16479_v1 = vld [vmem:[#allocation13 + $0x10] sm:$0xff]  }
 0x9a5   :  { %v17748_v60 = vpack.c.bf16 %v10382_v20, %v10376_v62  ;;  %v10477_v38 = vpop.f32.mrb[92].mxu1  ;;  %v10384_v41 = vpop.f32.mrb[85].mxu0  ;;  %v10736_v2 = vor.u32 %v10735_v34, %v10731_v52  ;;  %v16481_v34 = vld [vmem:[#allocation13 + $0x58] sm:$0xff]  }
 0x9a6   :  { %v17751_v18 = vpack.c.bf16 %v10477_v38, %v10471_v49  ;;  %v17753_v31 = vpack.c.bf16 %v10384_v41, %v10378_v16  ;;  %v10479_v4 = vpop.f32.mrb[93].mxu1  ;;  %v16476_v16 = vld [vmem:[#allocation13 + $0x88] sm:$0xff]  }
 0x9a7   :  { %v10702_v17 = vshll.u32 %v17748_v60, 16  ;;  %v17757_v14 = vpack.c.bf16 %v10479_v4, %v10473_v44  ;;  %v16477_v44 = vld [vmem:[#allocation13 + $0x50] sm:$0xff]   ;;  %v10742_v43 = vshrl.u32 %v17748_v60, 16 }
 0x9a8   :  { %v10726_v11 = vshll.u32 %v17751_v18, 16  ;;  %v10388_v37 = vpop.f32.mrb[86].mxu0  ;;  %v10714_v56 = vshll.u32 %v17753_v31, 16  ;;  %v10750_v28 = vshrl.u32 %v17753_v31, 16  ;;  %v10758_v8 = vshrl.u32 %v17751_v18, 16  ;;  %v16480_v4 = vld [vmem:[#allocation13 + $0x90] sm:$0xff]  }
 0x9a9   :  { %v10704_v55 = vrot.slane %v10702_v17, 1  ;;  %v17762_v54 = vpack.c.bf16 %v10388_v37, %v10388_v37  ;;  %v10483_v27 = vpop.f32.mrb[94].mxu1  ;;  %v10390_v42 = vpop.f32.mrb[87].mxu0  ;;  %v10738_v32 = vshll.u32 %v17757_v14, 16  ;;  %v10766_v7 = vshrl.u32 %v17757_v14, 16 }
 0x9aa   :  { %v10728_v24 = vrot.slane %v10726_v11, 1  ;;  %v17765_v22 = vpack.c.bf16 %v10483_v27, %v10483_v27  ;;  %v17767_v23 = vpack.c.bf16 %v10390_v42, %v10390_v42  ;;  %v10485_v6 = vpop.f32.mrb[95].mxu1  ;;  %v10716_v25 = vrot.slane %v10714_v56, 1  ;;  %v16482_v56 = vld [vmem:[#allocation13 + $0xd8] sm:$0xff]   ;;  %v16485_v27 = vld [vmem:[#allocation13 + $0x60] sm:$0xff]  }
 0x9ab   :  { %v17769_v13 = vpack.c.bf16 %v10485_v6, %v10485_v6  ;;  %v10740_v26 = vrot.slane %v10738_v32, 1  ;;  %v17782_v9 = vsel %vm5384_vm6, %v10700_v12, %v10704_v55  ;;  %v10746_v39 = vshll.u32 %v17762_v54, 16  ;;  %v16483_v12 = vld [vmem:[#allocation13 + $0x18] sm:$0xff]   ;;  %v16486_v42 = vld [vmem:[#allocation13 + $0xe0] sm:$0xff]  }
 0x9ac   :  { %v17772_v15 = vsel %vm5384_vm6, %v10712_v10, %v10716_v25  ;;  %v10754_v57 = vshll.u32 %v17767_v23, 16  ;;  %v17789_v50 = vsel %vm5384_vm6, %v10724_v53, %v10728_v24  ;;  %v10752_v45 = vor.u32 %v10750_v28, %v10716_v25 }
 0x9ad   :  { %11022 = vmatprep.mubr.bf16.mxu0 %v17772_v15  ;;  %v17779_v35 = vsel %vm5384_vm6, %v10736_v2, %v10740_v26  ;;  %v10770_v47 = vshll.u32 %v17769_v13, 16  ;;  %v10762_v40 = vshll.u32 %v17765_v22, 16  ;;  %v10768_v46 = vor.u32 %v10766_v7, %v10740_v26  ;;  %v16488_v2 = vld [vmem:[#allocation13 + $0xa0] sm:$0xff]  }
 0x9ae   :  { %11078 = vmatprep.mubr.bf16.mxu1 %v17779_v35  ;;  %11023 = vmatmul.mubr.bf16.vlgmr.msra.gmra.mrb[88].mxu0 %v17782_v9  ;;  %v10756_v0 = vrot.slane %v10754_v57, 1  ;;  %v10748_v20 = vrot.slane %v10746_v39, 1  ;;  %v10744_v41 = vor.u32 %v10742_v43, %v10704_v55  ;;  %v10760_v21 = vor.u32 %v10758_v8, %v10728_v24  ;;  %v16484_v55 = vld [vmem:[#allocation13 + $0x98] sm:$0xff]   ;;  %v16487_v24 = vld [vmem:[#allocation13 + $0x20] sm:$0xff]   ;;  %v16490_v57 = vld [vmem:[#allocation13 + $0xe8] sm:$0xff]  }
 0x9af   :  { %11079 = vmatmul.mubr.bf16.vlgmr.msra.gmra.mrb[96].mxu1 %v17789_v50  ;;  %14319 = vmatpush3.bf16.msra.mxu0 %v16471_v19  ;;  %v10772_v62 = vrot.slane %v10770_v47, 1  ;;  %v10764_v38 = vrot.slane %v10762_v40, 1  ;;  %v10777_v59 = vshrl.u32 %v17767_v23, 16  ;;  %v10783_v17 = vshrl.u32 %v17769_v13, 16  ;;  %v16493_v39 = vld [vmem:[#allocation13 + $0x70] sm:$0xff]   ;;  %v16502_v43 = vld [vmem:[#allocation13 + $0x3c0] sm:$0xff]  }
 0x9b0   :  { %14353 = vmatpush3.bf16.msra.mxu1 %v16472_v29  ;;  %v17794_v49 = vsel %vm5384_vm6, %v10752_v45, %v10756_v0  ;;  %14320 = vmatprep.subr.bf16.mxu0 %v16473_v30  ;;  %v17805_v3 = vsel %vm5384_vm6, %v10744_v41, %v10748_v20  ;;  %v10774_v10 = vshrl.u32 %v17762_v54, 16  ;;  %v10780_v32 = vshrl.u32 %v17765_v22, 16  ;;  %v16489_v29 = vld [vmem:[#allocation13 + $0x68] sm:$0xff]   ;;  %v16494_v45 = vld [vmem:[#allocation13 + $0xf0] sm:$0xff]  }
 0x9b1   :  { %11030 = vmatprep.mubr.bf16.mxu0 %v17794_v49  ;;  %v17798_v58 = vsel %vm5384_vm6, %v10768_v46, %v10772_v62  ;;  %14354 = vmatprep.subr.bf16.mxu1 %v16474_v48  ;;  %v17810_v11 = vsel %vm5384_vm6, %v10760_v21, %v10764_v38  ;;  %v17812_v37 = vor.u32 %v10777_v59, %v10756_v0  ;;  %v11118_v6 = vrot.slane %v17753_v31, 1  ;;  %v16491_v30 = vld [vmem:[#allocation13 + $0x28] sm:$0xff]   ;;  %v16495_v0 = vld [vmem:[#allocation13 + $0x30] sm:$0xff]   ;;  %v16497_v46 = vld [vmem:[#allocation13 + $0x78] sm:$0xff]  }
 0x9b2   :  { %11086 = vmatprep.mubr.bf16.mxu1 %v17798_v58  ;;  %v17815_v52 = vor.u32 %v10783_v17, %v10772_v62  ;;  %v17822_v25 = vor.u32 %v10774_v10, %v10748_v20  ;;  %v11124_v26 = vrot.slane %v17757_v14, 1  ;;  %v17825_v53 = vor.u32 %v10780_v32, %v10764_v38  ;;  %v16492_v48 = vld [vmem:[#allocation13 + $0xa8] sm:$0xff]   ;;  %v16496_v40 = vld [vmem:[#allocation13 + $0xb0] sm:$0xff]   ;;  %v16498_v62 = vld [vmem:[#allocation13 + $0xf8] sm:$0xff]  }
 0x9b3   :  { %14321 = vmatpush3.bf16.msra.mxu0 %v16475_v36  ;;  %v11117_v19 = vrot.slane %v17739_v5, 1  ;;  %v11123_v28 = vrot.slane %v17741_v63, 1  ;;  %v16499_v36 = vld [vmem:[#allocation13 + $0x38] sm:$0xff]   ;;  %v11121_v20 = vrot.slane %v17751_v18, 1  ;;  %v17842_v8 = vrot.slane %v17767_v23, 1  ;;  %v16503_v21 = vld [vmem:[#allocation13 + $0x300] sm:$0xff]  }
 0x9b4   :  { %14355 = vmatpush3.bf16.msra.mxu1 %v16476_v16  ;;  %14322 = vmatprep.subr.bf16.mxu0 %v16477_v44  ;;  %v16500_v16 = vld [vmem:[#allocation13 + $0xb8] sm:$0xff]   ;;  %v16501_v44 = vld [vmem:[#allocation13 + $0x340] sm:$0xff]   ;;  %v11114_v38 = vrot.slane %v17735_v51, 1  ;;  %v17846_v41 = vrot.slane %v17769_v13, 1  ;;  %v16505_v17 = vld [vmem:[#allocation13 + $0x348] sm:$0xff]   ;;  %v17868_v10 = vrot.slane %v17762_v54, 1 }
 0x9b5   :  { %14356 = vmatprep.subr.bf16.mxu1 %v16478_v61  ;;  %v17832_v7 = vsel %vm6305_vm7, %v11117_v19, %v11118_v6  ;;  %v17836_v47 = vsel %vm6305_vm7, %v11123_v28, %v11124_v26  ;;  %v11115_v61 = vrot.slane %v17748_v60, 1  ;;  %v16504_v59 = vld [vmem:[#allocation13 + $0x380] sm:$0xff]   ;;  %v16509_v32 = vld [vmem:[#allocation13 + $0x350] sm:$0xff]  }
 0x9b6   :  { %11031 = vmatmul.mubr.bf16.gmra.mrb[92].mxu0 %v17805_v3  ;;  %v16512_v19 = vld [vmem:[#allocation13 + $0x390] sm:$0xff]  }
 0x9b7   :  { %11087 = vmatmul.mubr.bf16.gmra.mrb[100].mxu1 %v17810_v11  ;;  %14323 = vmatpush3.bf16.msra.mxu0 %v16479_v1  ;;  %v11120_v1 = vrot.slane %v17737_v33, 1 }
 0x9b8   :  { %14357 = vmatpush3.bf16.msra.mxu1 %v16480_v4  ;;  %11038 = vmatprep.mubr.bf16.mxu0 %v17812_v37  ;;  %v17850_v4 = vsel %vm6305_vm7, %v11114_v38, %v11115_v61  ;;  %v16529_v38 = vld [vmem:[#allocation13 + $0x378] sm:$0xff]  }
 0x9b9   :  { %11094 = vmatprep.mubr.bf16.mxu1 %v17815_v52  ;;  %14324 = vmatprep.subr.bf16.mxu0 %v16481_v34  ;;  %v17854_v34 = vsel %vm6305_vm7, %v11120_v1, %v11121_v20  ;;  %v16530_v1 = vld [vmem:[#allocation13 + $0x3f8] sm:$0xff]  }
 0x9ba   :  { %14358 = vmatprep.subr.bf16.mxu1 %v16482_v56  ;;  %v17858_v56 = vsel %vm6305_vm7, %v11118_v6, %v17842_v8  ;;  %v16510_v6 = vld [vmem:[#allocation13 + $0x3d0] sm:$0xff]  }
 0x9bb   :  { %14325 = vmatpush3.bf16.msra.mxu0 %v16483_v12  ;;  %v16506_v12 = vld [vmem:[#allocation13 + $0x3c8] sm:$0xff]  }
 0x9bc   :  { %14359 = vmatpush3.bf16.msra.mxu1 %v16484_v55  ;;  %14326 = vmatprep.subr.bf16.mxu0 %v16485_v27  ;;  %v17864_v55 = vsel %vm6305_vm7, %v11124_v26, %v17846_v41  ;;  %v16507_v27 = vld [vmem:[#allocation13 + $0x308] sm:$0xff]   ;;  %v17875_v26 = vsel %vm6305_vm7, %v11115_v61, %v17868_v10  ;;  %v16526_v61 = vld [vmem:[#allocation13 + $0x3f0] sm:$0xff]  }
 0x9bd   :  { %14360 = vmatprep.subr.bf16.mxu1 %v16486_v42  ;;  %v16508_v42 = vld [vmem:[#allocation13 + $0x388] sm:$0xff]  }
 0x9be   :  { %11039 = vmatmul.mubr.bf16.gmra.mrb[96].mxu0 %v17822_v25 }
 0x9bf   :  { %11095 = vmatmul.mubr.bf16.gmra.mrb[104].mxu1 %v17825_v53  ;;  %14327 = vmatpush3.bf16.msra.mxu0 %v16487_v24  ;;  %v17871_v24 = vrot.slane %v17765_v22, 1 }
 0x9c0   :  { %14361 = vmatpush3.bf16.msra.mxu1 %v16488_v2  ;;  %11370 = vmatprep.mubr.bf16.mxu0 %v17832_v7  ;;  %v16511_v2 = vld [vmem:[#allocation13 + $0x310] sm:$0xff]  }
 0x9c1   :  { %11426 = vmatprep.mubr.bf16.mxu1 %v17836_v47  ;;  %14328 = vmatprep.subr.bf16.mxu0 %v16489_v29  ;;  %v16513_v29 = vld [vmem:[#allocation13 + $0x358] sm:$0xff]   ;;  %v17880_v28 = vsel %vm6305_vm7, %v11121_v20, %v17871_v24  ;;  %v16528_v20 = vld [vmem:[#allocation13 + $0x3b0] sm:$0xff]  }
 0x9c2   :  { %14362 = vmatprep.subr.bf16.mxu1 %v16490_v57  ;;  %v16514_v57 = vld [vmem:[#allocation13 + $0x3d8] sm:$0xff]  }
 0x9c3   :  { %14329 = vmatpush3.bf16.msra.mxu0 %v16491_v30  ;;  %v16515_v30 = vld [vmem:[#allocation13 + $0x318] sm:$0xff]  }
 0x9c4   :  { %14363 = vmatpush3.bf16.msra.mxu1 %v16492_v48  ;;  %14330 = vmatprep.subr.bf16.mxu0 %v16493_v39  ;;  %v16516_v48 = vld [vmem:[#allocation13 + $0x398] sm:$0xff]   ;;  %v16517_v39 = vld [vmem:[#allocation13 + $0x360] sm:$0xff]  }
 0x9c5   :  { %14364 = vmatprep.subr.bf16.mxu1 %v16494_v45  ;;  %v16518_v45 = vld [vmem:[#allocation13 + $0x3e0] sm:$0xff]  }
 0x9c7   :  { %14331 = vmatpush3.bf16.msra.mxu0 %v16495_v0  ;;  %v16519_v0 = vld [vmem:[#allocation13 + $0x320] sm:$0xff]  }
 0x9c8   :  { %14365 = vmatpush3.bf16.msra.mxu1 %v16496_v40  ;;  %14332 = vmatprep.subr.bf16.mxu0 %v16497_v46  ;;  %v16520_v40 = vld [vmem:[#allocation13 + $0x3a0] sm:$0xff]   ;;  %v16521_v46 = vld [vmem:[#allocation13 + $0x368] sm:$0xff]  }
 0x9c9   :  { %14366 = vmatprep.subr.bf16.mxu1 %v16498_v62  ;;  %v16522_v62 = vld [vmem:[#allocation13 + $0x3e8] sm:$0xff]  }
 0x9cb   :  { %14333 = vmatpush3.bf16.msra.mxu0 %v16499_v36  ;;  %v16523_v36 = vld [vmem:[#allocation13 + $0x328] sm:$0xff]  }
 0x9cc   :  { %14367 = vmatpush3.bf16.msra.mxu1 %v16500_v16  ;;  %14386 = vmatprep.subr.bf16.mxu0 %v16501_v44  ;;  %v16524_v16 = vld [vmem:[#allocation13 + $0x3a8] sm:$0xff]   ;;  %v16525_v44 = vld [vmem:[#allocation13 + $0x370] sm:$0xff]  }
 0x9cd   :  { %14420 = vmatprep.subr.bf16.mxu1 %v16502_v43  ;;  %v16527_v43 = vld [vmem:[#allocation13 + $0x330] sm:$0xff]  }
 0x9ce   :  { %11371 = vmatmul.mubr.bf16.vlgmr.msra.gmra.mrb[100].mxu0 %v17850_v4 }
 0x9cf   :  { %11427 = vmatmul.mubr.bf16.vlgmr.msra.gmra.mrb[108].mxu1 %v17854_v34  ;;  %11378 = vmatprep.mubr.bf16.mxu0 %v17858_v56 }
 0x9d0   :  { %11434 = vmatprep.mubr.bf16.mxu1 %v17864_v55  ;;  %14387 = vmatpush3.bf16.msra.mxu0 %v16503_v21  ;;  %v16533_v21 = vld [vmem:[#allocation13 + $0x140] sm:$0xff]  }
 0x9d1   :  { %14421 = vmatpush3.bf16.msra.mxu1 %v16504_v59  ;;  %14388 = vmatprep.subr.bf16.mxu0 %v16505_v17  ;;  %v16534_v59 = vld [vmem:[#allocation13 + $0x1c0] sm:$0xff]  }
 0x9d2   :  { %14422 = vmatprep.subr.bf16.mxu1 %v16506_v12  ;;  %v16535_v17 = vld [vmem:[#allocation13 + $0x100] sm:$0xff]  }
 0x9d3   :  { %v16536_v12 = vld [vmem:[#allocation13 + $0x180] sm:$0xff]  }
 0x9d4   :  { %14389 = vmatpush3.bf16.msra.mxu0 %v16507_v27  ;;  %v16537_v27 = vld [vmem:[#allocation13 + $0x148] sm:$0xff]  }
 0x9d5   :  { %14423 = vmatpush3.bf16.msra.mxu1 %v16508_v42  ;;  %14390 = vmatprep.subr.bf16.mxu0 %v16509_v32  ;;  %v16538_v42 = vld [vmem:[#allocation13 + $0x1c8] sm:$0xff]  }
 0x9d6   :  { %11379 = vmatmul.mubr.bf16.gmra.mrb[104].mxu0 %v17875_v26  ;;  %14424 = vmatprep.subr.bf16.mxu1 %v16510_v6  ;;  %v16539_v32 = vld [vmem:[#allocation13 + $0x108] sm:$0xff]  }
 0x9d7   :  { %11435 = vmatmul.mubr.bf16.gmra.mrb[112].mxu1 %v17880_v28  ;;  %11386 = vmatprep.mubr.bf16.mxu0 %v17842_v8  ;;  %v16540_v6 = vld [vmem:[#allocation13 + $0x188] sm:$0xff]  }
 0x9d8   :  { %11442 = vmatprep.mubr.bf16.mxu1 %v17846_v41  ;;  %14391 = vmatpush3.bf16.msra.mxu0 %v16511_v2  ;;  %v16541_v2 = vld [vmem:[#allocation13 + $0x150] sm:$0xff]  }
 0x9d9   :  { %14425 = vmatpush3.bf16.msra.mxu1 %v16512_v19  ;;  %14392 = vmatprep.subr.bf16.mxu0 %v16513_v29  ;;  %v16542_v19 = vld [vmem:[#allocation13 + $0x1d0] sm:$0xff]  }
 0x9da   :  { %14426 = vmatprep.subr.bf16.mxu1 %v16514_v57  ;;  %v16543_v29 = vld [vmem:[#allocation13 + $0x110] sm:$0xff]   ;;  %v16545_v57 = vld [vmem:[#allocation13 + $0x158] sm:$0xff]  }
 0x9dc   :  { %14393 = vmatpush3.bf16.msra.mxu0 %v16515_v30  ;;  %v16549_v30 = vld [vmem:[#allocation13 + $0x160] sm:$0xff]  }
 0x9dd   :  { %14427 = vmatpush3.bf16.msra.mxu1 %v16516_v48  ;;  %14394 = vmatprep.subr.bf16.mxu0 %v16517_v39  ;;  %v16550_v48 = vld [vmem:[#allocation13 + $0x1e0] sm:$0xff]  }
 0x9de   :  { %11387 = vmatmul.mubr.bf16.gmra.mrb[108].mxu0 %v17868_v10  ;;  %14428 = vmatprep.subr.bf16.mxu1 %v16518_v45  ;;  %v16551_v39 = vld [vmem:[#allocation13 + $0x120] sm:$0xff]   ;;  %v16553_v45 = vld [vmem:[#allocation13 + $0x168] sm:$0xff]  }
 0x9df   :  { %11443 = vmatmul.mubr.bf16.gmra.mrb[116].mxu1 %v17871_v24  ;;  %11739 = vmatprep.mubr.bf16.mxu0 %v17772_v15  ;;  %v16531_v15 = vld [vmem:[#allocation13 + $0x338] sm:$0xff]  }
 0x9e0   :  { %14395 = vmatpush3.bf16.msra.mxu0 %v16519_v0  ;;  %11795 = vmatprep.mubr.bf16.mxu1 %v17779_v35  ;;  %v16532_v35 = vld [vmem:[#allocation13 + $0x3b8] sm:$0xff]   ;;  %v16557_v0 = vld [vmem:[#allocation13 + $0x170] sm:$0xff]  }
 0x9e1   :  { %14429 = vmatpush3.bf16.msra.mxu1 %v16520_v40  ;;  %14396 = vmatprep.subr.bf16.mxu0 %v16521_v46  ;;  %v16558_v40 = vld [vmem:[#allocation13 + $0x1f0] sm:$0xff]  }
 0x9e2   :  { %14430 = vmatprep.subr.bf16.mxu1 %v16522_v62  ;;  %v16559_v46 = vld [vmem:[#allocation13 + $0x130] sm:$0xff]   ;;  %v16561_v62 = vld [vmem:[#allocation13 + $0x178] sm:$0xff]  }
 0x9e4   :  { %14397 = vmatpush3.bf16.msra.mxu0 %v16523_v36  ;;  %v16565_v36 = vld [vmem:[#allocation13 + $0x440] sm:$0xff]  }
 0x9e5   :  { %14431 = vmatpush3.bf16.msra.mxu1 %v16524_v16  ;;  %14398 = vmatprep.subr.bf16.mxu0 %v16525_v44  ;;  %v16566_v16 = vld [vmem:[#allocation13 + $0x4c0] sm:$0xff]  }
 0x9e6   :  { %14432 = vmatprep.subr.bf16.mxu1 %v16526_v61  ;;  %v16567_v44 = vld [vmem:[#allocation13 + $0x400] sm:$0xff]  }
 0x9e7   :  { %v16568_v61 = vld [vmem:[#allocation13 + $0x480] sm:$0xff]  }
 0x9e8   :  { %14399 = vmatpush3.bf16.msra.mxu0 %v16527_v43  ;;  %v16569_v43 = vld [vmem:[#allocation13 + $0x448] sm:$0xff]  }
 0x9e9   :  { %14433 = vmatpush3.bf16.msra.mxu1 %v16528_v20  ;;  %14400 = vmatprep.subr.bf16.mxu0 %v16529_v38  ;;  %v16570_v20 = vld [vmem:[#allocation13 + $0x4c8] sm:$0xff]  }
 0x9ea   :  { %14434 = vmatprep.subr.bf16.mxu1 %v16530_v1  ;;  %v16571_v38 = vld [vmem:[#allocation13 + $0x408] sm:$0xff]  }
 0x9eb   :  { %v16572_v1 = vld [vmem:[#allocation13 + $0x488] sm:$0xff]  }
 0x9ec   :  { %14401 = vmatpush3.bf16.msra.mxu0 %v16531_v15  ;;  %v16573_v15 = vld [vmem:[#allocation13 + $0x450] sm:$0xff]  }
 0x9ed   :  { %14435 = vmatpush3.bf16.msra.mxu1 %v16532_v35  ;;  %14454 = vmatprep.subr.bf16.mxu0 %v16533_v21  ;;  %v16574_v35 = vld [vmem:[#allocation13 + $0x4d0] sm:$0xff]  }
 0x9ee   :  { %14488 = vmatprep.subr.bf16.mxu1 %v16534_v59  ;;  %v16575_v21 = vld [vmem:[#allocation13 + $0x410] sm:$0xff]   ;;  %v16577_v59 = vld [vmem:[#allocation13 + $0x458] sm:$0xff]  }
 0x9ef   :  { %11740 = vmatmul.mubr.bf16.vlgmr.msra.gmra.mrb[112].mxu0 %v17782_v9  ;;  %v16544_v9 = vld [vmem:[#allocation13 + $0x190] sm:$0xff]  }
 0x9f0   :  { %11796 = vmatmul.mubr.bf16.vlgmr.msra.gmra.mrb[120].mxu1 %v17789_v50  ;;  %11747 = vmatprep.mubr.bf16.mxu0 %v17794_v49  ;;  %v16546_v50 = vld [vmem:[#allocation13 + $0x1d8] sm:$0xff]  }
 0x9f1   :  { %11803 = vmatprep.mubr.bf16.mxu1 %v17798_v58  ;;  %14455 = vmatpush3.bf16.msra.mxu0 %v16535_v17  ;;  %v16547_v49 = vld [vmem:[#allocation13 + $0x118] sm:$0xff]   ;;  %v16581_v17 = vld [vmem:[#allocation13 + $0x460] sm:$0xff]  }
 0x9f2   :  { %14489 = vmatpush3.bf16.msra.mxu1 %v16536_v12  ;;  %14456 = vmatprep.subr.bf16.mxu0 %v16537_v27  ;;  %v16548_v58 = vld [vmem:[#allocation13 + $0x198] sm:$0xff]   ;;  %v16582_v12 = vld [vmem:[#allocation13 + $0x4e0] sm:$0xff]  }
 0x9f3   :  { %14490 = vmatprep.subr.bf16.mxu1 %v16538_v42  ;;  %v16583_v27 = vld [vmem:[#allocation13 + $0x420] sm:$0xff]   ;;  %v16585_v42 = vld [vmem:[#allocation13 + $0x468] sm:$0xff]  }
 0x9f5   :  { %14457 = vmatpush3.bf16.msra.mxu0 %v16539_v32  ;;  %v16589_v32 = vld [vmem:[#allocation13 + $0x470] sm:$0xff]  }
 0x9f6   :  { %14491 = vmatpush3.bf16.msra.mxu1 %v16540_v6  ;;  %14458 = vmatprep.subr.bf16.mxu0 %v16541_v2  ;;  %v16590_v6 = vld [vmem:[#allocation13 + $0x4f0] sm:$0xff]  }
 0x9f7   :  { %11748 = vmatmul.mubr.bf16.gmra.mrb[116].mxu0 %v17805_v3  ;;  %14492 = vmatprep.subr.bf16.mxu1 %v16542_v19  ;;  %v16552_v3 = vld [vmem:[#allocation13 + $0x1a0] sm:$0xff]   ;;  %v16591_v2 = vld [vmem:[#allocation13 + $0x430] sm:$0xff]   ;;  %v16593_v19 = vld [vmem:[#allocation13 + $0x478] sm:$0xff]  }
 0x9f8   :  { %11804 = vmatmul.mubr.bf16.gmra.mrb[124].mxu1 %v17810_v11  ;;  %11755 = vmatprep.mubr.bf16.mxu0 %v17812_v37  ;;  %v16554_v11 = vld [vmem:[#allocation13 + $0x1e8] sm:$0xff]  }
 0x9f9   :  { %11811 = vmatprep.mubr.bf16.mxu1 %v17815_v52  ;;  %14459 = vmatpush3.bf16.msra.mxu0 %v16543_v29  ;;  %v16555_v37 = vld [vmem:[#allocation13 + $0x128] sm:$0xff]  }
 0x9fa   :  { %14493 = vmatpush3.bf16.msra.mxu1 %v16544_v9  ;;  %14460 = vmatprep.subr.bf16.mxu0 %v16545_v57  ;;  %v16556_v52 = vld [vmem:[#allocation13 + $0x1a8] sm:$0xff]  }
 0x9fb   :  { %14494 = vmatprep.subr.bf16.mxu1 %v16546_v50 }
 0x9fd   :  { %14461 = vmatpush3.bf16.msra.mxu0 %v16547_v49 }
 0x9fe   :  { %14495 = vmatpush3.bf16.msra.mxu1 %v16548_v58  ;;  %14462 = vmatprep.subr.bf16.mxu0 %v16549_v30 }
 0x9ff   :  { %11756 = vmatmul.mubr.bf16.gmra.mrb[120].mxu0 %v17822_v25  ;;  %14496 = vmatprep.subr.bf16.mxu1 %v16550_v48  ;;  %v16560_v25 = vld [vmem:[#allocation13 + $0x1b0] sm:$0xff]  }
 0xa00   :  { %11812 = vmatmul.mubr.bf16.gmra.mrb[128].mxu1 %v17825_v53  ;;  %12043 = vmatprep.mubr.bf16.mxu0 %v17832_v7  ;;  %v16562_v53 = vld [vmem:[#allocation13 + $0x1f8] sm:$0xff]  }
 0xa01   :  { %14463 = vmatpush3.bf16.msra.mxu0 %v16551_v39  ;;  %12099 = vmatprep.mubr.bf16.mxu1 %v17836_v47  ;;  %v16563_v7 = vld [vmem:[#allocation13 + $0x138] sm:$0xff]  }
 0xa02   :  { %14497 = vmatpush3.bf16.msra.mxu1 %v16552_v3  ;;  %14464 = vmatprep.subr.bf16.mxu0 %v16553_v45  ;;  %v16564_v47 = vld [vmem:[#allocation13 + $0x1b8] sm:$0xff]  }
 0xa03   :  { %14498 = vmatprep.subr.bf16.mxu1 %v16554_v11 }
 0xa05   :  { %14465 = vmatpush3.bf16.msra.mxu0 %v16555_v37 }
 0xa06   :  { %14499 = vmatpush3.bf16.msra.mxu1 %v16556_v52  ;;  %14466 = vmatprep.subr.bf16.mxu0 %v16557_v0 }
 0xa07   :  { %14500 = vmatprep.subr.bf16.mxu1 %v16558_v40 }
 0xa09   :  { %14467 = vmatpush3.bf16.msra.mxu0 %v16559_v46 }
 0xa0a   :  { %14501 = vmatpush3.bf16.msra.mxu1 %v16560_v25  ;;  %14468 = vmatprep.subr.bf16.mxu0 %v16561_v62 }
 0xa0b   :  { %14502 = vmatprep.subr.bf16.mxu1 %v16562_v53 }
 0xa0d   :  { %14469 = vmatpush3.bf16.msra.mxu0 %v16563_v7 }
 0xa0e   :  { %14503 = vmatpush3.bf16.msra.mxu1 %v16564_v47  ;;  %14522 = vmatprep.subr.bf16.mxu0 %v16565_v36 }
 0xa0f   :  { %14556 = vmatprep.subr.bf16.mxu1 %v16566_v16 }
 0xa10   :  { %12044 = vmatmul.mubr.bf16.vlgmr.msra.gmra.mrb[124].mxu0 %v17850_v4  ;;  %v16576_v4 = vld [vmem:[#allocation13 + $0x490] sm:$0xff]  }
 0xa11   :  { %12100 = vmatmul.mubr.bf16.vlgmr.msra.gmra.mrb[132].mxu1 %v17854_v34  ;;  %12051 = vmatprep.mubr.bf16.mxu0 %v17858_v56  ;;  %v16578_v34 = vld [vmem:[#allocation13 + $0x4d8] sm:$0xff]  }
 0xa12   :  { %12107 = vmatprep.mubr.bf16.mxu1 %v17864_v55  ;;  %14523 = vmatpush3.bf16.msra.mxu0 %v16567_v44  ;;  %v16579_v56 = vld [vmem:[#allocation13 + $0x418] sm:$0xff]  }
 0xa13   :  { %14557 = vmatpush3.bf16.msra.mxu1 %v16568_v61  ;;  %14524 = vmatprep.subr.bf16.mxu0 %v16569_v43  ;;  %v16580_v55 = vld [vmem:[#allocation13 + $0x498] sm:$0xff]  }
 0xa14   :  { %14558 = vmatprep.subr.bf16.mxu1 %v16570_v20 }
 0xa16   :  { %14525 = vmatpush3.bf16.msra.mxu0 %v16571_v38 }
 0xa17   :  { %14559 = vmatpush3.bf16.msra.mxu1 %v16572_v1  ;;  %14526 = vmatprep.subr.bf16.mxu0 %v16573_v15 }
 0xa18   :  { %12052 = vmatmul.mubr.bf16.gmra.mrb[128].mxu0 %v17875_v26  ;;  %14560 = vmatprep.subr.bf16.mxu1 %v16574_v35  ;;  %v16584_v26 = vld [vmem:[#allocation13 + $0x4a0] sm:$0xff]  }
 0xa19   :  { %12108 = vmatmul.mubr.bf16.gmra.mrb[136].mxu1 %v17880_v28  ;;  %12059 = vmatprep.mubr.bf16.mxu0 %v17842_v8  ;;  %v16586_v8 = vld [vmem:[#allocation13 + $0x4e8] sm:$0xff]  }
 0xa1a   :  { %12115 = vmatprep.mubr.bf16.mxu1 %v17846_v41  ;;  %14527 = vmatpush3.bf16.msra.mxu0 %v16575_v21  ;;  %v16587_v41 = vld [vmem:[#allocation13 + $0x428] sm:$0xff]  }
 0xa1b   :  { %14561 = vmatpush3.bf16.msra.mxu1 %v16576_v4  ;;  %14528 = vmatprep.subr.bf16.mxu0 %v16577_v59  ;;  %v16588_v28 = vld [vmem:[#allocation13 + $0x4a8] sm:$0xff]  }
 0xa1c   :  { %14562 = vmatprep.subr.bf16.mxu1 %v16578_v34 }
 0xa1e   :  { %14529 = vmatpush3.bf16.msra.mxu0 %v16579_v56 }
 0xa1f   :  { %14563 = vmatpush3.bf16.msra.mxu1 %v16580_v55  ;;  %14530 = vmatprep.subr.bf16.mxu0 %v16581_v17 }
 0xa20   :  { %12060 = vmatmul.mubr.bf16.gmra.mrb[132].mxu0 %v17868_v10  ;;  %14564 = vmatprep.subr.bf16.mxu1 %v16582_v12  ;;  %v16592_v10 = vld [vmem:[#allocation13 + $0x4b0] sm:$0xff]  }
 0xa21   :  { %12116 = vmatmul.mubr.bf16.gmra.mrb[140].mxu1 %v17871_v24  ;;  %12412 = vmatprep.mubr.bf16.mxu0 %v17739_v5  ;;  %v16594_v24 = vld [vmem:[#allocation13 + $0x4f8] sm:$0xff]  }
 0xa22   :  { %14531 = vmatpush3.bf16.msra.mxu0 %v16583_v27  ;;  %12468 = vmatprep.mubr.bf16.mxu1 %v17741_v63  ;;  %v16595_v5 = vld [vmem:[#allocation13 + $0x438] sm:$0xff]  }
 0xa23   :  { %14565 = vmatpush3.bf16.msra.mxu1 %v16584_v26  ;;  %14532 = vmatprep.subr.bf16.mxu0 %v16585_v42  ;;  %v16596_v63 = vld [vmem:[#allocation13 + $0x4b8] sm:$0xff]  }
 0xa24   :  { %14566 = vmatprep.subr.bf16.mxu1 %v16586_v8 }
 0xa26   :  { %14533 = vmatpush3.bf16.msra.mxu0 %v16587_v41 }
 0xa27   :  { %14567 = vmatpush3.bf16.msra.mxu1 %v16588_v28  ;;  %14534 = vmatprep.subr.bf16.mxu0 %v16589_v32 }
 0xa28   :  { %14568 = vmatprep.subr.bf16.mxu1 %v16590_v6 }
 0xa2a   :  { %14535 = vmatpush3.bf16.msra.mxu0 %v16591_v2 }
 0xa2b   :  { %14569 = vmatpush3.bf16.msra.mxu1 %v16592_v10  ;;  %14536 = vmatprep.subr.bf16.mxu0 %v16593_v19 }
 0xa2c   :  { %14570 = vmatprep.subr.bf16.mxu1 %v16594_v24 }
 0xa2e   :  { %14537 = vmatpush3.bf16.msra.mxu0 %v16595_v5 }
 0xa2f   :  { %14571 = vmatpush3.bf16.msra.mxu1 %v16596_v63 }
 0xa31   :  { %12413 = vmatmul.mubr.bf16.vlgmr.msra.gmra.mrb[136].mxu0 %v17735_v51 }
 0xa32   :  { %12469 = vmatmul.mubr.bf16.vlgmr.msra.gmra.mrb[144].mxu1 %v17737_v33  ;;  %12420 = vmatprep.mubr.bf16.mxu0 %v17753_v31 }
 0xa33   :  { %12476 = vmatprep.mubr.bf16.mxu1 %v17757_v14 }
 0xa39   :  { %12421 = vmatmul.mubr.bf16.gmra.mrb[140].mxu0 %v17748_v60 }
 0xa3a   :  { %12477 = vmatmul.mubr.bf16.gmra.mrb[148].mxu1 %v17751_v18  ;;  %12428 = vmatprep.mubr.bf16.mxu0 %v17767_v23 }
 0xa3b   :  { %12484 = vmatprep.mubr.bf16.mxu1 %v17769_v13 }
 0xa41   :  { %12429 = vmatmul.mubr.bf16.gmra.mrb[144].mxu0 %v17762_v54 }
 0xa42   :  { %12485 = vmatmul.mubr.bf16.gmra.mrb[152].mxu1 %v17765_v22 }
 0xa81   :  { %v14266_v29 = vpop.f32.mrb[88].mxu0 }
 0xa82   :  { %v14300_v51 = vpop.f32.mrb[96].mxu1  ;;  %v14267_v9 = vpop.f32.mrb[89].mxu0 }
 0xa83   :  { %v14268_v33 = vadd.f32 %v14267_v9, %v14266_v29  ;;  %v14301_v57 = vpop.f32.mrb[97].mxu1  ;;  %v14269_v31 = vpop.f32.mrb[90].mxu0 }
 0xa84   :  { %v14302_v50 = vadd.f32 %v14301_v57, %v14300_v51  ;;  %v14303_v14 = vpop.f32.mrb[98].mxu1  ;;  %v14270_v49 = vpop.f32.mrb[91].mxu0 }
 0xa85   :  { %v14271_v60 = vadd.f32 %v14270_v49, %v14269_v31  ;;  %v14304_v58 = vpop.f32.mrb[99].mxu1 }
 0xa86   :  { %v11081_v18 = vadd.f32 %v14302_v50, %v14268_v33  ;;  %v14305_v30 = vadd.f32 %v14304_v58, %v14303_v14  ;;  %v14224_v50 = vld [vmem:[%s18054_s12 + $0x40] sm:$0xff] }
 0xa87   :  { %14626 = vmatprep.mubr.msk.f32.mxu0 %vm12591_vm9, %v14224_v50 }
 0xa88   :  { %v11084_v23 = vadd.f32 %v14305_v30, %v14271_v60 }
 0xa89   :  { %v14272_v48 = vpop.f32.mrb[92].mxu0 }
 0xa8a   :  { %v14306_v13 = vpop.f32.mrb[100].mxu1  ;;  %v14273_v39 = vpop.f32.mrb[93].mxu0 }
 0xa8b   :  { %v14274_v54 = vadd.f32 %v14273_v39, %v14272_v48  ;;  %v14307_v3 = vpop.f32.mrb[101].mxu1  ;;  %v14275_v22 = vpop.f32.mrb[94].mxu0 }
 0xa8c   :  { %v14308_v45 = vadd.f32 %v14307_v3, %v14306_v13  ;;  %v14309_v11 = vpop.f32.mrb[102].mxu1  ;;  %v14276_v37 = vpop.f32.mrb[95].mxu0 }
 0xa8d   :  { %v14277_v52 = vadd.f32 %v14276_v37, %v14275_v22  ;;  %v14310_v0 = vpop.f32.mrb[103].mxu1 }
 0xa8e   :  { %v11089_v40 = vadd.f32 %v14308_v45, %v14274_v54  ;;  %v14311_v46 = vadd.f32 %v14310_v0, %v14309_v11 }
 0xa90   :  { %v11092_v25 = vadd.f32 %v14311_v46, %v14277_v52 }
 0xa91   :  { %v14278_v62 = vpop.f32.mrb[96].mxu0 }
 0xa92   :  { %v14312_v53 = vpop.f32.mrb[104].mxu1  ;;  %v14279_v7 = vpop.f32.mrb[97].mxu0 }
 0xa93   :  { %v14280_v47 = vadd.f32 %v14279_v7, %v14278_v62  ;;  %v14313_v36 = vpop.f32.mrb[105].mxu1  ;;  %v14281_v16 = vpop.f32.mrb[98].mxu0 }
 0xa94   :  { %v14314_v44 = vadd.f32 %v14313_v36, %v14312_v53  ;;  %v14315_v61 = vpop.f32.mrb[106].mxu1  ;;  %v14282_v43 = vpop.f32.mrb[99].mxu0 }
 0xa95   :  { %v14316_v20 = vpop.f32.mrb[107].mxu1 }
 0xa96   :  { %v11097_v38 = vadd.f32 %v14314_v44, %v14280_v47 }
 0xaa1   :  { %v14334_v1 = vpop.f32.mrb[100].mxu0 }
 0xaa2   :  { %v14368_v15 = vpop.f32.mrb[108].mxu1  ;;  %v14335_v35 = vpop.f32.mrb[101].mxu0 }
 0xaa3   :  { %v14336_v21 = vadd.f32 %v14335_v35, %v14334_v1  ;;  %v14369_v4 = vpop.f32.mrb[109].mxu1  ;;  %v14337_v59 = vpop.f32.mrb[102].mxu0 }
 0xaa4   :  { %v14370_v34 = vadd.f32 %v14369_v4, %v14368_v15  ;;  %v14371_v56 = vpop.f32.mrb[110].mxu1  ;;  %v14338_v55 = vpop.f32.mrb[103].mxu0 }
 0xaa5   :  { %v11373_v17 = vadd.f32 %v14336_v21, %v11081_v18  ;;  %v14339_v12 = vadd.f32 %v14338_v55, %v14337_v59  ;;  %v14372_v27 = vpop.f32.mrb[111].mxu1 }
 0xaa6   :  { %v14373_v26 = vadd.f32 %v14372_v27, %v14371_v56 }
 0xaa7   :  { %v17923_v42 = vadd.f32 %v14370_v34, %v11373_v17  ;;  %v11376_v8 = vadd.f32 %v14339_v12, %v11084_v23 }
 0xaa9   :  { %v17925_v41 = vadd.f32 %v14373_v26, %v11376_v8  ;;  %v14340_v28 = vpop.f32.mrb[104].mxu0 }
 0xaaa   :  { %v14374_v32 = vpop.f32.mrb[112].mxu1  ;;  %v14341_v6 = vpop.f32.mrb[105].mxu0 }
 0xaab   :  { %v14342_v2 = vadd.f32 %v14341_v6, %v14340_v28  ;;  %v14375_v10 = vpop.f32.mrb[113].mxu1  ;;  %v14343_v19 = vpop.f32.mrb[106].mxu0 }
 0xaac   :  { %v14376_v24 = vadd.f32 %v14375_v10, %v14374_v32  ;;  %v14377_v5 = vpop.f32.mrb[114].mxu1  ;;  %v14344_v63 = vpop.f32.mrb[107].mxu0 }
 0xaad   :  { %v11381_v29 = vadd.f32 %v14342_v2, %v11089_v40  ;;  %v14345_v51 = vadd.f32 %v14344_v63, %v14343_v19  ;;  %v14378_v9 = vpop.f32.mrb[115].mxu1 }
 0xaae   :  { %v14379_v33 = vadd.f32 %v14378_v9, %v14377_v5 }
 0xaaf   :  { %v17927_v57 = vadd.f32 %v14376_v24, %v11381_v29  ;;  %v11384_v31 = vadd.f32 %v14345_v51, %v11092_v25 }
 0xab1   :  { %v17932_v14 = vadd.f32 %v14379_v33, %v11384_v31  ;;  %v14346_v49 = vpop.f32.mrb[108].mxu0 }
 0xab2   :  { %v14380_v60 = vpop.f32.mrb[116].mxu1  ;;  %v14347_v58 = vpop.f32.mrb[109].mxu0 }
 0xab3   :  { %v14348_v18 = vadd.f32 %v14347_v58, %v14346_v49  ;;  %v14381_v30 = vpop.f32.mrb[117].mxu1  ;;  %v14349_v23 = vpop.f32.mrb[110].mxu0 }
 0xab4   :  { %v14382_v48 = vadd.f32 %v14381_v30, %v14380_v60  ;;  %v14383_v13 = vpop.f32.mrb[118].mxu1  ;;  %v14350_v39 = vpop.f32.mrb[111].mxu0 }
 0xab5   :  { %v11389_v54 = vadd.f32 %v14348_v18, %v11097_v38  ;;  %v14384_v3 = vpop.f32.mrb[119].mxu1  ;;  %v17937_v18 = vld [vmem:[#allocation15] ss:$0 sm:$0xff] }
 0xab7   :  { %v17935_v22 = vadd.f32 %v14382_v48, %v11389_v54 }
 0xac2   :  { %v14402_v45 = vpop.f32.mrb[112].mxu0 }
 0xac3   :  { %v14436_v11 = vpop.f32.mrb[120].mxu1  ;;  %v14403_v37 = vpop.f32.mrb[113].mxu0 }
 0xac4   :  { %v14404_v52 = vadd.f32 %v14403_v37, %v14402_v45  ;;  %v14437_v0 = vpop.f32.mrb[121].mxu1  ;;  %v14405_v40 = vpop.f32.mrb[114].mxu0 }
 0xac5   :  { %v14438_v46 = vadd.f32 %v14437_v0, %v14436_v11  ;;  %v14439_v25 = vpop.f32.mrb[122].mxu1  ;;  %v14406_v62 = vpop.f32.mrb[115].mxu0 }
 0xac6   :  { %v14407_v53 = vadd.f32 %v14406_v62, %v14405_v40  ;;  %v14440_v7 = vpop.f32.mrb[123].mxu1 }
 0xac7   :  { %v11798_v47 = vadd.f32 %v14438_v46, %v14404_v52  ;;  %v14441_v36 = vadd.f32 %v14440_v7, %v14439_v25 }
 0xac9   :  { %v11801_v16 = vadd.f32 %v14441_v36, %v14407_v53 }
 0xaca   :  { %v14408_v44 = vpop.f32.mrb[116].mxu0 }
 0xacb   :  { %v14442_v61 = vpop.f32.mrb[124].mxu1  ;;  %v14409_v43 = vpop.f32.mrb[117].mxu0 }
 0xacc   :  { %v14410_v20 = vadd.f32 %v14409_v43, %v14408_v44  ;;  %v14443_v38 = vpop.f32.mrb[125].mxu1  ;;  %v14411_v1 = vpop.f32.mrb[118].mxu0 }
 0xacd   :  { %v14444_v15 = vadd.f32 %v14443_v38, %v14442_v61  ;;  %v14445_v35 = vpop.f32.mrb[126].mxu1  ;;  %v14412_v21 = vpop.f32.mrb[119].mxu0 }
 0xace   :  { %v14413_v4 = vadd.f32 %v14412_v21, %v14411_v1  ;;  %v14446_v59 = vpop.f32.mrb[127].mxu1 }
 0xacf   :  { %v11806_v34 = vadd.f32 %v14444_v15, %v14410_v20  ;;  %v14447_v56 = vadd.f32 %v14446_v59, %v14445_v35 }
 0xad1   :  { %v11809_v55 = vadd.f32 %v14447_v56, %v14413_v4 }
 0xad2   :  { %v14414_v17 = vpop.f32.mrb[120].mxu0 }
 0xad3   :  { %v14448_v12 = vpop.f32.mrb[128].mxu1  ;;  %v14415_v27 = vpop.f32.mrb[121].mxu0 }
 0xad4   :  { %v14416_v26 = vadd.f32 %v14415_v27, %v14414_v17  ;;  %v14449_v8 = vpop.f32.mrb[129].mxu1  ;;  %v14417_v28 = vpop.f32.mrb[122].mxu0 }
 0xad5   :  { %v14450_v32 = vadd.f32 %v14449_v8, %v14448_v12  ;;  %v14451_v6 = vpop.f32.mrb[130].mxu1  ;;  %v14418_v2 = vpop.f32.mrb[123].mxu0 }
 0xad6   :  { %v14452_v10 = vpop.f32.mrb[131].mxu1 }
 0xad7   :  { %v11814_v19 = vadd.f32 %v14450_v32, %v14416_v26 }
 0xae3   :  { %v14470_v24 = vpop.f32.mrb[124].mxu0 }
 0xae4   :  { %v14504_v5 = vpop.f32.mrb[132].mxu1  ;;  %v14471_v63 = vpop.f32.mrb[125].mxu0 }
 0xae5   :  { %v14472_v29 = vadd.f32 %v14471_v63, %v14470_v24  ;;  %v14505_v51 = vpop.f32.mrb[133].mxu1  ;;  %v14473_v9 = vpop.f32.mrb[126].mxu0 }
 0xae6   :  { %v14506_v33 = vadd.f32 %v14505_v51, %v14504_v5  ;;  %v14507_v31 = vpop.f32.mrb[134].mxu1  ;;  %v14474_v50 = vpop.f32.mrb[127].mxu0 }
 0xae7   :  { %v12046_v49 = vadd.f32 %v14472_v29, %v11798_v47  ;;  %v14475_v60 = vadd.f32 %v14474_v50, %v14473_v9  ;;  %v14508_v58 = vpop.f32.mrb[135].mxu1 }
 0xae8   :  { %v14509_v30 = vadd.f32 %v14508_v58, %v14507_v31 }
 0xae9   :  { %v12102_v23 = vadd.f32 %v14506_v33, %v12046_v49  ;;  %v12049_v48 = vadd.f32 %v14475_v60, %v11801_v16 }
 0xaeb   :  { %v12539_v13 = vadd.f32 %v17937_v18, %v12102_v23  ;;  %v12105_v39 = vadd.f32 %v14509_v30, %v12049_v48  ;;  %v14476_v54 = vpop.f32.mrb[128].mxu0 }
 0xaec   :  { %v14510_v3 = vpop.f32.mrb[136].mxu1  ;;  %v14477_v45 = vpop.f32.mrb[129].mxu0 }
 0xaed   :  { %v12544_v11 = vsub.f32 0.0, %v12539_v13  ;;  %v12540_v37 = vadd.f32 %v17937_v18, %v12105_v39  ;;  %v14478_v52 = vadd.f32 %v14477_v45, %v14476_v54  ;;  %v14511_v0 = vpop.f32.mrb[137].mxu1  ;;  %v14479_v40 = vpop.f32.mrb[130].mxu0 }
 0xaee   :  { %v14512_v46 = vadd.f32 %v14511_v0, %v14510_v3  ;;  %v14513_v25 = vpop.f32.mrb[138].mxu1  ;;  %v14480_v62 = vpop.f32.mrb[131].mxu0 }
 0xaef   :  { %v12549_v53 = vmul.f32 1.442695, %v12544_v11  ;;  %v12545_v7 = vsub.f32 0.0, %v12540_v37  ;;  %v12054_v47 = vadd.f32 %v14478_v52, %v11806_v34  ;;  %v14481_v36 = vadd.f32 %v14480_v62, %v14479_v40  ;;  %v14514_v16 = vpop.f32.mrb[139].mxu1 }
 0xaf0   :  { %v14515_v44 = vadd.f32 %v14514_v16, %v14513_v25 }
 0xaf1   :  { %16597 = vpow2.f32 %v12549_v53  ;;  %v12551_v61 = vmul.f32 1.442695, %v12545_v7  ;;  %v12110_v43 = vadd.f32 %v14512_v46, %v12054_v47  ;;  %v12057_v20 = vadd.f32 %v14481_v36, %v11809_v55 }
 0xaf3   :  { %16599 = vpow2.f32 %v12551_v61  ;;  %v12541_v38 = vadd.f32 %v17937_v18, %v12110_v43  ;;  %v12113_v1 = vadd.f32 %v14515_v44, %v12057_v20  ;;  %v14482_v15 = vpop.f32.mrb[132].mxu0 }
 0xaf4   :  { %v14516_v35 = vpop.f32.mrb[140].mxu1  ;;  %v14483_v21 = vpop.f32.mrb[133].mxu0 }
 0xaf5   :  { %v12546_v4 = vsub.f32 0.0, %v12541_v38  ;;  %v12542_v59 = vadd.f32 %v17937_v18, %v12113_v1  ;;  %v14484_v56 = vadd.f32 %v14483_v21, %v14482_v15  ;;  %v14517_v17 = vpop.f32.mrb[141].mxu1  ;;  %v14485_v34 = vpop.f32.mrb[134].mxu0 }
 0xaf6   :  { %v14518_v12 = vadd.f32 %v14517_v17, %v14516_v35  ;;  %v14519_v27 = vpop.f32.mrb[142].mxu1  ;;  %v14486_v26 = vpop.f32.mrb[135].mxu0 }
 0xaf7   :  { %v12553_v8 = vmul.f32 1.442695, %v12546_v4  ;;  %v12547_v28 = vsub.f32 0.0, %v12542_v59  ;;  %v12062_v32 = vadd.f32 %v14484_v56, %v11814_v19  ;;  %v14520_v55 = vpop.f32.mrb[143].mxu1 }
 0xaf9   :  { %16601 = vpow2.f32 %v12553_v8  ;;  %v12555_v6 = vmul.f32 1.442695, %v12547_v28  ;;  %v12118_v2 = vadd.f32 %v14518_v12, %v12062_v32 }
 0xafb   :  { %v16598_v10 = vpop.eup %16597  ;;  %16603 = vpow2.f32 %v12555_v6  ;;  %v12543_v24 = vadd.f32 %v17937_v18, %v12118_v2 }
 0xafc   :  { %v12559_v5 = vadd.f32 1.0, %v16598_v10 }
 0xafd   :  { %v16600_v63 = vpop.eup %16599  ;;  %v12548_v29 = vsub.f32 0.0, %v12543_v24 }
 0xafe   :  { %v12560_v51 = vadd.f32 1.0, %v16600_v63  ;;  %16605 = vrcp.f32 %v12559_v5 }
 0xaff   :  { %v12557_v9 = vmul.f32 1.442695, %v12548_v29 }
 0xb00   :  { %16607 = vrcp.f32 %v12560_v51 }
 0xb01   :  { %16609 = vpow2.f32 %v12557_v9 }
 0xb03   :  { %v16602_v33 = vpop.eup %16601 }
 0xb04   :  { %v14538_v31 = vpop.f32.mrb[136].mxu0  ;;  %v12561_v19 = vadd.f32 1.0, %v16602_v33 }
 0xb05   :  { %v16604_v50 = vpop.eup %16603  ;;  %v14572_v49 = vpop.f32.mrb[144].mxu1 }
 0xb06   :  { %v14539_v60 = vpop.f32.mrb[137].mxu0  ;;  %v12562_v58 = vadd.f32 1.0, %v16604_v50  ;;  %v14573_v23 = vpop.f32.mrb[145].mxu1 }
 0xb07   :  { %v14540_v30 = vadd.f32 %v14539_v60, %v14538_v31  ;;  %v14541_v48 = vpop.f32.mrb[138].mxu0  ;;  %v14574_v13 = vadd.f32 %v14573_v23, %v14572_v49  ;;  %v14575_v39 = vpop.f32.mrb[146].mxu1 }
 0xb08   :  { %v14542_v54 = vpop.f32.mrb[139].mxu0  ;;  %16611 = vrcp.f32 %v12562_v58  ;;  %v14576_v45 = vpop.f32.mrb[147].mxu1  ;;  %v14226_v58 = vld [vmem:[%s18054_s12 + $0x50] sm:$0xff] }
 0xb09   :  { %v14543_v3 = vadd.f32 %v14542_v54, %v14541_v48  ;;  %v16606_v11 = vpop.eup %16605  ;;  %16613 = vrcp.f32 %v12561_v19  ;;  %v12471_v37 = vadd.f32 %v14574_v13, %v14540_v30  ;;  %v14577_v52 = vadd.f32 %v14576_v45, %v14575_v39  ;;  %v14227_v39 = vld [vmem:[%s18054_s12 + $0x58] sm:$0xff] }
 0xb0a   :  { %v16608_v0 = vpop.eup %16607 }
 0xb0b   :  { %v16610_v40 = vpop.eup %16609  ;;  %v12492_v46 = vadd.f32 %v12471_v37, %v17923_v42  ;;  %v12474_v25 = vadd.f32 %v14577_v52, %v14543_v3  ;;  %v14700_v62 = vpack.c.bf16 %v16608_v0, %v16606_v11  ;;  %v14228_v3 = vld [vmem:[%s18054_s12 + $0x60] sm:$0xff]  ;;  %v14230_v52 = vld [vmem:[%s18054_s12 + $0x70] sm:$0xff] }
 0xb0c   :  { %v12563_v53 = vadd.f32 1.0, %v16610_v40  ;;  %v14544_v7 = vpop.f32.mrb[140].mxu0  ;;  %v14231_v40 = vld [vmem:[%s18054_s12 + $0x78] sm:$0xff] }
 0xb0d   :  { %v12504_v47 = vadd.f32 %v17937_v18, %v12492_v46  ;;  %v12493_v36 = vadd.f32 %v12474_v25, %v17925_v41  ;;  %v14578_v16 = vpop.f32.mrb[148].mxu1  ;;  %v14545_v44 = vpop.f32.mrb[141].mxu0  ;;  %14701 = vmatprep.subr.bf16.mxu0 %v14700_v62  ;;  %v12574_v25 = vld [vmem:[%s18054_s12] sm:$0xff] }
 0xb0e   :  { %16615 = vrcp.f32 %v12563_v53  ;;  %v14546_v61 = vadd.f32 %v14545_v44, %v14544_v7  ;;  %v14579_v43 = vpop.f32.mrb[149].mxu1  ;;  %v14547_v20 = vpop.f32.mrb[142].mxu0  ;;  %14703 = vmatpush3.bf16.msra.mxu0 %v14700_v62 }
 0xb0f   :  { %v12509_v38 = vsub.f32 0.0, %v12504_v47  ;;  %v12505_v1 = vadd.f32 %v17937_v18, %v12493_v36  ;;  %v14580_v42 = vadd.f32 %v14579_v43, %v14578_v16  ;;  %v14581_v15 = vpop.f32.mrb[150].mxu1  ;;  %v14548_v35 = vpop.f32.mrb[143].mxu0 }
 0xb10   :  { %v14549_v21 = vadd.f32 %v14548_v35, %v14547_v20  ;;  %v14582_v4 = vpop.f32.mrb[151].mxu1  ;;  %v12578_v35 = vld [vmem:[%s18054_s12 + $0x20] sm:$0xff] }
 0xb11   :  { %v12514_v59 = vmul.f32 1.442695, %v12509_v38  ;;  %v12510_v56 = vsub.f32 0.0, %v12505_v1  ;;  %v12479_v17 = vadd.f32 %v14580_v42, %v14546_v61  ;;  %v14583_v41 = vadd.f32 %v14582_v4, %v14581_v15  ;;  %v12575_v1 = vld [vmem:[%s18054_s12 + $0x8] sm:$0xff]  ;;  %v12576_v42 = vld [vmem:[%s18054_s12 + $0x10] sm:$0xff]  ;;  %v12577_v15 = vld [vmem:[%s18054_s12 + $0x18] sm:$0xff] }
 0xb12   :  { %v16612_v34 = vpop.eup %16611  ;;  %v12580_v4 = vld [vmem:[%s18054_s12 + $0x30] sm:$0xff] }
 0xb13   :  { %v16614_v12 = vpop.eup %16613  ;;  %16617 = vpow2.f32 %v12514_v59  ;;  %v12516_v27 = vmul.f32 1.442695, %v12510_v56  ;;  %v12494_v26 = vadd.f32 %v12479_v17, %v17927_v57  ;;  %v12482_v8 = vadd.f32 %v14583_v41, %v14549_v21  ;;  %v12579_v21 = vld [vmem:[%s18054_s12 + $0x28] sm:$0xff]  ;;  %v12581_v59 = vld [vmem:[%s18054_s12 + $0x38] sm:$0xff] }
 0xb14   :  { %v14550_v28 = vpop.f32.mrb[144].mxu0  ;;  %v14704_v32 = vpack.c.bf16 %v16612_v34, %v16614_v12 }
 0xb15   :  { %16619 = vpow2.f32 %v12516_v27  ;;  %v12506_v55 = vadd.f32 %v17937_v18, %v12494_v26  ;;  %v12495_v6 = vadd.f32 %v12482_v8, %v17932_v14  ;;  %v14584_v2 = vpop.f32.mrb[152].mxu1  ;;  %v14551_v10 = vpop.f32.mrb[145].mxu0  ;;  %v14225_v14 = vld [vmem:[%s18054_s12 + $0x48] sm:$0xff] }
 0xb16   :  { %v14552_v24 = vadd.f32 %v14551_v10, %v14550_v28  ;;  %v14585_v5 = vpop.f32.mrb[153].mxu1  ;;  %v14553_v63 = vpop.f32.mrb[146].mxu0  ;;  %14705 = vmatprep.subr.bf16.mxu0 %v14704_v32 }
 0xb17   :  { %v12511_v29 = vsub.f32 0.0, %v12506_v55  ;;  %v12507_v51 = vadd.f32 %v17937_v18, %v12495_v6  ;;  %v14586_v9 = vadd.f32 %v14585_v5, %v14584_v2  ;;  %v14587_v33 = vpop.f32.mrb[154].mxu1  ;;  %v14554_v57 = vpop.f32.mrb[147].mxu0  ;;  %14707 = vmatpush3.bf16.msra.mxu0 %v14704_v32 }
 0xb18   :  { %v16616_v31 = vpop.eup %16615  ;;  %v14588_v50 = vpop.f32.mrb[155].mxu1 }
 0xb19   :  { %v12518_v19 = vmul.f32 1.442695, %v12511_v29  ;;  %v12512_v49 = vsub.f32 0.0, %v12507_v51  ;;  %v12487_v60 = vadd.f32 %v14586_v9, %v14552_v24  ;;  %14624 = vmatprep.subr.msk.mxu0 %vm987_vm1, %v16616_v31 }
 0xb1b   :  { %16621 = vpow2.f32 %v12518_v19  ;;  %v12520_v30 = vmul.f32 1.442695, %v12512_v49  ;;  %v12496_v23 = vadd.f32 %v12487_v60, %v17935_v22  ;;  %14625 = vmatpush3.msk.msra.mxu0 %vm987_vm1, %v16616_v31 }
 0xb1c   :  { %14627 = vmatmul.mubr.msk.f32.vlgmr.msra.gmra.mrb[148].mxu0 %vm12591_vm9, %v14225_v14 }
 0xb1d   :  { %v16618_v48 = vpop.eup %16617  ;;  %16623 = vpow2.f32 %v12520_v30  ;;  %v12508_v13 = vadd.f32 %v17937_v18, %v12496_v23  ;;  %14629 = vmatprep.mubr.msk.f32.mxu0 %vm12591_vm9, %v14226_v58  ;;  %v14229_v18 = vld [vmem:[%s18054_s12 + $0x68] sm:$0xff] }
 0xb1e   :  { %v12524_v54 = vadd.f32 1.0, %v16618_v48 }
 0xb1f   :  { %v16620_v22 = vpop.eup %16619  ;;  %v12513_v45 = vsub.f32 0.0, %v12508_v13 }
 0xb20   :  { %v12525_v11 = vadd.f32 1.0, %v16620_v22  ;;  %14630 = vmatmul.mubr.msk.f32.gmra.mrb[150].mxu0 %vm12591_vm9, %v14227_v39  ;;  %16625 = vrcp.f32 %v12524_v54 }
 0xb21   :  { %v12522_v37 = vmul.f32 1.442695, %v12513_v45  ;;  %14632 = vmatprep.mubr.msk.f32.mxu0 %vm12591_vm9, %v14228_v3 }
 0xb22   :  { %16627 = vrcp.f32 %v12525_v11 }
 0xb23   :  { %16629 = vpow2.f32 %v12522_v37 }
 0xb24   :  { %14633 = vmatmul.mubr.msk.f32.gmra.mrb[152].mxu0 %vm12591_vm9, %v14229_v18 }
 0xb25   :  { %v16622_v0 = vpop.eup %16621  ;;  %14635 = vmatprep.mubr.msk.f32.mxu0 %vm12591_vm9, %v14230_v52 }
 0xb26   :  { %v12526_v46 = vadd.f32 1.0, %v16622_v0 }
 0xb27   :  { %v16624_v62 = vpop.eup %16623 }
 0xb28   :  { %v12527_v53 = vadd.f32 1.0, %v16624_v62  ;;  %14636 = vmatmul.mubr.msk.f32.gmra.mrb[154].mxu0 %vm12591_vm9, %v14231_v40  ;;  %16631 = vrcp.f32 %v12526_v46 }
 0xb29   :  { %14648 = vmatprep.mubr.msk.f32.mxu0 %vm12591_vm9, %v12574_v25 }
 0xb2a   :  { %16633 = vrcp.f32 %v12527_v53  ;;  %v16626_v7 = vpop.eup %16625 }
 0xb2c   :  { %v16628_v47 = vpop.eup %16627 }
 0xb2d   :  { %v16630_v36 = vpop.eup %16629  ;;  %v14708_v16 = vpack.c.bf16 %v16628_v47, %v16626_v7 }
 0xb2e   :  { %v12528_v44 = vadd.f32 1.0, %v16630_v36 }
 0xb2f   :  { %14709 = vmatprep.subr.bf16.mxu0 %v14708_v16 }
 0xb30   :  { %16635 = vrcp.f32 %v12528_v44  ;;  %14711 = vmatpush3.bf16.msra.mxu0 %v14708_v16 }
 0xb32   :  { %v16632_v61 = vpop.eup %16631 }
 0xb34   :  { %v16634_v43 = vpop.eup %16633 }
 0xb35   :  { %v14712_v20 = vpack.c.bf16 %v16634_v43, %v16632_v61 }
 0xb37   :  { %14713 = vmatprep.subr.bf16.mxu0 %v14712_v20 }
 0xb38   :  { %14715 = vmatpush3.bf16.msra.mxu0 %v14712_v20 }
 0xb3a   :  { %v16636_v38 = vpop.eup %16635 }
 0xb3b   :  { %14646 = vmatprep.subr.msk.mxu0 %vm987_vm1, %v16636_v38 }
 0xb3c   :  { %14647 = vmatpush3.msk.msra.mxu0 %vm987_vm1, %v16636_v38 }
 0xb3d   :  { %14649 = vmatmul.mubr.msk.f32.vlgmr.msra.gmra.mrb[148].mxu0 %vm12591_vm9, %v12575_v1 }
 0xb3e   :  { %14651 = vmatprep.mubr.msk.f32.mxu0 %vm12591_vm9, %v12576_v42 }
 0xb41   :  { %14652 = vmatmul.mubr.msk.f32.gmra.mrb[150].mxu0 %vm12591_vm9, %v12577_v15 }
 0xb42   :  { %14654 = vmatprep.mubr.msk.f32.mxu0 %vm12591_vm9, %v12578_v35 }
 0xb45   :  { %14655 = vmatmul.mubr.msk.f32.gmra.mrb[152].mxu0 %vm12591_vm9, %v12579_v21 }
 0xb46   :  { %14657 = vmatprep.mubr.msk.f32.mxu0 %vm12591_vm9, %v12580_v4 }
 0xb49   :  { %14658 = vmatmul.mubr.msk.f32.gmra.mrb[154].mxu0 %vm12591_vm9, %v12581_v59 }
 0xc10   :  { %v14650_v56 = vpop.f32.mrb[148].mxu0 }
 0xc11   :  { %12857 = vst [vmem:[%s18055_s13 + $0x8] sm:$0xff] %v14650_v56  ;;  %v12817_v17 = vpop.f32.mrb[149].mxu0 }
 0xc12   :  { %12856 = vst [vmem:[%s18055_s13] sm:$0xff] %v12817_v17 }
 0xc14   :  { %v14653_v41 = vpop.f32.mrb[150].mxu0 }
 0xc15   :  { %12859 = vst [vmem:[%s18055_s13 + $0x18] sm:$0xff] %v14653_v41  ;;  %v12827_v34 = vpop.f32.mrb[151].mxu0 }
 0xc16   :  { %12858 = vst [vmem:[%s18055_s13 + $0x10] sm:$0xff] %v12827_v34 }
 0xc18   :  { %v14656_v12 = vpop.f32.mrb[152].mxu0 }
 0xc19   :  { %12861 = vst [vmem:[%s18055_s13 + $0x28] sm:$0xff] %v14656_v12  ;;  %v12837_v27 = vpop.f32.mrb[153].mxu0 }
 0xc1a   :  { %12860 = vst [vmem:[%s18055_s13 + $0x20] sm:$0xff] %v12837_v27 }
 0xc1c   :  { %v14659_v26 = vpop.f32.mrb[154].mxu0 }
 0xc1d   :  { %12863 = vst [vmem:[%s18055_s13 + $0x38] sm:$0xff] %v14659_v26  ;;  %v12847_v8 = vpop.f32.mrb[155].mxu0 }
 0xc1e   :  { %12862 = vst [vmem:[%s18055_s13 + $0x30] sm:$0xff] %v12847_v8 }
 0xc1f   :  { %12868 = vsyncpa [#allocation3], 1 }
 0xc20   :  { %12869 = vsyncpa [#allocation5], 1 }
 0xc21   :  { %12870 = vsyncpa [#allocation8], 1 }
 0xc22   :  { %12871 = vsyncpa [#allocation11], 1 }
 0xc23   :  { %12872 = vsyncpa [#allocation14], 1 }

</bundles_post_ra>
